<compile_context>
chip_gen: v6e
topology: v6e:2x2x1
jax: 0.10.0
libtpu: 0.0.40
codegen_flags: <defaults>
</compile_context>

<pallas_src>
import functools

import numpy as np
import jax
import jax.numpy as jnp
from jax.experimental import pallas as pl
from jax.experimental.pallas import tpu as pltpu

NUM_CLASSES = 10
CONV_OUT = 16
CIN = 3
KH = KW = 3
GROUP = 8                                     # sublane-aligned rows per conv tap
PAD = 128                                     # lane padding around each tile (>= W+1)
_TAPS = tuple((dy, dx) for dy in (-1, 0, 1) for dx in (-1, 0, 1))


# ---------------- grid-invariant boundary masks (hoisted, host-built) --------- #

@functools.lru_cache(maxsize=None)
def _tap_mask_host(h, w, tn):
    """[9*GROUP, tn*h*w] 0/1 mask; rows >= CIN of each 8-row tap group stay zero."""
    hw = h * w
    p = np.arange(hw)
    yy, xx = p // w, p % w
    m = np.zeros((KH * KW * GROUP, tn * hw), dtype=np.float32)
    for k, (dy, dx) in enumerate(_TAPS):
        valid = ((yy + dy >= 0) & (yy + dy < h) &
                 (xx + dx >= 0) & (xx + dx < w)).astype(np.float32)
        row = np.tile(valid, tn)
        for c in range(CIN):
            m[k * GROUP + c, :] = row
    return m


# --------------------- fused model (conv + GAP + head [+ CE]) ----------------- #

def _fused_call(x_nchw, wc_packed, bc, fc_w, fc_b, labels, tile_n, with_loss):
    N, Cin, H, W = x_nchw.shape
    assert Cin == CIN and GROUP >= CIN and PAD >= W + 1
    HW = H * W
    Cout, KP = wc_packed.shape
    NC = fc_w.shape[1]
    TN = N if tile_n >= N else tile_n          # whole samples per grid step
    assert N % TN == 0, "batch must be divisible by the batch tile"
    TM = TN * HW
    assert TM % 128 == 0, "tile_n * H * W must be a multiple of 128"
    n_tiles = N // TN

    # Contiguous (free) reshape only -- no wrapper-side transpose / dtype copy.
    x2d = x_nchw.reshape(N * Cin, HW)
    # Constant, built once at trace time.
    tap_mask = jnp.asarray(_tap_mask_host(H, W, TN), dtype=jnp.bfloat16)

    def kernel(*refs):
        if with_loss:
            (x_ref, mask_ref, wc_ref, bc_ref, wf_ref, bf_ref, lbl_ref,
             o_ref, loss_ref, xext_ref, patch_ref) = refs
        else:
            (x_ref, mask_ref, wc_ref, bc_ref, wf_ref, bf_ref,
             o_ref, xext_ref, patch_ref) = refs
            lbl_ref = loss_ref = None

        # ---- in-kernel relayout: [TN*Cin, HW] (NCHW order) -> [Cin, TN*HW] ----
        xv = x_ref[...]                                           # [TN*Cin, HW] f32
        for n in range(TN):
            xext_ref[0:CIN, PAD + n * HW: PAD + (n + 1) * HW] = (
                xv[n * CIN:(n + 1) * CIN, :].astype(jnp.bfloat16))

        # ---- im2col rows: 9 shifted slices, masked by the hoisted constant ----
        # where() (not *) so never-written xext rows / PAD borders (stale VMEM,
        # possibly NaN) can never leak into the matmul: no zero-fills needed.
        zero = jnp.bfloat16(0.0)
        for k, (dy, dx) in enumerate(_TAPS):
            s = dy * W + dx
            sh = xext_ref[:, PAD + s: PAD + s + TM]               # [GROUP, TM]
            mk = mask_ref[k * GROUP:(k + 1) * GROUP, :]
            patch_ref[k * GROUP:(k + 1) * GROUP, :] = jnp.where(mk != zero, sh, zero)

        # ---- conv3x3 = one bf16 MXU matmul, f32 accumulation, bias + ReLU -----
        conv = jnp.dot(wc_ref[...], patch_ref[...],
                       preferred_element_type=jnp.float32)        # [Cout, TM]
        conv = jnp.maximum(conv + bc_ref[...], 0.0)

        # ---- global average pool via per-sample lane reductions (XLU) ---------
        cols = [jnp.sum(conv[:, n * HW:(n + 1) * HW], axis=1, keepdims=True)
                for n in range(TN)]
        pooled_cn = jnp.concatenate(cols, axis=1) * (1.0 / HW)    # [Cout, TN] f32

        # ---- linear head -> logits for this batch tile ------------------------
        logits = (jnp.dot(pooled_cn.T, wf_ref[...],
                          preferred_element_type=jnp.float32)
                  + bf_ref[...])                                  # [TN, NC]
        o_ref[...] = logits

        # ---- fused cross-entropy epilogue (per-sample losses) -----------------
        if with_loss:
            m = jnp.max(logits, axis=-1, keepdims=True)
            lse = jnp.log(jnp.sum(jnp.exp(logits - m), axis=-1, keepdims=True)) + m
            cls = jax.lax.broadcasted_iota(jnp.int32, logits.shape, 1)
            picked = jnp.sum(jnp.where(cls == lbl_ref[...], logits, 0.0),
                             axis=-1, keepdims=True)
            loss_ref[...] = lse - picked                          # [TN, 1]

    in_specs = [
        pl.BlockSpec((TN * CIN, HW), lambda i: (i, 0)),           # input tile
        pl.BlockSpec((KH * KW * GROUP, TM), lambda i: (0, 0)),    # constant masks
        pl.BlockSpec((Cout, KP), lambda i: (0, 0)),               # packed conv w (bf16)
        pl.BlockSpec((Cout, 1), lambda i: (0, 0)),                # conv bias
        pl.BlockSpec((Cout, NC), lambda i: (0, 0)),               # head weight
        pl.BlockSpec((1, NC), lambda i: (0, 0)),                  # head bias
    ]
    args = [x2d, tap_mask, wc_packed, bc, fc_w, fc_b]
    out_shape = [jax.ShapeDtypeStruct((N, NC), jnp.float32)]
    out_specs = [pl.BlockSpec((TN, NC), lambda i: (i, 0))]
    if with_loss:
        in_specs.append(pl.BlockSpec((TN, 1), lambda i: (i, 0)))  # raw int32 labels
        args.append(labels.astype(jnp.int32).reshape(N, 1))
        out_shape.append(jax.ShapeDtypeStruct((N, 1), jnp.float32))
        out_specs.append(pl.BlockSpec((TN, 1), lambda i: (i, 0)))

    outs = pl.pallas_call(
        kernel,
        out_shape=tuple(out_shape),
        grid=(n_tiles,),
        in_specs=in_specs,
        out_specs=tuple(out_specs),
        scratch_shapes=[
            pltpu.VMEM((GROUP, TM + 2 * PAD), jnp.bfloat16),      # padded input rows
            pltpu.VMEM((KH * KW * GROUP, TM), jnp.bfloat16),      # im2col rows
        ],
        compiler_params=pltpu.CompilerParams(
            dimension_semantics=("parallel",),
            vmem_limit_bytes=32 * 1024 * 1024),
    )(*args)
    return outs


@functools.partial(jax.jit, static_argnames=("tile_n",))
def fused_forward(x_nchw, wc_packed, bc, fc_w, fc_b, *, tile_n):
    (logits,) = _fused_call(x_nchw, wc_packed, bc, fc_w, fc_b, None, tile_n, False)
    return logits


@functools.partial(jax.jit, static_argnames=("tile_n",))
def fused_forward_with_loss(x_nchw, labels, wc_packed, bc, fc_w, fc_b, *, tile_n):
    logits, loss_rows = _fused_call(x_nchw, wc_packed, bc, fc_w, fc_b,
                                    labels, tile_n, True)
    loss = jnp.sum(loss_rows) / x_nchw.shape[0]   # CrossEntropyLoss mean reduction
    return loss, logits


# -------------------- standalone CE (kept for _compute_loss API) -------------- #

def _ce_kernel(logits_ref, labels_ref, loss_ref):
    lg = logits_ref[...]
    lbl = labels_ref[...]
    m = jnp.max(lg, axis=-1, keepdims=True)
    lse = jnp.log(jnp.sum(jnp.exp(lg - m), axis=-1, keepdims=True)) + m
    cls = jax.lax.broadcasted_iota(jnp.int32, lg.shape, 1)
    picked = jnp.sum(jnp.where(cls == lbl, lg, 0.0), axis=-1, keepdims=True)
    loss_ref[...] = jnp.broadcast_to(jnp.mean(lse - picked), (1, 1))


@jax.jit
def cross_entropy_loss(logits, labels):
    N, NC = logits.shape
    labels2d = labels.astype(jnp.int32).reshape(N, 1)
    loss = pl.pallas_call(
        _ce_kernel,
        out_shape=jax.ShapeDtypeStruct((1, 1), jnp.float32),
        grid=(1,),
        in_specs=[pl.BlockSpec((N, NC), lambda i: (0, 0)),
                  pl.BlockSpec((N, 1), lambda i: (0, 0))],
        out_specs=pl.BlockSpec((1, 1), lambda i: (0, 0)),
    )(logits, labels2d)
    return loss[0, 0]


# --------------------------------- trainer ------------------------------------ #

def _pick_tile_n(n):
    # 8-16 whole samples per grid step; >=2 steps when possible so v7x's two
    # TensorCores can split the "parallel" batch axis.  Per-step VMEM stays
    # ~3-10 MB, under every generation's scoped-VMEM limit (incl. v7x 64 MiB).
    for t in (16, 8):
        if n % t == 0 and n // t >= 2:
            return t
    return n


class BaseTrainerPallas:
    """JAX/Pallas re-implementation of BaseTrainer.forward semantics."""

    def __init__(self, key, num_classes=NUM_CLASSES):
        k1, k2 = jax.random.split(key, 2)
        # Deterministic synthetic model params (input_shape=(3,32,32), cifar10).
        self.conv_w = 0.1 * jax.random.normal(k1, (CONV_OUT, CIN, KH, KW), jnp.float32)
        self.conv_b = jnp.zeros((CONV_OUT,), jnp.float32)
        self.fc_w = 0.1 * jax.random.normal(k2, (CONV_OUT, num_classes), jnp.float32)
        self.fc_b = jnp.zeros((num_classes,), jnp.float32)

        # One-time packing of the conv weight: column = tap*GROUP + cin (bf16 -> MXU).
        w_tap_c = self.conv_w.transpose(0, 2, 3, 1).reshape(CONV_OUT, KH * KW, CIN)
        w_tap_c = jnp.pad(w_tap_c, ((0, 0), (0, 0), (0, GROUP - CIN)))
        self.wc_packed = w_tap_c.reshape(CONV_OUT, KH * KW * GROUP).astype(jnp.bfloat16)
        self.bc = self.conv_b.reshape(CONV_OUT, 1)
        self.bf = self.fc_b.reshape(1, num_classes)

        self.num_classes = num_classes
        self.input_shape = (3, 32, 32)

    # --- the wrapped "self.model(inputs)" --- #
    def _model(self, x_nchw):
        return fused_forward(x_nchw, self.wc_packed, self.bc, self.fc_w, self.bf,
                             tile_n=_pick_tile_n(x_nchw.shape[0]))

    def _compute_loss(self, real, target):
        return cross_entropy_loss(real, target)

    def _forward(self, batch_inputs):
        inputs, _ = batch_inputs
        return self._model(inputs)

    def _loss(self, batch_inputs):
        inputs, labels = batch_inputs
        # Fused conv+GAP+head+CE in a single pallas_call (loss, logits).
        return fused_forward_with_loss(inputs, labels, self.wc_packed, self.bc,
                                       self.fc_w, self.bf,
                                       tile_n=_pick_tile_n(inputs.shape[0]))

    def _predict(self, batch_inputs):
        inputs, labels = batch_inputs
        return self._model(inputs), labels

    def forward(self, batch_inputs, mode: str = 'tensor'):
        if mode == 'loss':
            return self._loss(batch_inputs)
        elif mode == 'tensor':
            return self._forward(batch_inputs)
        elif mode == 'predict':
            return self._predict(batch_inputs)
        else:
            raise RuntimeError(f'Invalid mode: {mode}')

    # TODO(synk): fit/_train/_validate/_init_flops are host-side training loops
    # (optimizer, scheduler, logger, checkpointing, FLOPs counter) with no Pallas
    # kernel equivalent.


# ------------------------------ pure-JAX reference ---------------------------- #

def _reference_forward(x_nchw, conv_w, conv_b, fc_w, fc_b):
    """Reference of the same synthetic model (same bf16 input/weight quantization)."""
    xq = x_nchw.astype(jnp.bfloat16).astype(jnp.float32)
    wq = conv_w.astype(jnp.bfloat16).astype(jnp.float32)
    feat = jax.lax.conv_general_dilated(
        xq, wq, window_strides=(1, 1), padding='SAME',
        dimension_numbers=('NCHW', 'OIHW', 'NCHW'),
        precision=jax.lax.Precision.HIGHEST)
    feat = jnp.maximum(feat + conv_b[None, :, None, None], 0.0)
    pooled = feat.mean(axis=(2, 3))
    return pooled @ fc_w + fc_b[None, :]


if __name__ == "__main__":
    key = jax.random.PRNGKey(0)
    kx, kl, kp = jax.random.split(key, 3)

    N = 16                                                    # 2 grid steps of 8 samples
    x = jax.random.normal(kx, (N, 3, 32, 32), jnp.float32)    # NCHW, CIFAR-10 shape
    labels = jax.random.randint(kl, (N,), 0, NUM_CLASSES, jnp.int32)

    trainer = BaseTrainerPallas(kp)

    logits = trainer.forward((x, labels), mode='tensor')
    loss, out = trainer.forward((x, labels), mode='loss')
    preds, lbls = trainer.forward((x, labels), mode='predict')
    loss2 = trainer._compute_loss(preds, lbls)
    jax.block_until_ready((logits, loss, out, preds, lbls, loss2))

    assert logits.shape == (N, NUM_CLASSES)
    assert out.shape == (N, NUM_CLASSES)
    assert preds.shape == (N, NUM_CLASSES)
    assert loss.shape == ()
    assert bool(jnp.isfinite(loss))

    # Correctness check against a pure-JAX reference of the same model.
    ref_logits = _reference_forward(x, trainer.conv_w, trainer.conv_b,
                                    trainer.fc_w, trainer.fc_b)
    ref_logp = jax.nn.log_softmax(ref_logits, axis=-1)
    ref_loss = -jnp.mean(ref_logp[jnp.arange(N), labels])
    assert bool(jnp.allclose(logits, ref_logits, rtol=2e-2, atol=2e-3)), "logits mismatch"
    assert bool(jnp.allclose(out, ref_logits, rtol=2e-2, atol=2e-3)), "loss-mode logits mismatch"
    assert bool(jnp.allclose(loss, ref_loss, rtol=2e-2, atol=2e-3)), "fused loss mismatch"
    assert bool(jnp.allclose(loss2, ref_loss, rtol=2e-2, atol=2e-3)), "standalone loss mismatch"

    print("KERNEL_OK")
</pallas_src>

<mosaic_0001>
module attributes {stable_mosaic.version = 11 : i64} {
  func.func @kernel(%arg0: i32, %arg1: memref<24x1024xf32, #tpu.memory_space<vmem>>, %arg2: memref<72x8192xbf16, #tpu.memory_space<vmem>>, %arg3: memref<16x72xbf16, #tpu.memory_space<vmem>>, %arg4: memref<16x1xf32, #tpu.memory_space<vmem>>, %arg5: memref<16x10xf32, #tpu.memory_space<vmem>>, %arg6: memref<1x10xf32, #tpu.memory_space<vmem>>, %arg7: memref<8x10xf32, #tpu.memory_space<vmem>>, %arg8: memref<8x8448xbf16, #tpu.memory_space<vmem>>, %arg9: memref<72x8192xbf16, #tpu.memory_space<vmem>>) attributes {dimension_semantics = [#tpu.dimension_semantics<parallel>], iteration_bounds = array<i64: 2>, scalar_prefetch = 0 : i64, scratch_operands = 2 : i64, tpu.core_type = #tpu.core_type<tc>, window_params = [{transform_indices = @transform_0, window_bounds = array<i64: 24, 1024>}, {pipeline_mode = #tpu.pipeline_mode<synchronous>, transform_indices = @transform_1, window_bounds = array<i64: 72, 8192>}, {pipeline_mode = #tpu.pipeline_mode<synchronous>, transform_indices = @transform_2, window_bounds = array<i64: 16, 72>}, {pipeline_mode = #tpu.pipeline_mode<synchronous>, transform_indices = @transform_3, window_bounds = array<i64: 16, 1>}, {pipeline_mode = #tpu.pipeline_mode<synchronous>, transform_indices = @transform_4, window_bounds = array<i64: 16, 10>}, {pipeline_mode = #tpu.pipeline_mode<synchronous>, transform_indices = @transform_5, window_bounds = array<i64: 1, 10>}, {transform_indices = @transform_6, window_bounds = array<i64: 8, 10>}]} {
    %c0 = arith.constant 0 : index
    %c0_0 = arith.constant 0 : index
    %0 = vector.load %arg1[%c0, %c0_0] : memref<24x1024xf32, #tpu.memory_space<vmem>>, vector<24x1024xf32>
    %1 = vector.extract_strided_slice %0 {offsets = [0, 0], sizes = [3, 1024], strides = [1, 1]} : vector<24x1024xf32> to vector<3x1024xf32>
    %2 = arith.truncf %1 : vector<3x1024xf32> to vector<3x1024xbf16>
    %c0_1 = arith.constant 0 : index
    %c128 = arith.constant 128 : index
    %3 = vector.load %arg8[%c0_1, %c128] : memref<8x8448xbf16, #tpu.memory_space<vmem>>, vector<3x1024xbf16>
    tpu.vector_store %arg8[%c0_1, %c128], %2 {strides = array<i32>} : memref<8x8448xbf16, #tpu.memory_space<vmem>>, vector<3x1024xbf16>,
    %4 = vector.extract_strided_slice %0 {offsets = [3, 0], sizes = [3, 1024], strides = [1, 1]} : vector<24x1024xf32> to vector<3x1024xf32>
    %5 = arith.truncf %4 : vector<3x1024xf32> to vector<3x1024xbf16>
    %c0_2 = arith.constant 0 : index
    %c1152 = arith.constant 1152 : index
    %6 = vector.load %arg8[%c0_2, %c1152] : memref<8x8448xbf16, #tpu.memory_space<vmem>>, vector<3x1024xbf16>
    tpu.vector_store %arg8[%c0_2, %c1152], %5 {strides = array<i32>} : memref<8x8448xbf16, #tpu.memory_space<vmem>>, vector<3x1024xbf16>,
    %7 = vector.extract_strided_slice %0 {offsets = [6, 0], sizes = [3, 1024], strides = [1, 1]} : vector<24x1024xf32> to vector<3x1024xf32>
    %8 = arith.truncf %7 : vector<3x1024xf32> to vector<3x1024xbf16>
    %c0_3 = arith.constant 0 : index
    %c2176 = arith.constant 2176 : index
    %9 = vector.load %arg8[%c0_3, %c2176] : memref<8x8448xbf16, #tpu.memory_space<vmem>>, vector<3x1024xbf16>
    tpu.vector_store %arg8[%c0_3, %c2176], %8 {strides = array<i32>} : memref<8x8448xbf16, #tpu.memory_space<vmem>>, vector<3x1024xbf16>,
    %10 = vector.extract_strided_slice %0 {offsets = [9, 0], sizes = [3, 1024], strides = [1, 1]} : vector<24x1024xf32> to vector<3x1024xf32>
    %11 = arith.truncf %10 : vector<3x1024xf32> to vector<3x1024xbf16>
    %c0_4 = arith.constant 0 : index
    %c3200 = arith.constant 3200 : index
    %12 = vector.load %arg8[%c0_4, %c3200] : memref<8x8448xbf16, #tpu.memory_space<vmem>>, vector<3x1024xbf16>
    tpu.vector_store %arg8[%c0_4, %c3200], %11 {strides = array<i32>} : memref<8x8448xbf16, #tpu.memory_space<vmem>>, vector<3x1024xbf16>,
    %13 = vector.extract_strided_slice %0 {offsets = [12, 0], sizes = [3, 1024], strides = [1, 1]} : vector<24x1024xf32> to vector<3x1024xf32>
    %14 = arith.truncf %13 : vector<3x1024xf32> to vector<3x1024xbf16>
    %c0_5 = arith.constant 0 : index
    %c4224 = arith.constant 4224 : index
    %15 = vector.load %arg8[%c0_5, %c4224] : memref<8x8448xbf16, #tpu.memory_space<vmem>>, vector<3x1024xbf16>
    tpu.vector_store %arg8[%c0_5, %c4224], %14 {strides = array<i32>} : memref<8x8448xbf16, #tpu.memory_space<vmem>>, vector<3x1024xbf16>,
    %16 = vector.extract_strided_slice %0 {offsets = [15, 0], sizes = [3, 1024], strides = [1, 1]} : vector<24x1024xf32> to vector<3x1024xf32>
    %17 = arith.truncf %16 : vector<3x1024xf32> to vector<3x1024xbf16>
    %c0_6 = arith.constant 0 : index
    %c5248 = arith.constant 5248 : index
    %18 = vector.load %arg8[%c0_6, %c5248] : memref<8x8448xbf16, #tpu.memory_space<vmem>>, vector<3x1024xbf16>
    tpu.vector_store %arg8[%c0_6, %c5248], %17 {strides = array<i32>} : memref<8x8448xbf16, #tpu.memory_space<vmem>>, vector<3x1024xbf16>,
    %19 = vector.extract_strided_slice %0 {offsets = [18, 0], sizes = [3, 1024], strides = [1, 1]} : vector<24x1024xf32> to vector<3x1024xf32>
    %20 = arith.truncf %19 : vector<3x1024xf32> to vector<3x1024xbf16>
    %c0_7 = arith.constant 0 : index
    %c6272 = arith.constant 6272 : index
    %21 = vector.load %arg8[%c0_7, %c6272] : memref<8x8448xbf16, #tpu.memory_space<vmem>>, vector<3x1024xbf16>
    tpu.vector_store %arg8[%c0_7, %c6272], %20 {strides = array<i32>} : memref<8x8448xbf16, #tpu.memory_space<vmem>>, vector<3x1024xbf16>,
    %22 = vector.extract_strided_slice %0 {offsets = [21, 0], sizes = [3, 1024], strides = [1, 1]} : vector<24x1024xf32> to vector<3x1024xf32>
    %23 = arith.truncf %22 : vector<3x1024xf32> to vector<3x1024xbf16>
    %c0_8 = arith.constant 0 : index
    %c7296 = arith.constant 7296 : index
    %24 = vector.load %arg8[%c0_8, %c7296] : memref<8x8448xbf16, #tpu.memory_space<vmem>>, vector<3x1024xbf16>
    tpu.vector_store %arg8[%c0_8, %c7296], %23 {strides = array<i32>} : memref<8x8448xbf16, #tpu.memory_space<vmem>>, vector<3x1024xbf16>,
    %c0_9 = arith.constant 0 : index
    %c95 = arith.constant 95 : index
    %25 = vector.load %arg8[%c0_9, %c95] : memref<8x8448xbf16, #tpu.memory_space<vmem>>, vector<8x8192xbf16>
    %c0_10 = arith.constant 0 : index
    %c0_11 = arith.constant 0 : index
    %26 = vector.load %arg2[%c0_10, %c0_11] : memref<72x8192xbf16, #tpu.memory_space<vmem>>, vector<8x8192xbf16>
    %cst = arith.constant 0.000000e+00 : bf16
    %27 = vector.broadcast %cst : bf16 to vector<8x8192xbf16>
    %28 = arith.cmpf one, %26, %27 : vector<8x8192xbf16>
    %cst_12 = arith.constant 0.000000e+00 : bf16
    %29 = vector.broadcast %cst_12 : bf16 to vector<8x8192xbf16>
    %30 = arith.select %28, %25, %29 : vector<8x8192xi1>, vector<8x8192xbf16>
    %c0_13 = arith.constant 0 : index
    %c0_14 = arith.constant 0 : index
    %31 = vector.load %arg9[%c0_13, %c0_14] : memref<72x8192xbf16, #tpu.memory_space<vmem>>, vector<8x8192xbf16>
    tpu.vector_store %arg9[%c0_13, %c0_14], %30 {strides = array<i32>} : memref<72x8192xbf16, #tpu.memory_space<vmem>>, vector<8x8192xbf16>,
    %c0_15 = arith.constant 0 : index
    %c96 = arith.constant 96 : index
    %32 = vector.load %arg8[%c0_15, %c96] : memref<8x8448xbf16, #tpu.memory_space<vmem>>, vector<8x8192xbf16>
    %c8 = arith.constant 8 : index
    %c0_16 = arith.constant 0 : index
    %33 = vector.load %arg2[%c8, %c0_16] : memref<72x8192xbf16, #tpu.memory_space<vmem>>, vector<8x8192xbf16>
    %cst_17 = arith.constant 0.000000e+00 : bf16
    %34 = vector.broadcast %cst_17 : bf16 to vector<8x8192xbf16>
    %35 = arith.cmpf one, %33, %34 : vector<8x8192xbf16>
    %cst_18 = arith.constant 0.000000e+00 : bf16
    %36 = vector.broadcast %cst_18 : bf16 to vector<8x8192xbf16>
    %37 = arith.select %35, %32, %36 : vector<8x8192xi1>, vector<8x8192xbf16>
    %c8_19 = arith.constant 8 : index
    %c0_20 = arith.constant 0 : index
    %38 = vector.load %arg9[%c8_19, %c0_20] : memref<72x8192xbf16, #tpu.memory_space<vmem>>, vector<8x8192xbf16>
    tpu.vector_store %arg9[%c8_19, %c0_20], %37 {strides = array<i32>} : memref<72x8192xbf16, #tpu.memory_space<vmem>>, vector<8x8192xbf16>,
    %c0_21 = arith.constant 0 : index
    %c97 = arith.constant 97 : index
    %39 = vector.load %arg8[%c0_21, %c97] : memref<8x8448xbf16, #tpu.memory_space<vmem>>, vector<8x8192xbf16>
    %c16 = arith.constant 16 : index
    %c0_22 = arith.constant 0 : index
    %40 = vector.load %arg2[%c16, %c0_22] : memref<72x8192xbf16, #tpu.memory_space<vmem>>, vector<8x8192xbf16>
    %cst_23 = arith.constant 0.000000e+00 : bf16
    %41 = vector.broadcast %cst_23 : bf16 to vector<8x8192xbf16>
    %42 = arith.cmpf one, %40, %41 : vector<8x8192xbf16>
    %cst_24 = arith.constant 0.000000e+00 : bf16
    %43 = vector.broadcast %cst_24 : bf16 to vector<8x8192xbf16>
    %44 = arith.select %42, %39, %43 : vector<8x8192xi1>, vector<8x8192xbf16>
    %c16_25 = arith.constant 16 : index
    %c0_26 = arith.constant 0 : index
    %45 = vector.load %arg9[%c16_25, %c0_26] : memref<72x8192xbf16, #tpu.memory_space<vmem>>, vector<8x8192xbf16>
    tpu.vector_store %arg9[%c16_25, %c0_26], %44 {strides = array<i32>} : memref<72x8192xbf16, #tpu.memory_space<vmem>>, vector<8x8192xbf16>,
    %c0_27 = arith.constant 0 : index
    %c127 = arith.constant 127 : index
    %46 = vector.load %arg8[%c0_27, %c127] : memref<8x8448xbf16, #tpu.memory_space<vmem>>, vector<8x8192xbf16>
    %c24 = arith.constant 24 : index
    %c0_28 = arith.constant 0 : index
    %47 = vector.load %arg2[%c24, %c0_28] : memref<72x8192xbf16, #tpu.memory_space<vmem>>, vector<8x8192xbf16>
    %cst_29 = arith.constant 0.000000e+00 : bf16
    %48 = vector.broadcast %cst_29 : bf16 to vector<8x8192xbf16>
    %49 = arith.cmpf one, %47, %48 : vector<8x8192xbf16>
    %cst_30 = arith.constant 0.000000e+00 : bf16
    %50 = vector.broadcast %cst_30 : bf16 to vector<8x8192xbf16>
    %51 = arith.select %49, %46, %50 : vector<8x8192xi1>, vector<8x8192xbf16>
    %c24_31 = arith.constant 24 : index
    %c0_32 = arith.constant 0 : index
    %52 = vector.load %arg9[%c24_31, %c0_32] : memref<72x8192xbf16, #tpu.memory_space<vmem>>, vector<8x8192xbf16>
    tpu.vector_store %arg9[%c24_31, %c0_32], %51 {strides = array<i32>} : memref<72x8192xbf16, #tpu.memory_space<vmem>>, vector<8x8192xbf16>,
    %c0_33 = arith.constant 0 : index
    %c128_34 = arith.constant 128 : index
    %53 = vector.load %arg8[%c0_33, %c128_34] : memref<8x8448xbf16, #tpu.memory_space<vmem>>, vector<8x8192xbf16>
    %c32 = arith.constant 32 : index
    %c0_35 = arith.constant 0 : index
    %54 = vector.load %arg2[%c32, %c0_35] : memref<72x8192xbf16, #tpu.memory_space<vmem>>, vector<8x8192xbf16>
    %cst_36 = arith.constant 0.000000e+00 : bf16
    %55 = vector.broadcast %cst_36 : bf16 to vector<8x8192xbf16>
    %56 = arith.cmpf one, %54, %55 : vector<8x8192xbf16>
    %cst_37 = arith.constant 0.000000e+00 : bf16
    %57 = vector.broadcast %cst_37 : bf16 to vector<8x8192xbf16>
    %58 = arith.select %56, %53, %57 : vector<8x8192xi1>, vector<8x8192xbf16>
    %c32_38 = arith.constant 32 : index
    %c0_39 = arith.constant 0 : index
    %59 = vector.load %arg9[%c32_38, %c0_39] : memref<72x8192xbf16, #tpu.memory_space<vmem>>, vector<8x8192xbf16>
    tpu.vector_store %arg9[%c32_38, %c0_39], %58 {strides = array<i32>} : memref<72x8192xbf16, #tpu.memory_space<vmem>>, vector<8x8192xbf16>,
    %c0_40 = arith.constant 0 : index
    %c129 = arith.constant 129 : index
    %60 = vector.load %arg8[%c0_40, %c129] : memref<8x8448xbf16, #tpu.memory_space<vmem>>, vector<8x8192xbf16>
    %c40 = arith.constant 40 : index
    %c0_41 = arith.constant 0 : index
    %61 = vector.load %arg2[%c40, %c0_41] : memref<72x8192xbf16, #tpu.memory_space<vmem>>, vector<8x8192xbf16>
    %cst_42 = arith.constant 0.000000e+00 : bf16
    %62 = vector.broadcast %cst_42 : bf16 to vector<8x8192xbf16>
    %63 = arith.cmpf one, %61, %62 : vector<8x8192xbf16>
    %cst_43 = arith.constant 0.000000e+00 : bf16
    %64 = vector.broadcast %cst_43 : bf16 to vector<8x8192xbf16>
    %65 = arith.select %63, %60, %64 : vector<8x8192xi1>, vector<8x8192xbf16>
    %c40_44 = arith.constant 40 : index
    %c0_45 = arith.constant 0 : index
    %66 = vector.load %arg9[%c40_44, %c0_45] : memref<72x8192xbf16, #tpu.memory_space<vmem>>, vector<8x8192xbf16>
    tpu.vector_store %arg9[%c40_44, %c0_45], %65 {strides = array<i32>} : memref<72x8192xbf16, #tpu.memory_space<vmem>>, vector<8x8192xbf16>,
    %c0_46 = arith.constant 0 : index
    %c159 = arith.constant 159 : index
    %67 = vector.load %arg8[%c0_46, %c159] : memref<8x8448xbf16, #tpu.memory_space<vmem>>, vector<8x8192xbf16>
    %c48 = arith.constant 48 : index
    %c0_47 = arith.constant 0 : index
    %68 = vector.load %arg2[%c48, %c0_47] : memref<72x8192xbf16, #tpu.memory_space<vmem>>, vector<8x8192xbf16>
    %cst_48 = arith.constant 0.000000e+00 : bf16
    %69 = vector.broadcast %cst_48 : bf16 to vector<8x8192xbf16>
    %70 = arith.cmpf one, %68, %69 : vector<8x8192xbf16>
    %cst_49 = arith.constant 0.000000e+00 : bf16
    %71 = vector.broadcast %cst_49 : bf16 to vector<8x8192xbf16>
    %72 = arith.select %70, %67, %71 : vector<8x8192xi1>, vector<8x8192xbf16>
    %c48_50 = arith.constant 48 : index
    %c0_51 = arith.constant 0 : index
    %73 = vector.load %arg9[%c48_50, %c0_51] : memref<72x8192xbf16, #tpu.memory_space<vmem>>, vector<8x8192xbf16>
    tpu.vector_store %arg9[%c48_50, %c0_51], %72 {strides = array<i32>} : memref<72x8192xbf16, #tpu.memory_space<vmem>>, vector<8x8192xbf16>,
    %c0_52 = arith.constant 0 : index
    %c160 = arith.constant 160 : index
    %74 = vector.load %arg8[%c0_52, %c160] : memref<8x8448xbf16, #tpu.memory_space<vmem>>, vector<8x8192xbf16>
    %c56 = arith.constant 56 : index
    %c0_53 = arith.constant 0 : index
    %75 = vector.load %arg2[%c56, %c0_53] : memref<72x8192xbf16, #tpu.memory_space<vmem>>, vector<8x8192xbf16>
    %cst_54 = arith.constant 0.000000e+00 : bf16
    %76 = vector.broadcast %cst_54 : bf16 to vector<8x8192xbf16>
    %77 = arith.cmpf one, %75, %76 : vector<8x8192xbf16>
    %cst_55 = arith.constant 0.000000e+00 : bf16
    %78 = vector.broadcast %cst_55 : bf16 to vector<8x8192xbf16>
    %79 = arith.select %77, %74, %78 : vector<8x8192xi1>, vector<8x8192xbf16>
    %c56_56 = arith.constant 56 : index
    %c0_57 = arith.constant 0 : index
    %80 = vector.load %arg9[%c56_56, %c0_57] : memref<72x8192xbf16, #tpu.memory_space<vmem>>, vector<8x8192xbf16>
    tpu.vector_store %arg9[%c56_56, %c0_57], %79 {strides = array<i32>} : memref<72x8192xbf16, #tpu.memory_space<vmem>>, vector<8x8192xbf16>,
    %c0_58 = arith.constant 0 : index
    %c161 = arith.constant 161 : index
    %81 = vector.load %arg8[%c0_58, %c161] : memref<8x8448xbf16, #tpu.memory_space<vmem>>, vector<8x8192xbf16>
    %c64 = arith.constant 64 : index
    %c0_59 = arith.constant 0 : index
    %82 = vector.load %arg2[%c64, %c0_59] : memref<72x8192xbf16, #tpu.memory_space<vmem>>, vector<8x8192xbf16>
    %cst_60 = arith.constant 0.000000e+00 : bf16
    %83 = vector.broadcast %cst_60 : bf16 to vector<8x8192xbf16>
    %84 = arith.cmpf one, %82, %83 : vector<8x8192xbf16>
    %cst_61 = arith.constant 0.000000e+00 : bf16
    %85 = vector.broadcast %cst_61 : bf16 to vector<8x8192xbf16>
    %86 = arith.select %84, %81, %85 : vector<8x8192xi1>, vector<8x8192xbf16>
    %c64_62 = arith.constant 64 : index
    %c0_63 = arith.constant 0 : index
    %87 = vector.load %arg9[%c64_62, %c0_63] : memref<72x8192xbf16, #tpu.memory_space<vmem>>, vector<8x8192xbf16>
    tpu.vector_store %arg9[%c64_62, %c0_63], %86 {strides = array<i32>} : memref<72x8192xbf16, #tpu.memory_space<vmem>>, vector<8x8192xbf16>,
    %c0_64 = arith.constant 0 : index
    %c0_65 = arith.constant 0 : index
    %88 = vector.load %arg3[%c0_64, %c0_65] : memref<16x72xbf16, #tpu.memory_space<vmem>>, vector<16x72xbf16>
    %c0_66 = arith.constant 0 : index
    %c0_67 = arith.constant 0 : index
    %89 = vector.load %arg9[%c0_66, %c0_67] : memref<72x8192xbf16, #tpu.memory_space<vmem>>, vector<72x8192xbf16>
    %cst_68 = arith.constant dense<0.000000e+00> : vector<16x8192xf32>
    %90 = tpu.matmul %88, %89, %cst_68 {dimension_numbers = #tpu.dot_dimension_numbers<[1], [0], [0], [1], [0, 0, 1, 1], [], []>} : vector<16x72xbf16>, vector<72x8192xbf16>, vector<16x8192xf32> -> vector<16x8192xf32>
    %c0_69 = arith.constant 0 : index
    %c0_70 = arith.constant 0 : index
    %91 = vector.load %arg4[%c0_69, %c0_70] : memref<16x1xf32, #tpu.memory_space<vmem>>, vector<16x1xf32>
    %92 = vector.broadcast %91 : vector<16x1xf32> to vector<16x8192xf32>
    %93 = arith.addf %90, %92 : vector<16x8192xf32>
    %cst_71 = arith.constant 0.000000e+00 : f32
    %94 = vector.broadcast %cst_71 : f32 to vector<16x8192xf32>
    %95 = arith.maximumf %93, %94 : vector<16x8192xf32>
    %96 = vector.extract_strided_slice %95 {offsets = [0, 0], sizes = [16, 1024], strides = [1, 1]} : vector<16x8192xf32> to vector<16x1024xf32>
    %cst_72 = arith.constant dense<0.000000e+00> : vector<16xf32>
    %97 = vector.multi_reduction <add>, %96, %cst_72 [1] : vector<16x1024xf32> to vector<16xf32>
    %98 = vector.shape_cast %97 : vector<16xf32> to vector<16x1xf32>
    %99 = vector.extract_strided_slice %95 {offsets = [0, 1024], sizes = [16, 1024], strides = [1, 1]} : vector<16x8192xf32> to vector<16x1024xf32>
    %cst_73 = arith.constant dense<0.000000e+00> : vector<16xf32>
    %100 = vector.multi_reduction <add>, %99, %cst_73 [1] : vector<16x1024xf32> to vector<16xf32>
    %101 = vector.shape_cast %100 : vector<16xf32> to vector<16x1xf32>
    %102 = vector.extract_strided_slice %95 {offsets = [0, 2048], sizes = [16, 1024], strides = [1, 1]} : vector<16x8192xf32> to vector<16x1024xf32>
    %cst_74 = arith.constant dense<0.000000e+00> : vector<16xf32>
    %103 = vector.multi_reduction <add>, %102, %cst_74 [1] : vector<16x1024xf32> to vector<16xf32>
    %104 = vector.shape_cast %103 : vector<16xf32> to vector<16x1xf32>
    %105 = vector.extract_strided_slice %95 {offsets = [0, 3072], sizes = [16, 1024], strides = [1, 1]} : vector<16x8192xf32> to vector<16x1024xf32>
    %cst_75 = arith.constant dense<0.000000e+00> : vector<16xf32>
    %106 = vector.multi_reduction <add>, %105, %cst_75 [1] : vector<16x1024xf32> to vector<16xf32>
    %107 = vector.shape_cast %106 : vector<16xf32> to vector<16x1xf32>
    %108 = vector.extract_strided_slice %95 {offsets = [0, 4096], sizes = [16, 1024], strides = [1, 1]} : vector<16x8192xf32> to vector<16x1024xf32>
    %cst_76 = arith.constant dense<0.000000e+00> : vector<16xf32>
    %109 = vector.multi_reduction <add>, %108, %cst_76 [1] : vector<16x1024xf32> to vector<16xf32>
    %110 = vector.shape_cast %109 : vector<16xf32> to vector<16x1xf32>
    %111 = vector.extract_strided_slice %95 {offsets = [0, 5120], sizes = [16, 1024], strides = [1, 1]} : vector<16x8192xf32> to vector<16x1024xf32>
    %cst_77 = arith.constant dense<0.000000e+00> : vector<16xf32>
    %112 = vector.multi_reduction <add>, %111, %cst_77 [1] : vector<16x1024xf32> to vector<16xf32>
    %113 = vector.shape_cast %112 : vector<16xf32> to vector<16x1xf32>
    %114 = vector.extract_strided_slice %95 {offsets = [0, 6144], sizes = [16, 1024], strides = [1, 1]} : vector<16x8192xf32> to vector<16x1024xf32>
    %cst_78 = arith.constant dense<0.000000e+00> : vector<16xf32>
    %115 = vector.multi_reduction <add>, %114, %cst_78 [1] : vector<16x1024xf32> to vector<16xf32>
    %116 = vector.shape_cast %115 : vector<16xf32> to vector<16x1xf32>
    %117 = vector.extract_strided_slice %95 {offsets = [0, 7168], sizes = [16, 1024], strides = [1, 1]} : vector<16x8192xf32> to vector<16x1024xf32>
    %cst_79 = arith.constant dense<0.000000e+00> : vector<16xf32>
    %118 = vector.multi_reduction <add>, %117, %cst_79 [1] : vector<16x1024xf32> to vector<16xf32>
    %119 = vector.shape_cast %118 : vector<16xf32> to vector<16x1xf32>
    %120 = tpu.concatenate %98, %101, %104, %107, %110, %113, %116, %119 in 1 : vector<16x1xf32>, vector<16x1xf32>, vector<16x1xf32>, vector<16x1xf32>, vector<16x1xf32>, vector<16x1xf32>, vector<16x1xf32>, vector<16x1xf32> -> vector<16x8xf32>
    %cst_80 = arith.constant 9.765625E-4 : f32
    %121 = vector.broadcast %cst_80 : f32 to vector<16x8xf32>
    %122 = arith.mulf %120, %121 : vector<16x8xf32>
    %123 = tpu.transpose %122, [1, 0] : vector<16x8xf32> -> vector<8x16xf32>
    %c0_81 = arith.constant 0 : index
    %c0_82 = arith.constant 0 : index
    %124 = vector.load %arg5[%c0_81, %c0_82] : memref<16x10xf32, #tpu.memory_space<vmem>>, vector<16x10xf32>
    %cst_83 = arith.constant dense<0.000000e+00> : vector<8x10xf32>
    %125 = tpu.matmul %123, %124, %cst_83 {dimension_numbers = #tpu.dot_dimension_numbers<[1], [0], [0], [1], [0, 0, 1, 1], [], []>} : vector<8x16xf32>, vector<16x10xf32>, vector<8x10xf32> -> vector<8x10xf32>
    %c0_84 = arith.constant 0 : index
    %c0_85 = arith.constant 0 : index
    %126 = vector.load %arg6[%c0_84, %c0_85] : memref<1x10xf32, #tpu.memory_space<vmem>>, vector<1x10xf32>
    %127 = vector.broadcast %126 : vector<1x10xf32> to vector<8x10xf32>
    %128 = arith.addf %125, %127 : vector<8x10xf32>
    %c0_86 = arith.constant 0 : index
    %c0_87 = arith.constant 0 : index
    %129 = vector.load %arg7[%c0_86, %c0_87] : memref<8x10xf32, #tpu.memory_space<vmem>>, vector<8x10xf32>
    tpu.vector_store %arg7[%c0_86, %c0_87], %128 {strides = array<i32>} : memref<8x10xf32, #tpu.memory_space<vmem>>, vector<8x10xf32>,
    return
  }
  func.func @transform_0(%arg0: i32) -> (i32, i32) {
    %c0_i32 = arith.constant 0 : i32
    %c0_i32_0 = arith.constant 0 : i32
    return %arg0, %c0_i32 : i32, i32
  }
  func.func @transform_1(%arg0: i32) -> (i32, i32) {
    %c0_i32 = arith.constant 0 : i32
    %c0_i32_0 = arith.constant 0 : i32
    %c0_i32_1 = arith.constant 0 : i32
    return %c0_i32, %c0_i32_0 : i32, i32
  }
  func.func @transform_2(%arg0: i32) -> (i32, i32) {
    %c0_i32 = arith.constant 0 : i32
    %c0_i32_0 = arith.constant 0 : i32
    %c0_i32_1 = arith.constant 0 : i32
    return %c0_i32, %c0_i32_0 : i32, i32
  }
  func.func @transform_3(%arg0: i32) -> (i32, i32) {
    %c0_i32 = arith.constant 0 : i32
    %c0_i32_0 = arith.constant 0 : i32
    %c0_i32_1 = arith.constant 0 : i32
    return %c0_i32, %c0_i32_0 : i32, i32
  }
  func.func @transform_4(%arg0: i32) -> (i32, i32) {
    %c0_i32 = arith.constant 0 : i32
    %c0_i32_0 = arith.constant 0 : i32
    %c0_i32_1 = arith.constant 0 : i32
    return %c0_i32, %c0_i32_0 : i32, i32
  }
  func.func @transform_5(%arg0: i32) -> (i32, i32) {
    %c0_i32 = arith.constant 0 : i32
    %c0_i32_0 = arith.constant 0 : i32
    %c0_i32_1 = arith.constant 0 : i32
    return %c0_i32, %c0_i32_0 : i32, i32
  }
  func.func @transform_6(%arg0: i32) -> (i32, i32) {
    %c0_i32 = arith.constant 0 : i32
    %c0_i32_0 = arith.constant 0 : i32
    return %arg0, %c0_i32 : i32, i32
  }
}

</mosaic_0001>

<bundles_post_ra>
// kernel: fused_forward.1
= control target key start
LH: loop header
LB: loop body
LE: loop exit
PB: predicated region body
PF: predicated region fallthrough
CT: control target
= control target key end

     0   :  { %11 = vsyncpa [#allocation5], 0  ;;  %s12608_s0 = inlined_call_operand.vmem [shape: f32[48,1024], index: 0, kind: input, shape index: {}]   ;;  %s12609_s1 = inlined_call_operand.hbm [shape: bf16[72,8192], index: 1, kind: input, shape index: {}]   ;;  %s12610_s2 = inlined_call_operand.hbm [shape: bf16[16,72], index: 2, kind: input, shape index: {}]   ;;  %s12611_s3 = inlined_call_operand.vmem [shape: f32[16,1], index: 3, kind: input, shape index: {}]   ;;  %s12612_s4 = inlined_call_operand.hbm [shape: f32[16,10], index: 4, kind: input, shape index: {}]   ;;  %s12613_s5 = inlined_call_operand.hbm [shape: f32[1,10], index: 5, kind: input, shape index: {}]   ;;  %s12614_s6 = inlined_call_operand.hbm [shape: f32[16,10], index: 6, kind: output, shape index: {}]  }
   0x1   :  { %12 = vsyncpa [#allocation8], 0 }
   0x2   :  { %13 = vsyncpa [#allocation11], 0 }
   0x3   :  { %14 = vsyncpa [#allocation6], 0 }
   0x4   :  { %16 = vsyncpa [#allocation6 + $0x1], 0  ;;  %s8790_s21 = smov 0   ;;  %s8792_s22 = smov 0  }
   0x5   :  { %s8794_s23 = smov 0   ;;  %s8796_s24 = smov 0  }
   0x6 LB: > { %s8811_s25 = sadd.s32 4294967295, %s8731_s24   ;;  %s7961_s26 = sadd.s32 4294967294, %s8731_s24   ;;  %s8731_s24 = sphi %s8796_s24, %s12832_s24   ;;  %s8727_s23 = sphi %s8794_s23, %s12831_s23   ;;  %s8723_s22 = sphi %s8792_s22, %s12830_s22   ;;  %s8719_s21 = sphi %s8790_s21, %s12829_s21  }
   0x7   : > { %s8815_s27 = sadd.s32 1, %s8731_s24   ;;  %s160_s28 = sadd.s32 1, %s8727_s23 }
   0x8   : > { %s157_s29 = ssub.s32 %s8731_s24, %s8815_s27  ;;  %p170_p0 = scmp.ne.s32.totalorder %s8727_s23, %s8723_s22 }
   0x9   : > { %p158_p1 = scmp.eq.s32.totalorder %s157_s29, 0  ;;  %p171_p2 = scmp.eq.s32.totalorder %s8811_s25, 1 }
   0xa   : > { %p176_p3 = scmp.ne.s32.totalorder %s8723_s22, %s8719_s21  ;;  %p177_p4 = scmp.eq.s32.totalorder %s7961_s26, 1 }
   0xb   : > { %s8826_s30 = scalar_select %p158_p1, %s8727_s23, %s160_s28  }
   0xc   : > { %p8828_p5 = por %p171_p2, %p170_p0  ;;  %p8832_p6 = por %p177_p4, %p176_p3 }
   0xd   : > { %p7962_p7 = scmp.ge.s32.totalorder %s8731_s24, 1  ;;  %p184_p8 = scmp.lt.s32.totalorder %s8731_s24, 3 }
   0xe   : > { %s12640_s8 = scalar_select %p8832_p6, 1, 0 }
   0xf   : > { %p12615_p9 = scmp.eq.s32.totalorder %s8811_s25, 0  ;;  %p8839_p10 = pnand %p7962_p7, %p184_p8 }
  0x10   : > { %s8733_s10 = smov [#allocation7]   ;;  %s8734_s13 = smov [#allocation4]  }
  0x11   : > { %s209_s11 = sshll.u32 %s8733_s10, 4  ;;  %p8468_p11 = pneg %p8839_p10  ;;  %s210_s11 = int_to_ptr.vmem [resolvable:$true] %s209_s11 }
  0x12   : > { %s196_s14 = sshll.u32 %s8734_s13, 4  ;;  %s8566_s15 = scalar_lea.vmem %s210_s11, 128  ;;  %s197_s14 = int_to_ptr.vmem [resolvable:$true] %s196_s14 }
  0x13   : > { %p8847_p12 = pnand %p12615_p9, %p8468_p11  ;;  %p8567_p0 = scmp.ne.s32.totalorder %s210_s11, %s8566_s15 }
  0x14   : > { %p8574_p3 = scmp.lt.s32.totalorder %s210_s11, %s210_s11  ;;  %p8575_p4 = scmp.lt.s32.totalorder %s8566_s15, %s8566_s15 }
  0x15   : > { %p8557_p13 = pneg %p8847_p12 }
  0x16   : > { %p8576_p7 = por %p8575_p4, %p8574_p3 }
  0x17   : > { %p8569_p1 = pnand %p8567_p0, %p8557_p13 }
  0x19   : > { %p8570_p2 = pneg %p8569_p1 }
  0x1b   : > { %p8577_p8 = pnand %p8576_p7, %p8570_p2 }
  0x1d   : > { %8580 = shalt.err (!%p8577_p8)
}
  0x1e   : > { %s8735_s16 = smov 64   ;;  %s8736_s17 = smov 4  }
  0x1f   : > { %8474 = dma.hbm_to_vmem [thread:$0]  (!%p8847_p12), %s12610_s2, 128, %s210_s11, [#allocation8], %s8735_s16, %s8735_s16, %s8736_s17  }
  0x20   : > { %s8592_s20 = scalar_lea.vmem %s197_s14, 36864  ;;  %p8600_p9 = scmp.lt.s32.totalorder %s197_s14, %s197_s14 }
  0x21   : > { %p8593_p11 = scmp.ne.s32.totalorder %s197_s14, %s8592_s20  ;;  %p8601_p6 = scmp.lt.s32.totalorder %s8592_s20, %s8592_s20 }
  0x23   : > { %p8595_p0 = pnand %p8593_p11, %p8557_p13  ;;  %p8602_p3 = por %p8601_p6, %p8600_p9 }
  0x25   : > { %p8596_p1 = pneg %p8595_p0 }
  0x27   : > { %p8603_p2 = pnand %p8602_p3, %p8596_p1 }
  0x29   : > { %8606 = shalt.err (!%p8603_p2)
}
  0x2a   : > { %s8737_s26 = smov 4096   ;;  %s8738_s28 = smov 256  }
  0x2b   : > { %8471 = dma.hbm_to_vmem [thread:$0]  (!%p8847_p12), %s12609_s1, 36864, %s197_s14, [#allocation5], %s8737_s26, %s8737_s26, %s8738_s28  }
  0x2c   : > { %s8739_s11 = smov [#allocation9]  }
  0x2d   : > { %s225_s13 = sshll.u32 %s8739_s11, 4  ;;  %s226_s13 = int_to_ptr.vmem [resolvable:$true] %s225_s13 }
  0x2e   : > { %s8618_s15 = scalar_lea.vmem %s226_s13, 256  ;;  %p8626_p9 = scmp.lt.s32.totalorder %s226_s13, %s226_s13 }
  0x2f   : > { %p8619_p4 = scmp.ne.s32.totalorder %s226_s13, %s8618_s15  ;;  %p8627_p8 = scmp.lt.s32.totalorder %s8618_s15, %s8618_s15 }
  0x31   : > { %p8621_p7 = pnand %p8619_p4, %p8557_p13  ;;  %p8628_p11 = por %p8627_p8, %p8626_p9 }
  0x33   : > { %p8622_p6 = pneg %p8621_p7 }
  0x35   : > { %p8629_p0 = pnand %p8628_p11, %p8622_p6 }
  0x37   : > { %8632 = shalt.err (!%p8629_p0)
}
  0x38   : > { %s8740_s16 = smov 128   ;;  %s8741_s17 = smov 8  }
  0x39   : > { %8477 = dma.hbm_to_vmem [thread:$0]  (!%p8847_p12), %s12612_s4, 256, %s226_s13, [#allocation8], %s8740_s16, %s8740_s16, %s8741_s17  }
  0x3a   : > { %s8742_s19 = smov [#allocation10]  }
  0x3b   : > { %s239_s20 = sshll.u32 %s8742_s19, 4  ;;  %s240_s20 = int_to_ptr.vmem [resolvable:$true] %s239_s20 }
  0x3c   : > { %s8644_s26 = scalar_lea.vmem %s240_s20, 16  ;;  %s8651_s28 = scalar_lea.vmem %s240_s20, 32 }
  0x3d   : > { %p8645_p1 = scmp.ne.s32.totalorder %s240_s20, %s8644_s26  ;;  %p8652_p4 = scmp.lt.s32.totalorder %s240_s20, %s240_s20 }
  0x3e   : > { %p8653_p7 = scmp.lt.s32.totalorder %s8651_s28, %s8644_s26 }
  0x3f   : > { %p8647_p3 = pnand %p8645_p1, %p8557_p13 }
  0x40   : > { %p8654_p6 = por %p8653_p7, %p8652_p4 }
  0x41   : > { %p8648_p2 = pneg %p8647_p3 }
  0x43   : > { %p8655_p9 = pnand %p8654_p6, %p8648_p2 }
  0x45   : > { %8658 = shalt.err (!%p8655_p9)
}
  0x46   : > { %8480 = dma.hbm_to_vmem [thread:$0]  (!%p8847_p12), %s12613_s5, 16, %s240_s20, [#allocation11]  }
  0x47   : > { %262 = sbr.rel (%p8839_p10) target bundleno = 1432 (0x598), region = 44 }
  0x4c   : > { %p12643_p8 = scmp.eq.s32.totalorder %s8811_s25, 0 }
  0x4e   : > { %8702 = dma.done.wait (%p12643_p8), [#allocation5], 36864   ;;  %p12644_p13 = pmov %p12643_p8 }
  0x4f   : > { %p12645_p11 = pmov %p12643_p8 }
  0x50   : > { %8704 = vsyncadd (%p12644_p13), [#allocation5], 4294930432 }
  0x51   : > { %8706 = dma.done.wait (%p12645_p11), [#allocation8], 384   ;;  %p12646_p0 = pmov %p12643_p8 }
  0x53   : > { %8708 = vsyncadd (%p12646_p0), [#allocation8], 4294966912  ;;  %p12647_p1 = pmov %p12646_p0 }
  0x54   : > { %p12648_p12 = pmov %p12646_p0 }
  0x55   : > { %8710 = dma.done.wait (%p12647_p1), [#allocation11], 16  }
  0x56   : > { %8712 = vsyncadd (%p12648_p12), [#allocation11], 4294967280  ;;  %s305_s9 = smul.u32 3, %s8811_s25  ;;  %vm369_vm0 = vcmask 1041408   ;;  %vm370_vm1 = vsmask.f32 1280 }
  0x57   : > { %vm372_vm2 = vcmask 1045508   ;;  %vm373_vm3 = vsmask.f32 5376  ;;  %vm371_vm4 = vmand %vm369_vm0, %vm370_vm1  ;;  %v376_v1 = vld [vmem:[#allocation2 + $0x4] sm:$0x33]  ;;  %vm480_vm7 = vcmask 1040384  }
  0x58   : > { %p306_p10 = scmp.lt.s32.totalorder %s305_s9, 5  ;;  %vm374_vm5 = vmand %vm372_vm2, %vm373_vm3  ;;  %v379_v2 = vld [vmem:[#allocation2 + $0xc] sm:$0x33]  ;;  %v382_v3 = vld [vmem:[#allocation2 + $0x14] sm:$0x33]  ;;  %vm481_vm8 = vcmask 1044484  }
  0x59   : > { %vm8900_vm6 = vmor %vm374_vm5, %vm371_vm4  ;;  %v385_v15 = vld [vmem:[#allocation2 + $0x1c] sm:$0x33]  ;;  %v428_v30 = vld [vmem:[#allocation2 + $0x24] sm:$0x33]  ;;  %s8743_s16 = smov 95   ;;  %s8744_s17 = smov 97  }
  0x5a   : > { %s12834_s9 = smov (!%p306_p10, %s305_s9), 5  ;;  %v431_v36 = vld [vmem:[#allocation2 + $0x2c] sm:$0x33]  ;;  %vm8946_vm9 = vmor %vm480_vm7, %vm481_vm8  ;;  %v503_v48 = vld [vmem:[#allocation2 + $0x44] sm:$0x33]  ;;  %s8745_s14 = smov 96  }
  0x5b   : > { %s8411_s12 = sshll.u32 %s12834_s9, 6  ;;  %v434_v53 = vld [vmem:[#allocation2 + $0x34] sm:$0x33]  ;;  %v437_v58 = vld [vmem:[#allocation2 + $0x3c] sm:$0x33]  ;;  %s8746_s18 = smov 127  }
  0x5c   : > { %s8907_s15 = scalar_lea.vmem %s12608_s0, %s8411_s12  ;;  %s8747_s19 = smov 31   ;;  %vm1063_vm10 = vcmask 1043456   ;;  %vm3955_vm11 = vcmask 777216   ;;  %vm3175_vm13 = vcmask 793600   ;;  %vm3565_vm15 = vcmask 785408  }
  0x5d   : > { %v313_v4 = vld [vmem:[%s8907_s15] sm:$0xff]  ;;  %v314_v5 = vld [vmem:[%s8907_s15 + $0x8] sm:$0xff]  ;;  %v315_v6 = vld [vmem:[%s8907_s15 + $0x10] sm:$0xff]  ;;  %s8748_s20 = smov 1   ;;  %s8749_s26 = smov 33   ;;  %vm2785_vm3 = vcmask 1039360  }
  0x5e   : > { %v8412_v7 = vpack.c.bf16 %v314_v5, %v313_v4  ;;  %v316_v8 = vld [vmem:[%s8907_s15 + $0x18] sm:$0xff]  ;;  %v317_v9 = vld [vmem:[%s8907_s15 + $0x20] sm:$0xff]  ;;  %v318_v10 = vld [vmem:[%s8907_s15 + $0x28] sm:$0xff]  ;;  %s8750_s28 = smov 32   ;;  %vm12619_vm8 = vcmask 252928   ;;  %s302_s11 = sand.u32 1, %s8723_s22  }
  0x5f   : > { %v8915_v11 = vpack.c.bf16 %v316_v8, %v315_v6  ;;  %v8917_v12 = vpack.c.bf16 %v318_v10, %v317_v9  ;;  %v319_v13 = vld [vmem:[%s8907_s15 + $0x30] sm:$0xff]  ;;  %v320_v14 = vld [vmem:[%s8907_s15 + $0x38] sm:$0xff]  ;;  %v321_v28 = vld [vmem:[%s8907_s15 + $0x40] sm:$0xff]  ;;  %s7973_s13 = sshll.u32 %s302_s11, 3 }
  0x60   : > { %v377_v16 = vsel %vm8900_vm6, %v8412_v7, %v376_v1  ;;  %v8923_v17 = vpack.c.bf16 %v320_v14, %v319_v13  ;;  %v389_v18 = vshrl.u32 %v8412_v7, 16  ;;  %v392_v19 = vshll.u32 %v8412_v7, 16  ;;  %v322_v29 = vld [vmem:[%s8907_s15 + $0x48] sm:$0xff]  ;;  %v323_v63 = vld [vmem:[%s8907_s15 + $0x50] sm:$0xff]  ;;  %v324_v1 = vld [vmem:[%s8907_s15 + $0x58] sm:$0xff] }
  0x61   : > { %378 = vst [vmem:[#allocation2 + $0x4] sm:$0x33] %v377_v16  ;;  %v380_v20 = vsel %vm8900_vm6, %v8915_v11, %v379_v2  ;;  %v383_v21 = vsel %vm8900_vm6, %v8917_v12, %v382_v3  ;;  %v398_v22 = vshrl.u32 %v8915_v11, 16  ;;  %v401_v23 = vshll.u32 %v8915_v11, 16  ;;  %v506_v6 = vld [vmem:[#allocation2 + $0x4c] sm:$0x33] }
  0x62   : > { %381 = vst [vmem:[#allocation2 + $0xc] sm:$0x33] %v380_v20  ;;  %384 = vst [vmem:[#allocation2 + $0x14] sm:$0x33] %v383_v21  ;;  %v386_v24 = vsel %vm8900_vm6, %v8923_v17, %v385_v15  ;;  %v391_v25 = vrot.slane %v389_v18, 5  ;;  %v394_v26 = vrot.slane %v392_v19, 6  ;;  %v8942_v39 = vpack.c.bf16 %v322_v29, %v321_v28 }
  0x63   : > { %v407_v27 = vshrl.u32 %v8917_v12, 16  ;;  %387 = vst [vmem:[#allocation2 + $0x1c] sm:$0x33] %v386_v24  ;;  %v400_v31 = vrot.slane %v398_v22, 5  ;;  %v403_v32 = vrot.slane %v401_v23, 6  ;;  %v410_v33 = vshll.u32 %v8917_v12, 16 }
  0x64   : > { %v416_v34 = vshrl.u32 %v8923_v17, 16  ;;  %v395_v35 = vor.u32 %v394_v26, %v391_v25  ;;  %v419_v38 = vshll.u32 %v8923_v17, 16  ;;  %v7988_v44 = vrot.slane %v8412_v7, 11  ;;  %v325_v7 = vld [vmem:[%s8907_s15 + $0x60] sm:$0xff]  ;;  %v326_v9 = vld [vmem:[%s8907_s15 + $0x68] sm:$0xff]  ;;  %v327_v21 = vld [vmem:[%s8907_s15 + $0x70] sm:$0xff] }
  0x65   : > { %v409_v37 = vrot.slane %v407_v27, 5  ;;  %v404_v40 = vor.u32 %v403_v32, %v400_v31  ;;  %v412_v41 = vrot.slane %v410_v33, 6  ;;  %v485_v47 = vrot.slane %v8942_v39, 7  ;;  %v509_v16 = vld [vmem:[#allocation2 + $0x54] sm:$0x33] }
  0x66   : > { %v418_v42 = vrot.slane %v416_v34, 5  ;;  %v396_v45 = vrot.slane %v395_v35, 4  ;;  %v421_v46 = vrot.slane %v419_v38, 6  ;;  %v8973_v3 = vpack.c.bf16 %v324_v1, %v323_v63  ;;  %v328_v22 = vld [vmem:[%s8907_s15 + $0x78] sm:$0xff] }
  0x67   : > { %v405_v49 = vrot.slane %v404_v40, 4  ;;  %v413_v50 = vor.u32 %v412_v41, %v409_v37  ;;  %v486_v55 = vsel %vm8946_vm9, %v7988_v44, %v485_v47  ;;  %v7989_v4 = vrot.slane %v8915_v11, 11  ;;  %v512_v31 = vld [vmem:[#allocation2 + $0x5c] sm:$0x33] }
  0x68   : > { %v8951_v51 = vld [vmem:[#allocation2 + $0x4] sm:$0xff]  ;;  %v429_v52 = vsel %vm8900_vm6, %v396_v45, %v428_v30  ;;  %v422_v54 = vor.u32 %v421_v46, %v418_v42  ;;  %v504_v59 = vsel %vm8900_vm6, %v486_v55, %v503_v48  ;;  %v489_v5 = vrot.slane %v8973_v3, 7 }
  0x69   : > { %3855 = vrot.lane.b32.xlu0 %v8951_v51, %s8743_s16  ;;  %3075 = vrot.lane.b32.xlu1 %v8951_v51, %s8744_s17  ;;  %430 = vst [vmem:[#allocation2 + $0x24] sm:$0x33] %v429_v52  ;;  %v432_v56 = vsel %vm8900_vm6, %v405_v49, %v431_v36  ;;  %v414_v57 = vrot.slane %v413_v50, 4  ;;  %v8965_v60 = vld [vmem:[#allocation2 + $0xc] sm:$0xff]  ;;  %505 = vst [vmem:[#allocation2 + $0x44] sm:$0x33] %v504_v59  ;;  %v8991_v13 = vpack.c.bf16 %v326_v9, %v325_v7 }
  0x6a   : > { %433 = vst [vmem:[#allocation2 + $0x2c] sm:$0x33] %v432_v56  ;;  %v423_v61 = vrot.slane %v422_v54, 4  ;;  %v490_v8 = vsel %vm8946_vm9, %v7989_v4, %v489_v5  ;;  %v7990_v11 = vrot.slane %v8917_v12, 11  ;;  %v8994_v14 = vld [vmem:[#allocation2 + $0x14] sm:$0xff]  ;;  %v1615_v12 = vld [vmem:[#allocation2] sm:$0xff]  ;;  %v9023_v23 = vpack.c.bf16 %v328_v22, %v327_v21 }
  0x6b   : > { %v435_v62 = vsel %vm8900_vm6, %v414_v57, %v434_v53  ;;  %v507_v10 = vsel %vm8900_vm6, %v490_v8, %v506_v6  ;;  %v493_v15 = vrot.slane %v8991_v13, 7  ;;  %v1616_v20 = vld [vmem:[#allocation2 + $0x8] sm:$0xff]  ;;  %v544_v24 = vshrl.u32 %v8942_v39, 16  ;;  %v2007_v26 = vld [vmem:[#allocation2 + $0x10] sm:$0xff]  ;;  %v2948_v38 = vld [vmem:[#allocation2 + $0x1c] sm:$0xff] }
  0x6c   : > { %436 = vst [vmem:[#allocation2 + $0x34] sm:$0x33] %v435_v62  ;;  %v438_v2 = vsel %vm8900_vm6, %v423_v61, %v437_v58  ;;  %508 = vst [vmem:[#allocation2 + $0x4c] sm:$0x33] %v507_v10  ;;  %v547_v25 = vshll.u32 %v8942_v39, 16  ;;  %v7991_v27 = vrot.slane %v8923_v17, 11 }
  0x6d   : > { %3857 = vrot.lane.b32.xlu0 %v8965_v60, %s8743_s16  ;;  %3077 = vrot.lane.b32.xlu1 %v8965_v60, %s8744_s17  ;;  %439 = vst [vmem:[#allocation2 + $0x3c] sm:$0x33] %v438_v2  ;;  %v494_v18 = vsel %vm8946_vm9, %v7990_v11, %v493_v15  ;;  %v497_v28 = vrot.slane %v9023_v23, 7  ;;  %v546_v29 = vrot.slane %v544_v24, 4  ;;  %v12628_v35 = vmov 0   ;;  %v1618_v41 = vld [vmem:[#allocation2 + $0x18] sm:$0xff] }
  0x6e   : > { %v510_v19 = vsel %vm8900_vm6, %v494_v18, %v509_v16  ;;  %v549_v30 = vrot.slane %v547_v25, 5  ;;  %6091 = vmatprep.mubr.bf16.mxu0 %v12628_v35  ;;  %6134 = vmatprep.mubr.bf16.mxu1 %v12628_v35  ;;  %v583_v36 = vld [vmem:[#allocation2 + $0x64] sm:$0x33]  ;;  %v553_v42 = vshrl.u32 %v8973_v3, 16  ;;  %v556_v43 = vshll.u32 %v8973_v3, 16 }
  0x6f   : > { %511 = vst [vmem:[#allocation2 + $0x54] sm:$0x33] %v510_v19  ;;  %v498_v32 = vsel %vm8946_vm9, %v7991_v27, %v497_v28  ;;  %8548 = vset.pattern.permute.xlu1 %v12628_v35  ;;  %8547 = vset.pattern.permute.xlu0 %v12628_v35  ;;  %v562_v47 = vshrl.u32 %v8991_v13, 16  ;;  %v565_v48 = vshll.u32 %v8991_v13, 16  ;;  %v586_v54 = vld [vmem:[#allocation2 + $0x6c] sm:$0x33] }
  0x70   : > { %v550_v33 = vor.u32 %v549_v30, %v546_v29  ;;  %v513_v34 = vsel %vm8900_vm6, %v498_v32, %v512_v31  ;;  %v3729_v40 = vld [vmem:[#allocation2 + $0x24] sm:$0xff]  ;;  %v555_v44 = vrot.slane %v553_v42, 4  ;;  %v558_v45 = vrot.slane %v556_v43, 5  ;;  %v589_v58 = vld [vmem:[#allocation2 + $0x74] sm:$0x33] }
  0x71   : > { %3465 = vrot.lane.b32.xlu0 %v8951_v51, %s8745_s14  ;;  %3467 = vrot.lane.b32.xlu1 %v8965_v60, %s8745_s14  ;;  %514 = vst [vmem:[#allocation2 + $0x5c] sm:$0x33] %v513_v34  ;;  %v2009_v49 = vld [vmem:[#allocation2 + $0x20] sm:$0xff]  ;;  %v564_v52 = vrot.slane %v562_v47, 4  ;;  %v567_v53 = vrot.slane %v565_v48, 5  ;;  %v2950_v61 = vld [vmem:[#allocation2 + $0x2c] sm:$0xff] }
  0x72   : > { %v551_v17 = vrot.slane %v550_v33, 4  ;;  %v559_v46 = vor.u32 %v558_v45, %v555_v44  ;;  %v1620_v63 = vld [vmem:[#allocation2 + $0x28] sm:$0xff]  ;;  %v571_v1 = vshrl.u32 %v9023_v23, 16  ;;  %v574_v2 = vshll.u32 %v9023_v23, 16  ;;  %v592_v9 = vld [vmem:[#allocation2 + $0x7c] sm:$0x33] }
  0x73   : > { %v568_v56 = vor.u32 %v567_v53, %v564_v52  ;;  %v3731_v62 = vld [vmem:[#allocation2 + $0x34] sm:$0xff]  ;;  %v7996_v11 = vrot.slane %v8942_v39, 10  ;;  %v607_v15 = vld [vmem:[#allocation2 + $0x84] sm:$0x33] }
  0x74   : > { %v584_v37 = vsel %vm8900_vm6, %v551_v17, %v583_v36  ;;  %v560_v50 = vrot.slane %v559_v46, 4  ;;  %v573_v4 = vrot.slane %v571_v1, 4  ;;  %v576_v5 = vrot.slane %v574_v2, 5  ;;  %v2011_v7 = vld [vmem:[#allocation2 + $0x30] sm:$0xff]  ;;  %v2952_v18 = vld [vmem:[#allocation2 + $0x3c] sm:$0xff]  ;;  %v3733_v19 = vld [vmem:[#allocation2 + $0x44] sm:$0xff] }
  0x75   : > { %3859 = vrot.lane.b32.xlu0 %v8994_v14, %s8743_s16  ;;  %2685 = vrot.lane.b32.xlu1 %v8951_v51, %s8746_s18  ;;  %585 = vst [vmem:[#allocation2 + $0x64] sm:$0x33] %v584_v37  ;;  %v569_v57 = vrot.slane %v568_v56, 4  ;;  %v608_v16 = vsel %vm8900_vm6, %v7996_v11, %v607_v15  ;;  %v3758_v21 = vld [vmem:[#allocation4 + $0x800] sm:$0xff]  ;;  %v1622_v32 = vld [vmem:[#allocation2 + $0x38] sm:$0xff]  ;;  %v3759_v48 = vld [vmem:[#allocation4 + $0x808] sm:$0xff] }
  0x76   : > { %v587_v55 = vsel %vm8900_vm6, %v560_v50, %v586_v54  ;;  %v577_v6 = vor.u32 %v576_v5, %v573_v4  ;;  %609 = vst [vmem:[#allocation2 + $0x84] sm:$0x33] %v608_v16  ;;  %v2978_v30 = vld [vmem:[#allocation4 + $0x600] sm:$0xff]  ;;  %vm3790_vm12 = vcmp.ne.bf16.partialorder %v3758_v21, 0  ;;  %vm3791_vm1 = vcmp.ne.bf16.partialorder %v3759_v48, 0  ;;  %v2979_v11 = vld [vmem:[#allocation4 + $0x608] sm:$0xff] }
  0x77   : > { %588 = vst [vmem:[#allocation2 + $0x6c] sm:$0x33] %v587_v55  ;;  %v590_v59 = vsel %vm8900_vm6, %v569_v57, %v589_v58  ;;  %v3368_v34 = vld [vmem:[#allocation4 + $0x700] sm:$0xff]  ;;  %vm3010_vm14 = vcmp.ne.bf16.partialorder %v2978_v30, 0  ;;  %vm3011_vm5 = vcmp.ne.bf16.partialorder %v2979_v11, 0 }
  0x78   : > { %591 = vst [vmem:[#allocation2 + $0x74] sm:$0x33] %v590_v59  ;;  %v578_v8 = vrot.slane %v577_v6, 4  ;;  %vm3400_vm0 = vcmp.ne.bf16.partialorder %v3368_v34, 0  ;;  %v2427_v57 = vld [vmem:[#allocation4 + $0x400] sm:$0xff] }
  0x79   : > { %2687 = vrot.lane.b32.xlu0 %v8965_v60, %s8746_s18  ;;  %3079 = vrot.lane.b32.xlu1 %v8994_v14, %s8744_s17  ;;  %vm2459_vm2 = vcmp.ne.bf16.partialorder %v2427_v57, 0  ;;  %v610_v30 = vld [vmem:[#allocation2 + $0x8c] sm:$0x33]  ;;  %v613_v48 = vld [vmem:[#allocation2 + $0x94] sm:$0x33] }
  0x7a   : > { %v593_v10 = vsel %vm8900_vm6, %v578_v8, %v592_v9  ;;  %v2589_v57 = vld [vmem:[#allocation4 + $0x508] sm:$0xff] }
  0x7b   : > { %594 = vst [vmem:[#allocation2 + $0x7c] sm:$0x33] %v593_v10 }
  0x7d   : > { %3469 = vrot.lane.b32.xlu0 %v8994_v14, %s8745_s14  ;;  %1745 = vrot.lane.b32.xlu1 %v1615_v12, %s8747_s19 }
  0x81   : > { %1747 = vrot.lane.b32.xlu0 %v1616_v20, %s8747_s19  ;;  %2135 = vrot.lane.b32.xlu1 %v1615_v12, %s8748_s20 }
  0x85   : > { %2137 = vrot.lane.b32.xlu0 %v1616_v20, %s8748_s20  ;;  %2689 = vrot.lane.b32.xlu1 %v8994_v14, %s8746_s18 }
  0x89   : > { %966 = vrot.lane.b32.xlu1 %v1616_v20, %s8749_s26  ;;  %964 = vrot.lane.b32.xlu0 %v1615_v12, %s8749_s26 }
  0x8d   : > { %1357 = vrot.lane.b32.xlu1 %v1616_v20, %s8750_s28  ;;  %1355 = vrot.lane.b32.xlu0 %v1615_v12, %s8750_s28 }
  0x91   : > { %2139 = vrot.lane.b32.xlu1 %v2007_v26, %s8748_s20  ;;  %1749 = vrot.lane.b32.xlu0 %v2007_v26, %s8747_s19 }
  0x95   : > { %1359 = vrot.lane.b32.xlu1 %v2007_v26, %s8750_s28  ;;  %968 = vrot.lane.b32.xlu0 %v2007_v26, %s8749_s26 }
  0x99   : > { %3081 = vrot.lane.b32.xlu1 %v2948_v38, %s8744_s17  ;;  %3861 = vrot.lane.b32.xlu0 %v2948_v38, %s8743_s16 }
  0x9d   : > { %3863 = vrot.lane.b32.xlu1 %v3729_v40, %s8743_s16  ;;  %3471 = vrot.lane.b32.xlu0 %v2948_v38, %s8745_s14 }
  0xa1   : > { %3083 = vrot.lane.b32.xlu1 %v3729_v40, %s8744_s17  ;;  %2691 = vrot.lane.b32.xlu0 %v2948_v38, %s8746_s18 }
  0xa5   : > { %1751 = vrot.lane.b32.xlu1 %v1618_v41, %s8747_s19  ;;  %3473 = vrot.lane.b32.xlu0 %v3729_v40, %s8745_s14 }
  0xa9   : > { %2693 = vrot.lane.b32.xlu1 %v3729_v40, %s8746_s18  ;;  %2141 = vrot.lane.b32.xlu0 %v1618_v41, %s8748_s20 }
  0xad   : > { %1361 = vrot.lane.b32.xlu1 %v1618_v41, %s8750_s28  ;;  %970 = vrot.lane.b32.xlu0 %v1618_v41, %s8749_s26 }
  0xb1   : > { %2143 = vrot.lane.b32.xlu1 %v2009_v49, %s8748_s20  ;;  %1753 = vrot.lane.b32.xlu0 %v2009_v49, %s8747_s19 }
  0xb5   : > { %1363 = vrot.lane.b32.xlu1 %v2009_v49, %s8750_s28  ;;  %972 = vrot.lane.b32.xlu0 %v2009_v49, %s8749_s26 }
  0xb9   : > { %3085 = vrot.lane.b32.xlu1 %v2950_v61, %s8744_s17  ;;  %3865 = vrot.lane.b32.xlu0 %v2950_v61, %s8743_s16 }
  0xbd   : > { %3867 = vrot.lane.b32.xlu1 %v3731_v62, %s8743_s16  ;;  %3475 = vrot.lane.b32.xlu0 %v2950_v61, %s8745_s14 }
  0xc1   : > { %3087 = vrot.lane.b32.xlu1 %v3731_v62, %s8744_s17  ;;  %2695 = vrot.lane.b32.xlu0 %v2950_v61, %s8746_s18 }
  0xc5   : > { %1755 = vrot.lane.b32.xlu1 %v1620_v63, %s8747_s19  ;;  %3477 = vrot.lane.b32.xlu0 %v3731_v62, %s8745_s14 }
  0xc9   : > { %2697 = vrot.lane.b32.xlu1 %v3731_v62, %s8746_s18  ;;  %2145 = vrot.lane.b32.xlu0 %v1620_v63, %s8748_s20  ;;  %v2588_v62 = vld [vmem:[#allocation4 + $0x500] sm:$0xff] }
  0xca   : > { %vm2620_vm4 = vcmp.ne.bf16.partialorder %v2588_v62, 0 }
  0xcd   : > { %1365 = vrot.lane.b32.xlu1 %v1620_v63, %s8750_s28  ;;  %974 = vrot.lane.b32.xlu0 %v1620_v63, %s8749_s26 }
  0xd1   : > { %2147 = vrot.lane.b32.xlu1 %v2011_v7, %s8748_s20  ;;  %1757 = vrot.lane.b32.xlu0 %v2011_v7, %s8747_s19 }
  0xd5   : > { %1367 = vrot.lane.b32.xlu1 %v2011_v7, %s8750_s28  ;;  %976 = vrot.lane.b32.xlu0 %v2011_v7, %s8749_s26 }
  0xd9   : > { %3089 = vrot.lane.b32.xlu1 %v2952_v18, %s8744_s17  ;;  %3869 = vrot.lane.b32.xlu0 %v2952_v18, %s8743_s16 }
  0xdb   : > { %v3856_v12 = vpop.permute.xlu0 %3855  ;;  %v3076_v20 = vpop.permute.xlu1 %3075 }
  0xdc   : > { %v3921_v26 = vrot.slane %v3856_v12, 4  ;;  %v3141_v27 = vrot.slane %v3076_v20, 4 }
  0xdd   : > { %3871 = vrot.lane.b32.xlu1 %v3733_v19, %s8743_s16  ;;  %3479 = vrot.lane.b32.xlu0 %v2952_v18, %s8745_s14 }
  0xdf   : > { %v3858_v22 = vpop.permute.xlu0 %3857  ;;  %v9102_v25 = vpop.permute.xlu1 %3077 }
  0xe0   : > { %v3922_v28 = vrot.slane %v3858_v22, 4  ;;  %v3142_v29 = vrot.slane %v9102_v25, 4 }
  0xe1   : > { %3091 = vrot.lane.b32.xlu1 %v3733_v19, %s8744_s17  ;;  %2699 = vrot.lane.b32.xlu0 %v2952_v18, %s8746_s18  ;;  %v2013_v18 = vld [vmem:[#allocation2 + $0x40] sm:$0xff] }
  0xe2   : > { %v3174_v31 = vsel %vm1063_vm10, %v3141_v27, %v3142_v29  ;;  %v3954_v33 = vsel %vm1063_vm10, %v3921_v26, %v3922_v28  ;;  %v7997_v27 = vrot.slane %v8973_v3, 10 }
  0xe3   : > { %v3466_v17 = vpop.permute.xlu0 %3465  ;;  %v9109_v36 = vpop.permute.xlu1 %3467  ;;  %v3956_v37 = vsel %vm3955_vm11, %v3856_v12, %v3954_v33  ;;  %v3176_v45 = vsel %vm3175_vm13, %v3076_v20, %v3174_v31  ;;  %v3369_v12 = vld [vmem:[#allocation4 + $0x708] sm:$0xff] }
  0xe4   : > { %v3531_v38 = vrot.slane %v3466_v17, 4  ;;  %v3532_v40 = vrot.slane %v9109_v36, 4  ;;  %v4051_v41 = vsel %vm3790_vm12, %v3956_v37, 0  ;;  %v3271_v55 = vsel %vm3010_vm14, %v3176_v45, 0 }
  0xe5   : > { %1759 = vrot.lane.b32.xlu1 %v1622_v32, %s8747_s19  ;;  %3481 = vrot.lane.b32.xlu0 %v3733_v19, %s8745_s14  ;;  %v8278_v43 = vcombine.high %v4051_v41, %v4051_v41  ;;  %v8277_v44 = vcombine.low %v4051_v41, %v4051_v41  ;;  %vm3401_vm7 = vcmp.ne.bf16.partialorder %v3369_v12, 0  ;;  %v611_v34 = vsel %vm8900_vm6, %v7997_v27, %v610_v30  ;;  %v1648_v41 = vld [vmem:[#allocation4 + $0x200] sm:$0xff] }
  0xe6   : > { %v3564_v46 = vsel %vm1063_vm10, %v3531_v38, %v3532_v40  ;;  %612 = vst [vmem:[#allocation2 + $0x8c] sm:$0x33] %v611_v34  ;;  %vm1680_vm9 = vcmp.ne.bf16.partialorder %v1648_v41, 0  ;;  %vm12618_vm12 = vcmask 7168   ;;  %v867_v30 = vld [vmem:[#allocation4] sm:$0xff] }
  0xe7   : > { %8341 = vmatprep.subr.msk.bf16.mxu0 %vm1063_vm10, %v8278_v43  ;;  %v9120_v49 = vpop.permute.xlu0 %3859  ;;  %v2686_v50 = vpop.permute.xlu1 %2685  ;;  %v5868_v52 = vsel %vm1063_vm10, %v8277_v44, 0  ;;  %v3566_v53 = vsel %vm3565_vm15, %v3466_v17, %v3564_v46  ;;  %v2428_v43 = vld [vmem:[#allocation4 + $0x408] sm:$0xff] }
  0xe8   : > { %v3923_v54 = vrot.slane %v9120_v49, 4  ;;  %6066 = vmatpush1.bf16.msra.mxu0 %v5868_v52  ;;  %v3661_v56 = vsel %vm3400_vm0, %v3566_v53, 0  ;;  %v2751_v5 = vrot.slane %v2686_v50, 4  ;;  %vm2460_vm14 = vcmp.ne.bf16.partialorder %v2428_v43, 0  ;;  %v1624_v43 = vld [vmem:[#allocation2 + $0x48] sm:$0xff] }
  0xe9   : > { %2701 = vrot.lane.b32.xlu1 %v3733_v19, %s8746_s18  ;;  %2149 = vrot.lane.b32.xlu0 %v1622_v32, %s8748_s20  ;;  %v8214_v58 = vcombine.high %v3271_v55, %v3661_v56  ;;  %v8213_v59 = vcombine.low %v3271_v55, %v3661_v56  ;;  %v2491_v19 = vsel %vm2459_vm2, %v8951_v51, 0  ;;  %v2954_v55 = vld [vmem:[#allocation2 + $0x4c] sm:$0xff]  ;;  %v2492_v11 = vsel %vm2460_vm14, %v8965_v60, 0 }
  0xea   : > { %v3957_v61 = vsel %vm1063_vm10, %v3922_v28, %v3923_v54  ;;  %v2038_v56 = vld [vmem:[#allocation4 + $0x300] sm:$0xff]  ;;  %vm12617_vm2 = vcmask 269312  }
  0xeb   : > { %v9131_v63 = vpop.permute.xlu0 %2687  ;;  %6067 = vmatprep.subr.bf16.mxu0 %v8214_v58  ;;  %v9133_v2 = vpop.permute.xlu1 %3079  ;;  %v3958_v4 = vsel %vm3955_vm11, %v3858_v22, %v3957_v61  ;;  %vm2070_vm0 = vcmp.ne.bf16.partialorder %v2038_v56, 0 }
  0xec   : > { %v2752_v6 = vrot.slane %v9131_v63, 4  ;;  %v3143_v7 = vrot.slane %v9133_v2, 4  ;;  %6068 = vmatpush1.bf16.msra.mxu0 %v8213_v59  ;;  %v4052_v8 = vsel %vm3791_vm1, %v3958_v4, 0  ;;  %vm2621_vm1 = vcmp.ne.bf16.partialorder %v2589_v57, 0 }
  0xed   : > { %1369 = vrot.lane.b32.xlu1 %v1622_v32, %s8750_s28  ;;  %978 = vrot.lane.b32.xlu0 %v1622_v32, %s8749_s26  ;;  %v8280_v9 = vcombine.high %v4052_v8, %v4052_v8  ;;  %v8279_v10 = vcombine.low %v4052_v8, %v4052_v8 }
  0xee   : > { %v2784_v15 = vsel %vm1063_vm10, %v2751_v5, %v2752_v6  ;;  %v3177_v16 = vsel %vm1063_vm10, %v3142_v29, %v3143_v7 }
  0xef   : > { %8343 = vmatprep.subr.msk.bf16.mxu1 %vm1063_vm10, %v8280_v9  ;;  %v9149_v20 = vpop.permute.xlu0 %3469  ;;  %v1746_v21 = vpop.permute.xlu1 %1745  ;;  %v5874_v22 = vsel %vm1063_vm10, %v8279_v10, 0  ;;  %v2786_v26 = vsel %vm2785_vm3, %v2686_v50, %v2784_v15  ;;  %v3178_v32 = vsel %vm3175_vm13, %v9102_v25, %v3177_v16  ;;  %v7998_v25 = vrot.slane %v8991_v13, 10  ;;  %v9197_v10 = vld [vmem:[#allocation2 + $0x54] sm:$0xff] }
  0xf0   : > { %v3533_v28 = vrot.slane %v9149_v20, 4  ;;  %6109 = vmatpush1.bf16.msra.mxu1 %v5874_v22  ;;  %v2881_v29 = vsel %vm2620_vm4, %v2786_v26, 0  ;;  %v1811_v44 = vrot.slane %v1746_v21, 4  ;;  %vm12616_vm4 = vcmask 261120  }
  0xf1   : > { %2151 = vrot.lane.b32.xlu1 %v2013_v18, %s8748_s20  ;;  %1761 = vrot.lane.b32.xlu0 %v2013_v18, %s8747_s19  ;;  %v8150_v51 = vcombine.high %v2491_v19, %v2881_v29  ;;  %v8149_v31 = vcombine.low %v2491_v19, %v2881_v29 }
  0xf2   : > { %v3567_v33 = vsel %vm1063_vm10, %v3532_v40, %v3533_v28  ;;  %v3272_v40 = vsel %vm3011_vm5, %v3178_v32, 0  ;;  %vm899_vm5 = vcmp.ne.bf16.partialorder %v867_v30, 0 }
  0xf3   : > { %6069 = vmatprep.subr.bf16.mxu0 %v8150_v51  ;;  %v9166_v17 = vpop.permute.xlu0 %1747  ;;  %v2136_v37 = vpop.permute.xlu1 %2135  ;;  %v3568_v38 = vsel %vm3565_vm15, %v9109_v36, %v3567_v33  ;;  %v614_v36 = vsel %vm8900_vm6, %v7998_v25, %v613_v48  ;;  %v1649_v25 = vld [vmem:[#allocation4 + $0x208] sm:$0xff] }
  0xf4   : > { %v1812_v45 = vrot.slane %v9166_v17, 4  ;;  %6070 = vmatpush1.bf16.msra.mxu0 %v8149_v31  ;;  %v3662_v46 = vsel %vm3401_vm7, %v3568_v38, 0  ;;  %615 = vst [vmem:[#allocation2 + $0x94] sm:$0x33] %v614_v36  ;;  %v2201_v61 = vrot.slane %v2136_v37, 4 }
  0xf5   : > { %1371 = vrot.lane.b32.xlu1 %v2013_v18, %s8750_s28  ;;  %980 = vrot.lane.b32.xlu0 %v2013_v18, %s8749_s26  ;;  %v8216_v50 = vcombine.high %v3272_v40, %v3662_v46  ;;  %v8215_v52 = vcombine.low %v3272_v40, %v3662_v46 }
  0xf6   : > { %v1844_v53 = vsel %vm1063_vm10, %v1811_v44, %v1812_v45  ;;  %v2039_v44 = vld [vmem:[#allocation4 + $0x308] sm:$0xff] }
  0xf7   : > { %6110 = vmatprep.subr.bf16.mxu1 %v8216_v50  ;;  %v9180_v58 = vpop.permute.xlu0 %2137  ;;  %v9182_v59 = vpop.permute.xlu1 %2689  ;;  %v1846_v5 = vsel %vm12619_vm8, %v1746_v21, %v1844_v53  ;;  %vm2071_vm14 = vcmp.ne.bf16.partialorder %v2039_v44, 0 }
  0xf8   : > { %v2202_v62 = vrot.slane %v9180_v58, 4  ;;  %v2753_v4 = vrot.slane %v9182_v59, 4  ;;  %6111 = vmatpush1.bf16.msra.mxu1 %v8215_v52  ;;  %v1941_v18 = vsel %vm1680_vm9, %v1846_v5, 0  ;;  %vm1681_vm9 = vcmp.ne.bf16.partialorder %v1649_v25, 0  ;;  %v868_v5 = vld [vmem:[#allocation4 + $0x8] sm:$0xff]  ;;  %v9280_v25 = vld [vmem:[#allocation4 + $0x618] sm:$0xff] }
  0xf9   : > { %3093 = vrot.lane.b32.xlu1 %v2954_v55, %s8744_s17  ;;  %3873 = vrot.lane.b32.xlu0 %v2954_v55, %s8743_s16 }
  0xfa   : > { %v2234_v8 = vsel %vm1063_vm10, %v2201_v61, %v2202_v62  ;;  %v2787_v9 = vsel %vm1063_vm10, %v2752_v6, %v2753_v4 }
  0xfb   : > { %v9200_v15 = vpop.permute.xlu1 %966  ;;  %v965_v16 = vpop.permute.xlu0 %964  ;;  %v2236_v19 = vsel %vm12618_vm12, %v2136_v37, %v2234_v8  ;;  %v2788_v12 = vsel %vm2785_vm3, %v9131_v63, %v2787_v9  ;;  %v1258_v63 = vld [vmem:[#allocation4 + $0x100] sm:$0xff]  ;;  %v1259_v8 = vld [vmem:[#allocation4 + $0x108] sm:$0xff] }
  0xfc   : > { %v1031_v21 = vrot.slane %v9200_v15, 4  ;;  %v1030_v22 = vrot.slane %v965_v16, 4  ;;  %v2331_v26 = vsel %vm2070_vm0, %v2236_v19, 0  ;;  %v2882_v27 = vsel %vm2621_vm1, %v2788_v12, 0 }
  0xfd   : > { %3875 = vrot.lane.b32.xlu1 %v9197_v10, %s8743_s16  ;;  %3483 = vrot.lane.b32.xlu0 %v2954_v55, %s8745_s14  ;;  %v8086_v60 = vcombine.high %v1941_v18, %v2331_v26  ;;  %v8152_v6 = vcombine.high %v2492_v11, %v2882_v27  ;;  %v8085_v29 = vcombine.low %v1941_v18, %v2331_v26  ;;  %vm1290_vm7 = vcmp.ne.bf16.partialorder %v1258_v63, 0  ;;  %v9270_v63 = vld [vmem:[#allocation4 + $0x710] sm:$0xff] }
  0xfe   : > { %v1064_v51 = vsel %vm1063_vm10, %v1030_v22, %v1031_v21  ;;  %v8151_v31 = vcombine.low %v2492_v11, %v2882_v27  ;;  %vm5862_vm0 = vcmask 588800   ;;  %vm900_vm1 = vcmp.ne.bf16.partialorder %v868_v5, 0 }
  0xff   : > { %6071 = vmatprep.subr.bf16.mxu0 %v8086_v60  ;;  %6112 = vmatprep.subr.bf16.mxu1 %v8152_v6  ;;  %v1358_v32 = vpop.permute.xlu1 %1357  ;;  %v1356_v33 = vpop.permute.xlu0 %1355  ;;  %v1066_v38 = vsel %vm12617_vm2, %v965_v16, %v1064_v51  ;;  %v3760_v60 = vld [vmem:[#allocation4 + $0x810] sm:$0xff] }
 0x100   : > { %v1422_v34 = vrot.slane %v1358_v32, 4  ;;  %v1421_v37 = vrot.slane %v1356_v33, 4  ;;  %6072 = vmatpush1.bf16.msra.mxu0 %v8085_v29  ;;  %6113 = vmatpush1.bf16.msra.mxu1 %v8151_v31  ;;  %v1161_v50 = vsel %vm899_vm5, %v1066_v38, 0  ;;  %vm1291_vm5 = vcmp.ne.bf16.partialorder %v1259_v8, 0  ;;  %v2980_v6 = vld [vmem:[#allocation4 + $0x610] sm:$0xff]  ;;  %v3761_v38 = vld [vmem:[#allocation4 + $0x818] sm:$0xff] }
 0x101   : > { %3095 = vrot.lane.b32.xlu1 %v9197_v10, %s8744_s17  ;;  %2703 = vrot.lane.b32.xlu0 %v2954_v55, %s8746_s18  ;;  %v2429_v31 = vld [vmem:[#allocation4 + $0x410] sm:$0xff] }
 0x102   : > { %v1454_v41 = vsel %vm1063_vm10, %v1421_v37, %v1422_v34 }
 0x103   : > { %v1456_v40 = vsel %vm12616_vm4, %v1356_v33, %v1454_v41  ;;  %v9219_v46 = vpop.permute.xlu1 %2139  ;;  %v9221_v48 = vpop.permute.xlu0 %1749  ;;  %v9275_v41 = vld [vmem:[#allocation4 + $0x510] sm:$0xff] }
 0x104   : > { %v1551_v52 = vsel %vm1290_vm7, %v1456_v40, 0  ;;  %v2203_v36 = vrot.slane %v9219_v46, 4  ;;  %v1813_v53 = vrot.slane %v9221_v48, 4  ;;  %vm3792_vm7 = vcmp.ne.bf16.partialorder %v3760_v60, 0 }
 0x105   : > { %1763 = vrot.lane.b32.xlu1 %v1624_v43, %s8747_s19  ;;  %3485 = vrot.lane.b32.xlu0 %v9197_v10, %s8745_s14  ;;  %v8022_v55 = vcombine.high %v1161_v50, %v1551_v52  ;;  %v8021_v56 = vcombine.low %v1161_v50, %v1551_v52  ;;  %v2015_v50 = vld [vmem:[#allocation2 + $0x50] sm:$0xff] }
 0x106   : > { %v2237_v57 = vsel %vm1063_vm10, %v2202_v62, %v2203_v36  ;;  %v1847_v61 = vsel %vm1063_vm10, %v1812_v45, %v1813_v53  ;;  %v9246_v62 = vld [vmem:[#allocation7] sm:$0xff]  }
 0x107   : > { %v9238_v9 = vpop.permute.xlu1 %1359  ;;  %6073 = vmatprep.subr.bf16.mxu0 %v8022_v55  ;;  %v9240_v11 = vpop.permute.xlu0 %968  ;;  %v1848_v16 = vsel %vm12619_vm8, %v9166_v17, %v1847_v61  ;;  %v2238_v18 = vsel %vm12618_vm12, %v9180_v58, %v2237_v57  ;;  %v330_v57 = vld [vmem:[%s8907_s15 + $0x88] sm:$0xff] }
 0x108   : > { %v1423_v19 = vrot.slane %v9238_v9, 4  ;;  %v1032_v45 = vrot.slane %v9240_v11, 4  ;;  %6074 = vmatpush1.bf16.msra.mxu0 %v8021_v56  ;;  %v1942_v12 = vsel %vm1681_vm9, %v1848_v16, 0  ;;  %v2332_v22 = vsel %vm2071_vm14, %v2238_v18, 0 }
 0x109   : > { %2705 = vrot.lane.b32.xlu1 %v9197_v10, %s8746_s18  ;;  %2153 = vrot.lane.b32.xlu0 %v1624_v43, %s8748_s20  ;;  %v8088_v17 = vcombine.high %v1942_v12, %v2332_v22  ;;  %v8087_v26 = vcombine.low %v1942_v12, %v2332_v22  ;;  %vm3012_vm9 = vcmp.ne.bf16.partialorder %v2980_v6, 0  ;;  %vm3402_vm14 = vcmp.ne.bf16.partialorder %v9270_v63, 0 }
 0x10a   : > { %v1457_v58 = vsel %vm1063_vm10, %v1422_v34, %v1423_v19  ;;  %v1067_v27 = vsel %vm1063_vm10, %v1031_v21, %v1032_v45 }
 0x10b   : > { %v9263_v29 = vpop.permute.xlu1 %3081  ;;  %6114 = vmatprep.subr.bf16.mxu1 %v8088_v17  ;;  %v3862_v10 = vpop.permute.xlu0 %3861  ;;  %v1068_v30 = vsel %vm12617_vm2, %v9200_v15, %v1067_v27  ;;  %v1458_v51 = vsel %vm12616_vm4, %v1358_v32, %v1457_v58  ;;  %8342 = vmatmul.mubr.msk.bf16.vlgmr.msra.gmra.mxu0 %vm5862_vm0, %v9246_v62  ;;  %vm2622_vm4 = vcmp.ne.bf16.partialorder %v9275_v41, 0  ;;  %vm3013_vm2 = vcmp.ne.bf16.partialorder %v9280_v25, 0 }
 0x10c   : > { %v3144_v33 = vrot.slane %v9263_v29, 4  ;;  %v3924_v21 = vrot.slane %v3862_v10, 4  ;;  %6115 = vmatpush1.bf16.msra.mxu1 %v8087_v26  ;;  %v1162_v34 = vsel %vm900_vm1, %v1068_v30, 0  ;;  %v1552_v37 = vsel %vm1291_vm5, %v1458_v51, 0  ;;  %6177 = vmatprep.mubr.bf16.mxu0 %v12628_v35  ;;  %v9324_v26 = vld [vmem:[#allocation4 + $0x210] sm:$0xff] }
 0x10d   : > { %1373 = vrot.lane.b32.xlu1 %v1624_v43, %s8750_s28  ;;  %982 = vrot.lane.b32.xlu0 %v1624_v43, %s8749_s26  ;;  %v8024_v15 = vcombine.high %v1162_v34, %v1552_v37  ;;  %v8023_v32 = vcombine.low %v1162_v34, %v1552_v37  ;;  %vm2461_vm1 = vcmp.ne.bf16.partialorder %v2429_v31, 0  ;;  %v9291_v43 = vld [vmem:[#allocation4 + $0x718] sm:$0xff]  ;;  %vm3793_vm5 = vcmp.ne.bf16.partialorder %v3761_v38, 0 }
 0x10e   : > { %v3179_v44 = vsel %vm1063_vm10, %v3143_v7, %v3144_v33  ;;  %v3959_v40 = vsel %vm1063_vm10, %v3923_v54, %v3924_v21  ;;  %v7999_v7 = vrot.slane %v9023_v23, 10  ;;  %v329_v54 = vld [vmem:[%s8907_s15 + $0x80] sm:$0xff]  ;;  %v9313_v22 = vsel %vm2461_vm1, %v8994_v14, 0 }
 0x10f   : > { %v9293_v52 = vpop.permute.xlu1 %3863  ;;  %6116 = vmatprep.subr.bf16.mxu1 %v8024_v15  ;;  %v9295_v55 = vpop.permute.xlu0 %3471  ;;  %v3960_v56 = vsel %vm3955_vm11, %v9120_v49, %v3959_v40  ;;  %v3180_v16 = vsel %vm3175_vm13, %v9133_v2, %v3179_v44  ;;  %v616_v49 = vld [vmem:[#allocation2 + $0x9c] sm:$0x33]  ;;  %vm3403_vm12 = vcmp.ne.bf16.partialorder %v9291_v43, 0  ;;  %v9328_v27 = vpack.c.bf16 %v330_v57, %v329_v54 }
 0x110   : > { %v3925_v61 = vrot.slane %v9293_v52, 4  ;;  %v3534_v5 = vrot.slane %v9295_v55, 4  ;;  %6117 = vmatpush1.bf16.msra.mxu1 %v8023_v32  ;;  %v4053_v8 = vsel %vm3792_vm7, %v3960_v56, 0  ;;  %v617_v58 = vsel %vm8900_vm6, %v7999_v7, %v616_v49  ;;  %v2430_v32 = vld [vmem:[#allocation4 + $0x418] sm:$0xff] }
 0x111   : > { %2155 = vrot.lane.b32.xlu1 %v2015_v50, %s8748_s20  ;;  %1765 = vrot.lane.b32.xlu0 %v2015_v50, %s8747_s19  ;;  %v8282_v18 = vcombine.high %v4053_v8, %v4053_v8  ;;  %v8281_v12 = vcombine.low %v4053_v8, %v4053_v8  ;;  %v3273_v51 = vsel %vm3012_vm9, %v3180_v16, 0  ;;  %618 = vst [vmem:[#allocation2 + $0x9c] sm:$0x33] %v617_v58  ;;  %vm1682_vm7 = vcmp.ne.bf16.partialorder %v9324_v26, 0  ;;  %v9363_v56 = vld [vmem:[#allocation2 + $0x5c] sm:$0xff] }
 0x112   : > { %v3961_v17 = vsel %vm1063_vm10, %v3924_v21, %v3925_v61  ;;  %v3569_v2 = vsel %vm1063_vm10, %v3533_v28, %v3534_v5  ;;  %v9342_v21 = vld [vmem:[#allocation4 + $0x310] sm:$0xff]  ;;  %v668_v57 = vshrl.u32 %v9328_v27, 16  ;;  %vm659_vm1 = vsmask.f32 256 }
 0x113   : > { %v9330_v14 = vpop.permute.xlu1 %3083  ;;  %8345 = vmatprep.subr.msk.bf16.mxu0 %vm1063_vm10, %v8282_v18  ;;  %v9333_v60 = vpop.permute.xlu0 %2691  ;;  %v5880_v30 = vsel %vm1063_vm10, %v8281_v12, 0  ;;  %v3570_v28 = vsel %vm3565_vm15, %v9149_v20, %v3569_v2  ;;  %v3962_v31 = vsel %vm3955_vm11, %v3862_v10, %v3961_v17  ;;  %8344 = vmatmul.mubr.msk.bf16.vlgmr.msra.gmra.mxu1 %vm5862_vm0, %v9246_v62  ;;  %vm2072_vm9 = vcmp.ne.bf16.partialorder %v9342_v21, 0  ;;  %v9397_v17 = vld [vmem:[#allocation2 + $0x64] sm:$0xff]  ;;  %v9466_v21 = vld [vmem:[#allocation2 + $0x58] sm:$0xff] }
 0x114   : > { %v3145_v34 = vrot.slane %v9330_v14, 4  ;;  %v2754_v37 = vrot.slane %v9333_v60, 4  ;;  %6152 = vmatpush1.bf16.msra.mxu0 %v5880_v30  ;;  %v3663_v6 = vsel %vm3402_vm14, %v3570_v28, 0  ;;  %v4054_v15 = vsel %vm3793_vm5, %v3962_v31, 0  ;;  %6220 = vmatprep.mubr.bf16.mxu1 %v12628_v35  ;;  %v1260_v28 = vld [vmem:[#allocation4 + $0x110] sm:$0xff] }
 0x115   : > { %1375 = vrot.lane.b32.xlu1 %v2015_v50, %s8750_s28  ;;  %984 = vrot.lane.b32.xlu0 %v2015_v50, %s8749_s26  ;;  %v8217_v20 = vcombine.low %v3273_v51, %v3663_v6  ;;  %v8218_v10 = vcombine.high %v3273_v51, %v3663_v6  ;;  %v8284_v44 = vcombine.high %v4054_v15, %v4054_v15  ;;  %vm2462_vm14 = vcmp.ne.bf16.partialorder %v2430_v32, 0  ;;  %v869_v51 = vld [vmem:[#allocation4 + $0x10] sm:$0xff] }
 0x116   : > { %v3181_v63 = vsel %vm1063_vm10, %v3144_v33, %v3145_v34  ;;  %v2789_v38 = vsel %vm1063_vm10, %v2753_v4, %v2754_v37  ;;  %v8283_v40 = vcombine.low %v4054_v15, %v4054_v15  ;;  %v2591_v4 = vld [vmem:[#allocation4 + $0x518] sm:$0xff]  ;;  %vm660_vm5 = vsmask.f32 4368 }
 0x117   : > { %v9366_v50 = vpop.permute.xlu1 %1751  ;;  %6153 = vmatprep.subr.bf16.mxu0 %v8218_v10  ;;  %8347 = vmatprep.subr.msk.bf16.mxu1 %vm1063_vm10, %v8284_v44  ;;  %v9369_v7 = vpop.permute.xlu0 %3473  ;;  %v2790_v33 = vsel %vm2785_vm3, %v9182_v59, %v2789_v38  ;;  %v3182_v54 = vsel %vm3175_vm13, %v9263_v29, %v3181_v63  ;;  %v8008_v2 = vrot.slane %v544_v24, 11  ;;  %v670_v31 = vrot.slane %v668_v57, 7 }
 0x118   : > { %v1814_v8 = vrot.slane %v9366_v50, 4  ;;  %v3535_v16 = vrot.slane %v9369_v7, 4  ;;  %6154 = vmatpush1.bf16.msra.mxu0 %v8217_v20  ;;  %v5886_v49 = vsel %vm1063_vm10, %v8283_v40, 0  ;;  %v2883_v18 = vsel %vm2622_vm4, %v2790_v33, 0 }
 0x119   : > { %6195 = vmatpush1.bf16.msra.mxu1 %v5886_v49  ;;  %3097 = vrot.lane.b32.xlu1 %v9363_v56, %s8744_s17  ;;  %v8153_v59 = vcombine.low %v9313_v22, %v2883_v18  ;;  %v8154_v29 = vcombine.high %v9313_v22, %v2883_v18  ;;  %v2398_v22 = vld [vmem:[#allocation2 + $0x1c] sm:$0xff]  ;;  %vm2623_vm4 = vcmp.ne.bf16.partialorder %v2591_v4, 0  ;;  %v3274_v30 = vsel %vm3013_vm2, %v3182_v54, 0  ;;  %vm9420_vm2 = vmor %vm659_vm1, %vm660_vm5  ;;  %v718_v54 = vld [vmem:[#allocation2 + $0xa4] sm:$0x33] }
 0x11a   : > { %v1849_v12 = vsel %vm1063_vm10, %v1813_v53, %v1814_v8  ;;  %v3571_v41 = vsel %vm1063_vm10, %v3534_v5, %v3535_v16  ;;  %3877 = vrot.lane.b32.xlu0 %v9363_v56, %s8743_s16  ;;  %v671_v6 = vshll.u32 %v9328_v27, 16  ;;  %v2494_v44 = vsel %vm2462_vm14, %v2398_v22, 0  ;;  %v1651_v4 = vld [vmem:[#allocation4 + $0x218] sm:$0xff] }
 0x11b   : > { %v9401_v58 = vpop.permute.xlu1 %2693  ;;  %6155 = vmatprep.subr.bf16.mxu0 %v8154_v29  ;;  %v9403_v53 = vpop.permute.xlu0 %2141  ;;  %v3572_v5 = vsel %vm3565_vm15, %v9295_v55, %v3571_v41  ;;  %v1850_v25 = vsel %vm12619_vm8, %v9221_v48, %v1849_v12  ;;  %vm1292_vm1 = vcmp.ne.bf16.partialorder %v1260_v28, 0  ;;  %vm12655_vm14 = vcmask 7168   ;;  %v1261_v28 = vld [vmem:[#allocation4 + $0x118] sm:$0xff]  ;;  %v2044_v55 = vld [vmem:[#allocation4 + $0x330] sm:$0xff] }
 0x11c   : > { %v2755_v39 = vrot.slane %v9401_v58, 4  ;;  %v2204_v24 = vrot.slane %v9403_v53, 4  ;;  %6156 = vmatpush1.bf16.msra.mxu0 %v8153_v59  ;;  %v3664_v15 = vsel %vm3403_vm12, %v3572_v5, 0  ;;  %v673_v43 = vor.u32 %v671_v6, %v670_v31 }
 0x11d   : > { %3879 = vrot.lane.b32.xlu1 %v9397_v17, %s8743_s16  ;;  %v8219_v20 = vcombine.low %v3274_v30, %v3664_v15  ;;  %v8220_v10 = vcombine.high %v3274_v30, %v3664_v15  ;;  %vm901_vm12 = vcmp.ne.bf16.partialorder %v869_v51, 0  ;;  %v1943_v40 = vsel %vm1682_vm7, %v1850_v25, 0  ;;  %v870_v51 = vld [vmem:[#allocation4 + $0x18] sm:$0xff] }
 0x11e   : > { %v2791_v48 = vsel %vm1063_vm10, %v2754_v37, %v2755_v39  ;;  %v2239_v63 = vsel %vm1063_vm10, %v2203_v36, %v2204_v24  ;;  %3487 = vrot.lane.b32.xlu0 %v9363_v56, %s8745_s14  ;;  %v674_v36 = vsel %vm9420_vm2, %v8008_v2, %v673_v43  ;;  %v2041_v2 = vld [vmem:[#allocation4 + $0x318] sm:$0xff]  ;;  %vm12656_vm7 = vcmask 269312  }
 0x11f   : > { %v9439_v32 = vpop.permute.xlu1 %1361  ;;  %6196 = vmatprep.subr.bf16.mxu1 %v8220_v10  ;;  %v9441_v38 = vpop.permute.xlu0 %970  ;;  %v2240_v37 = vsel %vm12655_vm14, %v9219_v46, %v2239_v63  ;;  %v2792_v33 = vsel %vm2785_vm3, %v9333_v60, %v2791_v48  ;;  %v719_v30 = vsel %vm8900_vm6, %v674_v36, %v718_v54  ;;  %vm1683_vm5 = vcmp.ne.bf16.partialorder %v1651_v4, 0  ;;  %v331_v54 = vld [vmem:[%s8907_s15 + $0x90] sm:$0xff] }
 0x120   : > { %v1424_v49 = vrot.slane %v9439_v32, 4  ;;  %v1033_v18 = vrot.slane %v9441_v38, 4  ;;  %6197 = vmatpush1.bf16.msra.mxu1 %v8219_v20  ;;  %v2333_v59 = vsel %vm2072_vm9, %v2240_v37, 0  ;;  %v2884_v26 = vsel %vm2623_vm4, %v2792_v33, 0  ;;  %720 = vst [vmem:[#allocation2 + $0xa4] sm:$0x33] %v719_v30 }
 0x121   : > { %3099 = vrot.lane.b32.xlu1 %v9397_v17, %s8744_s17  ;;  %v8089_v46 = vcombine.low %v1943_v40, %v2333_v59  ;;  %v8090_v29 = vcombine.high %v1943_v40, %v2333_v59  ;;  %v8155_v60 = vcombine.low %v2494_v44, %v2884_v26  ;;  %v8156_v12 = vcombine.high %v2494_v44, %v2884_v26  ;;  %v3762_v40 = vld [vmem:[#allocation4 + $0x820] sm:$0xff]  ;;  %v332_v59 = vld [vmem:[%s8907_s15 + $0x98] sm:$0xff] }
 0x122   : > { %v1459_v41 = vsel %vm1063_vm10, %v1423_v19, %v1424_v49  ;;  %v1069_v22 = vsel %vm1063_vm10, %v1032_v45, %v1033_v18  ;;  %2707 = vrot.lane.b32.xlu0 %v9363_v56, %s8746_s18  ;;  %vm12657_vm9 = vcmask 261120   ;;  %vm2073_vm4 = vcmp.ne.bf16.partialorder %v2041_v2, 0 }
 0x123   : > { %v9470_v5 = vpop.permute.xlu1 %2143  ;;  %6157 = vmatprep.subr.bf16.mxu0 %v8090_v29  ;;  %6198 = vmatprep.subr.bf16.mxu1 %v8156_v12  ;;  %v9472_v31 = vpop.permute.xlu0 %1753  ;;  %v1070_v19 = vsel %vm12656_vm7, %v9240_v11, %v1069_v22  ;;  %v1460_v45 = vsel %vm12657_vm9, %v9238_v9, %v1459_v41  ;;  %v2982_v29 = vld [vmem:[#allocation4 + $0x620] sm:$0xff]  ;;  %v9530_v4 = vpack.c.bf16 %v332_v59, %v331_v54 }
 0x124   : > { %v2205_v56 = vrot.slane %v9470_v5, 4  ;;  %v1815_v15 = vrot.slane %v9472_v31, 4  ;;  %6158 = vmatpush1.bf16.msra.mxu0 %v8089_v46  ;;  %6199 = vmatpush1.bf16.msra.mxu1 %v8155_v60  ;;  %v1163_v25 = vsel %vm901_vm12, %v1070_v19, 0  ;;  %v1553_v20 = vsel %vm1292_vm1, %v1460_v45, 0  ;;  %vm12658_vm12 = vmmov %vm12655_vm14  ;;  %v2431_v60 = vld [vmem:[#allocation4 + $0x420] sm:$0xff] }
 0x125   : > { %1767 = vrot.lane.b32.xlu1 %v9466_v21, %s8747_s19  ;;  %v8025_v10 = vcombine.low %v1163_v25, %v1553_v20  ;;  %v8026_v44 = vcombine.high %v1163_v25, %v1553_v20  ;;  %vm902_vm1 = vcmp.ne.bf16.partialorder %v870_v51, 0  ;;  %vm1293_vm14 = vcmp.ne.bf16.partialorder %v1261_v28, 0  ;;  %v9535_v45 = vld [vmem:[#allocation4 + $0x520] sm:$0xff]  ;;  %v9554_v51 = vld [vmem:[#allocation4 + $0x728] sm:$0xff] }
 0x126   : > { %v2241_v9 = vsel %vm1063_vm10, %v2204_v24, %v2205_v56  ;;  %v1851_v11 = vsel %vm1063_vm10, %v1814_v8, %v1815_v15  ;;  %3489 = vrot.lane.b32.xlu0 %v9397_v17, %s8745_s14  ;;  %v2399_v20 = vld [vmem:[#allocation2 + $0x24] sm:$0xff] }
 0x127   : > { %v9494_v43 = vpop.permute.xlu1 %1363  ;;  %6159 = vmatprep.subr.bf16.mxu0 %v8026_v44  ;;  %v9496_v48 = vpop.permute.xlu0 %972  ;;  %v1852_v24 = vsel %vm12619_vm8, %v9366_v50, %v1851_v11  ;;  %v2242_v63 = vsel %vm12658_vm12, %v9403_v53, %v2241_v9  ;;  %vm2463_vm12 = vcmp.ne.bf16.partialorder %v2431_v60, 0  ;;  %v2017_v11 = vld [vmem:[#allocation2 + $0x60] sm:$0xff]  ;;  %vm3405_vm8 = vcmp.ne.bf16.partialorder %v9554_v51, 0 }
 0x128   : > { %v1425_v8 = vrot.slane %v9494_v43, 4  ;;  %v1034_v37 = vrot.slane %v9496_v48, 4  ;;  %6160 = vmatpush1.bf16.msra.mxu0 %v8025_v10  ;;  %v1944_v33 = vsel %vm1683_vm5, %v1852_v24, 0  ;;  %v2334_v36 = vsel %vm2073_vm4, %v2242_v63, 0  ;;  %v9540_v10 = vld [vmem:[#allocation4 + $0x628] sm:$0xff]  ;;  %v333_v63 = vld [vmem:[%s8907_s15 + $0xa0] sm:$0xff] }
 0x129   : > { %2709 = vrot.lane.b32.xlu1 %v9397_v17, %s8746_s18  ;;  %v8091_v26 = vcombine.low %v1944_v33, %v2334_v36  ;;  %v8092_v50 = vcombine.high %v1944_v33, %v2334_v36  ;;  %vm3794_vm5 = vcmp.ne.bf16.partialorder %v3762_v40, 0  ;;  %vm3014_vm4 = vcmp.ne.bf16.partialorder %v2982_v29, 0  ;;  %v334_v33 = vld [vmem:[%s8907_s15 + $0xa8] sm:$0xff]  ;;  %v2432_v29 = vld [vmem:[#allocation4 + $0x428] sm:$0xff] }
 0x12a   : > { %v1461_v53 = vsel %vm1063_vm10, %v1424_v49, %v1425_v8  ;;  %v1071_v46 = vsel %vm1063_vm10, %v1033_v18, %v1034_v37  ;;  %2157 = vrot.lane.b32.xlu0 %v9466_v21, %s8748_s20  ;;  %v9526_v49 = vld [vmem:[#allocation4 + $0x720] sm:$0xff]  ;;  %v9528_v18 = vld [vmem:[#allocation4 + $0x828] sm:$0xff] }
 0x12b   : > { %v9518_v12 = vpop.permute.xlu1 %3085  ;;  %6200 = vmatprep.subr.bf16.mxu1 %v8092_v50  ;;  %v3866_v17 = vpop.permute.xlu0 %3865  ;;  %v1072_v41 = vsel %vm12656_vm7, %v9441_v38, %v1071_v46  ;;  %v1462_v22 = vsel %vm12657_vm9, %v9439_v32, %v1461_v53  ;;  %8346 = vmatmul.mubr.msk.bf16.vlgmr.msra.gmra.mxu0 %vm5862_vm0, %v9246_v62  ;;  %vm2624_vm7 = vcmp.ne.bf16.partialorder %v9535_v45, 0  ;;  %vm3015_vm9 = vcmp.ne.bf16.partialorder %v9540_v10, 0 }
 0x12c   : > { %v3146_v2 = vrot.slane %v9518_v12, 4  ;;  %v3926_v30 = vrot.slane %v3866_v17, 4  ;;  %6201 = vmatpush1.bf16.msra.mxu1 %v8091_v26  ;;  %v1164_v19 = vsel %vm902_vm1, %v1072_v41, 0  ;;  %v1554_v38 = vsel %vm1293_vm14, %v1462_v22, 0  ;;  %6263 = vmatprep.mubr.bf16.mxu0 %v12628_v35 }
 0x12d   : > { %1377 = vrot.lane.b32.xlu1 %v9466_v21, %s8750_s28  ;;  %v8027_v32 = vcombine.low %v1164_v19, %v1554_v38  ;;  %v8028_v25 = vcombine.high %v1164_v19, %v1554_v38  ;;  %vm3404_vm1 = vcmp.ne.bf16.partialorder %v9526_v49, 0  ;;  %vm3795_vm14 = vcmp.ne.bf16.partialorder %v9528_v18, 0  ;;  %v9628_v18 = vld [vmem:[#allocation2 + $0x6c] sm:$0xff] }
 0x12e   : > { %v3183_v44 = vsel %vm1063_vm10, %v3145_v34, %v3146_v2  ;;  %v3963_v9 = vsel %vm1063_vm10, %v3925_v61, %v3926_v30  ;;  %986 = vrot.lane.b32.xlu0 %v9466_v21, %s8749_s26  ;;  %v681_v21 = vshrl.u32 %v9530_v4, 16  ;;  %v9572_v26 = vsel %vm2463_vm12, %v2399_v20, 0 }
 0x12f   : > { %v9556_v28 = vpop.permute.xlu1 %3867  ;;  %6202 = vmatprep.subr.bf16.mxu1 %v8028_v25  ;;  %v9558_v24 = vpop.permute.xlu0 %3475  ;;  %v3964_v34 = vsel %vm3955_vm11, %v9293_v52, %v3963_v9  ;;  %v3184_v61 = vsel %vm3175_vm13, %v9330_v14, %v3183_v44  ;;  %v9579_v50 = vrot.slane %v553_v42, 11  ;;  %v684_v53 = vshll.u32 %v9530_v4, 16 }
 0x130   : > { %v3927_v36 = vrot.slane %v9556_v28, 4  ;;  %v3536_v54 = vrot.slane %v9558_v24, 4  ;;  %6203 = vmatpush1.bf16.msra.mxu1 %v8027_v32  ;;  %v4055_v59 = vsel %vm3794_vm5, %v3964_v34, 0  ;;  %v3275_v60 = vsel %vm3014_vm4, %v3184_v61, 0 }
 0x131   : > { %2159 = vrot.lane.b32.xlu1 %v2017_v11, %s8748_s20  ;;  %v8286_v52 = vcombine.high %v4055_v59, %v4055_v59  ;;  %v8285_v14 = vcombine.low %v4055_v59, %v4055_v59  ;;  %v9592_v41 = vpack.c.bf16 %v334_v33, %v333_v63  ;;  %v683_v38 = vrot.slane %v681_v21, 7  ;;  %v9631_v63 = vld [vmem:[#allocation4 + $0x320] sm:$0xff] }
 0x132   : > { %v3965_v40 = vsel %vm1063_vm10, %v3926_v30, %v3927_v36  ;;  %v3573_v46 = vsel %vm1063_vm10, %v3535_v16, %v3536_v54  ;;  %1769 = vrot.lane.b32.xlu0 %v2017_v11, %s8747_s19  ;;  %v9605_v16 = vld [vmem:[#allocation4 + $0x220] sm:$0xff]  ;;  %vm2464_vm4 = vcmp.ne.bf16.partialorder %v2432_v29, 0  ;;  %vm2074_vm12 = vcmp.ne.bf16.partialorder %v9631_v63, 0 }
 0x133   : > { %v9594_v3 = vpop.permute.xlu1 %3087  ;;  %8349 = vmatprep.subr.msk.bf16.mxu0 %vm1063_vm10, %v8286_v52  ;;  %v9597_v42 = vpop.permute.xlu0 %2695  ;;  %v5892_v22 = vsel %vm1063_vm10, %v8285_v14, 0  ;;  %v3574_v30 = vsel %vm3565_vm15, %v9369_v7, %v3573_v46  ;;  %v3966_v19 = vsel %vm3955_vm11, %v3866_v17, %v3965_v40  ;;  %8348 = vmatmul.mubr.msk.bf16.vlgmr.msra.gmra.mxu1 %vm5862_vm0, %v9246_v62  ;;  %vm1684_vm5 = vcmp.ne.bf16.partialorder %v9605_v16, 0  ;;  %v721_v14 = vld [vmem:[#allocation2 + $0xac] sm:$0x33] }
 0x134   : > { %v3147_v32 = vrot.slane %v9594_v3, 4  ;;  %v2756_v25 = vrot.slane %v9597_v42, 4  ;;  %6238 = vmatpush1.bf16.msra.mxu0 %v5892_v22  ;;  %v3665_v20 = vsel %vm3404_vm1, %v3574_v30, 0  ;;  %v4056_v7 = vsel %vm3795_vm14, %v3966_v19, 0  ;;  %6306 = vmatprep.mubr.bf16.mxu1 %v12628_v35  ;;  %v9736_v63 = vld [vmem:[#allocation2 + $0x68] sm:$0xff] }
 0x135   : > { %1379 = vrot.lane.b32.xlu1 %v2017_v11, %s8750_s28  ;;  %v8221_v17 = vcombine.low %v3275_v60, %v3665_v20  ;;  %v8222_v44 = vcombine.high %v3275_v60, %v3665_v20  ;;  %v8288_v9 = vcombine.high %v4056_v7, %v4056_v7  ;;  %v8287_v34 = vcombine.low %v4056_v7, %v4056_v7  ;;  %v9672_v7 = vld [vmem:[#allocation4 + $0x20] sm:$0xff] }
 0x136   : > { %v3185_v61 = vsel %vm1063_vm10, %v3146_v2, %v3147_v32  ;;  %v2793_v49 = vsel %vm1063_vm10, %v2755_v39, %v2756_v25  ;;  %988 = vrot.lane.b32.xlu0 %v2017_v11, %s8749_s26  ;;  %v2593_v11 = vld [vmem:[#allocation4 + $0x528] sm:$0xff]  ;;  %v686_v52 = vor.u32 %v684_v53, %v683_v38  ;;  %v694_v40 = vshrl.u32 %v9592_v41, 16 }
 0x137   : > { %v9633_v33 = vpop.permute.xlu1 %1755  ;;  %6239 = vmatprep.subr.bf16.mxu0 %v8222_v44  ;;  %8351 = vmatprep.subr.msk.bf16.mxu1 %vm1063_vm10, %v8288_v9  ;;  %v9636_v2 = vpop.permute.xlu0 %3477  ;;  %v5898_v59 = vsel %vm1063_vm10, %v8287_v34, 0  ;;  %v2794_v39 = vsel %vm2785_vm3, %v9401_v58, %v2793_v49  ;;  %v3186_v30 = vsel %vm3175_vm13, %v9518_v12, %v3185_v61  ;;  %v2400_v58 = vld [vmem:[#allocation2 + $0x2c] sm:$0xff]  ;;  %vm2625_vm1 = vcmp.ne.bf16.partialorder %v2593_v11, 0 }
 0x138   : > { %v1816_v46 = vrot.slane %v9633_v33, 4  ;;  %v3537_v60 = vrot.slane %v9636_v2, 4  ;;  %6240 = vmatpush1.bf16.msra.mxu0 %v8221_v17  ;;  %6281 = vmatpush1.bf16.msra.mxu1 %v5898_v59  ;;  %v2885_v22 = vsel %vm2624_vm7, %v2794_v39, 0  ;;  %v687_v20 = vsel %vm9420_vm2, %v9579_v50, %v686_v52  ;;  %v1262_v34 = vld [vmem:[#allocation4 + $0x120] sm:$0xff]  ;;  %v1653_v11 = vld [vmem:[#allocation4 + $0x228] sm:$0xff] }
 0x139   : > { %3101 = vrot.lane.b32.xlu1 %v9628_v18, %s8744_s17  ;;  %v8157_v19 = vcombine.low %v9572_v26, %v2885_v22  ;;  %v8158_v38 = vcombine.high %v9572_v26, %v2885_v22  ;;  %v9670_v26 = vld [vmem:[#allocation2 + $0x74] sm:$0xff]  ;;  %v722_v50 = vsel %vm8900_vm6, %v687_v20, %v721_v14  ;;  %v3276_v44 = vsel %vm3015_vm9, %v3186_v30, 0 }
 0x13a   : > { %v1853_v12 = vsel %vm1063_vm10, %v1815_v15, %v1816_v46  ;;  %v3575_v45 = vsel %vm1063_vm10, %v3536_v54, %v3537_v60  ;;  %3881 = vrot.lane.b32.xlu0 %v9628_v18, %s8743_s16  ;;  %v2496_v9 = vsel %vm2464_vm4, %v2400_v58, 0  ;;  %723 = vst [vmem:[#allocation2 + $0xac] sm:$0x33] %v722_v50  ;;  %v696_v61 = vrot.slane %v694_v40, 7  ;;  %v724_v20 = vld [vmem:[#allocation2 + $0xb4] sm:$0x33] }
 0x13b   : > { %v9676_v17 = vpop.permute.xlu1 %2697  ;;  %6241 = vmatprep.subr.bf16.mxu0 %v8158_v38  ;;  %v9678_v15 = vpop.permute.xlu0 %2145  ;;  %v3576_v54 = vsel %vm3565_vm15, %v9558_v24, %v3575_v45  ;;  %vm12659_vm14 = vcmask 252928   ;;  %vm903_vm7 = vcmp.ne.bf16.partialorder %v9672_v7, 0  ;;  %v697_v52 = vshll.u32 %v9592_v41, 16 }
 0x13c   : > { %v2757_v49 = vrot.slane %v9676_v17, 4  ;;  %v2206_v59 = vrot.slane %v9678_v15, 4  ;;  %6242 = vmatpush1.bf16.msra.mxu0 %v8157_v19  ;;  %v3666_v39 = vsel %vm3405_vm8, %v3576_v54, 0  ;;  %v1854_v10 = vsel %vm12659_vm14, %v9472_v31, %v1853_v12  ;;  %v2043_v54 = vld [vmem:[#allocation4 + $0x328] sm:$0xff] }
 0x13d   : > { %3883 = vrot.lane.b32.xlu1 %v9670_v26, %s8743_s16  ;;  %v8223_v24 = vcombine.low %v3276_v44, %v3666_v39  ;;  %v8224_v29 = vcombine.high %v3276_v44, %v3666_v39  ;;  %vm1294_vm8 = vcmp.ne.bf16.partialorder %v1262_v34, 0  ;;  %v8010_v31 = vrot.slane %v562_v47, 11  ;;  %v872_v34 = vld [vmem:[#allocation4 + $0x28] sm:$0xff] }
 0x13e   : > { %v2795_v14 = vsel %vm1063_vm10, %v2756_v25, %v2757_v49  ;;  %v2243_v51 = vsel %vm1063_vm10, %v2205_v56, %v2206_v59  ;;  %3491 = vrot.lane.b32.xlu0 %v9628_v18, %s8745_s14  ;;  %v1945_v58 = vsel %vm1684_vm5, %v1854_v10, 0  ;;  %vm12660_vm9 = vcmask 7168  }
 0x13f   : > { %v9709_v22 = vpop.permute.xlu1 %1365  ;;  %6282 = vmatprep.subr.bf16.mxu1 %v8224_v29  ;;  %v9711_v30 = vpop.permute.xlu0 %974  ;;  %v2244_v25 = vsel %vm12660_vm9, %v9470_v5, %v2243_v51  ;;  %v2796_v56 = vsel %vm2785_vm3, %v9597_v42, %v2795_v14  ;;  %v699_v19 = vor.u32 %v697_v52, %v696_v61  ;;  %vm12661_vm5 = vcmask 269312  }
 0x140   : > { %v1426_v13 = vrot.slane %v9709_v22, 4  ;;  %v1035_v47 = vrot.slane %v9711_v30, 4  ;;  %6283 = vmatpush1.bf16.msra.mxu1 %v8223_v24  ;;  %v2335_v38 = vsel %vm2074_vm12, %v2244_v25, 0  ;;  %v2886_v16 = vsel %vm2625_vm1, %v2796_v56, 0 }
 0x141   : > { %3103 = vrot.lane.b32.xlu1 %v9670_v26, %s8744_s17  ;;  %v8093_v5 = vcombine.low %v1945_v58, %v2335_v38  ;;  %v8094_v12 = vcombine.high %v1945_v58, %v2335_v38  ;;  %v8159_v42 = vcombine.low %v2496_v9, %v2886_v16  ;;  %v8160_v45 = vcombine.high %v2496_v9, %v2886_v16 }
 0x142   : > { %v1463_v50 = vsel %vm1063_vm10, %v1425_v8, %v1426_v13  ;;  %v1073_v44 = vsel %vm1063_vm10, %v1034_v37, %v1035_v47  ;;  %2711 = vrot.lane.b32.xlu0 %v9628_v18, %s8746_s18  ;;  %v700_v61 = vsel %vm9420_vm2, %v8010_v31, %v699_v19  ;;  %vm12662_vm4 = vcmask 261120   ;;  %v1263_v31 = vld [vmem:[#allocation4 + $0x128] sm:$0xff] }
 0x143   : > { %v9740_v39 = vpop.permute.xlu1 %2147  ;;  %6243 = vmatprep.subr.bf16.mxu0 %v8094_v12  ;;  %6284 = vmatprep.subr.bf16.mxu1 %v8160_v45  ;;  %v9742_v9 = vpop.permute.xlu0 %1757  ;;  %v1074_v8 = vsel %vm12661_vm5, %v9496_v48, %v1073_v44  ;;  %v1464_v37 = vsel %vm12662_vm4, %v9494_v43, %v1463_v50  ;;  %v725_v18 = vsel %vm8900_vm6, %v700_v61, %v724_v20  ;;  %vm1685_vm12 = vcmp.ne.bf16.partialorder %v1653_v11, 0  ;;  %v335_v20 = vld [vmem:[%s8907_s15 + $0xb0] sm:$0xff]  ;;  %v3764_v45 = vld [vmem:[#allocation4 + $0x830] sm:$0xff] }
 0x144   : > { %v2207_v10 = vrot.slane %v9740_v39, 4  ;;  %v1817_v24 = vrot.slane %v9742_v9, 4  ;;  %6244 = vmatpush1.bf16.msra.mxu0 %v8093_v5  ;;  %6285 = vmatpush1.bf16.msra.mxu1 %v8159_v42  ;;  %v1165_v29 = vsel %vm903_vm7, %v1074_v8, 0  ;;  %v1555_v14 = vsel %vm1294_vm8, %v1464_v37, 0  ;;  %726 = vst [vmem:[#allocation2 + $0xb4] sm:$0x33] %v725_v18  ;;  %vm12663_vm7 = vmmov %vm12660_vm9 }
 0x145   : > { %1771 = vrot.lane.b32.xlu1 %v9736_v63, %s8747_s19  ;;  %v8029_v48 = vcombine.low %v1165_v29, %v1555_v14  ;;  %v8030_v43 = vcombine.high %v1165_v29, %v1555_v14  ;;  %vm2075_vm1 = vcmp.ne.bf16.partialorder %v2043_v54, 0  ;;  %v336_v5 = vld [vmem:[%s8907_s15 + $0xb8] sm:$0xff]  ;;  %vm904_vm8 = vcmp.ne.bf16.partialorder %v872_v34, 0  ;;  %v3765_v29 = vld [vmem:[#allocation4 + $0x838] sm:$0xff]  ;;  %s8408_s15 = sshll.u32 %s8811_s25, 7  ;;  %s8754_s25 = smov [#allocation12]  }
 0x146   : > { %v2245_v51 = vsel %vm1063_vm10, %v2206_v59, %v2207_v10  ;;  %v1855_v7 = vsel %vm1063_vm10, %v1816_v46, %v1817_v24  ;;  %3493 = vrot.lane.b32.xlu0 %v9670_v26, %s8745_s14  ;;  %vm1295_vm9 = vcmp.ne.bf16.partialorder %v1263_v31, 0  ;;  %v3374_v54 = vld [vmem:[#allocation4 + $0x730] sm:$0xff] }
 0x147   : > { %v9767_v58 = vpop.permute.xlu1 %1367  ;;  %6245 = vmatprep.subr.bf16.mxu0 %v8030_v43  ;;  %v9769_v25 = vpop.permute.xlu0 %976  ;;  %v1856_v59 = vsel %vm12659_vm14, %v9633_v33, %v1855_v7  ;;  %v2246_v56 = vsel %vm12663_vm7, %v9678_v15, %v2245_v51  ;;  %v2433_v14 = vld [vmem:[#allocation4 + $0x430] sm:$0xff]  ;;  %v2019_v51 = vld [vmem:[#allocation2 + $0x70] sm:$0xff]  ;;  %vm3406_vm14 = vcmp.ne.bf16.partialorder %v3374_v54, 0  ;;  %vm3797_vm7 = vcmp.ne.bf16.partialorder %v3765_v29, 0 }
 0x148   : > { %v1427_v19 = vrot.slane %v9767_v58, 4  ;;  %v1036_v46 = vrot.slane %v9769_v25, 4  ;;  %6246 = vmatpush1.bf16.msra.mxu0 %v8029_v48  ;;  %v1946_v38 = vsel %vm1685_vm12, %v1856_v59, 0  ;;  %v2336_v16 = vsel %vm2075_vm1, %v2246_v56, 0  ;;  %v9815_v7 = vld [vmem:[#allocation4 + $0x530] sm:$0xff] }
 0x149   : > { %2713 = vrot.lane.b32.xlu1 %v9670_v26, %s8746_s18  ;;  %v8095_v12 = vcombine.low %v1946_v38, %v2336_v16  ;;  %v8096_v42 = vcombine.high %v1946_v38, %v2336_v16  ;;  %vm3796_vm12 = vcmp.ne.bf16.partialorder %v3764_v45, 0  ;;  %v9876_v29 = vld [vmem:[#allocation2 + $0x7c] sm:$0xff] }
 0x14a   : > { %v1465_v33 = vsel %vm1063_vm10, %v1426_v13, %v1427_v19  ;;  %v1075_v15 = vsel %vm1063_vm10, %v1035_v47, %v1036_v46  ;;  %2161 = vrot.lane.b32.xlu0 %v9736_v63, %s8748_s20  ;;  %v2984_v13 = vld [vmem:[#allocation4 + $0x630] sm:$0xff]  ;;  %v9797_v47 = vpack.c.bf16 %v336_v5, %v335_v20 }
 0x14b   : > { %v9789_v50 = vpop.permute.xlu1 %3089  ;;  %6286 = vmatprep.subr.bf16.mxu1 %v8096_v42  ;;  %v3870_v26 = vpop.permute.xlu0 %3869  ;;  %v1076_v44 = vsel %vm12661_vm5, %v9711_v30, %v1075_v15  ;;  %v1466_v11 = vsel %vm12662_vm4, %v9709_v22, %v1465_v33  ;;  %8350 = vmatmul.mubr.msk.bf16.vlgmr.msra.gmra.mxu0 %vm5862_vm0, %v9246_v62  ;;  %vm3016_vm1 = vcmp.ne.bf16.partialorder %v2984_v13, 0 }
 0x14c   : > { %v3148_v61 = vrot.slane %v9789_v50, 4  ;;  %v3928_v8 = vrot.slane %v3870_v26, 4  ;;  %6287 = vmatpush1.bf16.msra.mxu1 %v8095_v12  ;;  %v1166_v37 = vsel %vm904_vm8, %v1076_v44, 0  ;;  %v1556_v18 = vsel %vm1295_vm9, %v1466_v11, 0  ;;  %6349 = vmatprep.mubr.bf16.mxu0 %v12628_v35  ;;  %v2985_v44 = vld [vmem:[#allocation4 + $0x638] sm:$0xff] }
 0x14d   : > { %1381 = vrot.lane.b32.xlu1 %v9736_v63, %s8750_s28  ;;  %v8031_v22 = vcombine.low %v1166_v37, %v1556_v18  ;;  %v8032_v30 = vcombine.high %v1166_v37, %v1556_v18  ;;  %vm2465_vm8 = vcmp.ne.bf16.partialorder %v2433_v14, 0  ;;  %vm2626_vm9 = vcmp.ne.bf16.partialorder %v9815_v7, 0  ;;  %v727_v14 = vld [vmem:[#allocation2 + $0xbc] sm:$0x33] }
 0x14e   : > { %v3187_v48 = vsel %vm1063_vm10, %v3147_v32, %v3148_v61  ;;  %v3967_v43 = vsel %vm1063_vm10, %v3927_v36, %v3928_v8  ;;  %990 = vrot.lane.b32.xlu0 %v9736_v63, %s8749_s26  ;;  %v707_v36 = vshrl.u32 %v9797_v47, 16  ;;  %v710_v42 = vshll.u32 %v9797_v47, 16 }
 0x14f   : > { %v9817_v34 = vpop.permute.xlu1 %3871  ;;  %6288 = vmatprep.subr.bf16.mxu1 %v8032_v30  ;;  %v9819_v31 = vpop.permute.xlu0 %3479  ;;  %v3968_v32 = vsel %vm3955_vm11, %v9556_v28, %v3967_v43  ;;  %v3188_v59 = vsel %vm3175_vm13, %v9594_v3, %v3187_v48  ;;  %v9833_v28 = vrot.slane %v571_v1, 11  ;;  %vm3017_vm5 = vcmp.ne.bf16.partialorder %v2985_v44, 0  ;;  %v3375_v43 = vld [vmem:[#allocation4 + $0x738] sm:$0xff] }
 0x150   : > { %v3929_v63 = vrot.slane %v9817_v34, 4  ;;  %v3538_v56 = vrot.slane %v9819_v31, 4  ;;  %6289 = vmatpush1.bf16.msra.mxu1 %v8031_v22  ;;  %v4057_v38 = vsel %vm3796_vm12, %v3968_v32, 0  ;;  %v3277_v12 = vsel %vm3016_vm1, %v3188_v59, 0 }
 0x151   : > { %2163 = vrot.lane.b32.xlu1 %v2019_v51, %s8748_s20  ;;  %v8290_v16 = vcombine.high %v4057_v38, %v4057_v38  ;;  %v8289_v20 = vcombine.low %v4057_v38, %v4057_v38  ;;  %v709_v11 = vrot.slane %v707_v36, 7  ;;  %v1654_v38 = vld [vmem:[#allocation4 + $0x230] sm:$0xff]  ;;  %vm3407_vm4 = vcmp.ne.bf16.partialorder %v3375_v43, 0 }
 0x152   : > { %v3969_v3 = vsel %vm1063_vm10, %v3928_v8, %v3929_v63  ;;  %v3577_v5 = vsel %vm1063_vm10, %v3537_v60, %v3538_v56  ;;  %1773 = vrot.lane.b32.xlu0 %v2019_v51, %s8747_s19  ;;  %v2401_v60 = vld [vmem:[#allocation2 + $0x34] sm:$0xff]  ;;  %vm1686_vm12 = vcmp.ne.bf16.partialorder %v1654_v38, 0  ;;  %vm12664_vm1 = vcmask 252928  }
 0x153   : > { %v9846_v33 = vpop.permute.xlu1 %3091  ;;  %8353 = vmatprep.subr.msk.bf16.mxu0 %vm1063_vm10, %v8290_v16  ;;  %v9849_v23 = vpop.permute.xlu0 %2699  ;;  %v5904_v1 = vsel %vm1063_vm10, %v8289_v20, 0  ;;  %v3578_v15 = vsel %vm3565_vm15, %v9636_v2, %v3577_v5  ;;  %v3970_v45 = vsel %vm3955_vm11, %v3870_v26, %v3969_v3  ;;  %8352 = vmatmul.mubr.msk.bf16.vlgmr.msra.gmra.mxu1 %vm5862_vm0, %v9246_v62  ;;  %v2497_v48 = vsel %vm2465_vm8, %v2401_v60, 0 }
 0x154   : > { %v3149_v13 = vrot.slane %v9846_v33, 4  ;;  %v2758_v8 = vrot.slane %v9849_v23, 4  ;;  %6324 = vmatpush1.bf16.msra.mxu0 %v5904_v1  ;;  %v3667_v37 = vsel %vm3406_vm14, %v3578_v15, 0  ;;  %v4058_v18 = vsel %vm3797_vm7, %v3970_v45, 0  ;;  %6392 = vmatprep.mubr.bf16.mxu1 %v12628_v35  ;;  %v770_v1 = vld [vmem:[#allocation2 + $0xc4] sm:$0x33] }
 0x155   : > { %1383 = vrot.lane.b32.xlu1 %v2019_v51, %s8750_s28  ;;  %v8225_v2 = vcombine.low %v3277_v12, %v3667_v37  ;;  %v8226_v62 = vcombine.high %v3277_v12, %v3667_v37  ;;  %v8292_v26 = vcombine.high %v4058_v18, %v4058_v18  ;;  %v8291_v22 = vcombine.low %v4058_v18, %v4058_v18 }
 0x156   : > { %v3189_v30 = vsel %vm1063_vm10, %v3148_v61, %v3149_v13  ;;  %v2797_v54 = vsel %vm1063_vm10, %v2757_v49, %v2758_v8  ;;  %992 = vrot.lane.b32.xlu0 %v2019_v51, %s8749_s26  ;;  %v712_v51 = vor.u32 %v710_v42, %v709_v11  ;;  %v8016_v16 = vrot.slane %v9328_v27, 9  ;;  %v9913_v11 = vld [vmem:[#allocation2 + $0x84] sm:$0xff] }
 0x157   : > { %v9879_v32 = vpop.permute.xlu1 %1759  ;;  %6325 = vmatprep.subr.bf16.mxu0 %v8226_v62  ;;  %8355 = vmatprep.subr.msk.bf16.mxu1 %vm1063_vm10, %v8292_v26  ;;  %v9882_v61 = vpop.permute.xlu0 %3481  ;;  %v5910_v59 = vsel %vm1063_vm10, %v8291_v22, 0  ;;  %v2798_v49 = vsel %vm2785_vm3, %v9676_v17, %v2797_v54  ;;  %v3190_v12 = vsel %vm3175_vm13, %v9789_v50, %v3189_v30  ;;  %v2434_v17 = vld [vmem:[#allocation4 + $0x438] sm:$0xff]  ;;  %v873_v26 = vld [vmem:[#allocation4 + $0x30] sm:$0xff]  ;;  %vm2076_vm14 = vcmp.ne.bf16.partialorder %v2044_v55, 0 }
 0x158   : > { %v1818_v20 = vrot.slane %v9879_v32, 4  ;;  %v3539_v3 = vrot.slane %v9882_v61, 4  ;;  %6326 = vmatpush1.bf16.msra.mxu0 %v8225_v2  ;;  %6367 = vmatpush1.bf16.msra.mxu1 %v5910_v59  ;;  %v2887_v5 = vsel %vm2626_vm9, %v2798_v49, 0  ;;  %v713_v60 = vsel %vm9420_vm2, %v9833_v28, %v712_v51  ;;  %v2595_v28 = vld [vmem:[#allocation4 + $0x538] sm:$0xff]  ;;  %v1264_v59 = vld [vmem:[#allocation4 + $0x130] sm:$0xff] }
 0x159   : > { %3105 = vrot.lane.b32.xlu1 %v9876_v29, %s8744_s17  ;;  %v8161_v15 = vcombine.low %v2497_v48, %v2887_v5  ;;  %v8162_v45 = vcombine.high %v2497_v48, %v2887_v5  ;;  %v728_v37 = vsel %vm8900_vm6, %v713_v60, %v727_v14  ;;  %v3278_v2 = vsel %vm3017_vm5, %v3190_v12, 0  ;;  %v2402_v62 = vld [vmem:[#allocation2 + $0x3c] sm:$0xff] }
 0x15a   : > { %v1857_v7 = vsel %vm1063_vm10, %v1817_v24, %v1818_v20  ;;  %v3579_v50 = vsel %vm1063_vm10, %v3538_v56, %v3539_v3  ;;  %3885 = vrot.lane.b32.xlu0 %v9876_v29, %s8743_s16  ;;  %vm2466_vm2 = vcmp.ne.bf16.partialorder %v2434_v17, 0  ;;  %729 = vst [vmem:[#allocation2 + $0xbc] sm:$0x33] %v728_v37  ;;  %v771_v22 = vsel %vm8900_vm6, %v8016_v16, %v770_v1  ;;  %v1655_v55 = vld [vmem:[#allocation4 + $0x238] sm:$0xff] }
 0x15b   : > { %v9917_v18 = vpop.permute.xlu1 %2701  ;;  %6327 = vmatprep.subr.bf16.mxu0 %v8162_v45  ;;  %v9919_v24 = vpop.permute.xlu0 %2149  ;;  %v3580_v56 = vsel %vm3565_vm15, %v9819_v31, %v3579_v50  ;;  %v1858_v44 = vsel %vm12664_vm1, %v9742_v9, %v1857_v7  ;;  %772 = vst [vmem:[#allocation2 + $0xc4] sm:$0x33] %v771_v22  ;;  %vm2627_vm7 = vcmp.ne.bf16.partialorder %v2595_v28, 0  ;;  %v2498_v9 = vsel %vm2466_vm2, %v2402_v62, 0  ;;  %v9967_v50 = vld [vmem:[#allocation2 + $0x78] sm:$0xff]  ;;  %v2045_v28 = vld [vmem:[#allocation4 + $0x338] sm:$0xff] }
 0x15c   : > { %v2759_v30 = vrot.slane %v9917_v18, 4  ;;  %v2208_v54 = vrot.slane %v9919_v24, 4  ;;  %6328 = vmatpush1.bf16.msra.mxu0 %v8161_v15  ;;  %v3668_v48 = vsel %vm3407_vm4, %v3580_v56, 0  ;;  %vm905_vm8 = vcmp.ne.bf16.partialorder %v873_v26, 0  ;;  %v874_v26 = vld [vmem:[#allocation4 + $0x38] sm:$0xff] }
 0x15d   : > { %3887 = vrot.lane.b32.xlu1 %v9913_v11, %s8743_s16  ;;  %v8227_v31 = vcombine.low %v3278_v2, %v3668_v48  ;;  %v8228_v49 = vcombine.high %v3278_v2, %v3668_v48  ;;  %v1947_v5 = vsel %vm1686_vm12, %v1858_v44, 0  ;;  %vm12665_vm9 = vcmask 7168  }
 0x15e   : > { %v2799_v51 = vsel %vm1063_vm10, %v2758_v8, %v2759_v30  ;;  %v2247_v43 = vsel %vm1063_vm10, %v2207_v10, %v2208_v54  ;;  %3495 = vrot.lane.b32.xlu0 %v9876_v29, %s8745_s14  ;;  %vm1296_vm5 = vcmp.ne.bf16.partialorder %v1264_v59, 0  ;;  %vm12666_vm4 = vcmask 269312   ;;  %v1265_v59 = vld [vmem:[#allocation4 + $0x138] sm:$0xff] }
 0x15f   : > { %v9944_v14 = vpop.permute.xlu1 %1369  ;;  %6368 = vmatprep.subr.bf16.mxu1 %v8228_v49  ;;  %v9946_v16 = vpop.permute.xlu0 %978  ;;  %v2248_v8 = vsel %vm12665_vm9, %v9740_v39, %v2247_v43  ;;  %v2800_v12 = vsel %vm2785_vm3, %v9849_v23, %v2799_v51  ;;  %vm12667_vm12 = vcmask 261120   ;;  %vm1687_vm2 = vcmp.ne.bf16.partialorder %v1655_v55, 0  ;;  %v3376_v55 = vld [vmem:[#allocation4 + $0x740] sm:$0xff] }
 0x160   : > { %v1428_v10 = vrot.slane %v9944_v14, 4  ;;  %v1037_v17 = vrot.slane %v9946_v16, 4  ;;  %6369 = vmatpush1.bf16.msra.mxu1 %v8227_v31  ;;  %v2337_v1 = vsel %vm2076_vm14, %v2248_v8, 0  ;;  %v2888_v15 = vsel %vm2627_vm7, %v2800_v12, 0  ;;  %vm12669_vm7 = vmmov %vm12665_vm9 }
 0x161   : > { %3107 = vrot.lane.b32.xlu1 %v9913_v11, %s8744_s17  ;;  %v8097_v38 = vcombine.low %v1947_v5, %v2337_v1  ;;  %v8098_v45 = vcombine.high %v1947_v5, %v2337_v1  ;;  %v8163_v60 = vcombine.low %v2498_v9, %v2888_v15  ;;  %v8164_v39 = vcombine.high %v2498_v9, %v2888_v15  ;;  %v3766_v1 = vld [vmem:[#allocation4 + $0x840] sm:$0xff] }
 0x162   : > { %v1467_v23 = vsel %vm1063_vm10, %v1427_v19, %v1428_v10  ;;  %v1077_v7 = vsel %vm1063_vm10, %v1036_v46, %v1037_v17  ;;  %2715 = vrot.lane.b32.xlu0 %v9876_v29, %s8746_s18  ;;  %vm2077_vm1 = vcmp.ne.bf16.partialorder %v2045_v28, 0  ;;  %vm12668_vm14 = vcmask 252928   ;;  %v3767_v28 = vld [vmem:[#allocation4 + $0x848] sm:$0xff] }
 0x163   : > { %v9969_v37 = vpop.permute.xlu1 %2151  ;;  %6329 = vmatprep.subr.bf16.mxu0 %v8098_v45  ;;  %6370 = vmatprep.subr.bf16.mxu1 %v8164_v39  ;;  %v9971_v2 = vpop.permute.xlu0 %1761  ;;  %v1078_v19 = vsel %vm12666_vm4, %v9769_v25, %v1077_v7  ;;  %v1468_v56 = vsel %vm12667_vm12, %v9767_v58, %v1467_v23  ;;  %vm1297_vm9 = vcmp.ne.bf16.partialorder %v1265_v59, 0 }
 0x164   : > { %v2209_v46 = vrot.slane %v9969_v37, 4  ;;  %v1819_v29 = vrot.slane %v9971_v2, 4  ;;  %6330 = vmatpush1.bf16.msra.mxu0 %v8097_v38  ;;  %6371 = vmatpush1.bf16.msra.mxu1 %v8163_v60  ;;  %v1167_v62 = vsel %vm905_vm8, %v1078_v19, 0  ;;  %v1557_v22 = vsel %vm1296_vm5, %v1468_v56, 0  ;;  %vm12670_vm5 = vmmov %vm12666_vm4  ;;  %v10019_v60 = vld [vmem:[#allocation7] sm:$0xff]  }
 0x165   : > { %1775 = vrot.lane.b32.xlu1 %v9967_v50, %s8747_s19  ;;  %v8033_v48 = vcombine.low %v1167_v62, %v1557_v22  ;;  %v8034_v44 = vcombine.high %v1167_v62, %v1557_v22  ;;  %vm906_vm8 = vcmp.ne.bf16.partialorder %v874_v26, 0  ;;  %vm12671_vm4 = vmmov %vm12667_vm12  ;;  %vm3798_vm12 = vcmp.ne.bf16.partialorder %v3766_v1, 0  ;;  %v2021_v62 = vld [vmem:[#allocation2 + $0x80] sm:$0xff]  ;;  %v2435_v22 = vld [vmem:[#allocation4 + $0x440] sm:$0xff] }
 0x166   : > { %v2249_v58 = vsel %vm1063_vm10, %v2208_v54, %v2209_v46  ;;  %v1859_v25 = vsel %vm1063_vm10, %v1818_v20, %v1819_v29  ;;  %3497 = vrot.lane.b32.xlu0 %v9913_v11, %s8745_s14 }
 0x167   : > { %v9993_v31 = vpop.permute.xlu1 %1371  ;;  %6331 = vmatprep.subr.bf16.mxu0 %v8034_v44  ;;  %v9995_v49 = vpop.permute.xlu0 %980  ;;  %v1860_v51 = vsel %vm12668_vm14, %v9879_v32, %v1859_v25  ;;  %v2250_v54 = vsel %vm12669_vm7, %v9919_v24, %v2249_v58  ;;  %vm3799_vm14 = vcmp.ne.bf16.partialorder %v3767_v28, 0  ;;  %vm2467_vm7 = vcmp.ne.bf16.partialorder %v2435_v22, 0  ;;  %v10096_v28 = vld [vmem:[#allocation2 + $0x8c] sm:$0xff] }
 0x168   : > { %v1429_v43 = vrot.slane %v9993_v31, 4  ;;  %v1038_v20 = vrot.slane %v9995_v49, 4  ;;  %6332 = vmatpush1.bf16.msra.mxu0 %v8033_v48  ;;  %v1948_v9 = vsel %vm1687_vm2, %v1860_v51, 0  ;;  %v2338_v5 = vsel %vm2077_vm1, %v2250_v54, 0  ;;  %v10039_v48 = vld [vmem:[#allocation4 + $0x540] sm:$0xff] }
 0x169   : > { %2717 = vrot.lane.b32.xlu1 %v9913_v11, %s8746_s18  ;;  %v8099_v8 = vcombine.low %v1948_v9, %v2338_v5  ;;  %v8100_v12 = vcombine.high %v1948_v9, %v2338_v5  ;;  %vm3408_vm1 = vcmp.ne.bf16.partialorder %v3376_v55, 0  ;;  %v773_v51 = vld [vmem:[#allocation2 + $0xcc] sm:$0x33] }
 0x16a   : > { %v1469_v32 = vsel %vm1063_vm10, %v1428_v10, %v1429_v43  ;;  %v1079_v24 = vsel %vm1063_vm10, %v1037_v17, %v1038_v20  ;;  %2165 = vrot.lane.b32.xlu0 %v9967_v50, %s8748_s20  ;;  %v2986_v10 = vld [vmem:[#allocation4 + $0x640] sm:$0xff] }
 0x16b   : > { %v10013_v15 = vpop.permute.xlu1 %3093  ;;  %6372 = vmatprep.subr.bf16.mxu1 %v8100_v12  ;;  %v3874_v11 = vpop.permute.xlu0 %3873  ;;  %v1080_v38 = vsel %vm12670_vm5, %v9946_v16, %v1079_v24  ;;  %v1470_v45 = vsel %vm12671_vm4, %v9944_v14, %v1469_v32  ;;  %8354 = vmatmul.mubr.msk.bf16.vlgmr.msra.gmra.mxu0 %vm5862_vm0, %v10019_v60  ;;  %vm3018_vm2 = vcmp.ne.bf16.partialorder %v2986_v10, 0  ;;  %v8018_v10 = vrot.slane %v9592_v41, 9 }
 0x16c   : > { %v3150_v17 = vrot.slane %v10013_v15, 4  ;;  %v3930_v39 = vrot.slane %v3874_v11, 4  ;;  %6373 = vmatpush1.bf16.msra.mxu1 %v8099_v8  ;;  %v1168_v23 = vsel %vm906_vm8, %v1080_v38, 0  ;;  %v1558_v7 = vsel %vm1297_vm9, %v1470_v45, 0  ;;  %6435 = vmatprep.mubr.bf16.mxu0 %v12628_v35  ;;  %v2403_v38 = vld [vmem:[#allocation2 + $0x44] sm:$0xff]  ;;  %v2987_v45 = vld [vmem:[#allocation4 + $0x648] sm:$0xff] }
 0x16d   : > { %1385 = vrot.lane.b32.xlu1 %v9967_v50, %s8750_s28  ;;  %v8035_v14 = vcombine.low %v1168_v23, %v1558_v7  ;;  %v8036_v16 = vcombine.high %v1168_v23, %v1558_v7  ;;  %vm2628_vm8 = vcmp.ne.bf16.partialorder %v10039_v48, 0  ;;  %vm3019_vm9 = vcmp.ne.bf16.partialorder %v2987_v45, 0  ;;  %v10129_v48 = vld [vmem:[#allocation2 + $0x94] sm:$0xff] }
 0x16e   : > { %v3191_v19 = vsel %vm1063_vm10, %v3149_v13, %v3150_v17  ;;  %v3971_v56 = vsel %vm1063_vm10, %v3929_v63, %v3930_v39  ;;  %994 = vrot.lane.b32.xlu0 %v9967_v50, %s8749_s26  ;;  %v8017_v63 = vrot.slane %v9530_v4, 9 }
 0x16f   : > { %v10041_v44 = vpop.permute.xlu1 %3875  ;;  %6374 = vmatprep.subr.bf16.mxu1 %v8036_v16  ;;  %v10043_v58 = vpop.permute.xlu0 %3483  ;;  %v3972_v13 = vsel %vm3955_vm11, %v9817_v34, %v3971_v56  ;;  %v3192_v25 = vsel %vm3175_vm13, %v9846_v33, %v3191_v19 }
 0x170   : > { %v3931_v50 = vrot.slane %v10041_v44, 4  ;;  %v3540_v26 = vrot.slane %v10043_v58, 4  ;;  %6375 = vmatpush1.bf16.msra.mxu1 %v8035_v14  ;;  %v4059_v59 = vsel %vm3798_vm12, %v3972_v13, 0  ;;  %v3279_v5 = vsel %vm3018_vm2, %v3192_v25, 0 }
 0x171   : > { %2167 = vrot.lane.b32.xlu1 %v2021_v62, %s8748_s20  ;;  %v8294_v54 = vcombine.high %v4059_v59, %v4059_v59  ;;  %v8293_v9 = vcombine.low %v4059_v59, %v4059_v59  ;;  %v774_v8 = vsel %vm8900_vm6, %v8017_v63, %v773_v51  ;;  %v2499_v25 = vsel %vm2467_vm7, %v2403_v38, 0  ;;  %v3377_v63 = vld [vmem:[#allocation4 + $0x748] sm:$0xff] }
 0x172   : > { %v3973_v34 = vsel %vm1063_vm10, %v3930_v39, %v3931_v50  ;;  %v3581_v33 = vsel %vm1063_vm10, %v3539_v3, %v3540_v26  ;;  %1777 = vrot.lane.b32.xlu0 %v2021_v62, %s8747_s19  ;;  %775 = vst [vmem:[#allocation2 + $0xcc] sm:$0x33] %v774_v8  ;;  %vm3409_vm5 = vcmp.ne.bf16.partialorder %v3377_v63, 0  ;;  %vm12672_vm2 = vcmask 252928  }
 0x173   : > { %v10067_v12 = vpop.permute.xlu1 %3095  ;;  %8357 = vmatprep.subr.msk.bf16.mxu0 %vm1063_vm10, %v8294_v54  ;;  %v10070_v32 = vpop.permute.xlu0 %2703  ;;  %v5916_v24 = vsel %vm1063_vm10, %v8293_v9, 0  ;;  %v3582_v1 = vsel %vm3565_vm15, %v9882_v61, %v3581_v33  ;;  %v3974_v3 = vsel %vm3955_vm11, %v3874_v11, %v3973_v34  ;;  %8356 = vmatmul.mubr.msk.bf16.vlgmr.msra.gmra.mxu1 %vm5862_vm0, %v10019_v60  ;;  %v776_v61 = vld [vmem:[#allocation2 + $0xd4] sm:$0x33]  ;;  %v1656_v33 = vld [vmem:[#allocation4 + $0x240] sm:$0xff] }
 0x174   : > { %v3151_v39 = vrot.slane %v10067_v12, 4  ;;  %v2760_v23 = vrot.slane %v10070_v32, 4  ;;  %6410 = vmatpush1.bf16.msra.mxu0 %v5916_v24  ;;  %v3669_v7 = vsel %vm3408_vm1, %v3582_v1, 0  ;;  %v4060_v14 = vsel %vm3799_vm14, %v3974_v3, 0  ;;  %6478 = vmatprep.mubr.bf16.mxu1 %v12628_v35  ;;  %v2046_v1 = vld [vmem:[#allocation4 + $0x340] sm:$0xff]  ;;  %v2597_v3 = vld [vmem:[#allocation4 + $0x548] sm:$0xff] }
 0x175   : > { %1387 = vrot.lane.b32.xlu1 %v2021_v62, %s8750_s28  ;;  %v8229_v11 = vcombine.low %v3279_v5, %v3669_v7  ;;  %v8230_v16 = vcombine.high %v3279_v5, %v3669_v7  ;;  %v8296_v19 = vcombine.high %v4060_v14, %v4060_v14  ;;  %v8295_v56 = vcombine.low %v4060_v14, %v4060_v14  ;;  %v2436_v5 = vld [vmem:[#allocation4 + $0x448] sm:$0xff] }
 0x176   : > { %v3193_v13 = vsel %vm1063_vm10, %v3150_v17, %v3151_v39  ;;  %v2801_v55 = vsel %vm1063_vm10, %v2759_v30, %v2760_v23  ;;  %996 = vrot.lane.b32.xlu0 %v2021_v62, %s8749_s26  ;;  %v777_v30 = vsel %vm8900_vm6, %v8018_v10, %v776_v61  ;;  %vm1688_vm4 = vcmp.ne.bf16.partialorder %v1656_v33, 0  ;;  %v2404_v14 = vld [vmem:[#allocation2 + $0x4c] sm:$0xff] }
 0x177   : > { %v10099_v59 = vpop.permute.xlu1 %1763  ;;  %6411 = vmatprep.subr.bf16.mxu0 %v8230_v16  ;;  %8359 = vmatprep.subr.msk.bf16.mxu1 %vm1063_vm10, %v8296_v19  ;;  %v10102_v51 = vpop.permute.xlu0 %3485  ;;  %v5922_v17 = vsel %vm1063_vm10, %v8295_v56, 0  ;;  %v2802_v54 = vsel %vm2785_vm3, %v9917_v18, %v2801_v55  ;;  %v3194_v34 = vsel %vm3175_vm13, %v10013_v15, %v3193_v13  ;;  %778 = vst [vmem:[#allocation2 + $0xd4] sm:$0x33] %v777_v30  ;;  %vm2468_vm12 = vcmp.ne.bf16.partialorder %v2436_v5, 0  ;;  %v1266_v56 = vld [vmem:[#allocation4 + $0x140] sm:$0xff] }
 0x178   : > { %v1820_v62 = vrot.slane %v10099_v59, 4  ;;  %v3541_v22 = vrot.slane %v10102_v51, 4  ;;  %6412 = vmatpush1.bf16.msra.mxu0 %v8229_v11  ;;  %6453 = vmatpush1.bf16.msra.mxu1 %v5922_v17  ;;  %v2889_v9 = vsel %vm2628_vm8, %v2802_v54, 0  ;;  %vm2078_vm1 = vcmp.ne.bf16.partialorder %v2046_v1, 0  ;;  %v2047_v1 = vld [vmem:[#allocation4 + $0x348] sm:$0xff] }
 0x179   : > { %3109 = vrot.lane.b32.xlu1 %v10096_v28, %s8744_s17  ;;  %v8165_v18 = vcombine.low %v2499_v25, %v2889_v9  ;;  %v8166_v8 = vcombine.high %v2499_v25, %v2889_v9  ;;  %vm2629_vm14 = vcmp.ne.bf16.partialorder %v2597_v3, 0  ;;  %vm12673_vm8 = vcmask 7168  }
 0x17a   : > { %v1861_v24 = vsel %vm1063_vm10, %v1819_v29, %v1820_v62  ;;  %v3583_v15 = vsel %vm1063_vm10, %v3540_v26, %v3541_v22  ;;  %3889 = vrot.lane.b32.xlu0 %v10096_v28, %s8743_s16  ;;  %v3280_v29 = vsel %vm3019_vm9, %v3194_v34, 0  ;;  %v875_v26 = vld [vmem:[#allocation4 + $0x40] sm:$0xff]  ;;  %vm1298_vm9 = vcmp.ne.bf16.partialorder %v1266_v56, 0  ;;  %v1267_v56 = vld [vmem:[#allocation4 + $0x148] sm:$0xff] }
 0x17b   : > { %v10131_v38 = vpop.permute.xlu1 %2705  ;;  %6413 = vmatprep.subr.bf16.mxu0 %v8166_v8  ;;  %v10133_v10 = vpop.permute.xlu0 %2153  ;;  %v3584_v7 = vsel %vm3565_vm15, %v10043_v58, %v3583_v15  ;;  %v1862_v19 = vsel %vm12672_vm2, %v9971_v2, %v1861_v24  ;;  %v2500_v2 = vsel %vm2468_vm12, %v2404_v14, 0  ;;  %vm907_vm7 = vcmp.ne.bf16.partialorder %v875_v26, 0  ;;  %v10179_v24 = vld [vmem:[#allocation2 + $0x88] sm:$0xff]  ;;  %v1657_v15 = vld [vmem:[#allocation4 + $0x248] sm:$0xff] }
 0x17c   : > { %v2761_v61 = vrot.slane %v10131_v38, 4  ;;  %v2210_v11 = vrot.slane %v10133_v10, 4  ;;  %6414 = vmatpush1.bf16.msra.mxu0 %v8165_v18  ;;  %v3670_v16 = vsel %vm3409_vm5, %v3584_v7, 0  ;;  %v1949_v17 = vsel %vm1688_vm4, %v1862_v19, 0  ;;  %v876_v26 = vld [vmem:[#allocation4 + $0x48] sm:$0xff] }
 0x17d   : > { %3891 = vrot.lane.b32.xlu1 %v10129_v48, %s8743_s16  ;;  %v8231_v45 = vcombine.low %v3280_v29, %v3670_v16  ;;  %v8232_v58 = vcombine.high %v3280_v29, %v3670_v16  ;;  %vm12674_vm5 = vcmask 269312   ;;  %vm12675_vm4 = vcmask 261120  }
 0x17e   : > { %v2803_v13 = vsel %vm1063_vm10, %v2760_v23, %v2761_v61  ;;  %v2251_v55 = vsel %vm1063_vm10, %v2209_v46, %v2210_v11  ;;  %3499 = vrot.lane.b32.xlu0 %v10096_v28, %s8745_s14  ;;  %vm1689_vm12 = vcmp.ne.bf16.partialorder %v1657_v15, 0  ;;  %vm2079_vm2 = vcmp.ne.bf16.partialorder %v2047_v1, 0  ;;  %v3769_v1 = vld [vmem:[#allocation4 + $0x858] sm:$0xff] }
 0x17f   : > { %v10156_v25 = vpop.permute.xlu1 %1373  ;;  %6454 = vmatprep.subr.bf16.mxu1 %v8232_v58  ;;  %v10158_v63 = vpop.permute.xlu0 %982  ;;  %v2252_v23 = vsel %vm12673_vm8, %v9969_v37, %v2251_v55  ;;  %v2804_v54 = vsel %vm2785_vm3, %v10070_v32, %v2803_v13 }
 0x180   : > { %v1430_v46 = vrot.slane %v10156_v25, 4  ;;  %v1039_v30 = vrot.slane %v10158_v63, 4  ;;  %6455 = vmatpush1.bf16.msra.mxu1 %v8231_v45  ;;  %v2339_v9 = vsel %vm2078_vm1, %v2252_v23, 0  ;;  %v2890_v34 = vsel %vm2629_vm14, %v2804_v54, 0  ;;  %vm12677_vm14 = vmmov %vm12673_vm8 }
 0x181   : > { %3111 = vrot.lane.b32.xlu1 %v10129_v48, %s8744_s17  ;;  %v8101_v33 = vcombine.low %v1949_v17, %v2339_v9  ;;  %v8102_v5 = vcombine.high %v1949_v17, %v2339_v9  ;;  %v8167_v18 = vcombine.low %v2500_v2, %v2890_v34  ;;  %v8168_v37 = vcombine.high %v2500_v2, %v2890_v34 }
 0x182   : > { %v1471_v32 = vsel %vm1063_vm10, %v1429_v43, %v1430_v46  ;;  %v1081_v8 = vsel %vm1063_vm10, %v1038_v20, %v1039_v30  ;;  %2719 = vrot.lane.b32.xlu0 %v10096_v28, %s8746_s18  ;;  %vm12676_vm1 = vcmask 252928   ;;  %vm1299_vm8 = vcmp.ne.bf16.partialorder %v1267_v56, 0 }
 0x183   : > { %v10181_v3 = vpop.permute.xlu1 %2155  ;;  %6415 = vmatprep.subr.bf16.mxu0 %v8102_v5  ;;  %6456 = vmatprep.subr.bf16.mxu1 %v8168_v37  ;;  %v10183_v29 = vpop.permute.xlu0 %1765  ;;  %v1082_v43 = vsel %vm12674_vm5, %v9995_v49, %v1081_v8  ;;  %v1472_v7 = vsel %vm12675_vm4, %v9993_v31, %v1471_v32  ;;  %v3768_v5 = vld [vmem:[#allocation4 + $0x850] sm:$0xff] }
 0x184   : > { %v2211_v20 = vrot.slane %v10181_v3, 4  ;;  %v1821_v28 = vrot.slane %v10183_v29, 4  ;;  %6416 = vmatpush1.bf16.msra.mxu0 %v8101_v33  ;;  %6457 = vmatpush1.bf16.msra.mxu1 %v8167_v18  ;;  %v1169_v14 = vsel %vm907_vm7, %v1082_v43, 0  ;;  %v1559_v16 = vsel %vm1298_vm9, %v1472_v7, 0  ;;  %vm12678_vm9 = vmmov %vm12674_vm5  ;;  %v2988_v32 = vld [vmem:[#allocation4 + $0x650] sm:$0xff]  ;;  %v2023_v7 = vld [vmem:[#allocation2 + $0x90] sm:$0xff] }
 0x185   : > { %1779 = vrot.lane.b32.xlu1 %v10179_v24, %s8747_s19  ;;  %v8037_v19 = vcombine.low %v1169_v14, %v1559_v16  ;;  %v8038_v45 = vcombine.high %v1169_v14, %v1559_v16  ;;  %vm908_vm7 = vcmp.ne.bf16.partialorder %v876_v26, 0  ;;  %vm12679_vm5 = vmmov %vm12675_vm4  ;;  %v3378_v8 = vld [vmem:[#allocation4 + $0x750] sm:$0xff]  ;;  %vm3800_vm4 = vcmp.ne.bf16.partialorder %v3768_v5, 0 }
 0x186   : > { %v2253_v31 = vsel %vm1063_vm10, %v2210_v11, %v2211_v20  ;;  %v1863_v49 = vsel %vm1063_vm10, %v1820_v62, %v1821_v28  ;;  %3501 = vrot.lane.b32.xlu0 %v10129_v48, %s8745_s14  ;;  %v2437_v14 = vld [vmem:[#allocation4 + $0x450] sm:$0xff] }
 0x187   : > { %v10205_v58 = vpop.permute.xlu1 %1375  ;;  %6417 = vmatprep.subr.bf16.mxu0 %v8038_v45  ;;  %v10207_v13 = vpop.permute.xlu0 %984  ;;  %v1864_v55 = vsel %vm12676_vm1, %v10099_v59, %v1863_v49  ;;  %v2254_v11 = vsel %vm12677_vm14, %v10133_v10, %v2253_v31  ;;  %v10249_v45 = vld [vmem:[#allocation4 + $0x550] sm:$0xff]  ;;  %v8019_v31 = vrot.slane %v9797_v47, 9  ;;  %vm3801_vm1 = vcmp.ne.bf16.partialorder %v3769_v1, 0 }
 0x188   : > { %v1431_v2 = vrot.slane %v10205_v58, 4  ;;  %v1040_v62 = vrot.slane %v10207_v13, 4  ;;  %6418 = vmatpush1.bf16.msra.mxu0 %v8037_v19  ;;  %v1950_v17 = vsel %vm1689_vm12, %v1864_v55, 0  ;;  %v2340_v23 = vsel %vm2079_vm2, %v2254_v11, 0  ;;  %v779_v26 = vld [vmem:[#allocation2 + $0xdc] sm:$0x33] }
 0x189   : > { %2721 = vrot.lane.b32.xlu1 %v10129_v48, %s8746_s18  ;;  %v8103_v54 = vcombine.low %v1950_v17, %v2340_v23  ;;  %v8104_v9 = vcombine.high %v1950_v17, %v2340_v23  ;;  %vm3020_vm12 = vcmp.ne.bf16.partialorder %v2988_v32, 0  ;;  %vm3410_vm2 = vcmp.ne.bf16.partialorder %v3378_v8, 0 }
 0x18a   : > { %v1473_v59 = vsel %vm1063_vm10, %v1430_v46, %v1431_v2  ;;  %v1083_v10 = vsel %vm1063_vm10, %v1039_v30, %v1040_v62  ;;  %2169 = vrot.lane.b32.xlu0 %v10179_v24, %s8748_s20  ;;  %vm2469_vm14 = vcmp.ne.bf16.partialorder %v2437_v14, 0  ;;  %v780_v11 = vsel %vm8900_vm6, %v8019_v31, %v779_v26  ;;  %v2438_v31 = vld [vmem:[#allocation4 + $0x458] sm:$0xff] }
 0x18b   : > { %v10225_v34 = vpop.permute.xlu1 %3097  ;;  %6458 = vmatprep.subr.bf16.mxu1 %v8104_v9  ;;  %v1084_v48 = vsel %vm12678_vm9, %v10158_v63, %v1083_v10  ;;  %v1474_v33 = vsel %vm12679_vm5, %v10156_v25, %v1473_v59  ;;  %8358 = vmatmul.mubr.msk.bf16.vlgmr.msra.gmra.mxu0 %vm5862_vm0, %v10019_v60  ;;  %781 = vst [vmem:[#allocation2 + $0xdc] sm:$0x33] %v780_v11  ;;  %v10282_v10 = vrot.slane %v668_v57, 6  ;;  %v788_v8 = vrot.slane %v671_v6, 7  ;;  %v1658_v6 = vld [vmem:[#allocation4 + $0x250] sm:$0xff]  ;;  %v2599_v11 = vld [vmem:[#allocation4 + $0x558] sm:$0xff] }
 0x18c   : > { %v3152_v46 = vrot.slane %v10225_v34, 4  ;;  %v3878_v18 = vpop.permute.xlu0 %3877  ;;  %6459 = vmatpush1.bf16.msra.mxu1 %v8103_v54  ;;  %v1170_v30 = vsel %vm908_vm7, %v1084_v48, 0  ;;  %v1560_v37 = vsel %vm1299_vm8, %v1474_v33, 0  ;;  %6521 = vmatprep.mubr.bf16.mxu0 %v12628_v35  ;;  %vm2630_vm7 = vcmp.ne.bf16.partialorder %v10249_v45, 0 }
 0x18d   : > { %v3932_v15 = vrot.slane %v3878_v18, 4  ;;  %1389 = vrot.lane.b32.xlu1 %v10179_v24, %s8750_s28  ;;  %v8039_v63 = vcombine.low %v1170_v30, %v1560_v37  ;;  %v8040_v25 = vcombine.high %v1170_v30, %v1560_v37  ;;  %v2405_v30 = vld [vmem:[#allocation2 + $0x54] sm:$0xff]  ;;  %vm2470_vm5 = vcmp.ne.bf16.partialorder %v2438_v31, 0 }
 0x18e   : > { %v3195_v43 = vsel %vm1063_vm10, %v3151_v39, %v3152_v46  ;;  %998 = vrot.lane.b32.xlu0 %v10179_v24, %s8749_s26  ;;  %v789_v45 = vor.u32 %v788_v8, %v10282_v10 }
 0x18f   : > { %v3975_v16 = vsel %vm1063_vm10, %v3931_v50, %v3932_v15  ;;  %v10247_v19 = vpop.permute.xlu1 %3879  ;;  %6460 = vmatprep.subr.bf16.mxu1 %v8040_v25  ;;  %v3196_v50 = vsel %vm3175_vm13, %v10067_v12, %v3195_v43  ;;  %v3379_v25 = vld [vmem:[#allocation4 + $0x758] sm:$0xff] }
 0x190   : > { %v3933_v39 = vrot.slane %v10247_v19, 4  ;;  %v10253_v49 = vpop.permute.xlu0 %3487  ;;  %6461 = vmatpush1.bf16.msra.mxu1 %v8039_v63  ;;  %v3976_v24 = vsel %vm3955_vm11, %v10041_v44, %v3975_v16  ;;  %v3281_v9 = vsel %vm3020_vm12, %v3196_v50, 0  ;;  %v2989_v63 = vld [vmem:[#allocation4 + $0x658] sm:$0xff]  ;;  %vm3411_vm9 = vcmp.ne.bf16.partialorder %v3379_v25, 0 }
 0x191   : > { %v3542_v56 = vrot.slane %v10253_v49, 4  ;;  %2171 = vrot.lane.b32.xlu1 %v2023_v7, %s8748_s20  ;;  %v4061_v55 = vsel %vm3800_vm4, %v3976_v24, 0  ;;  %v10302_v16 = vld [vmem:[#allocation2 + $0x9c] sm:$0xff]  ;;  %vm3021_vm8 = vcmp.ne.bf16.partialorder %v2989_v63, 0  ;;  %vm1690_vm4 = vcmp.ne.bf16.partialorder %v1658_v6, 0 }
 0x192   : > { %v3977_v17 = vsel %vm1063_vm10, %v3932_v15, %v3933_v39  ;;  %1781 = vrot.lane.b32.xlu0 %v2023_v7, %s8747_s19  ;;  %v8298_v44 = vcombine.high %v4061_v55, %v4061_v55  ;;  %v8297_v12 = vcombine.low %v4061_v55, %v4061_v55 }
 0x193   : > { %v3585_v23 = vsel %vm1063_vm10, %v3541_v22, %v3542_v56  ;;  %v10274_v54 = vpop.permute.xlu1 %3099  ;;  %v3978_v59 = vsel %vm3955_vm11, %v3878_v18, %v3977_v17  ;;  %8360 = vmatmul.mubr.msk.bf16.vlgmr.msra.gmra.mxu1 %vm5862_vm0, %v10019_v60 }
 0x194   : > { %v3153_v48 = vrot.slane %v10274_v54, 4  ;;  %8361 = vmatprep.subr.msk.bf16.mxu0 %vm1063_vm10, %v8298_v44  ;;  %v10286_v33 = vpop.permute.xlu0 %2707  ;;  %v5928_v22 = vsel %vm1063_vm10, %v8297_v12, 0  ;;  %v3586_v5 = vsel %vm3565_vm15, %v10102_v51, %v3585_v23  ;;  %v4062_v18 = vsel %vm3801_vm1, %v3978_v59, 0  ;;  %6564 = vmatprep.mubr.bf16.mxu1 %v12628_v35  ;;  %v2406_v12 = vld [vmem:[#allocation2 + $0x5c] sm:$0xff]  ;;  %v10335_v59 = vld [vmem:[#allocation2 + $0xa4] sm:$0xff] }
 0x195   : > { %v2762_v37 = vrot.slane %v10286_v33, 4  ;;  %6496 = vmatpush1.bf16.msra.mxu0 %v5928_v22  ;;  %1391 = vrot.lane.b32.xlu1 %v2023_v7, %s8750_s28  ;;  %v3671_v57 = vsel %vm3410_vm2, %v3586_v5, 0  ;;  %v8300_v32 = vcombine.high %v4062_v18, %v4062_v18  ;;  %v8299_v15 = vcombine.low %v4062_v18, %v4062_v18 }
 0x196   : > { %v3197_v51 = vsel %vm1063_vm10, %v3152_v46, %v3153_v48  ;;  %1000 = vrot.lane.b32.xlu0 %v2023_v7, %s8749_s26  ;;  %v8233_v1 = vcombine.low %v3281_v9, %v3671_v57  ;;  %v8234_v43 = vcombine.high %v3281_v9, %v3671_v57  ;;  %v2501_v7 = vsel %vm2469_vm14, %v2405_v30, 0  ;;  %v1268_v57 = vld [vmem:[#allocation4 + $0x150] sm:$0xff] }
 0x197   : > { %v2805_v24 = vsel %vm1063_vm10, %v2761_v61, %v2762_v37  ;;  %v10311_v50 = vpop.permute.xlu1 %1767  ;;  %8363 = vmatprep.subr.msk.bf16.mxu1 %vm1063_vm10, %v8300_v32  ;;  %v5934_v46 = vsel %vm1063_vm10, %v8299_v15, 0  ;;  %v2048_v61 = vld [vmem:[#allocation4 + $0x350] sm:$0xff]  ;;  %v3198_v44 = vsel %vm3175_vm13, %v10225_v34, %v3197_v51  ;;  %vm2631_vm2 = vcmp.ne.bf16.partialorder %v2599_v11, 0 }
 0x198   : > { %v1822_v26 = vrot.slane %v10311_v50, 4  ;;  %6497 = vmatprep.subr.bf16.mxu0 %v8234_v43  ;;  %v10317_v55 = vpop.permute.xlu0 %3489  ;;  %6539 = vmatpush1.bf16.msra.mxu1 %v5934_v46  ;;  %v2806_v27 = vsel %vm2785_vm3, %v10131_v38, %v2805_v24  ;;  %vm2080_vm12 = vcmp.ne.bf16.partialorder %v2048_v61, 0  ;;  %v2502_v30 = vsel %vm2470_vm5, %v2406_v12, 0  ;;  %v877_v24 = vld [vmem:[#allocation4 + $0x50] sm:$0xff] }
 0x199   : > { %v3543_v17 = vrot.slane %v10317_v55, 4  ;;  %6498 = vmatpush1.bf16.msra.mxu0 %v8233_v1  ;;  %3113 = vrot.lane.b32.xlu1 %v10302_v16, %s8744_s17  ;;  %v2891_v14 = vsel %vm2630_vm7, %v2806_v27, 0  ;;  %v790_v32 = vrot.slane %v789_v45, 4  ;;  %v3282_v15 = vsel %vm3021_vm8, %v3198_v44, 0  ;;  %v1634_v61 = vld [vmem:[#allocation2 + $0x98] sm:$0xff] }
 0x19a   : > { %v1865_v38 = vsel %vm1063_vm10, %v1821_v28, %v1822_v26  ;;  %3893 = vrot.lane.b32.xlu0 %v10302_v16, %s8743_s16  ;;  %v8169_v23 = vcombine.low %v2501_v7, %v2891_v14  ;;  %v8170_v9 = vcombine.high %v2501_v7, %v2891_v14  ;;  %v822_v28 = vld [vmem:[#allocation2 + $0xe4] sm:$0x33]  ;;  %vm12680_vm1 = vcmask 252928  }
 0x19b   : > { %v3587_v34 = vsel %vm1063_vm10, %v3542_v56, %v3543_v17  ;;  %v10343_v22 = vpop.permute.xlu1 %2709  ;;  %v1866_v1 = vsel %vm12680_vm1, %v10183_v29, %v1865_v38  ;;  %v823_v63 = vsel %vm8900_vm6, %v790_v32, %v822_v28  ;;  %vm1300_vm14 = vcmp.ne.bf16.partialorder %v1268_v57, 0  ;;  %v2049_v38 = vld [vmem:[#allocation4 + $0x358] sm:$0xff] }
 0x19c   : > { %v2763_v5 = vrot.slane %v10343_v22, 4  ;;  %6499 = vmatprep.subr.bf16.mxu0 %v8170_v9  ;;  %v10346_v18 = vpop.permute.xlu0 %2157  ;;  %v3588_v10 = vsel %vm3565_vm15, %v10253_v49, %v3587_v34  ;;  %824 = vst [vmem:[#allocation2 + $0xe4] sm:$0x33] %v823_v63  ;;  %v1951_v7 = vsel %vm1690_vm4, %v1866_v1, 0  ;;  %vm12681_vm7 = vcmask 7168   ;;  %v1659_v34 = vld [vmem:[#allocation4 + $0x258] sm:$0xff] }
 0x19d   : > { %v2212_v56 = vrot.slane %v10346_v18, 4  ;;  %6500 = vmatpush1.bf16.msra.mxu0 %v8169_v23  ;;  %3895 = vrot.lane.b32.xlu1 %v10335_v59, %s8743_s16  ;;  %v3672_v51 = vsel %vm3411_vm9, %v3588_v10, 0  ;;  %vm909_vm8 = vcmp.ne.bf16.partialorder %v877_v24, 0  ;;  %vm12682_vm9 = vcmask 261120   ;;  %v1269_v57 = vld [vmem:[#allocation4 + $0x158] sm:$0xff] }
 0x19e   : > { %v2807_v49 = vsel %vm1063_vm10, %v2762_v37, %v2763_v5  ;;  %3503 = vrot.lane.b32.xlu0 %v10302_v16, %s8745_s14  ;;  %v8235_v43 = vcombine.low %v3282_v15, %v3672_v51  ;;  %v8236_v31 = vcombine.high %v3282_v15, %v3672_v51  ;;  %vm12683_vm5 = vcmask 269312   ;;  %v878_v1 = vld [vmem:[#allocation4 + $0x58] sm:$0xff] }
 0x19f   : > { %v2255_v25 = vsel %vm1063_vm10, %v2211_v20, %v2212_v56  ;;  %v10370_v8 = vpop.permute.xlu1 %1377  ;;  %v2808_v29 = vsel %vm2785_vm3, %v10286_v33, %v2807_v49  ;;  %vm2081_vm4 = vcmp.ne.bf16.partialorder %v2049_v38, 0 }
 0x1a0   : > { %v1432_v37 = vrot.slane %v10370_v8, 4  ;;  %6540 = vmatprep.subr.bf16.mxu1 %v8236_v31  ;;  %v10375_v46 = vpop.permute.xlu0 %986  ;;  %v2256_v27 = vsel %vm12681_vm7, %v10181_v3, %v2255_v25  ;;  %v2892_v20 = vsel %vm2631_vm2, %v2808_v29, 0  ;;  %vm12684_vm2 = vmmov %vm12681_vm7  ;;  %vm910_vm7 = vcmp.ne.bf16.partialorder %v878_v1, 0 }
 0x1a1   : > { %v1041_v14 = vrot.slane %v10375_v46, 4  ;;  %6541 = vmatpush1.bf16.msra.mxu1 %v8235_v43  ;;  %3115 = vrot.lane.b32.xlu1 %v10335_v59, %s8744_s17  ;;  %v2341_v33 = vsel %vm2080_vm12, %v2256_v27, 0  ;;  %v8171_v44 = vcombine.low %v2502_v30, %v2892_v20  ;;  %v8172_v12 = vcombine.high %v2502_v30, %v2892_v20 }
 0x1a2   : > { %v1475_v6 = vsel %vm1063_vm10, %v1431_v2, %v1432_v37  ;;  %2723 = vrot.lane.b32.xlu0 %v10302_v16, %s8746_s18  ;;  %v8105_v3 = vcombine.low %v1951_v7, %v2341_v33  ;;  %v8106_v11 = vcombine.high %v1951_v7, %v2341_v33  ;;  %vm1691_vm12 = vcmp.ne.bf16.partialorder %v1659_v34, 0 }
 0x1a3   : > { %v1085_v23 = vsel %vm1063_vm10, %v1040_v62, %v1041_v14  ;;  %v10393_v9 = vpop.permute.xlu1 %2159  ;;  %6542 = vmatprep.subr.bf16.mxu1 %v8172_v12  ;;  %v1476_v45 = vsel %vm12682_vm9, %v10205_v58, %v1475_v6  ;;  %v2990_v12 = vld [vmem:[#allocation4 + $0x660] sm:$0xff] }
 0x1a4   : > { %v2213_v2 = vrot.slane %v10393_v9, 4  ;;  %6501 = vmatprep.subr.bf16.mxu0 %v8106_v11  ;;  %v10398_v16 = vpop.permute.xlu0 %1769  ;;  %v1086_v28 = vsel %vm12683_vm5, %v10207_v13, %v1085_v23  ;;  %v1561_v10 = vsel %vm1300_vm14, %v1476_v45, 0  ;;  %vm1301_vm14 = vcmp.ne.bf16.partialorder %v1269_v57, 0  ;;  %v2439_v6 = vld [vmem:[#allocation4 + $0x460] sm:$0xff]  ;;  %v3771_v23 = vld [vmem:[#allocation4 + $0x868] sm:$0xff] }
 0x1a5   : > { %v1823_v62 = vrot.slane %v10398_v16, 4  ;;  %6502 = vmatpush1.bf16.msra.mxu0 %v8105_v3  ;;  %6543 = vmatpush1.bf16.msra.mxu1 %v8171_v44  ;;  %v1171_v30 = vsel %vm909_vm8, %v1086_v28, 0  ;;  %vm12685_vm8 = vmmov %vm12682_vm9  ;;  %v797_v45 = vrot.slane %v684_v53, 7 }
 0x1a6   : > { %v2257_v58 = vsel %vm1063_vm10, %v2212_v56, %v2213_v2  ;;  %1783 = vrot.lane.b32.xlu1 %v1634_v61, %s8747_s19  ;;  %3505 = vrot.lane.b32.xlu0 %v10335_v59, %s8745_s14  ;;  %v8041_v32 = vcombine.low %v1171_v30, %v1561_v10  ;;  %v8042_v13 = vcombine.high %v1171_v30, %v1561_v10  ;;  %vm12686_vm9 = vmmov %vm12683_vm5  ;;  %v2025_v10 = vld [vmem:[#allocation2 + $0xa0] sm:$0xff] }
 0x1a7   : > { %v1867_v15 = vsel %vm1063_vm10, %v1822_v26, %v1823_v62  ;;  %v10416_v51 = vpop.permute.xlu1 %1379  ;;  %v2258_v56 = vsel %vm12684_vm2, %v10346_v18, %v2257_v58 }
 0x1a8   : > { %v1433_v49 = vrot.slane %v10416_v51, 4  ;;  %6503 = vmatprep.subr.bf16.mxu0 %v8042_v13  ;;  %v10421_v43 = vpop.permute.xlu0 %988  ;;  %v1868_v31 = vsel %vm12680_vm1, %v10311_v50, %v1867_v15  ;;  %v2342_v63 = vsel %vm2081_vm4, %v2258_v56, 0  ;;  %v3770_v50 = vld [vmem:[#allocation4 + $0x860] sm:$0xff]  ;;  %vm3022_vm4 = vcmp.ne.bf16.partialorder %v2990_v12, 0 }
 0x1a9   : > { %v1042_v25 = vrot.slane %v10421_v43, 4  ;;  %6504 = vmatpush1.bf16.msra.mxu0 %v8041_v32  ;;  %v1952_v26 = vsel %vm1691_vm12, %v1868_v31, 0  ;;  %vm3802_vm5 = vcmp.ne.bf16.partialorder %v3770_v50, 0  ;;  %vm2471_vm12 = vcmp.ne.bf16.partialorder %v2439_v6, 0  ;;  %v825_v12 = vld [vmem:[#allocation2 + $0xec] sm:$0x33] }
 0x1aa   : > { %v1477_v18 = vsel %vm1063_vm10, %v1432_v37, %v1433_v49  ;;  %2725 = vrot.lane.b32.xlu1 %v10335_v59, %s8746_s18  ;;  %2173 = vrot.lane.b32.xlu0 %v1634_v61, %s8748_s20  ;;  %v8107_v29 = vcombine.low %v1952_v26, %v2342_v63  ;;  %v8108_v24 = vcombine.high %v1952_v26, %v2342_v63  ;;  %vm3803_vm1 = vcmp.ne.bf16.partialorder %v3771_v23, 0  ;;  %v2600_v63 = vld [vmem:[#allocation4 + $0x560] sm:$0xff] }
 0x1ab   : > { %v1087_v7 = vsel %vm1063_vm10, %v1041_v14, %v1042_v25  ;;  %v10436_v27 = vpop.permute.xlu1 %3101  ;;  %v1478_v20 = vsel %vm12685_vm8, %v10370_v8, %v1477_v18  ;;  %v794_v14 = vrot.slane %v681_v21, 6  ;;  %v3380_v21 = vld [vmem:[#allocation4 + $0x760] sm:$0xff] }
 0x1ac   : > { %v3154_v37 = vrot.slane %v10436_v27, 4  ;;  %6544 = vmatprep.subr.bf16.mxu1 %v8108_v24  ;;  %v3882_v33 = vpop.permute.xlu0 %3881  ;;  %v1088_v59 = vsel %vm12686_vm9, %v10375_v46, %v1087_v7  ;;  %v1562_v44 = vsel %vm1301_vm14, %v1478_v20, 0  ;;  %8362 = vmatmul.mubr.msk.bf16.vlgmr.msra.gmra.mxu0 %vm5862_vm0, %v10019_v60  ;;  %vm3412_vm2 = vcmp.ne.bf16.partialorder %v3380_v21, 0 }
 0x1ad   : > { %v3934_v3 = vrot.slane %v3882_v33, 4  ;;  %6545 = vmatpush1.bf16.msra.mxu1 %v8107_v29  ;;  %v1172_v8 = vsel %vm910_vm7, %v1088_v59, 0  ;;  %6607 = vmatprep.mubr.bf16.mxu0 %v12628_v35  ;;  %v798_v53 = vor.u32 %v797_v45, %v794_v14  ;;  %vm2632_vm14 = vcmp.ne.bf16.partialorder %v2600_v63, 0  ;;  %v3381_v14 = vld [vmem:[#allocation4 + $0x768] sm:$0xff] }
 0x1ae   : > { %v3199_v46 = vsel %vm1063_vm10, %v3153_v48, %v3154_v37  ;;  %1393 = vrot.lane.b32.xlu1 %v1634_v61, %s8750_s28  ;;  %1002 = vrot.lane.b32.xlu0 %v1634_v61, %s8749_s26  ;;  %v8043_v11 = vcombine.low %v1172_v8, %v1562_v44  ;;  %v8044_v38 = vcombine.high %v1172_v8, %v1562_v44  ;;  %v2407_v48 = vld [vmem:[#allocation2 + $0x64] sm:$0xff]  ;;  %v2991_v44 = vld [vmem:[#allocation4 + $0x668] sm:$0xff]  ;;  %v806_v21 = vrot.slane %v697_v52, 7 }
 0x1af   : > { %v3979_v34 = vsel %vm1063_vm10, %v3933_v39, %v3934_v3  ;;  %v10461_v28 = vpop.permute.xlu1 %3883  ;;  %v3200_v4 = vsel %vm3175_vm13, %v10274_v54, %v3199_v46  ;;  %v10478_v54 = vsel %vm2471_vm12, %v2407_v48, 0  ;;  %v799_v26 = vrot.slane %v798_v53, 4  ;;  %v10518_v46 = vld [vmem:[#allocation2 + $0xac] sm:$0xff] }
 0x1b0   : > { %v3935_v30 = vrot.slane %v10461_v28, 4  ;;  %6546 = vmatprep.subr.bf16.mxu1 %v8044_v38  ;;  %v10464_v61 = vpop.permute.xlu0 %3491  ;;  %v3980_v58 = vsel %vm3955_vm11, %v10247_v19, %v3979_v34  ;;  %v3283_v1 = vsel %vm3022_vm4, %v3200_v4, 0  ;;  %v803_v38 = vrot.slane %v694_v40, 6  ;;  %v2050_v34 = vld [vmem:[#allocation4 + $0x360] sm:$0xff] }
 0x1b1   : > { %v3544_v39 = vrot.slane %v10464_v61, 4  ;;  %6547 = vmatpush1.bf16.msra.mxu1 %v8043_v11  ;;  %v4063_v32 = vsel %vm3802_vm5, %v3980_v58, 0  ;;  %v1660_v11 = vld [vmem:[#allocation4 + $0x260] sm:$0xff]  ;;  %vm3023_vm7 = vcmp.ne.bf16.partialorder %v2991_v44, 0  ;;  %v826_v48 = vsel %vm8900_vm6, %v799_v26, %v825_v12  ;;  %v2601_v58 = vld [vmem:[#allocation4 + $0x568] sm:$0xff] }
 0x1b2   : > { %v3981_v13 = vsel %vm1063_vm10, %v3934_v3, %v3935_v30  ;;  %2175 = vrot.lane.b32.xlu1 %v2025_v10, %s8748_s20  ;;  %1785 = vrot.lane.b32.xlu0 %v2025_v10, %s8747_s19  ;;  %v8302_v19 = vcombine.high %v4063_v32, %v4063_v32  ;;  %v8301_v57 = vcombine.low %v4063_v32, %v4063_v32  ;;  %vm3413_vm8 = vcmp.ne.bf16.partialorder %v3381_v14, 0 }
 0x1b3   : > { %v3589_v15 = vsel %vm1063_vm10, %v3543_v17, %v3544_v39  ;;  %v10485_v56 = vpop.permute.xlu1 %3103  ;;  %v3982_v31 = vsel %vm3955_vm11, %v3882_v33, %v3981_v13  ;;  %827 = vst [vmem:[#allocation2 + $0xec] sm:$0x33] %v826_v48  ;;  %vm1692_vm9 = vcmp.ne.bf16.partialorder %v1660_v11, 0  ;;  %vm2082_vm5 = vcmp.ne.bf16.partialorder %v2050_v34, 0  ;;  %v2408_v13 = vld [vmem:[#allocation2 + $0x6c] sm:$0xff] }
 0x1b4   : > { %v3155_v18 = vrot.slane %v10485_v56, 4  ;;  %8365 = vmatprep.subr.msk.bf16.mxu0 %vm1063_vm10, %v8302_v19  ;;  %v10491_v29 = vpop.permute.xlu0 %2711  ;;  %v5940_v24 = vsel %vm1063_vm10, %v8301_v57, 0  ;;  %v3590_v50 = vsel %vm3565_vm15, %v10317_v55, %v3589_v15  ;;  %v4064_v17 = vsel %vm3803_vm1, %v3982_v31, 0  ;;  %8364 = vmatmul.mubr.msk.bf16.vlgmr.msra.gmra.mxu1 %vm5862_vm0, %v10019_v60  ;;  %v828_v31 = vld [vmem:[#allocation2 + $0xf4] sm:$0x33]  ;;  %v1636_v48 = vld [vmem:[#allocation2 + $0xa8] sm:$0xff] }
 0x1b5   : > { %v2764_v7 = vrot.slane %v10491_v29, 4  ;;  %6582 = vmatpush1.bf16.msra.mxu0 %v5940_v24  ;;  %v3673_v20 = vsel %vm3412_vm2, %v3590_v50, 0  ;;  %v8304_v33 = vcombine.high %v4064_v17, %v4064_v17  ;;  %v8303_v59 = vcombine.low %v4064_v17, %v4064_v17  ;;  %6650 = vmatprep.mubr.bf16.mxu1 %v12628_v35 }
 0x1b6   : > { %v3201_v55 = vsel %vm1063_vm10, %v3154_v37, %v3155_v18  ;;  %1395 = vrot.lane.b32.xlu1 %v2025_v10, %s8750_s28  ;;  %1004 = vrot.lane.b32.xlu0 %v2025_v10, %s8749_s26  ;;  %v8237_v60 = vcombine.low %v3283_v1, %v3673_v20  ;;  %v8238_v6 = vcombine.high %v3283_v1, %v3673_v20  ;;  %v2440_v10 = vld [vmem:[#allocation4 + $0x468] sm:$0xff]  ;;  %vm2633_vm12 = vcmp.ne.bf16.partialorder %v2601_v58, 0 }
 0x1b7   : > { %v2809_v3 = vsel %vm1063_vm10, %v2763_v5, %v2764_v7  ;;  %v10514_v8 = vpop.permute.xlu1 %1771  ;;  %8367 = vmatprep.subr.msk.bf16.mxu1 %vm1063_vm10, %v8304_v33  ;;  %v5946_v37 = vsel %vm1063_vm10, %v8303_v59, 0  ;;  %v3202_v52 = vsel %vm3175_vm13, %v10436_v27, %v3201_v55  ;;  %vm2472_vm4 = vcmp.ne.bf16.partialorder %v2440_v10, 0 }
 0x1b8   : > { %v1824_v23 = vrot.slane %v10514_v8, 4  ;;  %6583 = vmatprep.subr.bf16.mxu0 %v8238_v6  ;;  %v10525_v45 = vpop.permute.xlu0 %3493  ;;  %6625 = vmatpush1.bf16.msra.mxu1 %v5946_v37  ;;  %v2810_v5 = vsel %vm2785_vm3, %v10343_v22, %v2809_v3  ;;  %v807_v19 = vor.u32 %v806_v21, %v803_v38  ;;  %vm12687_vm2 = vcmask 252928  }
 0x1b9   : > { %v3545_v40 = vrot.slane %v10525_v45, 4  ;;  %6584 = vmatpush1.bf16.msra.mxu0 %v8237_v60  ;;  %v2893_v41 = vsel %vm2632_vm14, %v2810_v5, 0  ;;  %v2504_v33 = vsel %vm2472_vm4, %v2408_v13, 0  ;;  %vm12688_vm14 = vcmask 7168   ;;  %v2051_v5 = vld [vmem:[#allocation4 + $0x368] sm:$0xff] }
 0x1ba   : > { %v1869_v22 = vsel %vm1063_vm10, %v1823_v62, %v1824_v23  ;;  %3117 = vrot.lane.b32.xlu1 %v10518_v46, %s8744_s17  ;;  %3897 = vrot.lane.b32.xlu0 %v10518_v46, %s8743_s16  ;;  %v8173_v4 = vcombine.low %v10478_v54, %v2893_v41  ;;  %v8174_v53 = vcombine.high %v10478_v54, %v2893_v41  ;;  %v10553_v62 = vld [vmem:[#allocation2 + $0xb4] sm:$0xff]  ;;  %v3284_v54 = vsel %vm3023_vm7, %v3202_v52, 0 }
 0x1bb   : > { %v3591_v27 = vsel %vm1063_vm10, %v3544_v39, %v3545_v40  ;;  %v10551_v32 = vpop.permute.xlu1 %2713  ;;  %v1270_v39 = vld [vmem:[#allocation4 + $0x160] sm:$0xff]  ;;  %v1870_v24 = vsel %vm12687_vm2, %v10398_v16, %v1869_v22  ;;  %v808_v50 = vrot.slane %v807_v19, 4  ;;  %v1661_v41 = vld [vmem:[#allocation4 + $0x268] sm:$0xff] }
 0x1bc   : > { %v2765_v57 = vrot.slane %v10551_v32, 4  ;;  %6585 = vmatprep.subr.bf16.mxu0 %v8174_v53  ;;  %v10556_v15 = vpop.permute.xlu0 %2161  ;;  %v3592_v1 = vsel %vm3565_vm15, %v10464_v61, %v3591_v27  ;;  %vm1302_vm1 = vcmp.ne.bf16.partialorder %v1270_v39, 0  ;;  %v1953_v6 = vsel %vm1692_vm9, %v1870_v24, 0  ;;  %v1271_v27 = vld [vmem:[#allocation4 + $0x168] sm:$0xff] }
 0x1bd   : > { %v2214_v63 = vrot.slane %v10556_v15, 4  ;;  %6586 = vmatpush1.bf16.msra.mxu0 %v8173_v4  ;;  %v3674_v26 = vsel %vm3413_vm8, %v3592_v1, 0  ;;  %v829_v12 = vsel %vm8900_vm6, %v808_v50, %v828_v31  ;;  %vm12689_vm8 = vcmask 261120   ;;  %v880_v1 = vld [vmem:[#allocation4 + $0x68] sm:$0xff] }
 0x1be   : > { %v2811_v17 = vsel %vm1063_vm10, %v2764_v7, %v2765_v57  ;;  %3899 = vrot.lane.b32.xlu1 %v10553_v62, %s8743_s16  ;;  %3507 = vrot.lane.b32.xlu0 %v10518_v46, %s8745_s14  ;;  %v8239_v61 = vcombine.low %v3284_v54, %v3674_v26  ;;  %v8240_v20 = vcombine.high %v3284_v54, %v3674_v26  ;;  %v879_v7 = vld [vmem:[#allocation4 + $0x60] sm:$0xff]  ;;  %vm12690_vm9 = vcmask 269312  }
 0x1bf   : > { %v2259_v16 = vsel %vm1063_vm10, %v2213_v2, %v2214_v63  ;;  %v10578_v59 = vpop.permute.xlu1 %1381  ;;  %v2812_v44 = vsel %vm2785_vm3, %v10491_v29, %v2811_v17  ;;  %830 = vst [vmem:[#allocation2 + $0xf4] sm:$0x33] %v829_v12  ;;  %vm911_vm7 = vcmp.ne.bf16.partialorder %v879_v7, 0  ;;  %vm1693_vm4 = vcmp.ne.bf16.partialorder %v1661_v41, 0  ;;  %v10653_v12 = vld [vmem:[#allocation7] sm:$0xff]  }
 0x1c0   : > { %v1434_v55 = vrot.slane %v10578_v59, 4  ;;  %6626 = vmatprep.subr.bf16.mxu1 %v8240_v20  ;;  %v10585_v60 = vpop.permute.xlu0 %990  ;;  %v2260_v2 = vsel %vm12688_vm14, %v10393_v9, %v2259_v16  ;;  %v2894_v14 = vsel %vm2633_vm12, %v2812_v44, 0  ;;  %vm12691_vm12 = vmmov %vm12688_vm14  ;;  %vm912_vm14 = vcmp.ne.bf16.partialorder %v880_v1, 0  ;;  %v2409_v1 = vld [vmem:[#allocation2 + $0x74] sm:$0xff] }
 0x1c1   : > { %v1043_v29 = vrot.slane %v10585_v60, 4  ;;  %6627 = vmatpush1.bf16.msra.mxu1 %v8239_v61  ;;  %v2343_v3 = vsel %vm2082_vm5, %v2260_v2, 0  ;;  %v8175_v37 = vcombine.low %v2504_v33, %v2894_v14  ;;  %v8176_v38 = vcombine.high %v2504_v33, %v2894_v14 }
 0x1c2   : > { %v1479_v21 = vsel %vm1063_vm10, %v1433_v49, %v1434_v55  ;;  %3119 = vrot.lane.b32.xlu1 %v10553_v62, %s8744_s17  ;;  %2727 = vrot.lane.b32.xlu0 %v10518_v46, %s8746_s18  ;;  %v8109_v9 = vcombine.low %v1953_v6, %v2343_v3  ;;  %v8110_v11 = vcombine.high %v1953_v6, %v2343_v3  ;;  %vm2083_vm5 = vcmp.ne.bf16.partialorder %v2051_v5, 0  ;;  %v3773_v3 = vld [vmem:[#allocation4 + $0x878] sm:$0xff] }
 0x1c3   : > { %v1089_v34 = vsel %vm1063_vm10, %v1042_v25, %v1043_v29  ;;  %v10603_v10 = vpop.permute.xlu1 %2163  ;;  %6628 = vmatprep.subr.bf16.mxu1 %v8176_v38  ;;  %v1480_v49 = vsel %vm12689_vm8, %v10416_v51, %v1479_v21  ;;  %v812_v6 = vrot.slane %v707_v36, 6  ;;  %v3382_v36 = vld [vmem:[#allocation4 + $0x770] sm:$0xff] }
 0x1c4   : > { %v2215_v52 = vrot.slane %v10603_v10, 4  ;;  %6587 = vmatprep.subr.bf16.mxu0 %v8110_v11  ;;  %v10608_v46 = vpop.permute.xlu0 %1773  ;;  %v1090_v58 = vsel %vm12690_vm9, %v10421_v43, %v1089_v34  ;;  %v1563_v22 = vsel %vm1302_vm1, %v1480_v49, 0  ;;  %vm1303_vm1 = vcmp.ne.bf16.partialorder %v1271_v27, 0 }
 0x1c5   : > { %v1825_v25 = vrot.slane %v10608_v46, 4  ;;  %6588 = vmatpush1.bf16.msra.mxu0 %v8109_v9  ;;  %6629 = vmatpush1.bf16.msra.mxu1 %v8175_v37  ;;  %v1173_v4 = vsel %vm911_vm7, %v1090_v58, 0  ;;  %vm12692_vm7 = vmmov %vm12689_vm8  ;;  %v815_v37 = vrot.slane %v710_v42, 7  ;;  %v2027_v9 = vld [vmem:[#allocation2 + $0xb0] sm:$0xff] }
 0x1c6   : > { %v2261_v51 = vsel %vm1063_vm10, %v2214_v63, %v2215_v52  ;;  %1787 = vrot.lane.b32.xlu1 %v1636_v48, %s8747_s19  ;;  %3509 = vrot.lane.b32.xlu0 %v10553_v62, %s8745_s14  ;;  %v8045_v53 = vcombine.low %v1173_v4, %v1563_v22  ;;  %v8046_v43 = vcombine.high %v1173_v4, %v1563_v22  ;;  %vm12693_vm8 = vmmov %vm12690_vm9 }
 0x1c7   : > { %v1871_v13 = vsel %vm1063_vm10, %v1824_v23, %v1825_v25  ;;  %v10626_v19 = vpop.permute.xlu1 %1383  ;;  %v2262_v54 = vsel %vm12691_vm12, %v10556_v15, %v2261_v51  ;;  %v816_v42 = vor.u32 %v815_v37, %v812_v6  ;;  %vm3805_vm12 = vcmp.ne.bf16.partialorder %v3773_v3, 0  ;;  %v2602_v51 = vld [vmem:[#allocation4 + $0x570] sm:$0xff] }
 0x1c8   : > { %v1435_v39 = vrot.slane %v10626_v19, 4  ;;  %6589 = vmatprep.subr.bf16.mxu0 %v8046_v43  ;;  %v10631_v31 = vpop.permute.xlu0 %992  ;;  %v1872_v63 = vsel %vm12687_vm2, %v10514_v8, %v1871_v13  ;;  %v2344_v26 = vsel %vm2083_vm5, %v2262_v54, 0  ;;  %v3772_v8 = vld [vmem:[#allocation4 + $0x870] sm:$0xff] }
 0x1c9   : > { %v1044_v24 = vrot.slane %v10631_v31, 4  ;;  %6590 = vmatpush1.bf16.msra.mxu0 %v8045_v53  ;;  %v1954_v23 = vsel %vm1693_vm4, %v1872_v63, 0  ;;  %vm3804_vm9 = vcmp.ne.bf16.partialorder %v3772_v8, 0  ;;  %vm3414_vm4 = vcmp.ne.bf16.partialorder %v3382_v36, 0  ;;  %v2052_v37 = vld [vmem:[#allocation4 + $0x370] sm:$0xff] }
 0x1ca   : > { %v1481_v15 = vsel %vm1063_vm10, %v1434_v55, %v1435_v39  ;;  %2729 = vrot.lane.b32.xlu1 %v10553_v62, %s8746_s18  ;;  %2177 = vrot.lane.b32.xlu0 %v1636_v48, %s8748_s20  ;;  %v8111_v50 = vcombine.low %v1954_v23, %v2344_v26  ;;  %v8112_v17 = vcombine.high %v1954_v23, %v2344_v26  ;;  %v2992_v55 = vld [vmem:[#allocation4 + $0x670] sm:$0xff]  ;;  %v817_v53 = vrot.slane %v816_v42, 4 }
 0x1cb   : > { %v1091_v61 = vsel %vm1063_vm10, %v1043_v29, %v1044_v24  ;;  %v10646_v20 = vpop.permute.xlu1 %3105  ;;  %v1482_v33 = vsel %vm12692_vm7, %v10578_v59, %v1481_v15  ;;  %vm3024_vm5 = vcmp.ne.bf16.partialorder %v2992_v55, 0  ;;  %v3383_v55 = vld [vmem:[#allocation4 + $0x778] sm:$0xff] }
 0x1cc   : > { %v3156_v16 = vrot.slane %v10646_v20, 4  ;;  %6630 = vmatprep.subr.bf16.mxu1 %v8112_v17  ;;  %v3886_v44 = vpop.permute.xlu0 %3885  ;;  %v1092_v62 = vsel %vm12693_vm8, %v10585_v60, %v1091_v61  ;;  %v1564_v7 = vsel %vm1303_vm1, %v1482_v33, 0  ;;  %8366 = vmatmul.mubr.msk.bf16.vlgmr.msra.gmra.mxu0 %vm5862_vm0, %v10653_v12  ;;  %vm2634_vm1 = vcmp.ne.bf16.partialorder %v2602_v51, 0  ;;  %v2993_v61 = vld [vmem:[#allocation4 + $0x678] sm:$0xff] }
 0x1cd   : > { %v3936_v2 = vrot.slane %v3886_v44, 4  ;;  %6631 = vmatpush1.bf16.msra.mxu1 %v8111_v50  ;;  %v1174_v59 = vsel %vm912_vm14, %v1092_v62, 0  ;;  %6693 = vmatprep.mubr.bf16.mxu0 %v12628_v35  ;;  %v831_v50 = vld [vmem:[#allocation2 + $0xfc] sm:$0x33]  ;;  %vm3025_vm14 = vcmp.ne.bf16.partialorder %v2993_v61, 0 }
 0x1ce   : > { %v3203_v60 = vsel %vm1063_vm10, %v3155_v18, %v3156_v16  ;;  %1397 = vrot.lane.b32.xlu1 %v1636_v48, %s8750_s28  ;;  %1006 = vrot.lane.b32.xlu0 %v1636_v48, %s8749_s26  ;;  %v8047_v14 = vcombine.low %v1174_v59, %v1564_v7  ;;  %v8048_v29 = vcombine.high %v1174_v59, %v1564_v7  ;;  %v2441_v18 = vld [vmem:[#allocation4 + $0x470] sm:$0xff] }
 0x1cf   : > { %v3983_v38 = vsel %vm1063_vm10, %v3935_v30, %v3936_v2  ;;  %v10673_v21 = vpop.permute.xlu1 %3887  ;;  %v3204_v47 = vsel %vm3175_vm13, %v10485_v56, %v3203_v60  ;;  %vm2473_vm2 = vcmp.ne.bf16.partialorder %v2441_v18, 0  ;;  %v10725_v7 = vld [vmem:[#allocation2 + $0xbc] sm:$0xff] }
 0x1d0   : > { %v3937_v11 = vrot.slane %v10673_v21, 4  ;;  %6632 = vmatprep.subr.bf16.mxu1 %v8048_v29  ;;  %v10676_v5 = vpop.permute.xlu0 %3495  ;;  %v3984_v34 = vsel %vm3955_vm11, %v10461_v28, %v3983_v38  ;;  %v3285_v22 = vsel %vm3024_vm5, %v3204_v47, 0  ;;  %v1662_v59 = vld [vmem:[#allocation4 + $0x270] sm:$0xff]  ;;  %v2442_v60 = vld [vmem:[#allocation4 + $0x478] sm:$0xff] }
 0x1d1   : > { %v3546_v48 = vrot.slane %v10676_v5, 4  ;;  %6633 = vmatpush1.bf16.msra.mxu1 %v8047_v14  ;;  %v4065_v30 = vsel %vm3804_vm9, %v3984_v34, 0  ;;  %v832_v14 = vsel %vm8900_vm6, %v817_v53, %v831_v50  ;;  %v2603_v38 = vld [vmem:[#allocation4 + $0x578] sm:$0xff]  ;;  %vm3415_vm6 = vcmp.ne.bf16.partialorder %v3383_v55, 0 }
 0x1d2   : > { %v3985_v49 = vsel %vm1063_vm10, %v3936_v2, %v3937_v11  ;;  %2179 = vrot.lane.b32.xlu1 %v2027_v9, %s8748_s20  ;;  %1789 = vrot.lane.b32.xlu0 %v2027_v9, %s8747_s19  ;;  %v8306_v28 = vcombine.high %v4065_v30, %v4065_v30  ;;  %v8305_v41 = vcombine.low %v4065_v30, %v4065_v30  ;;  %v10755_v34 = vld [vmem:[#allocation2 + $0xc4] sm:$0xff]  ;;  %vm1694_vm7 = vcmp.ne.bf16.partialorder %v1662_v59, 0 }
 0x1d3   : > { %v3593_v56 = vsel %vm1063_vm10, %v3545_v40, %v3546_v48  ;;  %v10694_v58 = vpop.permute.xlu1 %3107  ;;  %v3986_v4 = vsel %vm3955_vm11, %v3886_v44, %v3985_v49  ;;  %833 = vst [vmem:[#allocation2 + $0xfc] sm:$0x33] %v832_v14  ;;  %vm2474_vm8 = vcmp.ne.bf16.partialorder %v2442_v60, 0  ;;  %vm2084_vm9 = vcmp.ne.bf16.partialorder %v2052_v37, 0  ;;  %v1272_v49 = vld [vmem:[#allocation4 + $0x170] sm:$0xff] }
 0x1d4   : > { %v3157_v43 = vrot.slane %v10694_v58, 4  ;;  %8369 = vmatprep.subr.msk.bf16.mxu0 %vm1063_vm10, %v8306_v28  ;;  %v10700_v27 = vpop.permute.xlu0 %2715  ;;  %v5952_v13 = vsel %vm1063_vm10, %v8305_v41, 0  ;;  %v3594_v54 = vsel %vm3565_vm15, %v10525_v45, %v3593_v56  ;;  %v4066_v40 = vsel %vm3805_vm12, %v3986_v4, 0  ;;  %8368 = vmatmul.mubr.msk.bf16.vlgmr.msra.gmra.mxu1 %vm5862_vm0, %v10653_v12 }
 0x1d5   : > { %v2766_v63 = vrot.slane %v10700_v27, 4  ;;  %6668 = vmatpush1.bf16.msra.mxu0 %v5952_v13  ;;  %v3675_v26 = vsel %vm3414_vm4, %v3594_v54, 0  ;;  %v8308_v23 = vcombine.high %v4066_v40, %v4066_v40  ;;  %v8307_v15 = vcombine.low %v4066_v40, %v4066_v40  ;;  %6736 = vmatprep.mubr.bf16.mxu1 %v12628_v35  ;;  %v881_v54 = vld [vmem:[#allocation4 + $0x70] sm:$0xff] }
 0x1d6   : > { %v3205_v45 = vsel %vm1063_vm10, %v3156_v16, %v3157_v43  ;;  %1399 = vrot.lane.b32.xlu1 %v2027_v9, %s8750_s28  ;;  %1008 = vrot.lane.b32.xlu0 %v2027_v9, %s8749_s26  ;;  %v8241_v17 = vcombine.low %v3285_v22, %v3675_v26  ;;  %v8242_v8 = vcombine.high %v3285_v22, %v3675_v26  ;;  %v2505_v16 = vsel %vm2473_vm2, %v2409_v1, 0 }
 0x1d7   : > { %v2813_v33 = vsel %vm1063_vm10, %v2765_v57, %v2766_v63  ;;  %v10721_v44 = vpop.permute.xlu1 %1775  ;;  %8371 = vmatprep.subr.msk.bf16.mxu1 %vm1063_vm10, %v8308_v23  ;;  %v5958_v62 = vsel %vm1063_vm10, %v8307_v15, 0  ;;  %v3206_v3 = vsel %vm3175_vm13, %v10646_v20, %v3205_v45  ;;  %vm2635_vm5 = vcmp.ne.bf16.partialorder %v2603_v38, 0 }
 0x1d8   : > { %v1826_v6 = vrot.slane %v10721_v44, 4  ;;  %6669 = vmatprep.subr.bf16.mxu0 %v8242_v8  ;;  %v10729_v2 = vpop.permute.xlu0 %3497  ;;  %6711 = vmatpush1.bf16.msra.mxu1 %v5958_v62  ;;  %v2814_v57 = vsel %vm2785_vm3, %v10551_v32, %v2813_v33  ;;  %v3286_v28 = vsel %vm3025_vm14, %v3206_v3, 0  ;;  %vm12694_vm4 = vcmask 252928   ;;  %v2053_v8 = vld [vmem:[#allocation4 + $0x378] sm:$0xff]  ;;  %v1638_v62 = vld [vmem:[#allocation2 + $0xb8] sm:$0xff] }
 0x1d9   : > { %v3547_v29 = vrot.slane %v10729_v2, 4  ;;  %6670 = vmatpush1.bf16.msra.mxu0 %v8241_v17  ;;  %v2895_v36 = vsel %vm2634_vm1, %v2814_v57, 0  ;;  %vm1304_vm12 = vcmp.ne.bf16.partialorder %v1272_v49, 0  ;;  %vm12695_vm2 = vcmask 7168  }
 0x1da   : > { %v1873_v32 = vsel %vm1063_vm10, %v1825_v25, %v1826_v6  ;;  %3121 = vrot.lane.b32.xlu1 %v10725_v7, %s8744_s17  ;;  %3901 = vrot.lane.b32.xlu0 %v10725_v7, %s8743_s16  ;;  %v8177_v0 = vcombine.low %v2505_v16, %v2895_v36  ;;  %v8178_v9 = vcombine.high %v2505_v16, %v2895_v36  ;;  %v2410_v25 = vld [vmem:[#allocation2 + $0x7c] sm:$0xff]  ;;  %vm913_vm1 = vcmp.ne.bf16.partialorder %v881_v54, 0 }
 0x1db   : > { %v3595_v20 = vsel %vm1063_vm10, %v3546_v48, %v3547_v29  ;;  %v10753_v18 = vpop.permute.xlu1 %2717  ;;  %v1874_v56 = vsel %vm12694_vm4, %v10608_v46, %v1873_v32  ;;  %v2506_v51 = vsel %vm2474_vm8, %v2410_v25, 0  ;;  %vm12696_vm14 = vcmask 261120   ;;  %v1663_v16 = vld [vmem:[#allocation4 + $0x278] sm:$0xff] }
 0x1dc   : > { %v2767_v47 = vrot.slane %v10753_v18, 4  ;;  %6671 = vmatprep.subr.bf16.mxu0 %v8178_v9  ;;  %v10758_v42 = vpop.permute.xlu0 %2165  ;;  %v3596_v30 = vsel %vm3565_vm15, %v10676_v5, %v3595_v20  ;;  %vm1695_vm8 = vcmp.ne.bf16.partialorder %v1663_v16, 0  ;;  %v1273_v36 = vld [vmem:[#allocation4 + $0x178] sm:$0xff]  ;;  %v2604_v16 = vld [vmem:[#allocation4 + $0x580] sm:$0xff] }
 0x1dd   : > { %v2216_v48 = vrot.slane %v10758_v42, 4  ;;  %6672 = vmatpush1.bf16.msra.mxu0 %v8177_v0  ;;  %v3676_v41 = vsel %vm3415_vm6, %v3596_v30, 0  ;;  %vm12697_vm6 = vcmask 269312   ;;  %v882_v32 = vld [vmem:[#allocation4 + $0x78] sm:$0xff] }
 0x1de   : > { %v2815_v22 = vsel %vm1063_vm10, %v2766_v63, %v2767_v47  ;;  %3903 = vrot.lane.b32.xlu1 %v10755_v34, %s8743_s16  ;;  %3511 = vrot.lane.b32.xlu0 %v10725_v7, %s8745_s14  ;;  %v8243_v5 = vcombine.low %v3286_v28, %v3676_v41  ;;  %v8244_v4 = vcombine.high %v3286_v28, %v3676_v41  ;;  %v1955_v63 = vsel %vm1694_vm7, %v1874_v56, 0  ;;  %v3774_v56 = vld [vmem:[#allocation4 + $0x880] sm:$0xff] }
 0x1df   : > { %v2263_v53 = vsel %vm1063_vm10, %v2215_v52, %v2216_v48  ;;  %v10778_v13 = vpop.permute.xlu1 %1385  ;;  %v2816_v46 = vsel %vm2785_vm3, %v10700_v27, %v2815_v22  ;;  %vm2085_vm7 = vcmp.ne.bf16.partialorder %v2053_v8, 0 }
 0x1e0   : > { %v1436_v40 = vrot.slane %v10778_v13, 4  ;;  %6712 = vmatprep.subr.bf16.mxu1 %v8244_v4  ;;  %v10783_v1 = vpop.permute.xlu0 %994  ;;  %v2264_v26 = vsel %vm12695_vm2, %v10603_v10, %v2263_v53  ;;  %v2896_v23 = vsel %vm2635_vm5, %v2816_v46, 0  ;;  %vm12699_vm5 = vmmov %vm12694_vm4  ;;  %vm1305_vm4 = vcmp.ne.bf16.partialorder %v1273_v36, 0  ;;  %v2994_v46 = vld [vmem:[#allocation4 + $0x680] sm:$0xff] }
 0x1e1   : > { %v1045_v52 = vrot.slane %v10783_v1, 4  ;;  %6713 = vmatpush1.bf16.msra.mxu1 %v8243_v5  ;;  %v2345_v15 = vsel %vm2084_vm9, %v2264_v26, 0  ;;  %v8179_v27 = vcombine.low %v2506_v51, %v2896_v23  ;;  %v8180_v50 = vcombine.high %v2506_v51, %v2896_v23  ;;  %vm12698_vm9 = vmmov %vm12695_vm2  ;;  %v2029_v23 = vld [vmem:[#allocation2 + $0xc0] sm:$0xff] }
 0x1e2   : > { %v1483_v45 = vsel %vm1063_vm10, %v1435_v39, %v1436_v40  ;;  %3123 = vrot.lane.b32.xlu1 %v10755_v34, %s8744_s17  ;;  %2731 = vrot.lane.b32.xlu0 %v10725_v7, %s8746_s18  ;;  %v8113_v10 = vcombine.low %v1955_v63, %v2345_v15  ;;  %v8114_v17 = vcombine.high %v1955_v63, %v2345_v15  ;;  %vm12700_vm2 = vmmov %vm12696_vm14 }
 0x1e3   : > { %v1093_v61 = vsel %vm1063_vm10, %v1044_v24, %v1045_v52  ;;  %v10801_v33 = vpop.permute.xlu1 %2167  ;;  %6714 = vmatprep.subr.bf16.mxu1 %v8180_v50  ;;  %v1484_v39 = vsel %vm12696_vm14, %v10626_v19, %v1483_v45  ;;  %vm3806_vm14 = vcmp.ne.bf16.partialorder %v3774_v56, 0  ;;  %v2443_v45 = vld [vmem:[#allocation4 + $0x480] sm:$0xff] }
 0x1e4   : > { %v2217_v55 = vrot.slane %v10801_v33, 4  ;;  %6673 = vmatprep.subr.bf16.mxu0 %v8114_v17  ;;  %v10806_v7 = vpop.permute.xlu0 %1777  ;;  %v1094_v57 = vsel %vm12697_vm6, %v10631_v31, %v1093_v61  ;;  %v1565_v59 = vsel %vm1304_vm12, %v1484_v39, 0  ;;  %vm914_vm12 = vcmp.ne.bf16.partialorder %v882_v32, 0 }
 0x1e5   : > { %v1827_v24 = vrot.slane %v10806_v7, 4  ;;  %6674 = vmatpush1.bf16.msra.mxu0 %v8113_v10  ;;  %6715 = vmatpush1.bf16.msra.mxu1 %v8179_v27  ;;  %v1175_v60 = vsel %vm913_vm1, %v1094_v57, 0  ;;  %vm12701_vm1 = vmmov %vm12697_vm6  ;;  %vm3026_vm6 = vcmp.ne.bf16.partialorder %v2994_v46, 0  ;;  %v2054_v46 = vld [vmem:[#allocation4 + $0x380] sm:$0xff] }
 0x1e6   : > { %v2265_v19 = vsel %vm1063_vm10, %v2216_v48, %v2217_v55  ;;  %1791 = vrot.lane.b32.xlu1 %v1638_v62, %s8747_s19  ;;  %3513 = vrot.lane.b32.xlu0 %v10755_v34, %s8745_s14  ;;  %v8049_v14 = vcombine.low %v1175_v60, %v1565_v59  ;;  %v8050_v31 = vcombine.high %v1175_v60, %v1565_v59 }
 0x1e7   : > { %v1875_v3 = vsel %vm1063_vm10, %v1826_v6, %v1827_v24  ;;  %v10824_v37 = vpop.permute.xlu1 %1387  ;;  %v2266_v38 = vsel %vm12698_vm9, %v10758_v42, %v2265_v19  ;;  %vm2475_vm9 = vcmp.ne.bf16.partialorder %v2443_v45, 0 }
 0x1e8   : > { %v1437_v0 = vrot.slane %v10824_v37, 4  ;;  %6675 = vmatprep.subr.bf16.mxu0 %v8050_v31  ;;  %v10829_v9 = vpop.permute.xlu0 %996  ;;  %v1876_v20 = vsel %vm12699_vm5, %v10721_v44, %v1875_v3  ;;  %v2346_v25 = vsel %vm2085_vm7, %v2266_v38, 0  ;;  %vm2636_vm5 = vcmp.ne.bf16.partialorder %v2604_v16, 0  ;;  %v883_v16 = vld [vmem:[#allocation4 + $0x80] sm:$0xff] }
 0x1e9   : > { %v1046_v30 = vrot.slane %v10829_v9, 4  ;;  %6676 = vmatpush1.bf16.msra.mxu0 %v8049_v14  ;;  %v1956_v6 = vsel %vm1695_vm8, %v1876_v20, 0  ;;  %v2411_v14 = vld [vmem:[#allocation2 + $0x84] sm:$0xff] }
 0x1ea   : > { %v1485_v42 = vsel %vm1063_vm10, %v1436_v40, %v1437_v0  ;;  %2733 = vrot.lane.b32.xlu1 %v10755_v34, %s8746_s18  ;;  %2181 = vrot.lane.b32.xlu0 %v1638_v62, %s8748_s20  ;;  %v8115_v49 = vcombine.low %v1956_v6, %v2346_v25  ;;  %v8116_v48 = vcombine.high %v1956_v6, %v2346_v25  ;;  %v2995_v25 = vld [vmem:[#allocation4 + $0x688] sm:$0xff] }
 0x1eb   : > { %v1095_v44 = vsel %vm1063_vm10, %v1045_v52, %v1046_v30  ;;  %v10844_v28 = vpop.permute.xlu1 %3109  ;;  %v1486_v41 = vsel %vm12700_vm2, %v10778_v13, %v1485_v42  ;;  %v3384_v52 = vld [vmem:[#allocation4 + $0x780] sm:$0xff] }
 0x1ec   : > { %v3158_v22 = vrot.slane %v10844_v28, 4  ;;  %6716 = vmatprep.subr.bf16.mxu1 %v8116_v48  ;;  %v3890_v5 = vpop.permute.xlu0 %3889  ;;  %v1096_v34 = vsel %vm12701_vm1, %v10783_v1, %v1095_v44  ;;  %v1566_v4 = vsel %vm1305_vm4, %v1486_v41, 0  ;;  %8370 = vmatmul.mubr.msk.bf16.vlgmr.msra.gmra.mxu0 %vm5862_vm0, %v10653_v12  ;;  %v3775_v1 = vld [vmem:[#allocation4 + $0x888] sm:$0xff]  ;;  %vm3416_vm8 = vcmp.ne.bf16.partialorder %v3384_v52, 0 }
 0x1ed   : > { %v3938_v51 = vrot.slane %v3890_v5, 4  ;;  %6717 = vmatpush1.bf16.msra.mxu1 %v8115_v49  ;;  %v1176_v53 = vsel %vm914_vm12, %v1096_v34, 0  ;;  %6779 = vmatprep.mubr.bf16.mxu0 %v12628_v35  ;;  %vm3807_vm7 = vcmp.ne.bf16.partialorder %v3775_v1, 0  ;;  %v10910_v48 = vld [vmem:[#allocation2 + $0xcc] sm:$0xff]  ;;  %v2507_v44 = vsel %vm2475_vm9, %v2411_v14, 0 }
 0x1ee   : > { %v3207_v13 = vsel %vm1063_vm10, %v3157_v43, %v3158_v22  ;;  %1401 = vrot.lane.b32.xlu1 %v1638_v62, %s8750_s28  ;;  %1010 = vrot.lane.b32.xlu0 %v1638_v62, %s8749_s26  ;;  %v8051_v54 = vcombine.low %v1176_v53, %v1566_v4  ;;  %v8052_v40 = vcombine.high %v1176_v53, %v1566_v4  ;;  %v3385_v41 = vld [vmem:[#allocation4 + $0x788] sm:$0xff]  ;;  %vm3027_vm4 = vcmp.ne.bf16.partialorder %v2995_v25, 0 }
 0x1ef   : > { %v3987_v63 = vsel %vm1063_vm10, %v3937_v11, %v3938_v51  ;;  %v10862_v26 = vpop.permute.xlu1 %3891  ;;  %v3208_v50 = vsel %vm3175_vm13, %v10694_v58, %v3207_v13  ;;  %v2444_v34 = vld [vmem:[#allocation4 + $0x488] sm:$0xff]  ;;  %vm3417_vm12 = vcmp.ne.bf16.partialorder %v3385_v41, 0  ;;  %vm12703_vm9 = vcmask 7168  }
 0x1f0   : > { %v3939_v15 = vrot.slane %v10862_v26, 4  ;;  %6718 = vmatprep.subr.bf16.mxu1 %v8052_v40  ;;  %v10865_v43 = vpop.permute.xlu0 %3499  ;;  %v3988_v27 = vsel %vm3955_vm11, %v10673_v21, %v3987_v63  ;;  %v3287_v62 = vsel %vm3026_vm6, %v3208_v50, 0  ;;  %v2605_v13 = vld [vmem:[#allocation4 + $0x588] sm:$0xff]  ;;  %vm2476_vm1 = vcmp.ne.bf16.partialorder %v2444_v34, 0  ;;  %v1274_v50 = vld [vmem:[#allocation4 + $0x180] sm:$0xff] }
 0x1f1   : > { %v3548_v10 = vrot.slane %v10865_v43, 4  ;;  %6719 = vmatpush1.bf16.msra.mxu1 %v8051_v54  ;;  %v4067_v11 = vsel %vm3806_vm14, %v3988_v27, 0  ;;  %v10938_v63 = vld [vmem:[#allocation2 + $0xd4] sm:$0xff]  ;;  %vm2086_vm14 = vcmp.ne.bf16.partialorder %v2054_v46, 0  ;;  %vm2637_vm6 = vcmp.ne.bf16.partialorder %v2605_v13, 0 }
 0x1f2   : > { %v3989_v17 = vsel %vm1063_vm10, %v3938_v51, %v3939_v15  ;;  %2183 = vrot.lane.b32.xlu1 %v2029_v23, %s8748_s20  ;;  %1793 = vrot.lane.b32.xlu0 %v2029_v23, %s8747_s19  ;;  %v8310_v8 = vcombine.high %v4067_v11, %v4067_v11  ;;  %v8309_v21 = vcombine.low %v4067_v11, %v4067_v11 }
 0x1f3   : > { %v3597_v58 = vsel %vm1063_vm10, %v3547_v29, %v3548_v10  ;;  %v10882_v61 = vpop.permute.xlu1 %3111  ;;  %v3990_v39 = vsel %vm3955_vm11, %v3890_v5, %v3989_v17  ;;  %v1664_v5 = vld [vmem:[#allocation4 + $0x280] sm:$0xff] }
 0x1f4   : > { %v3159_v57 = vrot.slane %v10882_v61, 4  ;;  %8373 = vmatprep.subr.msk.bf16.mxu0 %vm1063_vm10, %v8310_v8  ;;  %v10887_v59 = vpop.permute.xlu0 %2719  ;;  %v5964_v60 = vsel %vm1063_vm10, %v8309_v21, 0  ;;  %v3598_v19 = vsel %vm3565_vm15, %v10729_v2, %v3597_v58  ;;  %v4068_v29 = vsel %vm3807_vm7, %v3990_v39, 0  ;;  %8372 = vmatmul.mubr.msk.bf16.vlgmr.msra.gmra.mxu1 %vm5862_vm0, %v10653_v12 }
 0x1f5   : > { %v2768_v31 = vrot.slane %v10887_v59, 4  ;;  %6754 = vmatpush1.bf16.msra.mxu0 %v5964_v60  ;;  %v3677_v36 = vsel %vm3416_vm8, %v3598_v19, 0  ;;  %v8312_v3 = vcombine.high %v4068_v29, %v4068_v29  ;;  %v8311_v38 = vcombine.low %v4068_v29, %v4068_v29  ;;  %6822 = vmatprep.mubr.bf16.mxu1 %v12628_v35 }
 0x1f6   : > { %v3209_v32 = vsel %vm1063_vm10, %v3158_v22, %v3159_v57  ;;  %1403 = vrot.lane.b32.xlu1 %v2029_v23, %s8750_s28  ;;  %1012 = vrot.lane.b32.xlu0 %v2029_v23, %s8749_s26  ;;  %v8245_v2 = vcombine.low %v3287_v62, %v3677_v36  ;;  %v8246_v20 = vcombine.high %v3287_v62, %v3677_v36  ;;  %vm1696_vm2 = vcmp.ne.bf16.partialorder %v1664_v5, 0 }
 0x1f7   : > { %v2817_v6 = vsel %vm1063_vm10, %v2767_v47, %v2768_v31  ;;  %v10906_v42 = vpop.permute.xlu1 %1779  ;;  %8375 = vmatprep.subr.msk.bf16.mxu1 %vm1063_vm10, %v8312_v3  ;;  %v5970_v49 = vsel %vm1063_vm10, %v8311_v38, 0  ;;  %v3210_v53 = vsel %vm3175_vm13, %v10844_v28, %v3209_v32  ;;  %vm12702_vm7 = vcmask 252928  }
 0x1f8   : > { %v1828_v56 = vrot.slane %v10906_v42, 4  ;;  %6755 = vmatprep.subr.bf16.mxu0 %v8246_v20  ;;  %v10914_v22 = vpop.permute.xlu0 %3501  ;;  %6797 = vmatpush1.bf16.msra.mxu1 %v5970_v49  ;;  %v2818_v47 = vsel %vm2785_vm3, %v10753_v18, %v2817_v6  ;;  %vm1306_vm8 = vcmp.ne.bf16.partialorder %v1274_v50, 0  ;;  %v1640_v6 = vld [vmem:[#allocation2 + $0xc8] sm:$0xff]  ;;  %v1665_v49 = vld [vmem:[#allocation4 + $0x288] sm:$0xff] }
 0x1f9   : > { %v3549_v4 = vrot.slane %v10914_v22, 4  ;;  %6756 = vmatpush1.bf16.msra.mxu0 %v8245_v2  ;;  %v2897_v51 = vsel %vm2636_vm5, %v2818_v47, 0  ;;  %vm915_vm5 = vcmp.ne.bf16.partialorder %v883_v16, 0  ;;  %v2055_v2 = vld [vmem:[#allocation4 + $0x388] sm:$0xff] }
 0x1fa   : > { %v1877_v54 = vsel %vm1063_vm10, %v1827_v24, %v1828_v56  ;;  %3125 = vrot.lane.b32.xlu1 %v10910_v48, %s8744_s17  ;;  %3905 = vrot.lane.b32.xlu0 %v10910_v48, %s8743_s16  ;;  %v8181_v18 = vcombine.low %v2507_v44, %v2897_v51  ;;  %v8182_v40 = vcombine.high %v2507_v44, %v2897_v51  ;;  %v2412_v24 = vld [vmem:[#allocation2 + $0x8c] sm:$0xff] }
 0x1fb   : > { %v3599_v28 = vsel %vm1063_vm10, %v3548_v10, %v3549_v4  ;;  %v10936_v1 = vpop.permute.xlu1 %2721  ;;  %v3288_v10 = vsel %vm3027_vm4, %v3210_v53, 0  ;;  %v1878_v17 = vsel %vm12702_vm7, %v10806_v7, %v1877_v54  ;;  %v2508_v58 = vsel %vm2476_vm1, %v2412_v24, 0  ;;  %v1275_v51 = vld [vmem:[#allocation4 + $0x188] sm:$0xff] }
 0x1fc   : > { %v2769_v23 = vrot.slane %v10936_v1, 4  ;;  %6757 = vmatprep.subr.bf16.mxu0 %v8182_v40  ;;  %v10941_v52 = vpop.permute.xlu0 %2169  ;;  %v3600_v27 = vsel %vm3565_vm15, %v10865_v43, %v3599_v28  ;;  %v1957_v29 = vsel %vm1696_vm2, %v1878_v17, 0  ;;  %vm12704_vm4 = vcmask 261120   ;;  %v884_v54 = vld [vmem:[#allocation4 + $0x88] sm:$0xff]  ;;  %v3776_v17 = vld [vmem:[#allocation4 + $0x890] sm:$0xff] }
 0x1fd   : > { %v2218_v45 = vrot.slane %v10941_v52, 4  ;;  %6758 = vmatpush1.bf16.msra.mxu0 %v8181_v18  ;;  %v3678_v11 = vsel %vm3417_vm12, %v3600_v27, 0  ;;  %vm12705_vm12 = vcmask 269312   ;;  %vm2087_vm2 = vcmp.ne.bf16.partialorder %v2055_v2, 0 }
 0x1fe   : > { %v2819_v8 = vsel %vm1063_vm10, %v2768_v31, %v2769_v23  ;;  %3907 = vrot.lane.b32.xlu1 %v10938_v63, %s8743_s16  ;;  %3515 = vrot.lane.b32.xlu0 %v10910_v48, %s8745_s14  ;;  %v8247_v43 = vcombine.low %v3288_v10, %v3678_v11  ;;  %v8248_v21 = vcombine.high %v3288_v10, %v3678_v11  ;;  %vm1697_vm1 = vcmp.ne.bf16.partialorder %v1665_v49, 0  ;;  %v2606_v49 = vld [vmem:[#allocation4 + $0x590] sm:$0xff] }
 0x1ff   : > { %v2267_v62 = vsel %vm1063_vm10, %v2217_v55, %v2218_v45  ;;  %v10961_v39 = vpop.permute.xlu1 %1389  ;;  %v2820_v7 = vsel %vm2785_vm3, %v10887_v59, %v2819_v8 }
 0x200   : > { %v1438_v60 = vrot.slane %v10961_v39, 4  ;;  %6798 = vmatprep.subr.bf16.mxu1 %v8248_v21  ;;  %v10966_v19 = vpop.permute.xlu0 %998  ;;  %v2268_v14 = vsel %vm12703_vm9, %v10801_v33, %v2267_v62  ;;  %v2898_v31 = vsel %vm2637_vm6, %v2820_v7, 0  ;;  %vm12707_vm6 = vmmov %vm12702_vm7  ;;  %vm1307_vm7 = vcmp.ne.bf16.partialorder %v1275_v51, 0  ;;  %v2996_v7 = vld [vmem:[#allocation4 + $0x690] sm:$0xff] }
 0x201   : > { %v1047_v55 = vrot.slane %v10966_v19, 4  ;;  %6799 = vmatpush1.bf16.msra.mxu1 %v8247_v43  ;;  %v2347_v36 = vsel %vm2086_vm14, %v2268_v14, 0  ;;  %v8183_v59 = vcombine.low %v2508_v58, %v2898_v31  ;;  %v8184_v3 = vcombine.high %v2508_v58, %v2898_v31  ;;  %vm12706_vm14 = vmmov %vm12703_vm9  ;;  %v2031_v31 = vld [vmem:[#allocation2 + $0xd0] sm:$0xff] }
 0x202   : > { %v1487_v38 = vsel %vm1063_vm10, %v1437_v0, %v1438_v60  ;;  %3127 = vrot.lane.b32.xlu1 %v10938_v63, %s8744_s17  ;;  %2735 = vrot.lane.b32.xlu0 %v10910_v48, %s8746_s18  ;;  %v8117_v33 = vcombine.low %v1957_v29, %v2347_v36  ;;  %v8118_v32 = vcombine.high %v1957_v29, %v2347_v36  ;;  %vm12708_vm9 = vmmov %vm12704_vm4 }
 0x203   : > { %v1097_v20 = vsel %vm1063_vm10, %v1046_v30, %v1047_v55  ;;  %v10984_v25 = vpop.permute.xlu1 %2171  ;;  %6800 = vmatprep.subr.bf16.mxu1 %v8184_v3  ;;  %v1488_v0 = vsel %vm12704_vm4, %v10824_v37, %v1487_v38  ;;  %vm3808_vm4 = vcmp.ne.bf16.partialorder %v3776_v17, 0  ;;  %v2445_v38 = vld [vmem:[#allocation4 + $0x490] sm:$0xff] }
 0x204   : > { %v2219_v44 = vrot.slane %v10984_v25, 4  ;;  %6759 = vmatprep.subr.bf16.mxu0 %v8118_v32  ;;  %v10989_v48 = vpop.permute.xlu0 %1781  ;;  %v1098_v41 = vsel %vm12705_vm12, %v10829_v9, %v1097_v20  ;;  %v1567_v47 = vsel %vm1306_vm8, %v1488_v0, 0  ;;  %vm916_vm8 = vcmp.ne.bf16.partialorder %v884_v54, 0  ;;  %v2997_v54 = vld [vmem:[#allocation4 + $0x698] sm:$0xff] }
 0x205   : > { %v1829_v30 = vrot.slane %v10989_v48, 4  ;;  %6760 = vmatpush1.bf16.msra.mxu0 %v8117_v33  ;;  %6801 = vmatpush1.bf16.msra.mxu1 %v8183_v59  ;;  %v1177_v5 = vsel %vm915_vm5, %v1098_v41, 0  ;;  %vm12709_vm5 = vmmov %vm12705_vm12  ;;  %vm3028_vm12 = vcmp.ne.bf16.partialorder %v2996_v7, 0 }
 0x206   : > { %v2269_v37 = vsel %vm1063_vm10, %v2218_v45, %v2219_v44  ;;  %1795 = vrot.lane.b32.xlu1 %v1640_v6, %s8747_s19  ;;  %3517 = vrot.lane.b32.xlu0 %v10938_v63, %s8745_s14  ;;  %v8053_v34 = vcombine.low %v1177_v5, %v1567_v47  ;;  %v8054_v9 = vcombine.high %v1177_v5, %v1567_v47 }
 0x207   : > { %v1879_v53 = vsel %vm1063_vm10, %v1828_v56, %v1829_v30  ;;  %v11007_v46 = vpop.permute.xlu1 %1391  ;;  %v2270_v13 = vsel %vm12706_vm14, %v10941_v52, %v2269_v37  ;;  %vm2477_vm14 = vcmp.ne.bf16.partialorder %v2445_v38, 0 }
 0x208   : > { %v1439_v18 = vrot.slane %v11007_v46, 4  ;;  %6761 = vmatprep.subr.bf16.mxu0 %v8054_v9  ;;  %v11012_v40 = vpop.permute.xlu0 %1000  ;;  %v1880_v28 = vsel %vm12707_vm6, %v10906_v42, %v1879_v53  ;;  %v2348_v24 = vsel %vm2087_vm2, %v2270_v13, 0  ;;  %vm2638_vm6 = vcmp.ne.bf16.partialorder %v2606_v49, 0 }
 0x209   : > { %v1048_v27 = vrot.slane %v11012_v40, 4  ;;  %6762 = vmatpush1.bf16.msra.mxu0 %v8053_v34  ;;  %v1958_v56 = vsel %vm1697_vm1, %v1880_v28, 0  ;;  %v2413_v34 = vld [vmem:[#allocation2 + $0x94] sm:$0xff] }
 0x20a   : > { %v1489_v52 = vsel %vm1063_vm10, %v1438_v60, %v1439_v18  ;;  %2737 = vrot.lane.b32.xlu1 %v10938_v63, %s8746_s18  ;;  %2185 = vrot.lane.b32.xlu0 %v1640_v6, %s8748_s20  ;;  %v8119_v50 = vcombine.low %v1958_v56, %v2348_v24  ;;  %v8120_v45 = vcombine.high %v1958_v56, %v2348_v24 }
 0x20b   : > { %v1099_v42 = vsel %vm1063_vm10, %v1047_v55, %v1048_v27  ;;  %v11027_v10 = vpop.permute.xlu1 %3113  ;;  %v1490_v11 = vsel %vm12708_vm9, %v10961_v39, %v1489_v52  ;;  %v3386_v55 = vld [vmem:[#allocation4 + $0x790] sm:$0xff] }
 0x20c   : > { %v3160_v8 = vrot.slane %v11027_v10, 4  ;;  %6802 = vmatprep.subr.bf16.mxu1 %v8120_v45  ;;  %v3894_v43 = vpop.permute.xlu0 %3893  ;;  %v1100_v63 = vsel %vm12709_vm5, %v10966_v19, %v1099_v42  ;;  %v1568_v21 = vsel %vm1307_vm7, %v1490_v11, 0  ;;  %8374 = vmatmul.mubr.msk.bf16.vlgmr.msra.gmra.mxu0 %vm5862_vm0, %v10653_v12  ;;  %v3777_v19 = vld [vmem:[#allocation4 + $0x898] sm:$0xff]  ;;  %vm3418_vm1 = vcmp.ne.bf16.partialorder %v3386_v55, 0 }
 0x20d   : > { %v3940_v58 = vrot.slane %v3894_v43, 4  ;;  %6803 = vmatpush1.bf16.msra.mxu1 %v8119_v50  ;;  %v1178_v62 = vsel %vm916_vm8, %v1100_v63, 0  ;;  %6865 = vmatprep.mubr.bf16.mxu0 %v12628_v35  ;;  %vm3809_vm2 = vcmp.ne.bf16.partialorder %v3777_v19, 0  ;;  %v2972_v52 = vld [vmem:[#allocation2 + $0xdc] sm:$0xff]  ;;  %v2509_v50 = vsel %vm2477_vm14, %v2413_v34, 0 }
 0x20e   : > { %v3211_v39 = vsel %vm1063_vm10, %v3159_v57, %v3160_v8  ;;  %1405 = vrot.lane.b32.xlu1 %v1640_v6, %s8750_s28  ;;  %1014 = vrot.lane.b32.xlu0 %v1640_v6, %s8749_s26  ;;  %v8055_v16 = vcombine.low %v1178_v62, %v1568_v21  ;;  %v8056_v60 = vcombine.high %v1178_v62, %v1568_v21  ;;  %v3387_v45 = vld [vmem:[#allocation4 + $0x798] sm:$0xff]  ;;  %vm3029_vm7 = vcmp.ne.bf16.partialorder %v2997_v54, 0  ;;  %v1666_v21 = vld [vmem:[#allocation4 + $0x290] sm:$0xff] }
 0x20f   : > { %v3991_v29 = vsel %vm1063_vm10, %v3939_v15, %v3940_v58  ;;  %v11045_v14 = vpop.permute.xlu1 %3895  ;;  %v3212_v3 = vsel %vm3175_vm13, %v10882_v61, %v3211_v39  ;;  %vm3419_vm8 = vcmp.ne.bf16.partialorder %v3387_v45, 0  ;;  %v11117_v39 = vld [vmem:[#allocation2 + $0xe4] sm:$0xff]  ;;  %vm1698_vm9 = vcmp.ne.bf16.partialorder %v1666_v21, 0  ;;  %v2414_v55 = vld [vmem:[#allocation2 + $0x9c] sm:$0xff] }
 0x210   : > { %v3941_v36 = vrot.slane %v11045_v14, 4  ;;  %6804 = vmatprep.subr.bf16.mxu1 %v8056_v60  ;;  %v11048_v57 = vpop.permute.xlu0 %3503  ;;  %v3992_v59 = vsel %vm3955_vm11, %v10862_v26, %v3991_v29  ;;  %v3289_v6 = vsel %vm3028_vm12, %v3212_v3, 0  ;;  %v2607_v60 = vld [vmem:[#allocation4 + $0x598] sm:$0xff] }
 0x211   : > { %v3550_v33 = vrot.slane %v11048_v57, 4  ;;  %6805 = vmatpush1.bf16.msra.mxu1 %v8055_v16  ;;  %v4069_v15 = vsel %vm3808_vm4, %v3992_v59, 0  ;;  %v2056_v16 = vld [vmem:[#allocation4 + $0x390] sm:$0xff]  ;;  %vm12710_vm4 = vcmask 252928   ;;  %v886_v21 = vld [vmem:[#allocation4 + $0x98] sm:$0xff] }
 0x212   : > { %v3993_v32 = vsel %vm1063_vm10, %v3940_v58, %v3941_v36  ;;  %2187 = vrot.lane.b32.xlu1 %v2031_v31, %s8748_s20  ;;  %1797 = vrot.lane.b32.xlu0 %v2031_v31, %s8747_s19  ;;  %v8314_v2 = vcombine.high %v4069_v15, %v4069_v15  ;;  %v8313_v26 = vcombine.low %v4069_v15, %v4069_v15  ;;  %v2446_v58 = vld [vmem:[#allocation4 + $0x498] sm:$0xff]  ;;  %v885_v15 = vld [vmem:[#allocation4 + $0x90] sm:$0xff]  ;;  %vm2088_vm12 = vcmp.ne.bf16.partialorder %v2056_v16, 0 }
 0x213   : > { %v3601_v61 = vsel %vm1063_vm10, %v3549_v4, %v3550_v33  ;;  %v11065_v20 = vpop.permute.xlu1 %3115  ;;  %v3994_v0 = vsel %vm3955_vm11, %v3894_v43, %v3993_v32  ;;  %vm2478_vm5 = vcmp.ne.bf16.partialorder %v2446_v58, 0  ;;  %vm917_vm14 = vcmp.ne.bf16.partialorder %v885_v15, 0  ;;  %v1277_v58 = vld [vmem:[#allocation4 + $0x198] sm:$0xff] }
 0x214   : > { %v3161_v41 = vrot.slane %v11065_v20, 4  ;;  %8377 = vmatprep.subr.msk.bf16.mxu0 %vm1063_vm10, %v8314_v2  ;;  %v11070_v47 = vpop.permute.xlu0 %2723  ;;  %v5976_v5 = vsel %vm1063_vm10, %v8313_v26, 0  ;;  %v3602_v37 = vsel %vm3565_vm15, %v10914_v22, %v3601_v61  ;;  %v4070_v4 = vsel %vm3809_vm2, %v3994_v0, 0  ;;  %8376 = vmatmul.mubr.msk.bf16.vlgmr.msra.gmra.mxu1 %vm5862_vm0, %v10653_v12  ;;  %v1276_v61 = vld [vmem:[#allocation4 + $0x190] sm:$0xff] }
 0x215   : > { %v2770_v9 = vrot.slane %v11070_v47, 4  ;;  %6840 = vmatpush1.bf16.msra.mxu0 %v5976_v5  ;;  %v3679_v51 = vsel %vm3418_vm1, %v3602_v37, 0  ;;  %v8316_v53 = vcombine.high %v4070_v4, %v4070_v4  ;;  %v8315_v13 = vcombine.low %v4070_v4, %v4070_v4  ;;  %6908 = vmatprep.mubr.bf16.mxu1 %v12628_v35 }
 0x216   : > { %v3213_v22 = vsel %vm1063_vm10, %v3160_v8, %v3161_v41  ;;  %1407 = vrot.lane.b32.xlu1 %v2031_v31, %s8750_s28  ;;  %1016 = vrot.lane.b32.xlu0 %v2031_v31, %s8749_s26  ;;  %v8249_v12 = vcombine.low %v3289_v6, %v3679_v51  ;;  %v8250_v28 = vcombine.high %v3289_v6, %v3679_v51  ;;  %vm2639_vm2 = vcmp.ne.bf16.partialorder %v2607_v60, 0 }
 0x217   : > { %v2821_v24 = vsel %vm1063_vm10, %v2769_v23, %v2770_v9  ;;  %8379 = vmatprep.subr.msk.bf16.mxu1 %vm1063_vm10, %v8316_v53  ;;  %v5982_v56 = vsel %vm1063_vm10, %v8315_v13, 0  ;;  %v3214_v63 = vsel %vm3175_vm13, %v11027_v10, %v3213_v22  ;;  %v2510_v26 = vsel %vm2478_vm5, %v2414_v55, 0  ;;  %v11164_v22 = vld [vmem:[#allocation2 + $0xd8] sm:$0xff] }
 0x218   : > { %v11094_v42 = vpop.permute.xlu1 %1783  ;;  %6841 = vmatprep.subr.bf16.mxu0 %v8250_v28  ;;  %v11096_v11 = vpop.permute.xlu0 %3505  ;;  %6883 = vmatpush1.bf16.msra.mxu1 %v5982_v56  ;;  %v2822_v17 = vsel %vm2785_vm3, %v10936_v1, %v2821_v24  ;;  %v3290_v31 = vsel %vm3029_vm7, %v3214_v63, 0  ;;  %vm12711_vm1 = vcmask 7168   ;;  %v2057_v28 = vld [vmem:[#allocation4 + $0x398] sm:$0xff]  ;;  %vm12712_vm7 = vcmask 269312  }
 0x219   : > { %v1830_v23 = vrot.slane %v11094_v42, 4  ;;  %v3551_v8 = vrot.slane %v11096_v11, 4  ;;  %6842 = vmatpush1.bf16.msra.mxu0 %v8249_v12  ;;  %v2899_v43 = vsel %vm2638_vm6, %v2822_v17, 0  ;;  %vm1308_vm6 = vcmp.ne.bf16.partialorder %v1276_v61, 0  ;;  %v1667_v12 = vld [vmem:[#allocation4 + $0x298] sm:$0xff]  ;;  %v2998_v61 = vld [vmem:[#allocation4 + $0x6a0] sm:$0xff] }
 0x21a   : > { %3129 = vrot.lane.b32.xlu1 %v2972_v52, %s8744_s17  ;;  %3909 = vrot.lane.b32.xlu0 %v2972_v52, %s8743_s16  ;;  %v8185_v62 = vcombine.low %v2509_v50, %v2899_v43  ;;  %v8186_v7 = vcombine.high %v2509_v50, %v2899_v43  ;;  %vm2089_vm5 = vcmp.ne.bf16.partialorder %v2057_v28, 0 }
 0x21b   : > { %v1881_v1 = vsel %vm1063_vm10, %v1829_v30, %v1830_v23  ;;  %v3603_v10 = vsel %vm1063_vm10, %v3550_v33, %v3551_v8 }
 0x21c   : > { %v11119_v19 = vpop.permute.xlu1 %2725  ;;  %6843 = vmatprep.subr.bf16.mxu0 %v8186_v7  ;;  %v11121_v29 = vpop.permute.xlu0 %2173  ;;  %v3604_v30 = vsel %vm3565_vm15, %v11048_v57, %v3603_v10  ;;  %v1882_v33 = vsel %vm12710_vm4, %v10989_v48, %v1881_v1 }
 0x21d   : > { %v2771_v59 = vrot.slane %v11119_v19, 4  ;;  %v2220_v3 = vrot.slane %v11121_v29, 4  ;;  %6844 = vmatpush1.bf16.msra.mxu0 %v8185_v62  ;;  %v3680_v38 = vsel %vm3419_vm8, %v3604_v30, 0  ;;  %v1959_v49 = vsel %vm1698_vm9, %v1882_v33, 0 }
 0x21e   : > { %3911 = vrot.lane.b32.xlu1 %v11117_v39, %s8743_s16  ;;  %3519 = vrot.lane.b32.xlu0 %v2972_v52, %s8745_s14  ;;  %v8251_v57 = vcombine.low %v3290_v31, %v3680_v38  ;;  %v8252_v32 = vcombine.high %v3290_v31, %v3680_v38  ;;  %vm12713_vm8 = vcmask 261120   ;;  %vm1699_vm9 = vcmp.ne.bf16.partialorder %v1667_v12, 0 }
 0x21f   : > { %v2823_v2 = vsel %vm1063_vm10, %v2770_v9, %v2771_v59  ;;  %v2271_v48 = vsel %vm1063_vm10, %v2219_v44, %v2220_v3 }
 0x220   : > { %v11142_v6 = vpop.permute.xlu1 %1393  ;;  %6884 = vmatprep.subr.bf16.mxu1 %v8252_v32  ;;  %v11144_v0 = vpop.permute.xlu0 %1002  ;;  %v2272_v5 = vsel %vm12711_vm1, %v10984_v25, %v2271_v48  ;;  %v2824_v37 = vsel %vm2785_vm3, %v11070_v47, %v2823_v2 }
 0x221   : > { %v1440_v4 = vrot.slane %v11142_v6, 4  ;;  %v1049_v44 = vrot.slane %v11144_v0, 4  ;;  %6885 = vmatpush1.bf16.msra.mxu1 %v8251_v57  ;;  %v2349_v34 = vsel %vm2088_vm12, %v2272_v5, 0  ;;  %v2900_v9 = vsel %vm2639_vm2, %v2824_v37, 0  ;;  %vm12714_vm12 = vmmov %vm12711_vm1  ;;  %v11216_v57 = vld [vmem:[#allocation7] sm:$0xff]   ;;  %v2033_v37 = vld [vmem:[#allocation2 + $0xe0] sm:$0xff] }
 0x222   : > { %3131 = vrot.lane.b32.xlu1 %v11117_v39, %s8744_s17  ;;  %2739 = vrot.lane.b32.xlu0 %v2972_v52, %s8746_s18  ;;  %v8121_v51 = vcombine.low %v1959_v49, %v2349_v34  ;;  %v8122_v25 = vcombine.high %v1959_v49, %v2349_v34  ;;  %v8187_v53 = vcombine.low %v2510_v26, %v2900_v9  ;;  %vm918_vm2 = vcmp.ne.bf16.partialorder %v886_v21, 0  ;;  %v2999_v21 = vld [vmem:[#allocation4 + $0x6a8] sm:$0xff] }
 0x223   : > { %v1491_v47 = vsel %vm1063_vm10, %v1439_v18, %v1440_v4  ;;  %v1101_v13 = vsel %vm1063_vm10, %v1048_v27, %v1049_v44  ;;  %v8188_v54 = vcombine.high %v2510_v26, %v2900_v9  ;;  %vm1309_vm1 = vcmp.ne.bf16.partialorder %v1277_v58, 0 }
 0x224   : > { %v11166_v24 = vpop.permute.xlu1 %2175  ;;  %6845 = vmatprep.subr.bf16.mxu0 %v8122_v25  ;;  %v11168_v56 = vpop.permute.xlu0 %1785  ;;  %v1102_v52 = vsel %vm12712_vm7, %v11012_v40, %v1101_v13  ;;  %v1492_v18 = vsel %vm12713_vm8, %v11007_v46, %v1491_v47  ;;  %v2608_v25 = vld [vmem:[#allocation4 + $0x5a0] sm:$0xff] }
 0x225   : > { %v2221_v50 = vrot.slane %v11166_v24, 4  ;;  %6886 = vmatprep.subr.bf16.mxu1 %v8188_v54  ;;  %v1831_v27 = vrot.slane %v11168_v56, 4  ;;  %6846 = vmatpush1.bf16.msra.mxu0 %v8121_v51  ;;  %v1179_v45 = vsel %vm917_vm14, %v1102_v52, 0  ;;  %v1569_v17 = vsel %vm1308_vm6, %v1492_v18, 0  ;;  %vm12715_vm14 = vmmov %vm12712_vm7 }
 0x226   : > { %6887 = vmatpush1.bf16.msra.mxu1 %v8187_v53  ;;  %1799 = vrot.lane.b32.xlu1 %v11164_v22, %s8747_s19  ;;  %v8057_v43 = vcombine.low %v1179_v45, %v1569_v17  ;;  %v8058_v63 = vcombine.high %v1179_v45, %v1569_v17  ;;  %vm12716_vm6 = vmmov %vm12713_vm8  ;;  %vm3030_vm8 = vcmp.ne.bf16.partialorder %v2998_v61, 0 }
 0x227   : > { %v2273_v46 = vsel %vm1063_vm10, %v2220_v3, %v2221_v50  ;;  %v1883_v40 = vsel %vm1063_vm10, %v1830_v23, %v1831_v27  ;;  %3521 = vrot.lane.b32.xlu0 %v11117_v39, %s8745_s14  ;;  %v3778_v3 = vld [vmem:[#allocation4 + $0x8a0] sm:$0xff] }
 0x228   : > { %v11190_v62 = vpop.permute.xlu1 %1395  ;;  %6847 = vmatprep.subr.bf16.mxu0 %v8058_v63  ;;  %v11192_v7 = vpop.permute.xlu0 %1004  ;;  %v1884_v1 = vsel %vm12710_vm4, %v11094_v42, %v1883_v40  ;;  %v2274_v10 = vsel %vm12714_vm12, %v11121_v29, %v2273_v46  ;;  %vm3810_vm7 = vcmp.ne.bf16.partialorder %v3778_v3, 0  ;;  %vm2640_vm12 = vcmp.ne.bf16.partialorder %v2608_v25, 0 }
 0x229   : > { %v1441_v16 = vrot.slane %v11190_v62, 4  ;;  %v1050_v23 = vrot.slane %v11192_v7, 4  ;;  %6848 = vmatpush1.bf16.msra.mxu0 %v8057_v43  ;;  %v1960_v60 = vsel %vm1699_vm9, %v1884_v1, 0  ;;  %v2350_v31 = vsel %vm2089_vm5, %v2274_v10, 0 }
 0x22a   : > { %2741 = vrot.lane.b32.xlu1 %v11117_v39, %s8746_s18  ;;  %v8123_v30 = vcombine.low %v1960_v60, %v2350_v31  ;;  %v8124_v55 = vcombine.high %v1960_v60, %v2350_v31 }
 0x22b   : > { %v1493_v42 = vsel %vm1063_vm10, %v1440_v4, %v1441_v16  ;;  %v1103_v29 = vsel %vm1063_vm10, %v1049_v44, %v1050_v23  ;;  %2189 = vrot.lane.b32.xlu0 %v11164_v22, %s8748_s20  ;;  %v3388_v4 = vld [vmem:[#allocation4 + $0x7a0] sm:$0xff]  ;;  %v3779_v44 = vld [vmem:[#allocation4 + $0x8a8] sm:$0xff] }
 0x22c   : > { %v11210_v38 = vpop.permute.xlu1 %3117  ;;  %6888 = vmatprep.subr.bf16.mxu1 %v8124_v55  ;;  %v3898_v39 = vpop.permute.xlu0 %3897  ;;  %v1104_v33 = vsel %vm12715_vm14, %v11144_v0, %v1103_v29  ;;  %v1494_v15 = vsel %vm12716_vm6, %v11142_v6, %v1493_v42  ;;  %8378 = vmatmul.mubr.msk.bf16.vlgmr.msra.gmra.mxu0 %vm5862_vm0, %v11216_v57  ;;  %vm3420_vm9 = vcmp.ne.bf16.partialorder %v3388_v4, 0  ;;  %vm3811_vm5 = vcmp.ne.bf16.partialorder %v3779_v44, 0  ;;  %v3389_v42 = vld [vmem:[#allocation4 + $0x7a8] sm:$0xff] }
 0x22d   : > { %v3162_v32 = vrot.slane %v11210_v38, 4  ;;  %v3942_v2 = vrot.slane %v3898_v39, 4  ;;  %6889 = vmatpush1.bf16.msra.mxu1 %v8123_v30  ;;  %v1180_v48 = vsel %vm918_vm2, %v1104_v33, 0  ;;  %v1570_v26 = vsel %vm1309_vm1, %v1494_v15, 0  ;;  %6951 = vmatprep.mubr.bf16.mxu0 %v12628_v35  ;;  %v11280_v30 = vld [vmem:[#allocation2 + $0xec] sm:$0xff] }
 0x22e   : > { %1409 = vrot.lane.b32.xlu1 %v11164_v22, %s8750_s28  ;;  %v8059_v6 = vcombine.low %v1180_v48, %v1570_v26  ;;  %v8060_v0 = vcombine.high %v1180_v48, %v1570_v26  ;;  %vm3031_vm2 = vcmp.ne.bf16.partialorder %v2999_v21, 0  ;;  %v1668_v48 = vld [vmem:[#allocation4 + $0x2a0] sm:$0xff]  ;;  %v2448_v26 = vld [vmem:[#allocation4 + $0x4a8] sm:$0xff]  ;;  %vm3421_vm1 = vcmp.ne.bf16.partialorder %v3389_v42, 0 }
 0x22f   : > { %v3215_v49 = vsel %vm1063_vm10, %v3161_v41, %v3162_v32  ;;  %v3995_v5 = vsel %vm1063_vm10, %v3941_v36, %v3942_v2  ;;  %1018 = vrot.lane.b32.xlu0 %v11164_v22, %s8749_s26  ;;  %v2447_v41 = vld [vmem:[#allocation4 + $0x4a0] sm:$0xff]  ;;  %vm1700_vm14 = vcmp.ne.bf16.partialorder %v1668_v48, 0  ;;  %vm2480_vm6 = vcmp.ne.bf16.partialorder %v2448_v26, 0  ;;  %v888_v26 = vld [vmem:[#allocation4 + $0xa8] sm:$0xff] }
 0x230   : > { %v11234_v34 = vpop.permute.xlu1 %3899  ;;  %6890 = vmatprep.subr.bf16.mxu1 %v8060_v0  ;;  %v11236_v9 = vpop.permute.xlu0 %3507  ;;  %v3996_v51 = vsel %vm3955_vm11, %v11045_v14, %v3995_v5  ;;  %v3216_v13 = vsel %vm3175_vm13, %v11065_v20, %v3215_v49  ;;  %vm2479_vm4 = vcmp.ne.bf16.partialorder %v2447_v41, 0  ;;  %v2058_v49 = vld [vmem:[#allocation4 + $0x3a0] sm:$0xff]  ;;  %v2609_v5 = vld [vmem:[#allocation4 + $0x5a8] sm:$0xff] }
 0x231   : > { %v3943_v53 = vrot.slane %v11234_v34, 4  ;;  %v3552_v36 = vrot.slane %v11236_v9, 4  ;;  %6891 = vmatpush1.bf16.msra.mxu1 %v8059_v6  ;;  %v4071_v47 = vsel %vm3810_vm7, %v3996_v51, 0  ;;  %v3291_v18 = vsel %vm3030_vm8, %v3216_v13, 0  ;;  %v2416_v51 = vld [vmem:[#allocation2 + $0xac] sm:$0xff] }
 0x232   : > { %2191 = vrot.lane.b32.xlu1 %v2033_v37, %s8748_s20  ;;  %v8318_v54 = vcombine.high %v4071_v47, %v4071_v47  ;;  %v8317_v22 = vcombine.low %v4071_v47, %v4071_v47  ;;  %v887_v41 = vld [vmem:[#allocation4 + $0xa0] sm:$0xff]  ;;  %vm12717_vm7 = vcmask 252928   ;;  %vm2090_vm8 = vcmp.ne.bf16.partialorder %v2058_v49, 0 }
 0x233   : > { %v3997_v14 = vsel %vm1063_vm10, %v3942_v2, %v3943_v53  ;;  %v3605_v12 = vsel %vm1063_vm10, %v3551_v8, %v3552_v36  ;;  %1801 = vrot.lane.b32.xlu0 %v2033_v37, %s8747_s19  ;;  %v2415_v8 = vld [vmem:[#allocation2 + $0xa4] sm:$0xff] }
 0x234   : > { %v11253_v28 = vpop.permute.xlu1 %3119  ;;  %8381 = vmatprep.subr.msk.bf16.mxu0 %vm1063_vm10, %v8318_v54  ;;  %v11256_v20 = vpop.permute.xlu0 %2727  ;;  %v5988_v52 = vsel %vm1063_vm10, %v8317_v22, 0  ;;  %v3606_v45 = vsel %vm3565_vm15, %v11096_v11, %v3605_v12  ;;  %v3998_v17 = vsel %vm3955_vm11, %v3898_v39, %v3997_v14  ;;  %8380 = vmatmul.mubr.msk.bf16.vlgmr.msra.gmra.mxu1 %vm5862_vm0, %v11216_v57  ;;  %v2511_v55 = vsel %vm2479_vm4, %v2415_v8, 0  ;;  %v1278_v54 = vld [vmem:[#allocation4 + $0x1a0] sm:$0xff] }
 0x235   : > { %v3163_v43 = vrot.slane %v11253_v28, 4  ;;  %v2772_v63 = vrot.slane %v11256_v20, 4  ;;  %6926 = vmatpush1.bf16.msra.mxu0 %v5988_v52  ;;  %v3681_v46 = vsel %vm3420_vm9, %v3606_v45, 0  ;;  %v4072_v40 = vsel %vm3811_vm5, %v3998_v17, 0  ;;  %6994 = vmatprep.mubr.bf16.mxu1 %v12628_v35 }
 0x236   : > { %1411 = vrot.lane.b32.xlu1 %v2033_v37, %s8750_s28  ;;  %v8253_v11 = vcombine.low %v3291_v18, %v3681_v46  ;;  %v8254_v58 = vcombine.high %v3291_v18, %v3681_v46  ;;  %v8320_v1 = vcombine.high %v4072_v40, %v4072_v40  ;;  %v8319_v10 = vcombine.low %v4072_v40, %v4072_v40 }
 0x237   : > { %v3217_v60 = vsel %vm1063_vm10, %v3162_v32, %v3163_v43  ;;  %v2825_v31 = vsel %vm1063_vm10, %v2771_v59, %v2772_v63  ;;  %1020 = vrot.lane.b32.xlu0 %v2033_v37, %s8749_s26  ;;  %vm2641_vm9 = vcmp.ne.bf16.partialorder %v2609_v5, 0  ;;  %vm919_vm5 = vcmp.ne.bf16.partialorder %v887_v41, 0 }
 0x238   : > { %v11283_v29 = vpop.permute.xlu1 %1787  ;;  %6927 = vmatprep.subr.bf16.mxu0 %v8254_v58  ;;  %8383 = vmatprep.subr.msk.bf16.mxu1 %vm1063_vm10, %v8320_v1  ;;  %v11286_v3 = vpop.permute.xlu0 %3509  ;;  %v5994_v39 = vsel %vm1063_vm10, %v8319_v10, 0  ;;  %v2826_v33 = vsel %vm2785_vm3, %v11119_v19, %v2825_v31  ;;  %v3218_v2 = vsel %vm3175_vm13, %v11210_v38, %v3217_v60  ;;  %v11308_v38 = vld [vmem:[#allocation2 + $0xf4] sm:$0xff]  ;;  %vm12718_vm4 = vcmask 7168   ;;  %v11358_v10 = vld [vmem:[#allocation2 + $0xe8] sm:$0xff] }
 0x239   : > { %v1832_v59 = vrot.slane %v11283_v29, 4  ;;  %v3553_v15 = vrot.slane %v11286_v3, 4  ;;  %6928 = vmatpush1.bf16.msra.mxu0 %v8253_v11  ;;  %6969 = vmatpush1.bf16.msra.mxu1 %v5994_v39  ;;  %v2901_v32 = vsel %vm2640_vm12, %v2826_v33, 0  ;;  %v3292_v44 = vsel %vm3031_vm2, %v3218_v2, 0  ;;  %v1669_v60 = vld [vmem:[#allocation4 + $0x2a8] sm:$0xff] }
 0x23a   : > { %3133 = vrot.lane.b32.xlu1 %v11280_v30, %s8744_s17  ;;  %v8189_v61 = vcombine.low %v2511_v55, %v2901_v32  ;;  %v8190_v6 = vcombine.high %v2511_v55, %v2901_v32  ;;  %vm1310_vm12 = vcmp.ne.bf16.partialorder %v1278_v54, 0  ;;  %v2059_v31 = vld [vmem:[#allocation4 + $0x3a8] sm:$0xff]  ;;  %vm12719_vm2 = vcmask 269312  }
 0x23b   : > { %v1885_v19 = vsel %vm1063_vm10, %v1831_v27, %v1832_v59  ;;  %v3607_v0 = vsel %vm1063_vm10, %v3552_v36, %v3553_v15  ;;  %3913 = vrot.lane.b32.xlu0 %v11280_v30, %s8743_s16 }
 0x23c   : > { %v11310_v37 = vpop.permute.xlu1 %2729  ;;  %6929 = vmatprep.subr.bf16.mxu0 %v8190_v6  ;;  %v11312_v4 = vpop.permute.xlu0 %2177  ;;  %v3608_v27 = vsel %vm3565_vm15, %v11236_v9, %v3607_v0  ;;  %v1886_v13 = vsel %vm12717_vm7, %v11168_v56, %v1885_v19  ;;  %v2512_v56 = vsel %vm2480_vm6, %v2416_v51, 0  ;;  %vm2091_vm6 = vcmp.ne.bf16.partialorder %v2059_v31, 0 }
 0x23d   : > { %v2773_v25 = vrot.slane %v11310_v37, 4  ;;  %v2222_v36 = vrot.slane %v11312_v4, 4  ;;  %6930 = vmatpush1.bf16.msra.mxu0 %v8189_v61  ;;  %v3682_v47 = vsel %vm3421_vm1, %v3608_v27, 0  ;;  %v1961_v45 = vsel %vm1700_vm14, %v1886_v13, 0  ;;  %v1279_v61 = vld [vmem:[#allocation4 + $0x1a8] sm:$0xff] }
 0x23e   : > { %3915 = vrot.lane.b32.xlu1 %v11308_v38, %s8743_s16  ;;  %v8255_v22 = vcombine.low %v3292_v44, %v3682_v47  ;;  %v8256_v9 = vcombine.high %v3292_v44, %v3682_v47  ;;  %vm12720_vm1 = vcmask 261120   ;;  %vm1701_vm14 = vcmp.ne.bf16.partialorder %v1669_v60, 0 }
 0x23f   : > { %v2827_v14 = vsel %vm1063_vm10, %v2772_v63, %v2773_v25  ;;  %v2275_v12 = vsel %vm1063_vm10, %v2221_v50, %v2222_v36  ;;  %3523 = vrot.lane.b32.xlu0 %v11280_v30, %s8745_s14 }
 0x240   : > { %v11335_v52 = vpop.permute.xlu1 %1397  ;;  %6970 = vmatprep.subr.bf16.mxu1 %v8256_v9  ;;  %v11337_v18 = vpop.permute.xlu0 %1006  ;;  %v2276_v17 = vsel %vm12718_vm4, %v11166_v24, %v2275_v12  ;;  %v2828_v8 = vsel %vm2785_vm3, %v11256_v20, %v2827_v14 }
 0x241   : > { %v1442_v50 = vrot.slane %v11335_v52, 4  ;;  %v1051_v63 = vrot.slane %v11337_v18, 4  ;;  %6971 = vmatpush1.bf16.msra.mxu1 %v8255_v22  ;;  %v2351_v46 = vsel %vm2090_vm8, %v2276_v17, 0  ;;  %v2902_v40 = vsel %vm2641_vm9, %v2828_v8, 0  ;;  %vm12721_vm8 = vmmov %vm12718_vm4  ;;  %v2035_v8 = vld [vmem:[#allocation2 + $0xf0] sm:$0xff] }
 0x242   : > { %3135 = vrot.lane.b32.xlu1 %v11308_v38, %s8744_s17  ;;  %v8125_v21 = vcombine.low %v1961_v45, %v2351_v46  ;;  %v8126_v11 = vcombine.high %v1961_v45, %v2351_v46  ;;  %v8191_v58 = vcombine.low %v2512_v56, %v2902_v40  ;;  %v8192_v24 = vcombine.high %v2512_v56, %v2902_v40  ;;  %vm12722_vm4 = vmmov %vm12719_vm2  ;;  %v3000_v56 = vld [vmem:[#allocation4 + $0x6b0] sm:$0xff] }
 0x243   : > { %v1495_v20 = vsel %vm1063_vm10, %v1441_v16, %v1442_v50  ;;  %v1105_v1 = vsel %vm1063_vm10, %v1050_v23, %v1051_v63  ;;  %2743 = vrot.lane.b32.xlu0 %v11280_v30, %s8746_s18  ;;  %vm920_vm9 = vcmp.ne.bf16.partialorder %v888_v26, 0  ;;  %v3001_v26 = vld [vmem:[#allocation4 + $0x6b8] sm:$0xff] }
 0x244   : > { %v11360_v55 = vpop.permute.xlu1 %2179  ;;  %6931 = vmatprep.subr.bf16.mxu0 %v8126_v11  ;;  %6972 = vmatprep.subr.bf16.mxu1 %v8192_v24  ;;  %v11362_v42 = vpop.permute.xlu0 %1789  ;;  %v1106_v16 = vsel %vm12719_vm2, %v11192_v7, %v1105_v1  ;;  %v1496_v39 = vsel %vm12720_vm1, %v11190_v62, %v1495_v20  ;;  %v2610_v11 = vld [vmem:[#allocation4 + $0x5b0] sm:$0xff] }
 0x245   : > { %v2223_v23 = vrot.slane %v11360_v55, 4  ;;  %v1833_v30 = vrot.slane %v11362_v42, 4  ;;  %6932 = vmatpush1.bf16.msra.mxu0 %v8125_v21  ;;  %6973 = vmatpush1.bf16.msra.mxu1 %v8191_v58  ;;  %v1181_v33 = vsel %vm919_vm5, %v1106_v16, 0  ;;  %v1571_v32 = vsel %vm1310_vm12, %v1496_v39, 0  ;;  %vm12723_vm12 = vmmov %vm12720_vm1 }
 0x246   : > { %1803 = vrot.lane.b32.xlu1 %v11358_v10, %s8747_s19  ;;  %v8061_v2 = vcombine.low %v1181_v33, %v1571_v32  ;;  %v8062_v48 = vcombine.high %v1181_v33, %v1571_v32  ;;  %vm1311_vm5 = vcmp.ne.bf16.partialorder %v1279_v61, 0  ;;  %vm3032_vm1 = vcmp.ne.bf16.partialorder %v3000_v56, 0 }
 0x247   : > { %v2277_v62 = vsel %vm1063_vm10, %v2222_v36, %v2223_v23  ;;  %v1887_v7 = vsel %vm1063_vm10, %v1832_v59, %v1833_v30  ;;  %3525 = vrot.lane.b32.xlu0 %v11308_v38, %s8745_s14  ;;  %v3780_v36 = vld [vmem:[#allocation4 + $0x8b0] sm:$0xff] }
 0x248   : > { %v11384_v6 = vpop.permute.xlu1 %1399  ;;  %6933 = vmatprep.subr.bf16.mxu0 %v8062_v48  ;;  %v11386_v19 = vpop.permute.xlu0 %1008  ;;  %v1888_v0 = vsel %vm12717_vm7, %v11283_v29, %v1887_v7  ;;  %v2278_v49 = vsel %vm12721_vm8, %v11312_v4, %v2277_v62  ;;  %vm3812_vm2 = vcmp.ne.bf16.partialorder %v3780_v36, 0  ;;  %vm2642_vm8 = vcmp.ne.bf16.partialorder %v2610_v11, 0 }
 0x249   : > { %v1443_v5 = vrot.slane %v11384_v6, 4  ;;  %v1052_v59 = vrot.slane %v11386_v19, 4  ;;  %6934 = vmatpush1.bf16.msra.mxu0 %v8061_v2  ;;  %v1962_v44 = vsel %vm1701_vm14, %v1888_v0, 0  ;;  %v2352_v27 = vsel %vm2091_vm6, %v2278_v49, 0 }
 0x24a   : > { %2745 = vrot.lane.b32.xlu1 %v11308_v38, %s8746_s18  ;;  %v8127_v51 = vcombine.low %v1962_v44, %v2352_v27  ;;  %v8128_v41 = vcombine.high %v1962_v44, %v2352_v27 }
 0x24b   : > { %v1497_v29 = vsel %vm1063_vm10, %v1442_v50, %v1443_v5  ;;  %v1107_v4 = vsel %vm1063_vm10, %v1051_v63, %v1052_v59  ;;  %2193 = vrot.lane.b32.xlu0 %v11358_v10, %s8748_s20  ;;  %v3390_v50 = vld [vmem:[#allocation4 + $0x7b0] sm:$0xff]  ;;  %v3781_v63 = vld [vmem:[#allocation4 + $0x8b8] sm:$0xff] }
 0x24c   : > { %v11404_v47 = vpop.permute.xlu1 %3121  ;;  %6974 = vmatprep.subr.bf16.mxu1 %v8128_v41  ;;  %v3902_v38 = vpop.permute.xlu0 %3901  ;;  %v1108_v13 = vsel %vm12722_vm4, %v11337_v18, %v1107_v4  ;;  %v1498_v54 = vsel %vm12723_vm12, %v11335_v52, %v1497_v29  ;;  %8382 = vmatmul.mubr.msk.bf16.vlgmr.msra.gmra.mxu0 %vm5862_vm0, %v11216_v57  ;;  %vm3422_vm14 = vcmp.ne.bf16.partialorder %v3390_v50, 0  ;;  %vm3813_vm6 = vcmp.ne.bf16.partialorder %v3781_v63, 0  ;;  %v3391_v29 = vld [vmem:[#allocation4 + $0x7b8] sm:$0xff] }
 0x24d   : > { %v3164_v22 = vrot.slane %v11404_v47, 4  ;;  %v3944_v9 = vrot.slane %v3902_v38, 4  ;;  %6975 = vmatpush1.bf16.msra.mxu1 %v8127_v51  ;;  %v1182_v14 = vsel %vm920_vm9, %v1108_v13, 0  ;;  %v1572_v12 = vsel %vm1311_vm5, %v1498_v54, 0  ;;  %7037 = vmatprep.mubr.bf16.mxu0 %v12628_v35  ;;  %v11470_v51 = vld [vmem:[#allocation2 + $0xfc] sm:$0xff] }
 0x24e   : > { %1413 = vrot.lane.b32.xlu1 %v11358_v10, %s8750_s28  ;;  %v8063_v45 = vcombine.low %v1182_v14, %v1572_v12  ;;  %v8064_v18 = vcombine.high %v1182_v14, %v1572_v12  ;;  %vm3033_vm9 = vcmp.ne.bf16.partialorder %v3001_v26, 0  ;;  %v1670_v14 = vld [vmem:[#allocation4 + $0x2b0] sm:$0xff]  ;;  %v2450_v12 = vld [vmem:[#allocation4 + $0x4b8] sm:$0xff]  ;;  %vm3423_vm5 = vcmp.ne.bf16.partialorder %v3391_v29, 0 }
 0x24f   : > { %v3219_v52 = vsel %vm1063_vm10, %v3163_v43, %v3164_v22  ;;  %v3999_v17 = vsel %vm1063_vm10, %v3943_v53, %v3944_v9  ;;  %1022 = vrot.lane.b32.xlu0 %v11358_v10, %s8749_s26  ;;  %v2449_v43 = vld [vmem:[#allocation4 + $0x4b0] sm:$0xff]  ;;  %vm1702_vm4 = vcmp.ne.bf16.partialorder %v1670_v14, 0  ;;  %vm2482_vm12 = vcmp.ne.bf16.partialorder %v2450_v12, 0 }
 0x250   : > { %v11424_v46 = vpop.permute.xlu1 %3903  ;;  %6976 = vmatprep.subr.bf16.mxu1 %v8064_v18  ;;  %v11426_v40 = vpop.permute.xlu0 %3511  ;;  %v4000_v21 = vsel %vm3955_vm11, %v11234_v34, %v3999_v17  ;;  %v3220_v20 = vsel %vm3175_vm13, %v11253_v28, %v3219_v52  ;;  %vm2481_vm7 = vcmp.ne.bf16.partialorder %v2449_v43, 0  ;;  %v2060_v52 = vld [vmem:[#allocation4 + $0x3b0] sm:$0xff]  ;;  %v2611_v17 = vld [vmem:[#allocation4 + $0x5b8] sm:$0xff] }
 0x251   : > { %v3945_v58 = vrot.slane %v11424_v46, 4  ;;  %v3554_v53 = vrot.slane %v11426_v40, 4  ;;  %6977 = vmatpush1.bf16.msra.mxu1 %v8063_v45  ;;  %v4073_v24 = vsel %vm3812_vm2, %v4000_v21, 0  ;;  %v3293_v33 = vsel %vm3032_vm1, %v3220_v20, 0  ;;  %v2418_v21 = vld [vmem:[#allocation2 + $0xbc] sm:$0xff] }
 0x252   : > { %2195 = vrot.lane.b32.xlu1 %v2035_v8, %s8748_s20  ;;  %v8322_v1 = vcombine.high %v4073_v24, %v4073_v24  ;;  %v8321_v10 = vcombine.low %v4073_v24, %v4073_v24  ;;  %v889_v43 = vld [vmem:[#allocation4 + $0xb0] sm:$0xff]  ;;  %vm12724_vm2 = vcmask 252928   ;;  %vm2092_vm1 = vcmp.ne.bf16.partialorder %v2060_v52, 0 }
 0x253   : > { %v4001_v34 = vsel %vm1063_vm10, %v3944_v9, %v3945_v58  ;;  %v3609_v60 = vsel %vm1063_vm10, %v3553_v15, %v3554_v53  ;;  %1805 = vrot.lane.b32.xlu0 %v2035_v8, %s8747_s19  ;;  %v2417_v15 = vld [vmem:[#allocation2 + $0xb4] sm:$0xff] }
 0x254   : > { %v4002_v28 = vsel %vm3955_vm11, %v3902_v38, %v4001_v34  ;;  %v11444_v31 = vpop.permute.xlu1 %3123  ;;  %8385 = vmatprep.subr.msk.bf16.mxu0 %vm1063_vm10, %v8322_v1  ;;  %v11447_v16 = vpop.permute.xlu0 %2731  ;;  %v6000_v39 = vsel %vm1063_vm10, %v8321_v10, 0  ;;  %v3610_v32 = vsel %vm3565_vm15, %v11286_v3, %v3609_v60  ;;  %8384 = vmatmul.mubr.msk.bf16.vlgmr.msra.gmra.mxu1 %vm5862_vm0, %v11216_v57  ;;  %v2513_v41 = vsel %vm2481_vm7, %v2417_v15, 0  ;;  %v1280_v1 = vld [vmem:[#allocation4 + $0x1b0] sm:$0xff] }
 0x255   : > { %v3165_v2 = vrot.slane %v11444_v31, 4  ;;  %v2774_v48 = vrot.slane %v11447_v16, 4  ;;  %7012 = vmatpush1.bf16.msra.mxu0 %v6000_v39  ;;  %v3683_v62 = vsel %vm3422_vm14, %v3610_v32, 0  ;;  %v4074_v7 = vsel %vm3813_vm6, %v4002_v28, 0  ;;  %7080 = vmatprep.mubr.bf16.mxu1 %v12628_v35 }
 0x256   : > { %1415 = vrot.lane.b32.xlu1 %v2035_v8, %s8750_s28  ;;  %v8257_v61 = vcombine.low %v3293_v33, %v3683_v62  ;;  %v8258_v3 = vcombine.high %v3293_v33, %v3683_v62  ;;  %v8324_v0 = vcombine.high %v4074_v7, %v4074_v7  ;;  %v8323_v49 = vcombine.low %v4074_v7, %v4074_v7 }
 0x257   : > { %v3221_v44 = vsel %vm1063_vm10, %v3164_v22, %v3165_v2  ;;  %v2829_v27 = vsel %vm1063_vm10, %v2773_v25, %v2774_v48  ;;  %1024 = vrot.lane.b32.xlu0 %v2035_v8, %s8749_s26  ;;  %vm2643_vm14 = vcmp.ne.bf16.partialorder %v2611_v17, 0  ;;  %v2514_v28 = vsel %vm2482_vm12, %v2418_v21, 0 }
 0x258   : > { %v11473_v4 = vpop.permute.xlu1 %1791  ;;  %7013 = vmatprep.subr.bf16.mxu0 %v8258_v3  ;;  %8387 = vmatprep.subr.msk.bf16.mxu1 %vm1063_vm10, %v8324_v0  ;;  %v11476_v36 = vpop.permute.xlu0 %3513  ;;  %v6006_v38 = vsel %vm1063_vm10, %v8323_v49, 0  ;;  %v2830_v13 = vsel %vm2785_vm3, %v11310_v37, %v2829_v27  ;;  %v3222_v9 = vsel %vm3175_vm13, %v11404_v47, %v3221_v44  ;;  %v3757_v47 = vld [vmem:[#allocation2 + $0x104] sm:$0xf]  ;;  %vm921_vm6 = vcmp.ne.bf16.partialorder %v889_v43, 0  ;;  %v11544_v44 = vld [vmem:[#allocation2 + $0xf8] sm:$0xff] }
 0x259   : > { %v1834_v25 = vrot.slane %v11473_v4, 4  ;;  %v3555_v54 = vrot.slane %v11476_v36, 4  ;;  %7014 = vmatpush1.bf16.msra.mxu0 %v8257_v61  ;;  %7055 = vmatpush1.bf16.msra.mxu1 %v6006_v38  ;;  %v2903_v22 = vsel %vm2642_vm8, %v2830_v13, 0  ;;  %v3294_v63 = vsel %vm3033_vm9, %v3222_v9, 0  ;;  %v1671_v27 = vld [vmem:[#allocation4 + $0x2b8] sm:$0xff] }
 0x25a   : > { %3137 = vrot.lane.b32.xlu1 %v11470_v51, %s8744_s17  ;;  %v8193_v56 = vcombine.low %v2513_v41, %v2903_v22  ;;  %v8194_v45 = vcombine.high %v2513_v41, %v2903_v22  ;;  %vm12725_vm7 = vcmask 7168   ;;  %vm1312_vm8 = vcmp.ne.bf16.partialorder %v1280_v1, 0  ;;  %v2061_v41 = vld [vmem:[#allocation4 + $0x3b8] sm:$0xff] }
 0x25b   : > { %v1889_v37 = vsel %vm1063_vm10, %v1833_v30, %v1834_v25  ;;  %v3611_v18 = vsel %vm1063_vm10, %v3554_v53, %v3555_v54  ;;  %3917 = vrot.lane.b32.xlu0 %v11470_v51, %s8743_s16  ;;  %v3367_v13 = vld [vmem:[#allocation2 + $0x104] sm:$0xf]  ;;  %vm12726_vm9 = vcmask 269312   ;;  %vm2093_vm12 = vcmp.ne.bf16.partialorder %v2061_v41, 0 }
 0x25c   : > { %v11498_v8 = vpop.permute.xlu1 %2733  ;;  %7015 = vmatprep.subr.bf16.mxu0 %v8194_v45  ;;  %v11500_v50 = vpop.permute.xlu0 %2181  ;;  %v3612_v30 = vsel %vm3565_vm15, %v11426_v40, %v3611_v18  ;;  %v1890_v20 = vsel %vm12724_vm2, %v11362_v42, %v1889_v37  ;;  %v2977_v42 = vld [vmem:[#allocation2 + $0x104] sm:$0xf] }
 0x25d   : > { %v2775_v11 = vrot.slane %v11498_v8, 4  ;;  %v2224_v53 = vrot.slane %v11500_v50, 4  ;;  %7016 = vmatpush1.bf16.msra.mxu0 %v8193_v56  ;;  %v3684_v24 = vsel %vm3423_vm5, %v3612_v30, 0  ;;  %v1963_v32 = vsel %vm1702_vm4, %v1890_v20, 0  ;;  %v2587_v45 = vld [vmem:[#allocation2 + $0x104] sm:$0xf] }
 0x25e   : > { %3919 = vrot.lane.b32.xlu1 %v3757_v47, %s8743_s16  ;;  %v8259_v10 = vcombine.low %v3294_v63, %v3684_v24  ;;  %v8260_v34 = vcombine.high %v3294_v63, %v3684_v24  ;;  %vm12727_vm5 = vcmask 261120   ;;  %vm1703_vm4 = vcmp.ne.bf16.partialorder %v1671_v27, 0  ;;  %v890_v37 = vld [vmem:[#allocation4 + $0xb8] sm:$0xff]  ;;  %v3782_v20 = vld [vmem:[#allocation4 + $0x8c0] sm:$0xff]  ;;  %s304_s16 = scalar_lea.vmem [#allocation12], %s7973_s13 }
 0x25f   : > { %v2831_v40 = vsel %vm1063_vm10, %v2774_v48, %v2775_v11  ;;  %v2279_v60 = vsel %vm1063_vm10, %v2223_v23, %v2224_v53  ;;  %3527 = vrot.lane.b32.xlu0 %v11470_v51, %s8745_s14  ;;  %v1281_v18 = vld [vmem:[#allocation4 + $0x1b8] sm:$0xff] }
 0x260   : > { %v11522_v39 = vpop.permute.xlu1 %1401  ;;  %7056 = vmatprep.subr.bf16.mxu1 %v8260_v34  ;;  %v11524_v33 = vpop.permute.xlu0 %1010  ;;  %v2280_v15 = vsel %vm12725_vm7, %v11360_v55, %v2279_v60  ;;  %v2832_v23 = vsel %vm2785_vm3, %v11447_v16, %v2831_v40 }
 0x261   : > { %v1444_v48 = vrot.slane %v11522_v39, 4  ;;  %v1053_v62 = vrot.slane %v11524_v33, 4  ;;  %7057 = vmatpush1.bf16.msra.mxu1 %v8259_v10  ;;  %v2353_v7 = vsel %vm2092_vm1, %v2280_v15, 0  ;;  %v2904_v26 = vsel %vm2643_vm14, %v2832_v23, 0  ;;  %vm12728_vm1 = vmmov %vm12725_vm7  ;;  %v3002_v15 = vld [vmem:[#allocation4 + $0x6c0] sm:$0xff] }
 0x262   : > { %3139 = vrot.lane.b32.xlu1 %v2977_v42, %s8744_s17  ;;  %v8129_v61 = vcombine.low %v1963_v32, %v2353_v7  ;;  %v8130_v3 = vcombine.high %v1963_v32, %v2353_v7  ;;  %v8195_v0 = vcombine.low %v2514_v28, %v2904_v26  ;;  %v8196_v49 = vcombine.high %v2514_v28, %v2904_v26  ;;  %vm12729_vm7 = vmmov %vm12726_vm9  ;;  %v3392_v7 = vld [vmem:[#allocation4 + $0x7c0] sm:$0xff]  ;;  %v3783_v26 = vld [vmem:[#allocation4 + $0x8c8] sm:$0xff]  ;;  %s7861_s17 = sshll.u32 %s304_s16, 4  ;;  %s7862_s17 = int_to_ptr.vmem [resolvable:$true] %s7861_s17 }
 0x263   : > { %v1499_v55 = vsel %vm1063_vm10, %v1443_v5, %v1444_v48  ;;  %v1109_v16 = vsel %vm1063_vm10, %v1052_v59, %v1053_v62  ;;  %2747 = vrot.lane.b32.xlu0 %v11470_v51, %s8746_s18  ;;  %vm922_vm14 = vcmp.ne.bf16.partialorder %v890_v37, 0 }
 0x264   : > { %v11546_v29 = vpop.permute.xlu1 %2183  ;;  %7017 = vmatprep.subr.bf16.mxu0 %v8130_v3  ;;  %7058 = vmatprep.subr.bf16.mxu1 %v8196_v49  ;;  %v11548_v38 = vpop.permute.xlu0 %1793  ;;  %v1110_v5 = vsel %vm12726_vm9, %v11386_v19, %v1109_v16  ;;  %v1500_v59 = vsel %vm12727_vm5, %v11384_v6, %v1499_v55  ;;  %vm3814_vm9 = vcmp.ne.bf16.partialorder %v3782_v20, 0  ;;  %v1647_v49 = vld [vmem:[#allocation2 + $0x100] sm:$0xf]  ;;  %v2612_v55 = vld [vmem:[#allocation4 + $0x5c0] sm:$0xff]  ;;  %v3393_v20 = vld [vmem:[#allocation4 + $0x7c8] sm:$0xff] }
 0x265   : > { %v2225_v22 = vrot.slane %v11546_v29, 4  ;;  %v1835_v51 = vrot.slane %v11548_v38, 4  ;;  %7018 = vmatpush1.bf16.msra.mxu0 %v8129_v61  ;;  %7059 = vmatpush1.bf16.msra.mxu1 %v8195_v0  ;;  %v1183_v9 = vsel %vm921_vm6, %v1110_v5, 0  ;;  %v1573_v14 = vsel %vm1312_vm8, %v1500_v59, 0  ;;  %vm12730_vm8 = vmmov %vm12727_vm5  ;;  %v1257_v59 = vld [vmem:[#allocation2 + $0x100] sm:$0xf] }
 0x266   : > { %1807 = vrot.lane.b32.xlu1 %v11544_v44, %s8747_s19  ;;  %v8065_v12 = vcombine.low %v1183_v9, %v1573_v14  ;;  %v8066_v56 = vcombine.high %v1183_v9, %v1573_v14  ;;  %vm1313_vm6 = vcmp.ne.bf16.partialorder %v1281_v18, 0  ;;  %vm3034_vm5 = vcmp.ne.bf16.partialorder %v3002_v15, 0 }
 0x267   : > { %v2281_v6 = vsel %vm1063_vm10, %v2224_v53, %v2225_v22  ;;  %v1891_v19 = vsel %vm1063_vm10, %v1834_v25, %v1835_v51  ;;  %3529 = vrot.lane.b32.xlu0 %v3367_v13, %s8745_s14 }
 0x268   : > { %v11569_v47 = vpop.permute.xlu1 %1403  ;;  %7019 = vmatprep.subr.bf16.mxu0 %v8066_v56  ;;  %v11571_v52 = vpop.permute.xlu0 %1012  ;;  %v1892_v17 = vsel %vm12724_vm2, %v11473_v4, %v1891_v19  ;;  %v2282_v63 = vsel %vm12728_vm1, %v11500_v50, %v2281_v6  ;;  %vm2644_vm1 = vcmp.ne.bf16.partialorder %v2612_v55, 0  ;;  %v866_v56 = vld [vmem:[#allocation2 + $0x100] sm:$0xf]  ;;  %v2419_v19 = vld [vmem:[#allocation2 + $0xc4] sm:$0xff]  ;;  %v2420_v55 = vld [vmem:[#allocation2 + $0xcc] sm:$0xff] }
 0x269   : > { %v1445_v30 = vrot.slane %v11569_v47, 4  ;;  %v1054_v25 = vrot.slane %v11571_v52, 4  ;;  %7020 = vmatpush1.bf16.msra.mxu0 %v8065_v12  ;;  %v1964_v21 = vsel %vm1703_vm4, %v1892_v17, 0  ;;  %v2354_v43 = vsel %vm2093_vm12, %v2282_v63, 0  ;;  %v3003_v17 = vld [vmem:[#allocation4 + $0x6c8] sm:$0xff] }
 0x26a   : > { %2749 = vrot.lane.b32.xlu1 %v2587_v45, %s8746_s18  ;;  %v8131_v53 = vcombine.low %v1964_v21, %v2354_v43  ;;  %v8132_v24 = vcombine.high %v1964_v21, %v2354_v43  ;;  %vm3424_vm4 = vcmp.ne.bf16.partialorder %v3392_v7, 0  ;;  %vm3815_vm12 = vcmp.ne.bf16.partialorder %v3783_v26, 0  ;;  %v2062_v7 = vld [vmem:[#allocation4 + $0x3c0] sm:$0xff]  ;;  %v2613_v26 = vld [vmem:[#allocation4 + $0x5c8] sm:$0xff] }
 0x26b   : > { %v1501_v4 = vsel %vm1063_vm10, %v1444_v48, %v1445_v30  ;;  %v1111_v50 = vsel %vm1063_vm10, %v1053_v62, %v1054_v25  ;;  %2197 = vrot.lane.b32.xlu0 %v11544_v44, %s8748_s20  ;;  %v2037_v62 = vld [vmem:[#allocation2 + $0x100] sm:$0xf] }
 0x26c   : > { %v11590_v1 = vpop.permute.xlu1 %3125  ;;  %7060 = vmatprep.subr.bf16.mxu1 %v8132_v24  ;;  %v3906_v10 = vpop.permute.xlu0 %3905  ;;  %8386 = vmatmul.mubr.msk.bf16.vlgmr.msra.gmra.mxu0 %vm5862_vm0, %v11216_v57  ;;  %v1112_v34 = vsel %vm12729_vm7, %v11524_v33, %v1111_v50  ;;  %v1502_v40 = vsel %vm12730_vm8, %v11522_v39, %v1501_v4  ;;  %v4406_v4 = vld [vmem:[%s12611_s3 + $0x8] sm:$0xff] }
 0x26d   : > { %v3166_v60 = vrot.slane %v11590_v1, 4  ;;  %v3946_v42 = vrot.slane %v3906_v10, 4  ;;  %7061 = vmatpush1.bf16.msra.mxu1 %v8131_v53  ;;  %v1184_v28 = vsel %vm922_vm14, %v1112_v34, 0  ;;  %v1574_v32 = vsel %vm1313_vm6, %v1502_v40, 0  ;;  %7123 = vmatprep.mubr.bf16.mxu0 %v12628_v35 }
 0x26e   : > { %1417 = vrot.lane.b32.xlu1 %v11544_v44, %s8750_s28  ;;  %v8067_v23 = vcombine.low %v1184_v28, %v1574_v32  ;;  %v8068_v48 = vcombine.high %v1184_v28, %v1574_v32  ;;  %vm3035_vm14 = vcmp.ne.bf16.partialorder %v3003_v17, 0  ;;  %vm3425_vm6 = vcmp.ne.bf16.partialorder %v3393_v20, 0 }
 0x26f   : > { %v3223_v39 = vsel %vm1063_vm10, %v3165_v2, %v3166_v60  ;;  %v4003_v33 = vsel %vm1063_vm10, %v3945_v58, %v3946_v42  ;;  %1026 = vrot.lane.b32.xlu0 %v11544_v44, %s8749_s26  ;;  %v2451_v2 = vld [vmem:[#allocation4 + $0x4c0] sm:$0xff] }
 0x270   : > { %v4004_v61 = vsel %vm3955_vm11, %v11424_v46, %v4003_v33  ;;  %v11614_v3 = vpop.permute.xlu1 %3907  ;;  %7062 = vmatprep.subr.bf16.mxu1 %v8068_v48  ;;  %v11616_v0 = vpop.permute.xlu0 %3515  ;;  %v3224_v27 = vsel %vm3175_vm13, %v11444_v31, %v3223_v39  ;;  %vm2483_vm2 = vcmp.ne.bf16.partialorder %v2451_v2, 0  ;;  %v2452_v48 = vld [vmem:[#allocation4 + $0x4c8] sm:$0xff] }
 0x271   : > { %v3947_v58 = vrot.slane %v11614_v3, 4  ;;  %v3556_v16 = vrot.slane %v11616_v0, 4  ;;  %7063 = vmatpush1.bf16.msra.mxu1 %v8067_v23  ;;  %v4075_v44 = vsel %vm3814_vm9, %v4004_v61, 0  ;;  %v2515_v50 = vsel %vm2483_vm2, %v2419_v19, 0  ;;  %v1672_v23 = vld [vmem:[#allocation4 + $0x2c0] sm:$0xff] }
 0x272   : > { %2199 = vrot.lane.b32.xlu1 %v2037_v62, %s8748_s20  ;;  %v8326_v46 = vcombine.high %v4075_v44, %v4075_v44  ;;  %v8325_v41 = vcombine.low %v4075_v44, %v4075_v44  ;;  %vm1704_vm7 = vcmp.ne.bf16.partialorder %v1672_v23, 0  ;;  %vm2484_vm8 = vcmp.ne.bf16.partialorder %v2452_v48, 0  ;;  %v891_v44 = vld [vmem:[#allocation4 + $0xc0] sm:$0xff]  ;;  %s7848_s20 = scalar_lea.sflag [#allocation6], %s302_s11 }
 0x273   : > { %v4005_v13 = vsel %vm1063_vm10, %v3946_v42, %v3947_v58  ;;  %v3613_v5 = vsel %vm1063_vm10, %v3555_v54, %v3556_v16  ;;  %1809 = vrot.lane.b32.xlu0 %v1647_v49, %s8747_s19  ;;  %v3295_v54 = vsel %vm3034_vm5, %v3224_v27, 0  ;;  %vm12731_vm9 = vcmask 252928   ;;  %s12573_s19 = scalar_lea.hbm %s12614_s6, %s8408_s15 }
 0x274   : > { %v4006_v31 = vsel %vm3955_vm11, %v3906_v10, %v4005_v13  ;;  %v11634_v9 = vpop.permute.xlu1 %3127  ;;  %8388 = vmatmul.mubr.msk.bf16.vlgmr.msra.gmra.mxu1 %vm5862_vm0, %v11216_v57  ;;  %8389 = vmatprep.subr.msk.bf16.mxu0 %vm1063_vm10, %v8326_v46  ;;  %v11639_v14 = vpop.permute.xlu0 %2735  ;;  %v6012_v12 = vsel %vm1063_vm10, %v8325_v41, 0  ;;  %v3614_v6 = vsel %vm3565_vm15, %v11476_v36, %v3613_v5  ;;  %v1282_v13 = vld [vmem:[#allocation4 + $0x1c0] sm:$0xff]  ;;  %vm2094_vm5 = vcmp.ne.bf16.partialorder %v2062_v7, 0 }
 0x275   : > { %v3167_v45 = vrot.slane %v11634_v9, 4  ;;  %v2776_v37 = vrot.slane %v11639_v14, 4  ;;  %7098 = vmatpush1.bf16.msra.mxu0 %v6012_v12  ;;  %v3685_v57 = vsel %vm3424_vm4, %v3614_v6, 0  ;;  %v4076_v18 = vsel %vm3815_vm12, %v4006_v31, 0  ;;  %7166 = vmatprep.mubr.bf16.mxu1 %v12628_v35 }
 0x276   : > { %1419 = vrot.lane.b32.xlu1 %v1257_v59, %s8750_s28  ;;  %v8261_v63 = vcombine.low %v3295_v54, %v3685_v57  ;;  %v8262_v21 = vcombine.high %v3295_v54, %v3685_v57  ;;  %v8328_v43 = vcombine.high %v4076_v18, %v4076_v18  ;;  %v8327_v53 = vcombine.low %v4076_v18, %v4076_v18  ;;  %s8663_s28 = sshll.u32 %s8754_s25, 4  ;;  %s8664_s28 = int_to_ptr.vmem [resolvable:$false] %s8663_s28 }
 0x277   : > { %v3225_v36 = vsel %vm1063_vm10, %v3166_v60, %v3167_v45  ;;  %v2833_v24 = vsel %vm1063_vm10, %v2775_v11, %v2776_v37  ;;  %1028 = vrot.lane.b32.xlu0 %v866_v56, %s8749_s26  ;;  %v4405_v11 = vld [vmem:[%s12611_s3] sm:$0xff]  ;;  %vm2645_vm4 = vcmp.ne.bf16.partialorder %v2613_v26, 0  ;;  %v2516_v56 = vsel %vm2484_vm8, %v2420_v55, 0  ;;  %s8659_s26 = scalar_lea.vmem %s7862_s17, 128  ;;  %s8665_s29 = scalar_lea.vmem %s8664_s28, 256 }
 0x278   : > { %v11666_v10 = vpop.permute.xlu1 %1795  ;;  %7099 = vmatprep.subr.bf16.mxu0 %v8262_v21  ;;  %8391 = vmatprep.subr.msk.bf16.mxu1 %vm1063_vm10, %v8328_v43  ;;  %v11669_v34 = vpop.permute.xlu0 %3517  ;;  %v6018_v40 = vsel %vm1063_vm10, %v8327_v53, 0  ;;  %v2834_v60 = vsel %vm2785_vm3, %v11498_v8, %v2833_v24  ;;  %v3226_v15 = vsel %vm3175_vm13, %v11590_v1, %v3225_v36  ;;  %vm923_vm12 = vcmp.ne.bf16.partialorder %v891_v44, 0  ;;  %v1673_v24 = vld [vmem:[#allocation4 + $0x2c8] sm:$0xff]  ;;  %p8660_p3 = scmp.ne.s32.totalorder %s7862_s17, %s8659_s26  ;;  %p8666_p7 = scmp.lt.s32.totalorder %s7862_s17, %s8664_s28 }
 0x279   : > { %v1836_v42 = vrot.slane %v11666_v10, 4  ;;  %v3557_v28 = vrot.slane %v11669_v34, 4  ;;  %7100 = vmatpush1.bf16.msra.mxu0 %v8261_v63  ;;  %7141 = vmatpush1.bf16.msra.mxu1 %v6018_v40  ;;  %v2905_v32 = vsel %vm2644_vm1, %v2834_v60, 0  ;;  %v11692_v1 = vpop.f32.mrf.mxu0  ;;  %v3296_v2 = vsel %vm3035_vm14, %v3226_v15, 0  ;;  %p8667_p6 = scmp.lt.s32.totalorder %s8665_s29, %s8659_s26 }
 0x27a   : > { %4414 = vperm.xlu1 %8548, %v4406_v4   ;;  %v8197_v39 = vcombine.low %v2515_v50, %v2905_v32  ;;  %v8198_v33 = vcombine.high %v2515_v50, %v2905_v32  ;;  %vm12732_vm2 = vcmask 7168   ;;  %vm1314_vm1 = vcmp.ne.bf16.partialorder %v1282_v13, 0  ;;  %v2063_v4 = vld [vmem:[#allocation4 + $0x3c8] sm:$0xff]  ;;  %p8661_p2 = pnand %p8660_p3, %p8828_p5 }
 0x27b   : > { %v1893_v8 = vsel %vm1063_vm10, %v1835_v51, %v1836_v42  ;;  %v3615_v62 = vsel %vm1063_vm10, %v3556_v16, %v3557_v28  ;;  %4409 = vperm.xlu0 %8547, %v4405_v11   ;;  %v11714_v12 = vpop.f32.mrf.mxu0  ;;  %vm12733_vm14 = vcmask 269312   ;;  %v11745_v11 = vpop.f32.mrf.mxu1  ;;  %vm2095_vm8 = vcmp.ne.bf16.partialorder %v2063_v4, 0  ;;  %p8668_p9 = por %p8667_p6, %p8666_p7 }
 0x27c   : > { %v11694_v61 = vpop.permute.xlu1 %2737  ;;  %7101 = vmatprep.subr.bf16.mxu0 %v8198_v33  ;;  %v11696_v49 = vpop.permute.xlu0 %2185  ;;  %v3616_v51 = vsel %vm3565_vm15, %v11616_v0, %v3615_v62  ;;  %v1894_v41 = vsel %vm12731_vm9, %v11548_v38, %v1893_v8  ;;  %v892_v33 = vld [vmem:[#allocation4 + $0xc8] sm:$0xff]  ;;  %p8662_p4 = pneg %p8661_p2 }
 0x27d   : > { %v2777_v16 = vrot.slane %v11694_v61, 4  ;;  %v2226_v27 = vrot.slane %v11696_v49, 4  ;;  %7102 = vmatpush1.bf16.msra.mxu0 %v8197_v39  ;;  %v3686_v46 = vsel %vm3425_vm6, %v3616_v51, 0  ;;  %v1965_v6 = vsel %vm1704_vm7, %v1894_v41, 0  ;;  %v11735_v36 = vpop.f32.mrf.mxu0  ;;  %v1283_v8 = vld [vmem:[#allocation4 + $0x1c8] sm:$0xff]  ;;  %v11769_v51 = vpop.f32.mrf.mxu1 }
 0x27e   : > { %v8263_v5 = vcombine.low %v3296_v2, %v3686_v46  ;;  %v8264_v59 = vcombine.high %v3296_v2, %v3686_v46  ;;  %vm12734_vm6 = vcmask 261120   ;;  %vm1705_vm7 = vcmp.ne.bf16.partialorder %v1673_v24, 0  ;;  %p8669_p8 = pnand %p8668_p9, %p8662_p4 }
 0x27f   : > { %v2835_v0 = vsel %vm1063_vm10, %v2776_v37, %v2777_v16  ;;  %v2283_v31 = vsel %vm1063_vm10, %v2225_v22, %v2226_v27  ;;  %v11759_v39 = vpop.f32.mrf.mxu0 }
 0x280   : > { %v11716_v38 = vpop.permute.xlu1 %1405  ;;  %7142 = vmatprep.subr.bf16.mxu1 %v8264_v59  ;;  %v11718_v54 = vpop.permute.xlu0 %1014  ;;  %v2284_v19 = vsel %vm12732_vm2, %v11546_v29, %v2283_v31  ;;  %v2836_v37 = vsel %vm2785_vm3, %v11639_v14, %v2835_v0 }
 0x281   : > { %v1446_v22 = vrot.slane %v11716_v38, 4  ;;  %v1055_v57 = vrot.slane %v11718_v54, 4  ;;  %7143 = vmatpush1.bf16.msra.mxu1 %v8263_v5  ;;  %v2355_v18 = vsel %vm2094_vm5, %v2284_v19, 0  ;;  %v2906_v17 = vsel %vm2645_vm4, %v2836_v37, 0  ;;  %vm12735_vm5 = vmmov %vm12732_vm2  ;;  %v11775_v13 = vpop.f32.mrf.mxu0  ;;  %v3784_v5 = vld [vmem:[#allocation4 + $0x8d0] sm:$0xff]  ;;  %v11793_v19 = vpop.f32.mrf.mxu1 }
 0x282   : > { %v8133_v63 = vcombine.low %v1965_v6, %v2355_v18  ;;  %v8134_v21 = vcombine.high %v1965_v6, %v2355_v18  ;;  %v8199_v43 = vcombine.low %v2516_v56, %v2906_v17  ;;  %v8200_v53 = vcombine.high %v2516_v56, %v2906_v17  ;;  %vm12736_vm2 = vmmov %vm12733_vm14  ;;  %v11789_v6 = vld [vmem:[#allocation7] sm:$0xff]   ;;  %12738 = vst [vmem:[#allocation17_spill] sm:$0xff] %v11793_v19  ;;  %v3004_v17 = vld [vmem:[#allocation4 + $0x6d0] sm:$0xff] }
 0x283   : > { %v1503_v29 = vsel %vm1063_vm10, %v1445_v30, %v1446_v22  ;;  %v1113_v14 = vsel %vm1063_vm10, %v1054_v25, %v1055_v57  ;;  %vm924_vm4 = vcmp.ne.bf16.partialorder %v892_v33, 0 }
 0x284   : > { %v11737_v50 = vpop.permute.xlu1 %2187  ;;  %7103 = vmatprep.subr.bf16.mxu0 %v8134_v21  ;;  %7144 = vmatprep.subr.bf16.mxu1 %v8200_v53  ;;  %v11739_v20 = vpop.permute.xlu0 %1797  ;;  %v1114_v40 = vsel %vm12733_vm14, %v11571_v52, %v1113_v14  ;;  %v1504_v30 = vsel %vm12734_vm6, %v11569_v47, %v1503_v29  ;;  %vm3816_vm14 = vcmp.ne.bf16.partialorder %v3784_v5, 0  ;;  %v3394_v53 = vld [vmem:[#allocation4 + $0x7d0] sm:$0xff]  ;;  %v3785_v29 = vld [vmem:[#allocation4 + $0x8d8] sm:$0xff] }
 0x285   : > { %v2227_v25 = vrot.slane %v11737_v50, 4  ;;  %v1837_v60 = vrot.slane %v11739_v20, 4  ;;  %7104 = vmatpush1.bf16.msra.mxu0 %v8133_v63  ;;  %7145 = vmatpush1.bf16.msra.mxu1 %v8199_v43  ;;  %v1185_v32 = vsel %vm923_vm12, %v1114_v40, 0  ;;  %v1575_v15 = vsel %vm1314_vm1, %v1504_v30, 0  ;;  %vm12737_vm1 = vmmov %vm12734_vm6  ;;  %v11799_v63 = vpop.f32.mrf.mxu0  ;;  %v2453_v40 = vld [vmem:[#allocation4 + $0x4d0] sm:$0xff] }
 0x286   : > { %v8069_v23 = vcombine.low %v1185_v32, %v1575_v15  ;;  %v8070_v48 = vcombine.high %v1185_v32, %v1575_v15  ;;  %vm1315_vm12 = vcmp.ne.bf16.partialorder %v1283_v8, 0  ;;  %vm3036_vm6 = vcmp.ne.bf16.partialorder %v3004_v17, 0  ;;  %v2614_v30 = vld [vmem:[#allocation4 + $0x5d0] sm:$0xff]  ;;  %v11813_v32 = vpop.f32.mrf.mxu1 }
 0x287   : > { %v2285_v47 = vsel %vm1063_vm10, %v2226_v27, %v2227_v25  ;;  %v1895_v52 = vsel %vm1063_vm10, %v1836_v42, %v1837_v60  ;;  %12739 = vst [vmem:[#allocation18_spill] sm:$0xff] %v11813_v32 }
 0x288   : > { %v11761_v62 = vpop.permute.xlu1 %1407  ;;  %7105 = vmatprep.subr.bf16.mxu0 %v8070_v48  ;;  %v11763_v7 = vpop.permute.xlu0 %1016  ;;  %v1896_v26 = vsel %vm12731_vm9, %v11666_v10, %v1895_v52  ;;  %v2286_v2 = vsel %vm12735_vm5, %v11696_v49, %v2285_v47  ;;  %vm2485_vm9 = vcmp.ne.bf16.partialorder %v2453_v40, 0  ;;  %vm2646_vm5 = vcmp.ne.bf16.partialorder %v2614_v30, 0 }
 0x289   : > { %v1447_v55 = vrot.slane %v11761_v62, 4  ;;  %v1056_v42 = vrot.slane %v11763_v7, 4  ;;  %7106 = vmatpush1.bf16.msra.mxu0 %v8069_v23  ;;  %v1966_v44 = vsel %vm1705_vm7, %v1896_v26, 0  ;;  %v2356_v27 = vsel %vm2095_vm8, %v2286_v2, 0  ;;  %v11820_v47 = vpop.f32.mrf.mxu0  ;;  %v11830_v8 = vpop.f32.mrf.mxu1 }
 0x28a   : > { %v8135_v46 = vcombine.low %v1966_v44, %v2356_v27  ;;  %v8136_v41 = vcombine.high %v1966_v44, %v2356_v27  ;;  %12740 = vst [vmem:[#allocation19_spill] sm:$0xff] %v11820_v47  ;;  %vm3426_vm7 = vcmp.ne.bf16.partialorder %v3394_v53, 0  ;;  %vm3817_vm8 = vcmp.ne.bf16.partialorder %v3785_v29, 0  ;;  %v3005_v53 = vld [vmem:[#allocation4 + $0x6d8] sm:$0xff] }
 0x28b   : > { %v1505_v10 = vsel %vm1063_vm10, %v1446_v22, %v1447_v55  ;;  %v1115_v49 = vsel %vm1063_vm10, %v1055_v57, %v1056_v42 }
 0x28c   : > { %v11783_v59 = vpop.permute.xlu1 %3129  ;;  %7146 = vmatprep.subr.bf16.mxu1 %v8136_v41  ;;  %v3910_v0 = vpop.permute.xlu0 %3909  ;;  %v1116_v31 = vsel %vm12736_vm2, %v11718_v54, %v1115_v49  ;;  %v1506_v56 = vsel %vm12737_vm1, %v11716_v38, %v1505_v10  ;;  %8390 = vmatmul.mubr.msk.bf16.vlgmr.msra.gmra.mxu0 %vm5862_vm0, %v11789_v6 }
 0x28d   : > { %v3168_v37 = vrot.slane %v11783_v59, 4  ;;  %v3948_v22 = vrot.slane %v3910_v0, 4  ;;  %7147 = vmatpush1.bf16.msra.mxu1 %v8135_v46  ;;  %v1186_v57 = vsel %vm924_vm4, %v1116_v31, 0  ;;  %v1576_v18 = vsel %vm1315_vm12, %v1506_v56, 0  ;;  %7209 = vmatprep.mubr.bf16.mxu0 %v12628_v35 }
 0x28e   : > { %v8071_v54 = vcombine.low %v1186_v57, %v1576_v18  ;;  %v8072_v38 = vcombine.high %v1186_v57, %v1576_v18  ;;  %v11854_v18 = vpop.f32.mrf.mxu1  ;;  %vm3037_vm4 = vcmp.ne.bf16.partialorder %v3005_v53, 0 }
 0x28f   : > { %v3227_v21 = vsel %vm1063_vm10, %v3167_v45, %v3168_v37  ;;  %v4007_v43 = vsel %vm1063_vm10, %v3947_v58, %v3948_v22 }
 0x290   : > { %v4008_v14 = vsel %vm3955_vm11, %v11614_v3, %v4007_v43  ;;  %v11809_v24 = vpop.permute.xlu1 %3911  ;;  %7148 = vmatprep.subr.bf16.mxu1 %v8072_v38  ;;  %v11811_v4 = vpop.permute.xlu0 %3519  ;;  %v3228_v3 = vsel %vm3175_vm13, %v11634_v9, %v3227_v21 }
 0x291   : > { %v3949_v45 = vrot.slane %v11809_v24, 4  ;;  %v3558_v15 = vrot.slane %v11811_v4, 4  ;;  %7149 = vmatpush1.bf16.msra.mxu1 %v8071_v54  ;;  %v4077_v58 = vsel %vm3816_vm14, %v4008_v14, 0  ;;  %v3297_v27 = vsel %vm3036_vm6, %v3228_v3, 0  ;;  %v2454_v3 = vld [vmem:[#allocation4 + $0x4d8] sm:$0xff] }
 0x292   : > { %v8330_v23 = vcombine.high %v4077_v58, %v4077_v58  ;;  %v8329_v48 = vcombine.low %v4077_v58, %v4077_v58  ;;  %v1674_v58 = vld [vmem:[#allocation4 + $0x2d0] sm:$0xff]  ;;  %vm2486_vm1 = vcmp.ne.bf16.partialorder %v2454_v3, 0 }
 0x293   : > { %v4009_v52 = vsel %vm1063_vm10, %v3948_v22, %v3949_v45  ;;  %v3617_v33 = vsel %vm1063_vm10, %v3557_v28, %v3558_v15  ;;  %v2421_v28 = vld [vmem:[#allocation2 + $0xd4] sm:$0xff]  ;;  %v11849_v22 = vpop.f32.mrf.mxu0  ;;  %vm1706_vm2 = vcmp.ne.bf16.partialorder %v1674_v58, 0 }
 0x294   : > { %v4010_v9 = vsel %vm3955_vm11, %v3910_v0, %v4009_v52  ;;  %v11833_v26 = vpop.permute.xlu1 %3131  ;;  %8393 = vmatprep.subr.msk.bf16.mxu0 %vm1063_vm10, %v8330_v23  ;;  %v11836_v2 = vpop.permute.xlu0 %2739  ;;  %v6024_v44 = vsel %vm1063_vm10, %v8329_v48, 0  ;;  %v3618_v46 = vsel %vm3565_vm15, %v11669_v34, %v3617_v33  ;;  %8392 = vmatmul.mubr.msk.bf16.vlgmr.msra.gmra.mxu1 %vm5862_vm0, %v11789_v6  ;;  %12741 = vst [vmem:[#allocation20_spill] sm:$0xff] %v11849_v22  ;;  %v2517_v17 = vsel %vm2485_vm9, %v2421_v28, 0  ;;  %v2064_v33 = vld [vmem:[#allocation4 + $0x3d0] sm:$0xff] }
 0x295   : > { %v3169_v41 = vrot.slane %v11833_v26, 4  ;;  %v2778_v10 = vrot.slane %v11836_v2, 4  ;;  %7184 = vmatpush1.bf16.msra.mxu0 %v6024_v44  ;;  %v3687_v49 = vsel %vm3426_vm7, %v3618_v46, 0  ;;  %v4078_v5 = vsel %vm3817_vm8, %v4010_v9, 0  ;;  %7252 = vmatprep.mubr.bf16.mxu1 %v12628_v35  ;;  %v11866_v29 = vpop.f32.mrf.mxu0  ;;  %v11878_v44 = vpop.f32.mrf.mxu1  ;;  %v2422_v28 = vld [vmem:[#allocation2 + $0xdc] sm:$0xff] }
 0x296   : > { %v8265_v0 = vcombine.low %v3297_v27, %v3687_v49  ;;  %v8266_v31 = vcombine.high %v3297_v27, %v3687_v49  ;;  %v8332_v56 = vcombine.high %v4078_v5, %v4078_v5  ;;  %v8331_v34 = vcombine.low %v4078_v5, %v4078_v5  ;;  %12742 = vst [vmem:[#allocation21_spill] sm:$0xff] %v11878_v44 }
 0x297   : > { %v2837_v57 = vsel %vm1063_vm10, %v2777_v16, %v2778_v10  ;;  %v3229_v54 = vsel %vm1063_vm10, %v3168_v37, %v3169_v41  ;;  %v3395_v16 = vld [vmem:[#allocation4 + $0x7d8] sm:$0xff]  ;;  %vm2096_vm14 = vcmp.ne.bf16.partialorder %v2064_v33, 0  ;;  %vm12743_vm7 = vcmask 252928  }
 0x298   : > { %v11860_v38 = vpop.permute.xlu1 %1799  ;;  %7185 = vmatprep.subr.bf16.mxu0 %v8266_v31  ;;  %8395 = vmatprep.subr.msk.bf16.mxu1 %vm1063_vm10, %v8332_v56  ;;  %v6030_v21 = vsel %vm1063_vm10, %v8331_v34, 0  ;;  %v2838_v43 = vsel %vm2785_vm3, %v11694_v61, %v2837_v57  ;;  %v2615_v61 = vld [vmem:[#allocation4 + $0x5d8] sm:$0xff]  ;;  %v3230_v30 = vsel %vm3175_vm13, %v11783_v59, %v3229_v54  ;;  %vm3427_vm12 = vcmp.ne.bf16.partialorder %v3395_v16, 0 }
 0x299   : > { %v1838_v14 = vrot.slane %v11860_v38, 4  ;;  %v11869_v40 = vpop.permute.xlu0 %3521  ;;  %7186 = vmatpush1.bf16.msra.mxu0 %v8265_v0  ;;  %7227 = vmatpush1.bf16.msra.mxu1 %v6030_v21  ;;  %v2907_v37 = vsel %vm2646_vm5, %v2838_v43, 0  ;;  %vm2647_vm6 = vcmp.ne.bf16.partialorder %v2615_v61, 0  ;;  %v1284_v0 = vld [vmem:[#allocation4 + $0x1d0] sm:$0xff]  ;;  %v3298_v31 = vsel %vm3037_vm4, %v3230_v30, 0 }
 0x29a   : > { %v3559_v23 = vrot.slane %v11869_v40, 4  ;;  %v8201_v48 = vcombine.low %v2517_v17, %v2907_v37  ;;  %v8202_v52 = vcombine.high %v2517_v17, %v2907_v37  ;;  %v11904_v17 = vpop.f32.mrf.mxu1  ;;  %v2518_v21 = vsel %vm2486_vm1, %v2422_v28, 0 }
 0x29b   : > { %v1897_v9 = vsel %vm1063_vm10, %v1837_v60, %v1838_v14  ;;  %v11889_v60 = vpop.f32.mrf.mxu0  ;;  %12744 = vst [vmem:[#allocation22_spill] sm:$0xff] %v11904_v17  ;;  %vm1316_vm8 = vcmp.ne.bf16.partialorder %v1284_v0, 0  ;;  %vm12746_vm9 = vcmask 7168   ;;  %vm12747_vm4 = vcmask 261120  }
 0x29c   : > { %v3619_v27 = vsel %vm1063_vm10, %v3558_v15, %v3559_v23  ;;  %v11887_v46 = vpop.permute.xlu1 %2741  ;;  %7187 = vmatprep.subr.bf16.mxu0 %v8202_v52  ;;  %v1898_v34 = vsel %vm12743_vm7, %v11739_v20, %v1897_v9  ;;  %v893_v20 = vld [vmem:[#allocation4 + $0xd0] sm:$0xff]  ;;  %v11923_v9 = vpop.f32.mrf.mxu1 }
 0x29d   : > { %v12626_v49 = vrot.slane %v11887_v46, 4  ;;  %v11892_v5 = vpop.permute.xlu0 %2189  ;;  %7188 = vmatpush1.bf16.msra.mxu0 %v8201_v48  ;;  %v3620_v59 = vsel %vm3565_vm15, %v11811_v4, %v3619_v27  ;;  %v11914_v37 = vpop.f32.mrf.mxu0  ;;  %v1967_v3 = vsel %vm1706_vm2, %v1898_v34, 0  ;;  %vm925_vm5 = vcmp.ne.bf16.partialorder %v893_v20, 0  ;;  %v1675_v34 = vld [vmem:[#allocation4 + $0x2d8] sm:$0xff] }
 0x29e   : > { %v2228_v15 = vrot.slane %v11892_v5, 4  ;;  %v3688_v56 = vsel %vm3427_vm12, %v3620_v59, 0  ;;  %12745 = vst [vmem:[#allocation23_spill] sm:$0xff] %v11914_v37  ;;  %vm12749_vm12 = vcmask 269312   ;;  %vm1707_vm1 = vcmp.ne.bf16.partialorder %v1675_v34, 0 }
 0x29f   : > { %v2839_v57 = vsel %vm1063_vm10, %v2778_v10, %v12626_v49  ;;  %v8267_v54 = vcombine.low %v3298_v31, %v3688_v56  ;;  %v8268_v4 = vcombine.high %v3298_v31, %v3688_v56  ;;  %v2065_v56 = vld [vmem:[#allocation4 + $0x3d8] sm:$0xff] }
 0x2a0   : > { %v2287_v43 = vsel %vm1063_vm10, %v2227_v25, %v2228_v15  ;;  %v11910_v53 = vpop.permute.xlu1 %1409  ;;  %v2840_v16 = vsel %vm2785_vm3, %v11836_v2, %v2839_v57  ;;  %v11937_v57 = vpop.f32.mrf.mxu0  ;;  %vm2097_vm2 = vcmp.ne.bf16.partialorder %v2065_v56, 0 }
 0x2a1   : > { %v1448_v10 = vrot.slane %v11910_v53, 4  ;;  %7228 = vmatprep.subr.bf16.mxu1 %v8268_v4  ;;  %v11917_v48 = vpop.permute.xlu0 %1018  ;;  %v2288_v52 = vsel %vm12746_vm9, %v11737_v50, %v2287_v43  ;;  %v2908_v25 = vsel %vm2647_vm6, %v2840_v16, 0  ;;  %12748 = vst [vmem:[#allocation24_spill] sm:$0xff] %v11937_v57  ;;  %vm12751_vm6 = vmmov %vm12743_vm7 }
 0x2a2   : > { %v1057_v2 = vrot.slane %v11917_v48, 4  ;;  %7229 = vmatpush1.bf16.msra.mxu1 %v8267_v54  ;;  %v2357_v30 = vsel %vm2096_vm14, %v2288_v52, 0  ;;  %v8203_v27 = vcombine.low %v2518_v21, %v2908_v25  ;;  %v8204_v28 = vcombine.high %v2518_v21, %v2908_v25  ;;  %v11949_v16 = vpop.f32.mrf.mxu0  ;;  %vm12750_vm14 = vmmov %vm12746_vm9 }
 0x2a3   : > { %v1507_v59 = vsel %vm1063_vm10, %v1447_v55, %v1448_v10  ;;  %v8137_v58 = vcombine.low %v1967_v3, %v2357_v30  ;;  %v8138_v31 = vcombine.high %v1967_v3, %v2357_v30  ;;  %vm12753_vm9 = vmmov %vm12747_vm4 }
 0x2a4   : > { %v1117_v50 = vsel %vm1063_vm10, %v1056_v42, %v1057_v2  ;;  %v11933_v61 = vpop.permute.xlu1 %2191  ;;  %7230 = vmatprep.subr.bf16.mxu1 %v8204_v28  ;;  %v1508_v33 = vsel %vm12747_vm4, %v11761_v62, %v1507_v59  ;;  %v11945_v42 = vpop.f32.mrf.mxu1 }
 0x2a5   : > { %v12623_v54 = vrot.slane %v11933_v61, 4  ;;  %7189 = vmatprep.subr.bf16.mxu0 %v8138_v31  ;;  %v11940_v55 = vpop.permute.xlu0 %1801  ;;  %v1118_v4 = vsel %vm12749_vm12, %v11763_v7, %v1117_v50  ;;  %v1577_v21 = vsel %vm1316_vm8, %v1508_v33, 0  ;;  %v1285_v7 = vld [vmem:[#allocation4 + $0x1d8] sm:$0xff]  ;;  %v11971_v50 = vpop.f32.mrf.mxu0 }
 0x2a6   : > { %v12625_v43 = vrot.slane %v11940_v55, 4  ;;  %7190 = vmatpush1.bf16.msra.mxu0 %v8137_v58  ;;  %7231 = vmatpush1.bf16.msra.mxu1 %v8203_v27  ;;  %v1187_v62 = vsel %vm925_vm5, %v1118_v4, 0  ;;  %v894_v27 = vld [vmem:[#allocation4 + $0xd8] sm:$0xff]  ;;  %v11968_v31 = vpop.f32.mrf.mxu1  ;;  %vm1317_vm7 = vcmp.ne.bf16.partialorder %v1285_v7, 0  ;;  %vm12754_vm5 = vmmov %vm12749_vm12 }
 0x2a7   : > { %v2289_v3 = vsel %vm1063_vm10, %v2228_v15, %v12623_v54  ;;  %v8073_v52 = vcombine.low %v1187_v62, %v1577_v21  ;;  %v8074_v25 = vcombine.high %v1187_v62, %v1577_v21  ;;  %12752 = vst [vmem:[#allocation25_spill] sm:$0xff] %v11968_v31  ;;  %vm926_vm8 = vcmp.ne.bf16.partialorder %v894_v27, 0  ;;  %v3786_v62 = vld [vmem:[#allocation4 + $0x8e0] sm:$0xff]  ;;  %v11990_v27 = vpop.f32.mrf.mxu0 }
 0x2a8   : > { %v1899_v0 = vsel %vm1063_vm10, %v1838_v14, %v12625_v43  ;;  %v11959_v30 = vpop.permute.xlu1 %1411  ;;  %v2290_v20 = vsel %vm12750_vm14, %v11892_v5, %v2289_v3  ;;  %v11988_v7 = vpop.f32.mrf.mxu1  ;;  %12756 = vst [vmem:[#allocation27_spill] sm:$0xff] %v11990_v27  ;;  %vm3818_vm4 = vcmp.ne.bf16.partialorder %v3786_v62, 0  ;;  %v2424_v27 = vld [vmem:[#allocation2 + $0xec] sm:$0xff]  ;;  %v12767_v31 = vrot.slane %v11933_v61, 4 }
 0x2a9   : > { %v12621_v28 = vrot.slane %v11959_v30, 4  ;;  %7191 = vmatprep.subr.bf16.mxu0 %v8074_v25  ;;  %v11964_v15 = vpop.permute.xlu0 %1020  ;;  %v1900_v59 = vsel %vm12751_vm6, %v11860_v38, %v1899_v0  ;;  %v2358_v58 = vsel %vm2097_vm2, %v2290_v20, 0  ;;  %12755 = vst [vmem:[#allocation26_spill] sm:$0xff] %v11988_v7  ;;  %v3006_v20 = vld [vmem:[#allocation4 + $0x6e0] sm:$0xff] }
 0x2aa   : > { %v12620_v56 = vrot.slane %v11964_v15, 4  ;;  %7192 = vmatpush1.bf16.msra.mxu0 %v8073_v52  ;;  %v1968_v14 = vsel %vm1707_vm1, %v1900_v59, 0  ;;  %vm3038_vm12 = vcmp.ne.bf16.partialorder %v3006_v20, 0 }
 0x2ab   : > { %v1509_v5 = vsel %vm1063_vm10, %v1448_v10, %v12621_v28  ;;  %v8139_v33 = vcombine.low %v1968_v14, %v2358_v58  ;;  %v8140_v34 = vcombine.high %v1968_v14, %v2358_v58  ;;  %v11998_v14 = vpop.f32.mrf.mxu1 }
 0x2ac   : > { %v1119_v38 = vsel %vm1063_vm10, %v1057_v2, %v12620_v56  ;;  %v11979_v4 = vpop.permute.xlu1 %3133  ;;  %v1510_v21 = vsel %vm12753_vm9, %v11910_v53, %v1509_v5 }
 0x2ad   : > { %v12627_v3 = vrot.slane %v11979_v4, 4  ;;  %7232 = vmatprep.subr.bf16.mxu1 %v8140_v34  ;;  %v3914_v52 = vpop.permute.xlu0 %3913  ;;  %8394 = vmatmul.mubr.msk.bf16.vlgmr.msra.gmra.mxu0 %vm5862_vm0, %v11789_v6  ;;  %v1120_v10 = vsel %vm12754_vm5, %v11917_v48, %v1119_v38  ;;  %v1578_v25 = vsel %vm1317_vm7, %v1510_v21, 0  ;;  %v3787_v48 = vld [vmem:[#allocation4 + $0x8e8] sm:$0xff]  ;;  %v3396_v34 = vld [vmem:[#allocation4 + $0x7e0] sm:$0xff]  ;;  %v12018_v56 = vpop.f32.mrf.mxu1 }
 0x2ae   : > { %v3950_v2 = vrot.slane %v3914_v52, 4  ;;  %7233 = vmatpush1.bf16.msra.mxu1 %v8139_v33  ;;  %v1188_v0 = vsel %vm926_vm8, %v1120_v10, 0  ;;  %7295 = vmatprep.mubr.bf16.mxu0 %v12628_v35  ;;  %v2455_v10 = vld [vmem:[#allocation4 + $0x4e0] sm:$0xff]  ;;  %vm3819_vm2 = vcmp.ne.bf16.partialorder %v3787_v48, 0  ;;  %vm3428_vm1 = vcmp.ne.bf16.partialorder %v3396_v34, 0 }
 0x2af   : > { %v3231_v53 = vsel %vm1063_vm10, %v3169_v41, %v12627_v3  ;;  %v8075_v59 = vcombine.low %v1188_v0, %v1578_v25  ;;  %v8076_v58 = vcombine.high %v1188_v0, %v1578_v25  ;;  %v12013_v0 = vpop.f32.mrf.mxu0  ;;  %vm2487_vm14 = vcmp.ne.bf16.partialorder %v2455_v10, 0  ;;  %v3007_v3 = vld [vmem:[#allocation4 + $0x6e8] sm:$0xff]  ;;  %v2066_v10 = vld [vmem:[#allocation4 + $0x3e0] sm:$0xff] }
 0x2b0   : > { %v4011_v5 = vsel %vm1063_vm10, %v3949_v45, %v3950_v2  ;;  %v12003_v33 = vpop.permute.xlu1 %3915  ;;  %v3232_v62 = vsel %vm3175_vm13, %v11833_v26, %v3231_v53  ;;  %12757 = vst [vmem:[#allocation28_spill] sm:$0xff] %v12013_v0  ;;  %v12761_v34 = vrot.slane %v11887_v46, 4  ;;  %vm3039_vm7 = vcmp.ne.bf16.partialorder %v3007_v3, 0 }
 0x2b1   : > { %v4012_v38 = vsel %vm3955_vm11, %v11809_v24, %v4011_v5  ;;  %v12622_v21 = vrot.slane %v12003_v33, 4  ;;  %7234 = vmatprep.subr.bf16.mxu1 %v8076_v58  ;;  %v12008_v41 = vpop.permute.xlu0 %3523 }
 0x2b2   : > { %v12624_v25 = vrot.slane %v12008_v41, 4  ;;  %7235 = vmatpush1.bf16.msra.mxu1 %v8075_v59  ;;  %v4079_v45 = vsel %vm3818_vm4, %v4012_v38, 0  ;;  %v3299_v59 = vsel %vm3038_vm12, %v3232_v62, 0  ;;  %v2616_v38 = vld [vmem:[#allocation4 + $0x5e0] sm:$0xff]  ;;  %vm2098_vm4 = vcmp.ne.bf16.partialorder %v2066_v10, 0 }
 0x2b3   : > { %v4013_v24 = vsel %vm1063_vm10, %v3950_v2, %v12622_v21  ;;  %v8334_v5 = vcombine.high %v4079_v45, %v4079_v45  ;;  %v8333_v58 = vcombine.low %v4079_v45, %v4079_v45  ;;  %v12029_v2 = vpop.f32.mrf.mxu0  ;;  %v2423_v62 = vld [vmem:[#allocation2 + $0xe4] sm:$0xff]  ;;  %vm2648_vm6 = vcmp.ne.bf16.partialorder %v2616_v38, 0  ;;  %v12044_v45 = vpop.f32.mrf.mxu1 }
 0x2b4   : > { %v4014_v28 = vsel %vm3955_vm11, %v3914_v52, %v4013_v24  ;;  %v3621_v26 = vsel %vm1063_vm10, %v3559_v23, %v12624_v25  ;;  %v12026_v53 = vpop.permute.xlu1 %3135  ;;  %12758 = vst [vmem:[#allocation29_spill] sm:$0xff] %v12044_v45  ;;  %v12764_v38 = vrot.slane %v12008_v41, 4 }
 0x2b5   : > { %8396 = vmatmul.mubr.msk.bf16.vlgmr.msra.gmra.mxu1 %vm5862_vm0, %v11789_v6  ;;  %8397 = vmatprep.subr.msk.bf16.mxu0 %vm1063_vm10, %v8334_v5  ;;  %v12035_v52 = vpop.permute.xlu0 %2743  ;;  %v6036_v24 = vsel %vm1063_vm10, %v8333_v58, 0  ;;  %v3622_v23 = vsel %vm3565_vm15, %v11869_v40, %v3621_v26  ;;  %v4080_v20 = vsel %vm3819_vm2, %v4014_v28, 0  ;;  %v3397_v58 = vld [vmem:[#allocation4 + $0x7e8] sm:$0xff]  ;;  %v12759_v40 = vrot.slane %v12026_v53, 4 }
 0x2b6   : > { %v2780_v21 = vrot.slane %v12035_v52, 4  ;;  %7270 = vmatpush1.bf16.msra.mxu0 %v6036_v24  ;;  %v3689_v54 = vsel %vm3428_vm1, %v3622_v23, 0  ;;  %v8336_v25 = vcombine.high %v4080_v20, %v4080_v20  ;;  %v8335_v43 = vcombine.low %v4080_v20, %v4080_v20  ;;  %7338 = vmatprep.mubr.bf16.mxu1 %v12628_v35  ;;  %v12059_v23 = vpop.f32.mrf.mxu0 }
 0x2b7   : > { %v8269_v5 = vcombine.low %v3299_v59, %v3689_v54  ;;  %v8270_v49 = vcombine.high %v3299_v59, %v3689_v54  ;;  %v12760_v28 = vrot.slane %v11979_v4, 4  ;;  %v2519_v59 = vsel %vm2487_vm14, %v2423_v62, 0 }
 0x2b8   : > { %v2841_v26 = vsel %vm1063_vm10, %v12761_v34, %v2780_v21  ;;  %v12054_v24 = vpop.permute.xlu1 %1803  ;;  %8399 = vmatprep.subr.msk.bf16.mxu1 %vm1063_vm10, %v8336_v25  ;;  %v6042_v54 = vsel %vm1063_vm10, %v8335_v43, 0  ;;  %v2456_v34 = vld [vmem:[#allocation4 + $0x4e8] sm:$0xff]  ;;  %vm3429_vm8 = vcmp.ne.bf16.partialorder %v3397_v58, 0  ;;  %v12084_v7 = vpop.f32.mrf.mxu0  ;;  %vm12766_vm2 = vcmask 252928   ;;  %v895_v58 = vld [vmem:[#allocation4 + $0xe0] sm:$0xff] }
 0x2b9   : > { %v3233_v48 = vsel %vm1063_vm10, %v12760_v28, %v12759_v40  ;;  %v12631_v20 = vrot.slane %v12054_v24, 4  ;;  %7271 = vmatprep.subr.bf16.mxu0 %v8270_v49  ;;  %v12062_v35 = vpop.permute.xlu0 %3525  ;;  %7313 = vmatpush1.bf16.msra.mxu1 %v6042_v54  ;;  %v2842_v40 = vsel %vm2785_vm3, %v11887_v46, %v2841_v26  ;;  %v1676_v28 = vld [vmem:[#allocation4 + $0x2e0] sm:$0xff]  ;;  %v2617_v25 = vld [vmem:[#allocation4 + $0x5e8] sm:$0xff]  ;;  %v12762_v49 = vrot.slane %v11940_v55, 4  ;;  %v12075_v26 = vpop.f32.mrf.mxu1  ;;  %12765 = vst [vmem:[#allocation31_spill] sm:$0xff] %v12084_v7 }
 0x2ba   : > { %v12630_v45 = vrot.slane %v12062_v35, 4  ;;  %7272 = vmatpush1.bf16.msra.mxu0 %v8269_v5  ;;  %v2909_v43 = vsel %vm2648_vm6, %v2842_v40, 0  ;;  %v3234_v46 = vsel %vm3175_vm13, %v11979_v4, %v3233_v48  ;;  %12763 = vst [vmem:[#allocation30_spill] sm:$0xff] %v12075_v26  ;;  %vm1708_vm9 = vcmp.ne.bf16.partialorder %v1676_v28, 0  ;;  %v1286_v48 = vld [vmem:[#allocation4 + $0x1e0] sm:$0xff] }
 0x2bb   : > { %v1901_v62 = vsel %vm1063_vm10, %v12762_v49, %v12631_v20  ;;  %v8205_v54 = vcombine.low %v2519_v59, %v2909_v43  ;;  %v8206_v0 = vcombine.high %v2519_v59, %v2909_v43  ;;  %vm2488_vm5 = vcmp.ne.bf16.partialorder %v2456_v34, 0  ;;  %v12091_v49 = vpop.f32.mrf.mxu1 }
 0x2bc   : > { %v3623_v5 = vsel %vm1063_vm10, %v12764_v38, %v12630_v45  ;;  %v12082_v40 = vpop.permute.xlu1 %2745  ;;  %vm2649_vm12 = vcmp.ne.bf16.partialorder %v2617_v25, 0  ;;  %v3300_v45 = vsel %vm3039_vm7, %v3234_v46, 0  ;;  %v2520_v26 = vsel %vm2488_vm5, %v2424_v27, 0 }
 0x2bd   : > { %v12632_v59 = vrot.slane %v12082_v40, 4  ;;  %7273 = vmatprep.subr.bf16.mxu0 %v8206_v0  ;;  %v12087_v43 = vpop.permute.xlu0 %2193  ;;  %v3624_v4 = vsel %vm3565_vm15, %v12008_v41, %v3623_v5  ;;  %v1902_v0 = vsel %vm12766_vm2, %v11940_v55, %v1901_v62  ;;  %vm1318_vm1 = vcmp.ne.bf16.partialorder %v1286_v48, 0  ;;  %v12109_v55 = vpop.f32.mrf.mxu0 }
 0x2be   : > { %v2230_v38 = vrot.slane %v12087_v43, 4  ;;  %7274 = vmatpush1.bf16.msra.mxu0 %v8205_v54  ;;  %v3690_v20 = vsel %vm3429_vm8, %v3624_v4, 0  ;;  %12768 = vst [vmem:[#allocation32_spill] sm:$0xff] %v12109_v55  ;;  %v1969_v27 = vsel %vm1708_vm9, %v1902_v0, 0  ;;  %vm12769_vm14 = vcmask 7168  }
 0x2bf   : > { %v2843_v7 = vsel %vm1063_vm10, %v2780_v21, %v12632_v59  ;;  %v8271_v41 = vcombine.low %v3300_v45, %v3690_v20  ;;  %v8272_v5 = vcombine.high %v3300_v45, %v3690_v20  ;;  %v12118_v20 = vpop.f32.mrf.mxu1  ;;  %v12122_v4 = vpop.f32.mrf.mxu0  ;;  %vm927_vm6 = vcmp.ne.bf16.partialorder %v895_v58, 0 }
 0x2c0   : > { %v2291_v57 = vsel %vm1063_vm10, %v12767_v31, %v2230_v38  ;;  %v12105_v54 = vpop.permute.xlu1 %1413  ;;  %v2844_v3 = vsel %vm2785_vm3, %v12035_v52, %v2843_v7  ;;  %vm12772_vm7 = vcmask 261120   ;;  %vm12773_vm8 = vcmask 269312  }
 0x2c1   : > { %v1450_v62 = vrot.slane %v12105_v54, 4  ;;  %7314 = vmatprep.subr.bf16.mxu1 %v8272_v5  ;;  %v12112_v21 = vpop.permute.xlu0 %1022  ;;  %v2292_v45 = vsel %vm12769_vm14, %v11933_v61, %v2291_v57  ;;  %v2910_v31 = vsel %vm2649_vm12, %v2844_v3, 0  ;;  %v12770_v5 = vrot.slane %v11959_v30, 4  ;;  %v2067_v61 = vld [vmem:[#allocation4 + $0x3e8] sm:$0xff]  ;;  %vm12777_vm12 = vmmov %vm12766_vm2 }
 0x2c2   : > { %v1059_v7 = vrot.slane %v12112_v21, 4  ;;  %7315 = vmatpush1.bf16.msra.mxu1 %v8271_v41  ;;  %v2359_v52 = vsel %vm2098_vm4, %v2292_v45, 0  ;;  %v8207_v34 = vcombine.low %v2520_v26, %v2910_v31  ;;  %v8208_v46 = vcombine.high %v2520_v26, %v2910_v31  ;;  %v1677_v26 = vld [vmem:[#allocation4 + $0x2e8] sm:$0xff]  ;;  %vm12776_vm4 = vmmov %vm12769_vm14 }
 0x2c3   : > { %v1511_v28 = vsel %vm1063_vm10, %v12770_v5, %v1450_v62  ;;  %v8141_v0 = vcombine.low %v1969_v27, %v2359_v52  ;;  %v8142_v59 = vcombine.high %v1969_v27, %v2359_v52  ;;  %v12771_v57 = vrot.slane %v11964_v15, 4  ;;  %v12140_v52 = vpop.f32.mrf.mxu1  ;;  %vm12780_vm14 = vmmov %vm12772_vm7 }
 0x2c4   : > { %v12130_v3 = vpop.permute.xlu1 %2195  ;;  %7316 = vmatprep.subr.bf16.mxu1 %v8208_v46  ;;  %v1512_v10 = vsel %vm12772_vm7, %v11959_v30, %v1511_v28  ;;  %12774 = vst [vmem:[#allocation33_spill] sm:$0xff] %v12140_v52  ;;  %vm2099_vm9 = vcmp.ne.bf16.partialorder %v2067_v61, 0  ;;  %v12144_v30 = vpop.f32.mrf.mxu0  ;;  %vm1709_vm5 = vcmp.ne.bf16.partialorder %v1677_v26, 0  ;;  %v12775_v48 = vrot.slane %v12054_v24, 4  ;;  %v896_v61 = vld [vmem:[#allocation4 + $0xe8] sm:$0xff] }
 0x2c5   : > { %v1121_v25 = vsel %vm1063_vm10, %v12771_v57, %v1059_v7  ;;  %v12633_v41 = vrot.slane %v12130_v3, 4  ;;  %7275 = vmatprep.subr.bf16.mxu0 %v8142_v59  ;;  %v12135_v45 = vpop.permute.xlu0 %1805  ;;  %v1579_v31 = vsel %vm1318_vm1, %v1512_v10, 0  ;;  %vm928_vm1 = vcmp.ne.bf16.partialorder %v896_v61, 0 }
 0x2c6   : > { %v1122_v27 = vsel %vm12773_vm8, %v11964_v15, %v1121_v25  ;;  %v12634_v5 = vrot.slane %v12135_v45, 4  ;;  %7276 = vmatpush1.bf16.msra.mxu0 %v8141_v0  ;;  %7317 = vmatpush1.bf16.msra.mxu1 %v8207_v34  ;;  %v1287_v15 = vld [vmem:[#allocation4 + $0x1e8] sm:$0xff] }
 0x2c7   : > { %v1189_v46 = vsel %vm927_vm6, %v1122_v27, 0  ;;  %v2293_v59 = vsel %vm1063_vm10, %v2230_v38, %v12633_v41  ;;  %v12163_v27 = vpop.f32.mrf.mxu1  ;;  %vm1319_vm2 = vcmp.ne.bf16.partialorder %v1287_v15, 0  ;;  %vm12781_vm6 = vmmov %vm12773_vm8  ;;  %v12785_v15 = vrot.slane %v12003_v33, 4 }
 0x2c8   : > { %v8077_v28 = vcombine.low %v1189_v46, %v1579_v31  ;;  %v8078_v57 = vcombine.high %v1189_v46, %v1579_v31  ;;  %v1903_v0 = vsel %vm1063_vm10, %v12775_v48, %v12634_v5  ;;  %v12154_v34 = vpop.permute.xlu1 %1415  ;;  %v2294_v58 = vsel %vm12776_vm4, %v12087_v43, %v2293_v59  ;;  %12778 = vst [vmem:[#allocation34_spill] sm:$0xff] %v12163_v27  ;;  %v12166_v48 = vpop.f32.mrf.mxu0 }
 0x2c9   : > { %v12636_v25 = vrot.slane %v12154_v34, 4  ;;  %v12159_v38 = vpop.permute.xlu0 %1024  ;;  %v1904_v10 = vsel %vm12777_vm12, %v12054_v24, %v1903_v0  ;;  %v2360_v26 = vsel %vm2099_vm9, %v2294_v58, 0  ;;  %12779 = vst [vmem:[#allocation35_spill] sm:$0xff] %v12166_v48  ;;  %v12171_v41 = vpop.f32.mrf.mxu1  ;;  %v3788_v58 = vld [vmem:[#allocation4 + $0x8f0] sm:$0xff] }
 0x2ca   : > { %7277 = vmatprep.subr.bf16.mxu0 %v8078_v57  ;;  %v12635_v31 = vrot.slane %v12159_v38, 4  ;;  %v1970_v46 = vsel %vm1709_vm5, %v1904_v10, 0  ;;  %vm3820_vm7 = vcmp.ne.bf16.partialorder %v3788_v58, 0 }
 0x2cb   : > { %7278 = vmatpush1.bf16.msra.mxu0 %v8077_v28  ;;  %v1513_v43 = vsel %vm1063_vm10, %v1450_v62, %v12636_v25  ;;  %v8143_v59 = vcombine.low %v1970_v46, %v2360_v26  ;;  %v8144_v57 = vcombine.high %v1970_v46, %v2360_v26  ;;  %v3008_v46 = vld [vmem:[#allocation4 + $0x6f0] sm:$0xff]  ;;  %v3789_v25 = vld [vmem:[#allocation4 + $0x8f8] sm:$0xff] }
 0x2cc   : > { %v1123_v24 = vsel %vm1063_vm10, %v1059_v7, %v12635_v31  ;;  %v12176_v0 = vpop.permute.xlu1 %3137  ;;  %v1514_v28 = vsel %vm12780_vm14, %v12105_v54, %v1513_v43  ;;  %v12186_v31 = vpop.f32.mrf.mxu0  ;;  %v12783_v54 = vmov 0   ;;  %v12784_v43 = vrot.slane %v12026_v53, 4 }
 0x2cd   : > { %v12637_v10 = vrot.slane %v12176_v0, 4  ;;  %7318 = vmatprep.subr.bf16.mxu1 %v8144_v57  ;;  %v3918_v5 = vpop.permute.xlu0 %3917  ;;  %v1124_v62 = vsel %vm12781_vm6, %v12112_v21, %v1123_v24  ;;  %v1580_v61 = vsel %vm1319_vm2, %v1514_v28, 0  ;;  %12782 = vst [vmem:[#allocation36_spill] sm:$0xff] %v12186_v31  ;;  %v12194_v21 = vpop.f32.mrf.mxu1  ;;  %v3398_v28 = vld [vmem:[#allocation4 + $0x7f0] sm:$0xff]  ;;  %vm3040_vm8 = vcmp.ne.bf16.partialorder %v3008_v46, 0 }
 0x2ce   : > { %8398 = vmatmul.mubr.msk.bf16.vlgmr.msra.gmra.mxu0 %vm5862_vm0, %v11789_v6  ;;  %v3952_v26 = vrot.slane %v3918_v5, 4  ;;  %7319 = vmatpush1.bf16.msra.mxu1 %v8143_v59  ;;  %v1190_v7 = vsel %vm928_vm1, %v1124_v62, 0  ;;  %v12199_v62 = vpop.f32.mrf.mxu0  ;;  %vm3821_vm9 = vcmp.ne.bf16.partialorder %v3789_v25, 0  ;;  %vm3430_vm5 = vcmp.ne.bf16.partialorder %v3398_v28, 0 }
 0x2cf   : > { %7381 = vmatprep.mubr.bf16.mxu0 %v12783_v54  ;;  %v3235_v57 = vsel %vm1063_vm10, %v12784_v43, %v12637_v10  ;;  %v8079_v48 = vcombine.low %v1190_v7, %v1580_v61  ;;  %v8080_v27 = vcombine.high %v1190_v7, %v1580_v61  ;;  %v2457_v7 = vld [vmem:[#allocation4 + $0x4f0] sm:$0xff]  ;;  %v12787_v46 = vrot.slane %v12062_v35, 4 }
 0x2d0   : > { %v4015_v59 = vsel %vm1063_vm10, %v12785_v15, %v3952_v26  ;;  %v3920_v24 = vpop.permute.xlu1 %3919  ;;  %v3236_v61 = vsel %vm3175_vm13, %v12026_v53, %v3235_v57  ;;  %vm2489_vm4 = vcmp.ne.bf16.partialorder %v2457_v7, 0  ;;  %v2068_v7 = vld [vmem:[#allocation4 + $0x3f0] sm:$0xff] }
 0x2d1   : > { %v4016_v31 = vsel %vm3955_vm11, %v12003_v33, %v4015_v59  ;;  %v3953_v52 = vrot.slane %v3920_v24, 4  ;;  %7320 = vmatprep.subr.bf16.mxu1 %v8080_v27  ;;  %v12203_v43 = vpop.permute.xlu0 %3527  ;;  %v12210_v33 = vpop.f32.mrf.mxu1  ;;  %v3301_v59 = vsel %vm3040_vm8, %v3236_v61, 0  ;;  %v2618_v24 = vld [vmem:[#allocation4 + $0x5f0] sm:$0xff]  ;;  %vm2100_vm6 = vcmp.ne.bf16.partialorder %v2068_v7, 0 }
 0x2d2   : > { %v3562_v10 = vrot.slane %v12203_v43, 4  ;;  %7321 = vmatpush1.bf16.msra.mxu1 %v8079_v48  ;;  %v4081_v15 = vsel %vm3820_vm7, %v4016_v31, 0  ;;  %12786 = vst [vmem:[#allocation37_spill] sm:$0xff] %v12210_v33  ;;  %v12216_v48 = vpop.f32.mrf.mxu0  ;;  %vm12794_vm8 = vcmask 7168  }
 0x2d3   : > { %v4017_v55 = vsel %vm1063_vm10, %v3952_v26, %v3953_v52  ;;  %v8338_v37 = vcombine.high %v4081_v15, %v4081_v15  ;;  %v8337_v17 = vcombine.low %v4081_v15, %v4081_v15  ;;  %v2425_v26 = vld [vmem:[#allocation2 + $0xf4] sm:$0xff]  ;;  %v12230_v33 = vpop.f32.mrf.mxu1 }
 0x2d4   : > { %v4018_v27 = vsel %vm3955_vm11, %v3918_v5, %v4017_v55  ;;  %v3625_v53 = vsel %vm1063_vm10, %v12787_v46, %v3562_v10  ;;  %v3140_v57 = vpop.permute.xlu1 %3139  ;;  %vm2650_vm11 = vcmp.ne.bf16.partialorder %v2618_v24, 0  ;;  %12788 = vst [vmem:[#allocation38_spill] sm:$0xff] %v12230_v33 }
 0x2d5   : > { %v4082_v31 = vsel %vm3821_vm9, %v4018_v27, 0  ;;  %v3173_v52 = vrot.slane %v3140_v57, 4  ;;  %8400 = vmatmul.mubr.msk.bf16.vlgmr.msra.gmra.mxu1 %vm5862_vm0, %v11789_v6  ;;  %8401 = vmatprep.subr.msk.bf16.mxu0 %vm1063_vm10, %v8338_v37  ;;  %v12222_v58 = vpop.permute.xlu0 %2747  ;;  %v6048_v55 = vsel %vm1063_vm10, %v8337_v17, 0  ;;  %v3626_v5 = vsel %vm3565_vm15, %v12062_v35, %v3625_v53  ;;  %v3009_v37 = vld [vmem:[#allocation4 + $0x6f8] sm:$0xff] }
 0x2d6   : > { %v2782_v61 = vrot.slane %v12222_v58, 4  ;;  %7356 = vmatpush1.bf16.msra.mxu0 %v6048_v55  ;;  %v3691_v25 = vsel %vm3430_vm5, %v3626_v5, 0  ;;  %v8340_v15 = vcombine.high %v4082_v31, %v4082_v31  ;;  %v8339_v27 = vcombine.low %v4082_v31, %v4082_v31  ;;  %7424 = vmatprep.mubr.bf16.mxu1 %v12783_v54  ;;  %v3399_v57 = vld [vmem:[#allocation4 + $0x7f8] sm:$0xff]  ;;  %v12243_v31 = vpop.f32.mrf.mxu0 }
 0x2d7   : > { %v8273_v6 = vcombine.low %v3301_v59, %v3691_v25  ;;  %v8274_v46 = vcombine.high %v3301_v59, %v3691_v25  ;;  %v12789_v17 = vrot.slane %v12176_v0, 4  ;;  %v12790_v53 = vrot.slane %v12082_v40, 4 }
 0x2d8   : > { %v12238_v55 = vpop.permute.xlu1 %1807  ;;  %8403 = vmatprep.subr.msk.bf16.mxu1 %vm1063_vm10, %v8340_v15  ;;  %v6054_v54 = vsel %vm1063_vm10, %v8339_v27, 0  ;;  %v2521_v59 = vsel %vm2489_vm4, %v2425_v26, 0  ;;  %vm3041_vm12 = vcmp.ne.bf16.partialorder %v3009_v37, 0  ;;  %vm3431_vm2 = vcmp.ne.bf16.partialorder %v3399_v57, 0  ;;  %v2619_v26 = vld [vmem:[#allocation4 + $0x5f8] sm:$0xff]  ;;  %v12249_v27 = vpop.f32.mrf.mxu1  ;;  %v897_v57 = vld [vmem:[#allocation4 + $0xf0] sm:$0xff] }
 0x2d9   : > { %v3237_v35 = vsel %vm1063_vm10, %v12789_v17, %v3173_v52  ;;  %v2845_v28 = vsel %vm1063_vm10, %v12790_v53, %v2782_v61  ;;  %v12638_v5 = vrot.slane %v12238_v55, 4  ;;  %7357 = vmatprep.subr.bf16.mxu0 %v8274_v46  ;;  %v3530_v25 = vpop.permute.xlu0 %3529  ;;  %7399 = vmatpush1.bf16.msra.mxu1 %v6054_v54  ;;  %v1678_v17 = vld [vmem:[#allocation4 + $0x2f0] sm:$0xff]  ;;  %v2458_v53 = vld [vmem:[#allocation4 + $0x4f8] sm:$0xff]  ;;  %v12791_v46 = vrot.slane %v12135_v45, 4 }
 0x2da   : > { %v2846_v52 = vsel %vm2785_vm3, %v12082_v40, %v2845_v28  ;;  %v3563_v33 = vrot.slane %v3530_v25, 4  ;;  %7358 = vmatpush1.bf16.msra.mxu0 %v8273_v6  ;;  %v3238_v28 = vsel %vm3175_vm13, %v12176_v0, %v3237_v35  ;;  %vm1710_vm1 = vcmp.ne.bf16.partialorder %v1678_v17, 0  ;;  %v2426_v25 = vld [vmem:[#allocation2 + $0xfc] sm:$0xff] }
 0x2db   : > { %v2911_v15 = vsel %vm2650_vm11, %v2846_v52, 0  ;;  %v1905_v54 = vsel %vm1063_vm10, %v12791_v46, %v12638_v5  ;;  %vm2490_vm14 = vcmp.ne.bf16.partialorder %v2458_v53, 0  ;;  %v12259_v52 = vpop.f32.mrf.mxu0  ;;  %vm2651_vm7 = vcmp.ne.bf16.partialorder %v2619_v26, 0 }
 0x2dc   : > { %v8209_v44 = vcombine.low %v2521_v59, %v2911_v15  ;;  %v8210_v40 = vcombine.high %v2521_v59, %v2911_v15  ;;  %v3627_v24 = vsel %vm1063_vm10, %v3562_v10, %v3563_v33  ;;  %v2750_v6 = vpop.permute.xlu1 %2749  ;;  %v1288_v59 = vld [vmem:[#allocation4 + $0x1f0] sm:$0xff]  ;;  %v3302_v10 = vsel %vm3041_vm12, %v3238_v28, 0  ;;  %v12270_v15 = vpop.f32.mrf.mxu1  ;;  %vm12800_vm12 = vmmov %vm12794_vm8 }
 0x2dd   : > { %v2783_v22 = vrot.slane %v2750_v6, 4  ;;  %v12261_v47 = vpop.permute.xlu0 %2197  ;;  %v3628_v46 = vsel %vm3565_vm15, %v12203_v43, %v3627_v24  ;;  %vm12792_vm13 = vcmask 252928   ;;  %v2522_v43 = vsel %vm2490_vm14, %v2426_v25, 0 }
 0x2de   : > { %7359 = vmatprep.subr.bf16.mxu0 %v8210_v40  ;;  %v2232_v0 = vrot.slane %v12261_v47, 4  ;;  %v3692_v33 = vsel %vm3431_vm2, %v3628_v46, 0  ;;  %v1906_v35 = vsel %vm12792_vm13, %v12135_v45, %v1905_v54  ;;  %v12793_v24 = vrot.slane %v12130_v3, 4  ;;  %v12281_v45 = vpop.f32.mrf.mxu0  ;;  %vm12801_vm2 = vmmov %vm12792_vm13 }
 0x2df   : > { %7360 = vmatpush1.bf16.msra.mxu0 %v8209_v44  ;;  %v2847_v40 = vsel %vm1063_vm10, %v2782_v61, %v2783_v22  ;;  %v8275_v6 = vcombine.low %v3302_v10, %v3692_v33  ;;  %v8276_v5 = vcombine.high %v3302_v10, %v3692_v33  ;;  %vm1320_vm15 = vcmp.ne.bf16.partialorder %v1288_v59, 0  ;;  %v12292_v33 = vpop.f32.mrf.mxu1 }
 0x2e0   : > { %v2295_v32 = vsel %vm1063_vm10, %v12793_v24, %v2232_v0  ;;  %v12277_v44 = vpop.permute.xlu1 %1417  ;;  %v2848_v37 = vsel %vm2785_vm3, %v12222_v58, %v2847_v40  ;;  %v1971_v61 = vsel %vm1710_vm1, %v1906_v35, 0  ;;  %vm929_vm3 = vcmp.ne.bf16.partialorder %v897_v57, 0  ;;  %v2069_v24 = vld [vmem:[#allocation4 + $0x3f8] sm:$0xff] }
 0x2e1   : > { %v1452_v54 = vrot.slane %v12277_v44, 4  ;;  %7400 = vmatprep.subr.bf16.mxu1 %v8276_v5  ;;  %v12284_v22 = vpop.permute.xlu0 %1026  ;;  %v2296_v53 = vsel %vm12794_vm8, %v12130_v3, %v2295_v32  ;;  %v2912_v28 = vsel %vm2651_vm7, %v2848_v37, 0  ;;  %v12795_v5 = vrot.slane %v12154_v34, 4 }
 0x2e2   : > { %v1061_v25 = vrot.slane %v12284_v22, 4  ;;  %7401 = vmatpush1.bf16.msra.mxu1 %v8275_v6  ;;  %v2361_v58 = vsel %vm2100_vm6, %v2296_v53, 0  ;;  %v8211_v46 = vcombine.low %v2522_v43, %v2912_v28  ;;  %v8212_v10 = vcombine.high %v2522_v43, %v2912_v28  ;;  %v1679_v6 = vld [vmem:[#allocation4 + $0x2f8] sm:$0xff]  ;;  %v12302_v43 = vpop.f32.mrf.mxu0 }
 0x2e3   : > { %v1515_v40 = vsel %vm1063_vm10, %v12795_v5, %v1452_v54  ;;  %v8145_v17 = vcombine.low %v1971_v61, %v2361_v58  ;;  %v8146_v35 = vcombine.high %v1971_v61, %v2361_v58  ;;  %v12796_v32 = vrot.slane %v12159_v38, 4 }
 0x2e4   : > { %v2200_v26 = vpop.permute.xlu1 %2199  ;;  %7402 = vmatprep.subr.bf16.mxu1 %v8212_v10  ;;  %vm12797_vm9 = vcmask 261120   ;;  %vm12798_vm5 = vcmask 269312   ;;  %vm2101_vm4 = vcmp.ne.bf16.partialorder %v2069_v24, 0  ;;  %v6658_v10 = vpop.f32.mrf.mxu1  ;;  %vm1711_vm11 = vcmp.ne.bf16.partialorder %v1679_v6, 0 }
 0x2e5   : > { %v1125_v3 = vsel %vm1063_vm10, %v12796_v32, %v1061_v25  ;;  %v1516_v7 = vsel %vm12797_vm9, %v12154_v34, %v1515_v40  ;;  %v2233_v37 = vrot.slane %v2200_v26, 4  ;;  %7361 = vmatprep.subr.bf16.mxu0 %v8146_v35  ;;  %v1810_v53 = vpop.permute.xlu0 %1809  ;;  %v1289_v26 = vld [vmem:[#allocation4 + $0x1f8] sm:$0xff]  ;;  %v12799_v35 = vrot.slane %v12238_v55, 4  ;;  %vm12802_vm6 = vmmov %vm12797_vm9 }
 0x2e6   : > { %v1126_v61 = vsel %vm12798_vm5, %v12159_v38, %v1125_v3  ;;  %v1581_v28 = vsel %vm1320_vm15, %v1516_v7, 0  ;;  %v1843_v58 = vrot.slane %v1810_v53, 4  ;;  %7362 = vmatpush1.bf16.msra.mxu0 %v8145_v17  ;;  %7403 = vmatpush1.bf16.msra.mxu1 %v8211_v46  ;;  %v898_v17 = vld [vmem:[#allocation4 + $0xf8] sm:$0xff]  ;;  %v6699_v46 = vpop.f32.mrf.mxu0  ;;  %vm1321_vm1 = vcmp.ne.bf16.partialorder %v1289_v26, 0  ;;  %v6738_v53 = vpop.f32.mrf.mxu1  ;;  %vm12803_vm7 = vmmov %vm12798_vm5 }
 0x2e7   : > { %v1191_v5 = vsel %vm929_vm3, %v1126_v61, 0  ;;  %v2297_v34 = vsel %vm1063_vm10, %v2232_v0, %v2233_v37  ;;  %vm930_vm14 = vcmp.ne.bf16.partialorder %v898_v17, 0  ;;  %vm7713_vm13 = vcmask 23552   ;;  %vm12826_vm15 = vmmov %vm12794_vm8 }
 0x2e8   : > { %v8081_v40 = vcombine.low %v1191_v5, %v1581_v28  ;;  %v8082_v32 = vcombine.high %v1191_v5, %v1581_v28  ;;  %v1907_v19 = vsel %vm1063_vm10, %v12799_v35, %v1843_v58  ;;  %v1420_v38 = vpop.permute.xlu1 %1419  ;;  %v2298_v59 = vsel %vm12800_vm12, %v12261_v47, %v2297_v34  ;;  %v6701_v34 = vpop.f32.mrf.mxu0 }
 0x2e9   : > { %v1453_v57 = vrot.slane %v1420_v38, 4  ;;  %v1029_v3 = vpop.permute.xlu0 %1028  ;;  %v1908_v0 = vsel %vm12801_vm2, %v12238_v55, %v1907_v19  ;;  %v2362_v7 = vsel %vm2101_vm4, %v2298_v59, 0  ;;  %vm7716_vm8 = vcmask 31744   ;;  %vm12827_vm4 = vmmov %vm12800_vm12 }
 0x2ea   : > { %7363 = vmatprep.subr.bf16.mxu0 %v8082_v32  ;;  %v1062_v6 = vrot.slane %v1029_v3, 4  ;;  %v1972_v37 = vsel %vm1711_vm11, %v1908_v0, 0  ;;  %v8554_v32 = vld [vmem:[#allocation7] sm:$0xff]   ;;  %v6781_v35 = vpop.f32.mrf.mxu0  ;;  %vm7719_vm3 = vcmask 39936   ;;  %vm7722_vm9 = vcmask 48128  }
 0x2eb   : > { %7364 = vmatpush1.bf16.msra.mxu0 %v8081_v40  ;;  %v1517_v61 = vsel %vm1063_vm10, %v1452_v54, %v1453_v57  ;;  %v8147_v28 = vcombine.low %v1972_v37, %v2362_v7  ;;  %v8148_v58 = vcombine.high %v1972_v37, %v2362_v7  ;;  %v6740_v54 = vpop.f32.mrf.mxu1  ;;  %vm7725_vm5 = vcmask 56320  }
 0x2ec   : > { %v1127_v47 = vsel %vm1063_vm10, %v1061_v25, %v1062_v6  ;;  %v1518_v5 = vsel %vm12802_vm6, %v12277_v44, %v1517_v61  ;;  %v6783_v38 = vpop.f32.mrf.mxu0  ;;  %vm8753_vm10 = vmmov 0   ;;  %vm7771_vm11 = vcmask 130048  }
 0x2ed   : > { %7404 = vmatprep.subr.bf16.mxu1 %v8148_v58  ;;  %v1128_v19 = vsel %vm12803_vm7, %v12284_v22, %v1127_v47  ;;  %v1582_v55 = vsel %vm1321_vm1, %v1518_v5, 0  ;;  %v6742_v25 = vpop.f32.mrf.mxu1  ;;  %vm7845_vm12 = vcmask 80896  }
 0x2ee   : > { %8402 = vmatmul.mubr.msk.bf16.vlgmr.msra.gmra.mxu0 %vm5862_vm0, %v8554_v32  ;;  %7405 = vmatpush1.bf16.msra.mxu1 %v8147_v28  ;;  %v1192_v24 = vsel %vm930_vm14, %v1128_v19, 0 }
 0x2ef   : > { %v8083_v40 = vcombine.low %v1192_v24, %v1582_v55  ;;  %v8084_v26 = vcombine.high %v1192_v24, %v1582_v55  ;;  %v12335_v3 = vpop.f32.mrf.mxu1 }
 0x2f1   : > { %7406 = vmatprep.subr.bf16.mxu1 %v8084_v26 }
 0x2f2   : > { %7407 = vmatpush1.bf16.msra.mxu1 %v8083_v40 }
 0x2f5   : > { %8404 = vmatmul.mubr.msk.bf16.vlgmr.msra.gmra.mxu1 %vm5862_vm0, %v8554_v32  ;;  %v12325_v44 = vpop.permute.xlu1 %4414  ;;  %vm7710_vm0 = vcmask 15360  }
 0x2f6   : > { %v6614_v59 = vadd.f32 %v12243_v31, %v12325_v44  ;;  %v6616_v22 = vadd.f32 %v12259_v52, %v12325_v44  ;;  %v12331_v17 = vpop.permute.xlu0 %4409  ;;  %v6657_v57 = vadd.f32 %v12292_v33, %v12325_v44  ;;  %v6659_v28 = vadd.f32 %v6658_v10, %v12325_v44  ;;  %v6785_v33 = vpop.f32.mrf.mxu0 }
 0x2f7   : > { %v6610_v0 = vadd.f32 %v12199_v62, %v12331_v17  ;;  %v6612_v7 = vadd.f32 %v12216_v48, %v12331_v17  ;;  %v6653_v6 = vadd.f32 %v12249_v27, %v12331_v17  ;;  %v6655_v31 = vadd.f32 %v12270_v15, %v12331_v17  ;;  %v6824_v27 = vpop.f32.mrf.mxu1 }
 0x2f8   : > { %v7523_v52 = vmax.f32 %v6614_v59, 0.0  ;;  %v7524_v37 = vmax.f32 %v6616_v22, 0.0  ;;  %v7525_v61 = vmax.f32 %v6657_v57, 0.0  ;;  %v6696_v58 = vadd.f32 %v12281_v45, %v12331_v17  ;;  %v6787_v26 = vpop.f32.mrf.mxu0 }
 0x2f9   : > { %v7459_v47 = vmax.f32 %v6610_v0, 0.0  ;;  %v7460_v62 = vmax.f32 %v6612_v7, 0.0  ;;  %v7461_v5 = vmax.f32 %v6653_v6, 0.0  ;;  %v6698_v48 = vadd.f32 %v12302_v43, %v12331_v17  ;;  %v6826_v6 = vpop.f32.mrf.mxu1 }
 0x2fa   : > { %v7626_v32 = vadd.f32 %v7524_v37, %v7523_v52  ;;  %v7462_v19 = vmax.f32 %v6655_v31, 0.0  ;;  %v6700_v15 = vadd.f32 %v6699_v46, %v12325_v44  ;;  %v7526_v40 = vmax.f32 %v6659_v28, 0.0 }
 0x2fb   : > { %v7617_v55 = vadd.f32 %v7460_v62, %v7459_v47  ;;  %v7463_v10 = vmax.f32 %v6696_v58, 0.0  ;;  %v6739_v22 = vadd.f32 %v6738_v53, %v12331_v17  ;;  %v6702_v45 = vadd.f32 %v6701_v34, %v12325_v44  ;;  %v6867_v58 = vpop.f32.mrf.mxu0 }
 0x2fc   : > { %v7627_v24 = vadd.f32 %v7626_v32, %v7525_v61  ;;  %v7464_v57 = vmax.f32 %v6698_v48, 0.0  ;;  %v6741_v0 = vadd.f32 %v6740_v54, %v12331_v17  ;;  %v12355_v7 = vadd.f32 %v6742_v25, %v12325_v44 }
 0x2fd   : > { %v7618_v59 = vadd.f32 %v7617_v55, %v7461_v5  ;;  %v6782_v43 = vadd.f32 %v6781_v35, %v12331_v17  ;;  %v7527_v46 = vmax.f32 %v6700_v15, 0.0  ;;  %v6784_v52 = vadd.f32 %v6783_v38, %v12331_v17 }
 0x2fe   : > { %v6786_v37 = vadd.f32 %v6785_v33, %v12325_v44  ;;  %v7628_v61 = vadd.f32 %v7627_v24, %v7526_v40  ;;  %v6825_v53 = vadd.f32 %v6824_v27, %v12331_v17  ;;  %v6788_v34 = vadd.f32 %v6787_v26, %v12325_v44 }
 0x2ff   : > { %v7619_v31 = vadd.f32 %v7618_v59, %v7462_v19  ;;  %v7467_v28 = vmax.f32 %v6782_v43, 0.0  ;;  %v7465_v47 = vmax.f32 %v6739_v22, 0.0  ;;  %v7468_v25 = vmax.f32 %v6784_v52, 0.0  ;;  %v6828_v19 = vpop.f32.mrf.mxu1 }
 0x300   : > { %v7531_v62 = vmax.f32 %v6786_v37, 0.0  ;;  %v7528_v5 = vmax.f32 %v6702_v45, 0.0  ;;  %v7469_v35 = vmax.f32 %v6825_v53, 0.0  ;;  %v7532_v32 = vmax.f32 %v6788_v34, 0.0 }
 0x301   : > { %v7620_v54 = vadd.f32 %v7619_v31, %v7463_v10  ;;  %v6827_v48 = vadd.f32 %v6826_v6, %v12331_v17  ;;  %v7635_v55 = vadd.f32 %v7468_v25, %v7467_v28  ;;  %v6829_v33 = vadd.f32 %v6828_v19, %v12325_v44  ;;  %v6830_v34 = vpop.f32.mrf.mxu1 }
 0x302   : > { %v6868_v15 = vadd.f32 %v6867_v58, %v12331_v17  ;;  %v7629_v27 = vadd.f32 %v7628_v61, %v7527_v46  ;;  %v7466_v24 = vmax.f32 %v6741_v0, 0.0  ;;  %v6266_v26 = vadd.f32 %v11866_v29, %v12331_v17 }
 0x303   : > { %v7621_v38 = vadd.f32 %v7620_v54, %v7464_v57  ;;  %v7470_v40 = vmax.f32 %v6827_v48, 0.0  ;;  %v7636_v59 = vadd.f32 %v7635_v55, %v7469_v35  ;;  %v7644_v22 = vadd.f32 %v7532_v32, %v7531_v62  ;;  %v6869_v55 = vpop.f32.mrf.mxu0 }
 0x304   : > { %v7533_v45 = vmax.f32 %v6829_v33, 0.0  ;;  %v7471_v43 = vmax.f32 %v6868_v15, 0.0  ;;  %v6268_v6 = vadd.f32 %v11889_v60, %v12331_v17  ;;  %v6309_v57 = vadd.f32 %v11923_v9, %v12331_v17 }
 0x305   : > { %v7622_v10 = vadd.f32 %v7621_v38, %v7465_v47  ;;  %v6311_v31 = vadd.f32 %v11945_v42, %v12331_v17  ;;  %v7529_v0 = vmax.f32 %v12355_v7, 0.0  ;;  %v12376_v46 = vadd.f32 %v12335_v3, %v12325_v44 }
 0x306   : > { %v7637_v29 = vadd.f32 %v7636_v59, %v7470_v40  ;;  %v12378_v52 = vadd.f32 %v7629_v27, %v7528_v5  ;;  %v6352_v37 = vadd.f32 %v11949_v16, %v12331_v17  ;;  %v6354_v60 = vadd.f32 %v11971_v50, %v12331_v17 }
 0x307   : > { %v7443_v61 = vmax.f32 %v6266_v26, 0.0  ;;  %v12384_v9 = vadd.f32 %v7622_v10, %v7466_v24  ;;  %v7645_v28 = vadd.f32 %v7644_v22, %v7533_v45  ;;  %v6395_v42 = vadd.f32 %v11998_v14, %v12331_v17 }
 0x308   : > { %v7444_v53 = vmax.f32 %v6268_v6, 0.0  ;;  %v7638_v3 = vadd.f32 %v7637_v29, %v7471_v43  ;;  %v6397_v58 = vadd.f32 %v12018_v56, %v12331_v17  ;;  %v7445_v54 = vmax.f32 %v6309_v57, 0.0 }
 0x309   : > { %v7446_v47 = vmax.f32 %v6311_v31, 0.0  ;;  %v6094_v16 = vadd.f32 %v11692_v1, %v12331_v17  ;;  %v6096_v50 = vadd.f32 %v11714_v12, %v12331_v17  ;;  %v6137_v62 = vadd.f32 %v11745_v11, %v12331_v17  ;;  %v6910_v1 = vpop.f32.mrf.mxu1 }
 0x30a   : > { %v7581_v25 = vadd.f32 %v7444_v53, %v7443_v61  ;;  %v7447_v5 = vmax.f32 %v6352_v37, 0.0  ;;  %v7448_v14 = vmax.f32 %v6354_v60, 0.0  ;;  %v6139_v35 = vadd.f32 %v11769_v51, %v12331_v17 }
 0x30b   : > { %v6180_v56 = vadd.f32 %v11775_v13, %v12331_v17  ;;  %v7449_v32 = vmax.f32 %v6395_v42, 0.0  ;;  %v7435_v19 = vmax.f32 %v6094_v16, 0.0  ;;  %v7436_v38 = vmax.f32 %v6096_v50, 0.0 }
 0x30c   : > { %v7582_v48 = vadd.f32 %v7581_v25, %v7445_v54  ;;  %v7450_v33 = vmax.f32 %v6397_v58, 0.0  ;;  %v6182_v12 = vadd.f32 %v11799_v63, %v12331_v17  ;;  %v6223_v11 = vadd.f32 %v11830_v8, %v12331_v17 }
 0x30d   : > { %v6225_v15 = vadd.f32 %v11854_v18, %v12331_v17  ;;  %v7437_v27 = vmax.f32 %v6137_v62, 0.0  ;;  %v7438_v24 = vmax.f32 %v6139_v35, 0.0  ;;  %v7563_v13 = vadd.f32 %v7436_v38, %v7435_v19 }
 0x30e   : > { %v7583_v51 = vadd.f32 %v7582_v48, %v7446_v47  ;;  %v7439_v40 = vmax.f32 %v6180_v56, 0.0  ;;  %v6831_v26 = vadd.f32 %v6830_v34, %v12325_v44  ;;  %v6870_v10 = vadd.f32 %v6869_v55, %v12331_v17  ;;  %v12804_v56 = vld [vmem:[#allocation17_spill] sm:$0xff] }
 0x30f   : > { %v6911_v59 = vadd.f32 %v6910_v1, %v12331_v17  ;;  %v7564_v45 = vadd.f32 %v7563_v13, %v7437_v27  ;;  %v6438_v63 = vadd.f32 %v12029_v2, %v12331_v17  ;;  %v6440_v8 = vadd.f32 %v12059_v23, %v12331_v17  ;;  %v12806_v1 = vld [vmem:[#allocation19_spill] sm:$0xff] }
 0x310   : > { %v7584_v22 = vadd.f32 %v7583_v51, %v7447_v5  ;;  %v7440_v18 = vmax.f32 %v6182_v12, 0.0  ;;  %v7441_v43 = vmax.f32 %v6223_v11, 0.0  ;;  %v7534_v6 = vmax.f32 %v6831_v26, 0.0  ;;  %v6912_v12 = vpop.f32.mrf.mxu1 }
 0x311   : > { %v7472_v57 = vmax.f32 %v6870_v10, 0.0  ;;  %v7565_v29 = vadd.f32 %v7564_v45, %v7438_v24  ;;  %v7473_v37 = vmax.f32 %v6911_v59, 0.0  ;;  %v6481_v60 = vadd.f32 %v12091_v49, %v12331_v17  ;;  %v12809_v10 = vld [vmem:[#allocation22_spill] sm:$0xff] }
 0x312   : > { %v7585_v31 = vadd.f32 %v7584_v22, %v7448_v14  ;;  %v7442_v61 = vmax.f32 %v6225_v15, 0.0  ;;  %v6483_v53 = vadd.f32 %v12118_v20, %v12331_v17  ;;  %v6524_v2 = vadd.f32 %v12122_v4, %v12331_v17  ;;  %v6871_v20 = vpop.f32.mrf.mxu0 }
 0x313   : > { %v7639_v42 = vadd.f32 %v7638_v3, %v7472_v57  ;;  %v7566_v23 = vadd.f32 %v7565_v29, %v7439_v40  ;;  %v7451_v58 = vmax.f32 %v6438_v63, 0.0  ;;  %v7452_v54 = vmax.f32 %v6440_v8, 0.0  ;;  %v12808_v40 = vld [vmem:[#allocation21_spill] sm:$0xff] }
 0x314   : > { %v7586_v34 = vadd.f32 %v7585_v31, %v7449_v32  ;;  %v12419_v47 = vadd.f32 %v7645_v28, %v7534_v6  ;;  %v6526_v25 = vadd.f32 %v12144_v30, %v12331_v17  ;;  %v6567_v49 = vadd.f32 %v12171_v41, %v12331_v17  ;;  %v12805_v32 = vld [vmem:[#allocation18_spill] sm:$0xff]  ;;  %v12810_v31 = vld [vmem:[#allocation23_spill] sm:$0xff] }
 0x315   : > { %v12427_v3 = vadd.f32 %v12194_v21, %v12331_v17  ;;  %v7567_v50 = vadd.f32 %v7566_v23, %v7440_v18  ;;  %v7640_v4 = vadd.f32 %v7639_v42, %v7473_v37  ;;  %v7453_v62 = vmax.f32 %v6481_v60, 0.0  ;;  %v12811_v37 = vld [vmem:[#allocation24_spill] sm:$0xff] }
 0x316   : > { %v7587_v16 = vadd.f32 %v7586_v34, %v7450_v33  ;;  %v7454_v5 = vmax.f32 %v6483_v53, 0.0  ;;  %v7599_v14 = vadd.f32 %v7452_v54, %v7451_v58  ;;  %v6098_v28 = vadd.f32 %v11735_v36, %v12325_v44  ;;  %v6873_v36 = vpop.f32.mrf.mxu0  ;;  %v12812_v58 = vld [vmem:[#allocation25_spill] sm:$0xff] }
 0x317   : > { %v6100_v30 = vadd.f32 %v11759_v39, %v12325_v44  ;;  %v7568_v35 = vadd.f32 %v7567_v50, %v7441_v43  ;;  %v7455_v41 = vmax.f32 %v6524_v2, 0.0  ;;  %v6141_v21 = vadd.f32 %v12804_v56, %v12325_v44  ;;  %v12807_v39 = vld [vmem:[#allocation20_spill] sm:$0xff]  ;;  %v6914_v43 = vpop.f32.mrf.mxu1 }
 0x318   : > { %7588 = vadd.xlane.f32.xlu0 %v7587_v16  ;;  %v6143_v48 = vadd.f32 %v12805_v32, %v12325_v44  ;;  %v7456_v19 = vmax.f32 %v6526_v25, 0.0  ;;  %v7457_v38 = vmax.f32 %v6567_v49, 0.0  ;;  %v7600_v55 = vadd.f32 %v7599_v14, %v7453_v62  ;;  %v12446_v22 = vpop.f32.mrf.mxu0  ;;  %v12813_v25 = vld [vmem:[#allocation26_spill] sm:$0xff]  ;;  %v12814_v62 = vld [vmem:[#allocation27_spill] sm:$0xff] }
 0x319   : > { %v6184_v33 = vadd.f32 %v12806_v1, %v12325_v44  ;;  %v7569_v11 = vadd.f32 %v7568_v35, %v7442_v61  ;;  %v6186_v15 = vadd.f32 %v12807_v39, %v12325_v44  ;;  %v7499_v51 = vmax.f32 %v6098_v28, 0.0  ;;  %v12460_v14 = vpop.f32.mrf.mxu1 }
 0x31a   : > { %v7500_v27 = vmax.f32 %v6100_v30, 0.0  ;;  %v7458_v24 = vmax.f32 %v12427_v3, 0.0  ;;  %v7601_v13 = vadd.f32 %v7600_v55, %v7454_v5  ;;  %v6227_v26 = vadd.f32 %v12808_v40, %v12325_v44  ;;  %v6955_v3 = vpop.f32.mrf.mxu0  ;;  %v12815_v30 = vld [vmem:[#allocation28_spill] sm:$0xff]  ;;  %v12817_v55 = vld [vmem:[#allocation30_spill] sm:$0xff] }
 0x31b   : > { %v6229_v59 = vadd.f32 %v12809_v10, %v12325_v44  ;;  %7570 = vadd.xlane.f32.xlu1 %v7569_v11  ;;  %v7501_v45 = vmax.f32 %v6141_v21, 0.0  ;;  %v7502_v63 = vmax.f32 %v6143_v48, 0.0  ;;  %v6913_v18 = vadd.f32 %v6912_v12, %v12331_v17  ;;  %v12816_v48 = vld [vmem:[#allocation29_spill] sm:$0xff] }
 0x31c   : > { %v7572_v8 = vadd.f32 %v7500_v27, %v7499_v51  ;;  %v7602_v6 = vadd.f32 %v7601_v13, %v7455_v41  ;;  %v6872_v57 = vadd.f32 %v6871_v20, %v12325_v44  ;;  %v6270_v29 = vadd.f32 %v12810_v31, %v12325_v44 }
 0x31d   : > { %v6272_v60 = vadd.f32 %v12811_v37, %v12325_v44  ;;  %v7503_v61 = vmax.f32 %v6184_v33, 0.0  ;;  %v7504_v42 = vmax.f32 %v6186_v15, 0.0  ;;  %v7474_v2 = vmax.f32 %v6913_v18, 0.0  ;;  %v6996_v33 = vpop.f32.mrf.mxu1  ;;  %v6957_v15 = vpop.f32.mrf.mxu0 }
 0x31e   : > { %v7573_v53 = vadd.f32 %v7572_v8, %v7501_v45  ;;  %v7603_v34 = vadd.f32 %v7602_v6, %v7456_v19  ;;  %v7535_v23 = vmax.f32 %v6872_v57, 0.0  ;;  %v6313_v54 = vadd.f32 %v12812_v58, %v12325_v44  ;;  %v12821_v6 = vld [vmem:[#allocation34_spill] sm:$0xff] }
 0x31f   : > { %v6315_v49 = vadd.f32 %v12813_v25, %v12325_v44  ;;  %v7505_v20 = vmax.f32 %v6227_v26, 0.0  ;;  %v7506_v16 = vmax.f32 %v6229_v59, 0.0  ;;  %v6356_v5 = vadd.f32 %v12814_v62, %v12325_v44  ;;  %v12818_v26 = vld [vmem:[#allocation31_spill] sm:$0xff]  ;;  %v12819_v59 = vld [vmem:[#allocation32_spill] sm:$0xff] }
 0x320   : > { %v7574_v50 = vadd.f32 %v7573_v53, %v7502_v63  ;;  %v7604_v28 = vadd.f32 %v7603_v34, %v7457_v38  ;;  %v6358_v35 = vadd.f32 %v12815_v30, %v12325_v44  ;;  %v7507_v41 = vmax.f32 %v6270_v29, 0.0 }
 0x321   : > { %v7508_v56 = vmax.f32 %v6272_v60, 0.0  ;;  %v12464_v32 = vadd.f32 %v7640_v4, %v7474_v2  ;;  %v6399_v19 = vadd.f32 %v12816_v48, %v12325_v44  ;;  %v12470_v1 = vadd.f32 %v12817_v55, %v12325_v44  ;;  %v12823_v60 = vld [vmem:[#allocation36_spill] sm:$0xff] }
 0x322   : > { %v7575_v21 = vadd.f32 %v7574_v50, %v7503_v61  ;;  %v7605_v12 = vadd.f32 %v7604_v28, %v7458_v24  ;;  %v7647_v11 = vadd.f32 %v12419_v47, %v7535_v23  ;;  %v7509_v38 = vmax.f32 %v6313_v54, 0.0  ;;  %v12820_v47 = vld [vmem:[#allocation33_spill] sm:$0xff] }
 0x323   : > { %v7510_v39 = vmax.f32 %v6315_v49, 0.0  ;;  %v7511_v27 = vmax.f32 %v6356_v5, 0.0  ;;  %v7590_v13 = vadd.f32 %v7508_v56, %v7507_v41  ;;  %v6874_v4 = vadd.f32 %v6873_v36, %v12325_v44  ;;  %v6998_v36 = vpop.f32.mrf.mxu1  ;;  %v12824_v54 = vld [vmem:[#allocation37_spill] sm:$0xff]  ;;  %v12825_v49 = vld [vmem:[#allocation38_spill] sm:$0xff] }
 0x324   : > { %v7576_v51 = vadd.f32 %v7575_v21, %v7504_v42  ;;  %7606 = vadd.xlane.f32.xlu0 %v7605_v12  ;;  %v12475_v40 = vadd.f32 %v6914_v43, %v12325_v44  ;;  %v6442_v10 = vadd.f32 %v12818_v26, %v12325_v44  ;;  %v6444_v24 = vadd.f32 %v12819_v59, %v12325_v44  ;;  %v12822_v43 = vld [vmem:[#allocation35_spill] sm:$0xff]  ;;  %v6959_v42 = vpop.f32.mrf.mxu0 }
 0x325   : > { %v6485_v45 = vadd.f32 %v12820_v47, %v12325_v44  ;;  %v7591_v8 = vadd.f32 %v7590_v13, %v7509_v38  ;;  %v7536_v18 = vmax.f32 %v6874_v4, 0.0  ;;  %v6487_v57 = vadd.f32 %v12821_v6, %v12325_v44  ;;  %v7000_v30 = vpop.f32.mrf.mxu1 }
 0x326   : > { %v7577_v63 = vadd.f32 %v7576_v51, %v7505_v20  ;;  %v7512_v31 = vmax.f32 %v6358_v35, 0.0  ;;  %v7513_v29 = vmax.f32 %v6399_v19, 0.0  ;;  %v6528_v37 = vadd.f32 %v12822_v43, %v12325_v44 }
 0x327   : > { %v6530_v61 = vadd.f32 %v12823_v60, %v12325_v44  ;;  %v7514_v2 = vmax.f32 %v12470_v1, 0.0  ;;  %v7592_v34 = vadd.f32 %v7591_v8, %v7510_v39  ;;  %v7515_v23 = vmax.f32 %v6442_v10, 0.0  ;;  %v7002_v10 = vpop.f32.mrf.mxu1 }
 0x328   : > { %v7578_v53 = vadd.f32 %v7577_v63, %v7506_v16  ;;  %v7537_v58 = vmax.f32 %v12475_v40, 0.0  ;;  %v6571_v25 = vadd.f32 %v12824_v54, %v12325_v44  ;;  %v12495_v20 = vadd.f32 %v12825_v49, %v12325_v44 }
 0x329   : > { %v7516_v50 = vmax.f32 %v6444_v24, 0.0  ;;  %v7593_v62 = vadd.f32 %v7592_v34, %v7511_v27  ;;  %v12497_v5 = vadd.f32 %v7647_v11, %v7536_v18  ;;  %v7517_v28 = vmax.f32 %v6485_v45, 0.0 }
 0x32a   : > { %7579 = vadd.xlane.f32.xlu1 %v7578_v53  ;;  %v7518_v16 = vmax.f32 %v6487_v57, 0.0  ;;  %v7519_v35 = vmax.f32 %v6528_v37, 0.0  ;;  %v7520_v41 = vmax.f32 %v6530_v61, 0.0  ;;  %v6954_v21 = vadd.f32 %v12446_v22, %v12331_v17 }
 0x32b   : > { %v7608_v56 = vadd.f32 %v7516_v50, %v7515_v23  ;;  %v7594_v19 = vadd.f32 %v7593_v62, %v7512_v31  ;;  %v6956_v55 = vadd.f32 %v6955_v3, %v12331_v17  ;;  %v6958_v1 = vadd.f32 %v6957_v15, %v12325_v44 }
 0x32c   : > { %v7039_v48 = vpop.f32.mrf.mxu0  ;;  %v6997_v12 = vadd.f32 %v6996_v33, %v12331_v17  ;;  %v7521_v38 = vmax.f32 %v6571_v25, 0.0  ;;  %v7475_v39 = vmax.f32 %v6954_v21, 0.0  ;;  %v6960_v51 = vadd.f32 %v6959_v42, %v12325_v44 }
 0x32d   : > { %v7609_v11 = vadd.f32 %v7608_v56, %v7517_v28  ;;  %v7595_v13 = vadd.f32 %v7594_v19, %v7513_v29  ;;  %v7476_v4 = vmax.f32 %v6956_v55, 0.0  ;;  %v7539_v26 = vmax.f32 %v6958_v1, 0.0 }
 0x32e   : > { %v7041_v27 = vpop.f32.mrf.mxu0  ;;  %7624 = vadd.xlane.f32.xlu1 %v12384_v9  ;;  %v7477_v22 = vmax.f32 %v6997_v12, 0.0  ;;  %v7522_v59 = vmax.f32 %v12495_v20, 0.0  ;;  %v7540_v24 = vmax.f32 %v6960_v51, 0.0  ;;  %v6999_v15 = vadd.f32 %v6998_v36, %v12331_v17 }
 0x32f   : > { %v7610_v3 = vadd.f32 %v7609_v11, %v7518_v16  ;;  %v7596_v47 = vadd.f32 %v7595_v13, %v7514_v2  ;;  %v7653_v45 = vadd.f32 %v7476_v4, %v7475_v39  ;;  %v7001_v63 = vadd.f32 %v7000_v30, %v12325_v44 }
 0x330   : > { %v7043_v33 = vpop.f32.mrf.mxu0  ;;  %v7040_v8 = vadd.f32 %v7039_v48, %v12331_v17  ;;  %v7662_v6 = vadd.f32 %v7540_v24, %v7539_v26  ;;  %v7478_v9 = vmax.f32 %v6999_v15, 0.0  ;;  %v7003_v57 = vadd.f32 %v7002_v10, %v12325_v44 }
 0x331   : > { %v7611_v18 = vadd.f32 %v7610_v3, %v7519_v35  ;;  %7597 = vadd.xlane.f32.xlu0 %v7596_v47  ;;  %v7654_v29 = vadd.f32 %v7653_v45, %v7477_v22  ;;  %v7541_v43 = vmax.f32 %v7001_v63, 0.0  ;;  %v7042_v36 = vadd.f32 %v7041_v27, %v12331_v17 }
 0x332   : > { %v7045_v31 = vpop.f32.mrf.mxu0  ;;  %7642 = vadd.xlane.f32.xlu1 %v12464_v32  ;;  %v7479_v37 = vmax.f32 %v7040_v8, 0.0  ;;  %v7542_v61 = vmax.f32 %v7003_v57, 0.0  ;;  %v7044_v42 = vadd.f32 %v7043_v33, %v12325_v44  ;;  %v6917_v32 = vadd.f32 %v12460_v14, %v12325_v44 }
 0x333   : > { %v7612_v60 = vadd.f32 %v7611_v18, %v7520_v41  ;;  %v7046_v2 = vadd.f32 %v7045_v31, %v12325_v44  ;;  %v7655_v34 = vadd.f32 %v7654_v29, %v7478_v9  ;;  %v7663_v23 = vadd.f32 %v7662_v6, %v7541_v43 }
 0x334   : > { %v7082_v53 = vpop.f32.mrf.mxu1  ;;  %v7480_v54 = vmax.f32 %v7042_v36, 0.0  ;;  %v7543_v20 = vmax.f32 %v7044_v42, 0.0  ;;  %v7631_v41 = vadd.f32 %v12378_v52, %v7529_v0  ;;  %v7530_v56 = vmax.f32 %v12376_v46, 0.0 }
 0x335   : > { %v7083_v25 = vadd.f32 %v7082_v53, %v12331_v17  ;;  %v7613_v49 = vadd.f32 %v7612_v60, %v7521_v38  ;;  %v7544_v50 = vmax.f32 %v7046_v2, 0.0  ;;  %v7656_v28 = vadd.f32 %v7655_v34, %v7479_v37 }
 0x336   : > { %v7084_v62 = vpop.f32.mrf.mxu1  ;;  %v7664_v16 = vadd.f32 %v7663_v23, %v7542_v61  ;;  %v7649_v12 = vadd.f32 %v12497_v5, %v7537_v58  ;;  %v7538_v38 = vmax.f32 %v6917_v32, 0.0  ;;  %v7632_v46 = vadd.f32 %v7631_v41, %v7530_v56 }
 0x337   : > { %v7481_v30 = vmax.f32 %v7083_v25, 0.0  ;;  %v7085_v35 = vadd.f32 %v7084_v62, %v12331_v17  ;;  %v7614_v21 = vadd.f32 %v7613_v49, %v7522_v59  ;;  %v7657_v19 = vadd.f32 %v7656_v28, %v7480_v54 }
 0x338   : > { %v7086_v48 = vpop.f32.mrf.mxu1  ;;  %v7665_v55 = vadd.f32 %v7664_v16, %v7543_v20  ;;  %v7650_v27 = vadd.f32 %v7649_v12, %v7538_v38 }
 0x339   : > { %v7482_v1 = vmax.f32 %v7085_v35, 0.0  ;;  %v7087_v14 = vadd.f32 %v7086_v48, %v12325_v44  ;;  %7615 = vadd.xlane.f32.xlu0 %v7614_v21  ;;  %v7658_v39 = vadd.f32 %v7657_v19, %v7481_v30 }
 0x33a   : > { %v7088_v11 = vpop.f32.mrf.mxu1  ;;  %v7666_v7 = vadd.f32 %v7665_v55, %v7544_v50 }
 0x33b   : > { %v7545_v51 = vmax.f32 %v7087_v14, 0.0  ;;  %v7089_v0 = vadd.f32 %v7088_v11, %v12325_v44  ;;  %v7659_v52 = vadd.f32 %v7658_v39, %v7482_v1 }
 0x33d   : > { %7633 = vadd.xlane.f32.xlu0 %v7632_v46  ;;  %v7667_v13 = vadd.f32 %v7666_v7, %v7545_v51  ;;  %v7546_v4 = vmax.f32 %v7089_v0, 0.0  ;;  %7660 = vadd.xlane.f32.xlu1 %v7659_v52 }
 0x33f   : > { %v7668_v26 = vadd.f32 %v7667_v13, %v7546_v4 }
 0x341   : > { %7651 = vadd.xlane.f32.xlu0 %v7650_v27 }
 0x345   : > { %7669 = vadd.xlane.f32.xlu0 %v7668_v26 }
 0x34c   : > { %v7125_v40 = vpop.f32.mrf.mxu0 }
 0x34d   : > { %v7126_v10 = vadd.f32 %v7125_v40, %v12331_v17 }
 0x34e   : > { %v7127_v58 = vpop.f32.mrf.mxu0 }
 0x34f   : > { %v7128_v59 = vadd.f32 %v7127_v58, %v12331_v17  ;;  %v7483_v47 = vmax.f32 %v7126_v10, 0.0 }
 0x350   : > { %v7129_v5 = vpop.f32.mrf.mxu0 }
 0x351   : > { %v7130_v15 = vadd.f32 %v7129_v5, %v12325_v44  ;;  %v7484_v45 = vmax.f32 %v7128_v59, 0.0 }
 0x352   : > { %v7131_v3 = vpop.f32.mrf.mxu0 }
 0x353   : > { %v7132_v33 = vadd.f32 %v7131_v3, %v12325_v44  ;;  %v7547_v18 = vmax.f32 %v7130_v15, 0.0  ;;  %v7671_v9 = vadd.f32 %v7484_v45, %v7483_v47 }
 0x354   : > { %v7168_v22 = vpop.f32.mrf.mxu1 }
 0x355   : > { %v7169_v63 = vadd.f32 %v7168_v22, %v12331_v17  ;;  %v7548_v6 = vmax.f32 %v7132_v33, 0.0 }
 0x356   : > { %v7170_v24 = vpop.f32.mrf.mxu1 }
 0x357   : > { %v7485_v57 = vmax.f32 %v7169_v63, 0.0  ;;  %v7171_v31 = vadd.f32 %v7170_v24, %v12331_v17  ;;  %v7680_v37 = vadd.f32 %v7548_v6, %v7547_v18 }
 0x358   : > { %v7172_v8 = vpop.f32.mrf.mxu1 }
 0x359   : > { %v7173_v29 = vadd.f32 %v7172_v8, %v12325_v44  ;;  %v7672_v36 = vadd.f32 %v7671_v9, %v7485_v57  ;;  %v7486_v60 = vmax.f32 %v7171_v31, 0.0 }
 0x35a   : > { %v7174_v43 = vpop.f32.mrf.mxu1 }
 0x35b   : > { %v7549_v61 = vmax.f32 %v7173_v29, 0.0  ;;  %v7175_v42 = vadd.f32 %v7174_v43, %v12325_v44  ;;  %v7673_v2 = vadd.f32 %v7672_v36, %v7486_v60 }
 0x35d   : > { %v7681_v34 = vadd.f32 %v7680_v37, %v7549_v61  ;;  %v7550_v54 = vmax.f32 %v7175_v42, 0.0 }
 0x35f   : > { %v7682_v62 = vadd.f32 %v7681_v34, %v7550_v54 }
 0x36d   : > { %v7211_v53 = vpop.f32.mrf.mxu0 }
 0x36e   : > { %v7212_v23 = vadd.f32 %v7211_v53, %v12331_v17 }
 0x36f   : > { %v7213_v25 = vpop.f32.mrf.mxu0 }
 0x370   : > { %v7487_v49 = vmax.f32 %v7212_v23, 0.0  ;;  %v7214_v32 = vadd.f32 %v7213_v25, %v12331_v17 }
 0x371   : > { %v7215_v20 = vpop.f32.mrf.mxu0 }
 0x372   : > { %v7674_v50 = vadd.f32 %v7673_v2, %v7487_v49  ;;  %v7488_v28 = vmax.f32 %v7214_v32, 0.0  ;;  %v7216_v16 = vadd.f32 %v7215_v20, %v12325_v44 }
 0x373   : > { %v7217_v30 = vpop.f32.mrf.mxu0 }
 0x374   : > { %v7551_v35 = vmax.f32 %v7216_v16, 0.0  ;;  %v7218_v41 = vadd.f32 %v7217_v30, %v12325_v44  ;;  %v7675_v21 = vadd.f32 %v7674_v50, %v7488_v28 }
 0x375   : > { %v7254_v56 = vpop.f32.mrf.mxu1 }
 0x376   : > { %v7683_v48 = vadd.f32 %v7682_v62, %v7551_v35  ;;  %v7255_v19 = vadd.f32 %v7254_v56, %v12331_v17  ;;  %v7552_v55 = vmax.f32 %v7218_v41, 0.0 }
 0x377   : > { %v7256_v1 = vpop.f32.mrf.mxu1 }
 0x378   : > { %v7489_v14 = vmax.f32 %v7255_v19, 0.0  ;;  %v7257_v12 = vadd.f32 %v7256_v1, %v12331_v17  ;;  %v7684_v39 = vadd.f32 %v7683_v48, %v7552_v55 }
 0x379   : > { %v7258_v38 = vpop.f32.mrf.mxu1 }
 0x37a   : > { %v7676_v11 = vadd.f32 %v7675_v21, %v7489_v14  ;;  %v7490_v7 = vmax.f32 %v7257_v12, 0.0  ;;  %v7259_v51 = vadd.f32 %v7258_v38, %v12325_v44 }
 0x37b   : > { %v7260_v0 = vpop.f32.mrf.mxu1 }
 0x37c   : > { %v7677_v46 = vadd.f32 %v7676_v11, %v7490_v7  ;;  %v7553_v52 = vmax.f32 %v7259_v51, 0.0  ;;  %v7261_v27 = vadd.f32 %v7260_v0, %v12325_v44 }
 0x37e   : > { %v7685_v13 = vadd.f32 %v7684_v39, %v7553_v52  ;;  %v7554_v4 = vmax.f32 %v7261_v27, 0.0  ;;  %7678 = vadd.xlane.f32.xlu1 %v7677_v46 }
 0x380   : > { %v7686_v26 = vadd.f32 %v7685_v13, %v7554_v4 }
 0x382   : > { %7687 = vadd.xlane.f32.xlu0 %v7686_v26 }
 0x38e   : > { %v7297_v40 = vpop.f32.mrf.mxu0 }
 0x38f   : > { %v7298_v10 = vadd.f32 %v7297_v40, %v12331_v17  ;;  %v7763_v40 = vld [vmem:[#allocation9 + $0x8] sm:$0xff] }
 0x390   : > { %v7299_v58 = vpop.f32.mrf.mxu0 }
 0x391   : > { %v7300_v59 = vadd.f32 %v7299_v58, %v12331_v17  ;;  %v7491_v15 = vmax.f32 %v7298_v10, 0.0  ;;  %v8752_v58 = vmov 0.0  }
 0x392   : > { %v7301_v5 = vpop.f32.mrf.mxu0  ;;  %8443 = vmatprep.subr.mxu0 %v8752_v58  ;;  %8447 = vmatprep.mubr.msk.f32.mxu0 %vm8753_vm10, %v8752_v58 }
 0x393   : > { %v7492_v33 = vmax.f32 %v7300_v59, 0.0  ;;  %v7302_v45 = vadd.f32 %v7301_v5, %v12325_v44  ;;  %8444 = vmatpush3.msra.mxu0 %v7763_v40 }
 0x394   : > { %v7303_v3 = vpop.f32.mrf.mxu0  ;;  %8445 = vmatprep.subr.mxu0 %v8752_v58 }
 0x395   : > { %v7340_v22 = vpop.f32.mrf.mxu1  ;;  %v7304_v63 = vadd.f32 %v7303_v3, %v12325_v44  ;;  %v7689_v18 = vadd.f32 %v7492_v33, %v7491_v15  ;;  %v7555_v57 = vmax.f32 %v7302_v45, 0.0 }
 0x396   : > { %v7341_v47 = vadd.f32 %v7340_v22, %v12331_v17 }
 0x397   : > { %v7342_v24 = vpop.f32.mrf.mxu1  ;;  %v7556_v31 = vmax.f32 %v7304_v63, 0.0 }
 0x398   : > { %v7493_v6 = vmax.f32 %v7341_v47, 0.0  ;;  %v7343_v9 = vadd.f32 %v7342_v24, %v12331_v17 }
 0x399   : > { %v7344_v8 = vpop.f32.mrf.mxu1  ;;  %v7698_v61 = vadd.f32 %v7556_v31, %v7555_v57 }
 0x39a   : > { %v7345_v29 = vadd.f32 %v7344_v8, %v12325_v44  ;;  %v7690_v37 = vadd.f32 %v7689_v18, %v7493_v6  ;;  %v7494_v36 = vmax.f32 %v7343_v9, 0.0 }
 0x39b   : > { %v7346_v43 = vpop.f32.mrf.mxu1 }
 0x39c   : > { %v7557_v42 = vmax.f32 %v7345_v29, 0.0  ;;  %v7347_v53 = vadd.f32 %v7346_v43, %v12325_v44  ;;  %v7691_v25 = vadd.f32 %v7690_v37, %v7494_v36 }
 0x39e   : > { %v7699_v32 = vadd.f32 %v7698_v61, %v7557_v42  ;;  %v7558_v20 = vmax.f32 %v7347_v53, 0.0 }
 0x3a0   : > { %v7700_v56 = vadd.f32 %v7699_v32, %v7558_v20  ;;  %v8405_v20 = vld [vmem:[#allocation10] ss:$0 sm:$0xff] }
 0x3a1   : > { %v7589_v5 = vpop.xlane.xlu0 %7588 }
 0x3a4   : > { %v7571_v10 = vpop.xlane.xlu1 %7570 }
 0x3a5   : > { %v7708_v63 = vsel %vm12826_vm15, %v7571_v10, %v7589_v5 }
 0x3ad   : > { %v7607_v22 = vpop.xlane.xlu0 %7606 }
 0x3ae   : > { %v7383_v60 = vpop.f32.mrf.mxu0  ;;  %v7711_v8 = vsel %vm7710_vm0, %v7708_v63, %v7607_v22 }
 0x3af   : > { %v7384_v2 = vadd.f32 %v7383_v60, %v12331_v17 }
 0x3b0   : > { %v7385_v34 = vpop.f32.mrf.mxu0 }
 0x3b1   : > { %v7495_v23 = vmax.f32 %v7384_v2, 0.0  ;;  %v7386_v54 = vadd.f32 %v7385_v34, %v12331_v17 }
 0x3b2   : > { %v7387_v49 = vpop.f32.mrf.mxu0 }
 0x3b3   : > { %v7388_v50 = vadd.f32 %v7387_v49, %v12325_v44  ;;  %v7692_v62 = vadd.f32 %v7691_v25, %v7495_v23  ;;  %v7496_v28 = vmax.f32 %v7386_v54, 0.0  ;;  %v7580_v3 = vpop.xlane.xlu1 %7579 }
 0x3b4   : > { %v7389_v16 = vpop.f32.mrf.mxu0 }
 0x3b5   : > { %v7559_v30 = vmax.f32 %v7388_v50, 0.0  ;;  %v7390_v35 = vadd.f32 %v7389_v16, %v12325_v44  ;;  %v7426_v41 = vpop.f32.mrf.mxu1  ;;  %v7693_v48 = vadd.f32 %v7692_v62, %v7496_v28 }
 0x3b6   : > { %v7427_v21 = vadd.f32 %v7426_v41, %v12331_v17 }
 0x3b7   : > { %v7428_v19 = vpop.f32.mrf.mxu1  ;;  %v7701_v55 = vadd.f32 %v7700_v56, %v7559_v30  ;;  %v7560_v1 = vmax.f32 %v7390_v35, 0.0  ;;  %v7625_v24 = vpop.xlane.xlu1 %7624 }
 0x3b8   : > { %v7497_v14 = vmax.f32 %v7427_v21, 0.0  ;;  %v7429_v12 = vadd.f32 %v7428_v19, %v12331_v17  ;;  %v7762_v17 = vld [vmem:[#allocation9] sm:$0xff]  ;;  %v7714_v6 = vsel %vm7713_vm13, %v7711_v8, %v7625_v24 }
 0x3b9   : > { %v7430_v38 = vpop.f32.mrf.mxu1  ;;  %v7702_v0 = vadd.f32 %v7701_v55, %v7560_v1  ;;  %8446 = vmatpush3.msra.mxu0 %v7762_v17 }
 0x3ba   : > { %v7694_v11 = vadd.f32 %v7693_v48, %v7497_v14  ;;  %v7498_v39 = vmax.f32 %v7429_v12, 0.0  ;;  %v7431_v7 = vadd.f32 %v7430_v38, %v12325_v44  ;;  %v7598_v59 = vpop.xlane.xlu0 %7597 }
 0x3bb   : > { %v7432_v51 = vpop.f32.mrf.mxu1  ;;  %v7643_v33 = vpop.xlane.xlu1 %7642  ;;  %v7709_v31 = vsel %vm12827_vm4, %v7580_v3, %v7598_v59 }
 0x3bc   : > { %v7695_v46 = vadd.f32 %v7694_v11, %v7498_v39  ;;  %v7561_v52 = vmax.f32 %v7431_v7, 0.0  ;;  %v7433_v27 = vadd.f32 %v7432_v51, %v12325_v44  ;;  %v7717_v57 = vsel %vm7716_vm8, %v7714_v6, %v7643_v33 }
 0x3be   : > { %v7703_v13 = vadd.f32 %v7702_v0, %v7561_v52  ;;  %v7562_v4 = vmax.f32 %v7433_v27, 0.0  ;;  %7696 = vadd.xlane.f32.xlu1 %v7695_v46 }
 0x3c0   : > { %v7704_v26 = vadd.f32 %v7703_v13, %v7562_v4 }
 0x3c2   : > { %7705 = vadd.xlane.f32.xlu1 %v7704_v26  ;;  %v7616_v44 = vpop.xlane.xlu0 %7615 }
 0x3c3   : > { %v7712_v43 = vsel %vm7710_vm0, %v7709_v31, %v7616_v44 }
 0x3c6   : > { %v7634_v15 = vpop.xlane.xlu0 %7633  ;;  %v7661_v47 = vpop.xlane.xlu1 %7660 }
 0x3c7   : > { %v7720_v29 = vsel %vm7719_vm3, %v7717_v57, %v7661_v47  ;;  %v7715_v60 = vsel %vm7713_vm13, %v7712_v43, %v7634_v15 }
 0x3ca   : > { %v7652_v45 = vpop.xlane.xlu0 %7651 }
 0x3cb   : > { %v7718_v53 = vsel %vm7716_vm8, %v7715_v60, %v7652_v45 }
 0x3ce   : > { %v7670_v9 = vpop.xlane.xlu0 %7669 }
 0x3cf   : > { %v7721_v34 = vsel %vm7719_vm3, %v7718_v53, %v7670_v9 }
 0x407   : > { %v7679_v18 = vpop.xlane.xlu1 %7678 }
 0x408   : > { %v7723_v37 = vsel %vm7722_vm9, %v7720_v29, %v7679_v18 }
 0x40b   : > { %v7688_v61 = vpop.xlane.xlu0 %7687 }
 0x40c   : > { %v7724_v23 = vsel %vm7722_vm9, %v7721_v34, %v7688_v61 }
 0x447   : > { %v7697_v36 = vpop.xlane.xlu1 %7696 }
 0x448   : > { %v7726_v42 = vsel %vm7725_vm5, %v7723_v37, %v7697_v36 }
 0x449   : > { %v7728_v2 = vmul.f32 0.0009765625, %v7726_v42 }
 0x44b   : > { %7730 = vxpose.xlu0.b32.start [1/2] (short) (narrow) %v7728_v2, 8  ;;  %v7706_v54 = vpop.xlane.xlu1 %7705 }
 0x44c   : > { %v7727_v25 = vsel %vm7725_vm5, %v7724_v23, %v7706_v54 }
 0x44d   : > { %v7729_v49 = vmul.f32 0.0009765625, %v7727_v25 }
 0x44f   : > { %7731 = vxpose.xlu0.b32.end [2/2] (short) (narrow) %v7729_v49, 8 }
 0x4c7   : > { %v7746_v32 = vpop.trf.xlu0 }
 0x4c8   : > { %8448 = vmatmul.mubr.msk.f32.vlgmr.msra.gmra.mxu0 %vm7771_vm11, %v7746_v32 }
 0x588   : > { %v7841_v50 = vpop.f32.mrf.mxu0 }
 0x589   : > { %v7842_v62 = vadd.f32 %v8405_v20, %v7841_v50 }
 0x58a   : > { %v8449_v28 = vpop.f32.mrf.mxu0 }
 0x58b   : > { %7846 = vst.msk [vmem:[%s304_s16] sm:$0xff] %vm7845_vm12, %v7842_v62 }
 0x58c   : > { %8672 = shalt.err (!%p8669_p8)
}
 0x58d   : > { %s8673_s10 = scalar_lea.hbm %s12573_s19, 128  ;;  %s8677_s11 = scalar_lea.hbm %s12614_s6, 256 }
 0x58e   : > { %p8674_p13 = scmp.ne.s32.totalorder %s12573_s19, %s8673_s10  ;;  %p8678_p1 = scmp.lt.s32.totalorder %s12573_s19, %s12614_s6 }
 0x58f   : > { %p8679_p12 = scmp.lt.s32.totalorder %s8677_s11, %s8673_s10 }
 0x590   : > { %p8675_p11 = pnand %p8674_p13, %p8828_p5 }
 0x591   : > { %p8680_p10 = por %p8679_p12, %p8678_p1 }
 0x592   : > { %p8676_p0 = pneg %p8675_p11 }
 0x594   : > { %p8681_p3 = pnand %p8680_p10, %p8676_p0 }
 0x596   : > { %8684 = shalt.err (!%p8681_p3)
}
 0x597   : > { %8466 = dma.vmem_to_hbm [thread:$0]  (%p8828_p5), %s7862_s17, 128, %s12573_s19, %s7848_s20  }
 0x598 PF: > { %p8493_p2 = scmp.ge.s32.totalorder %s8731_s24, 2  ;;  %s7873_s16 = sand.u32 1, %s8719_s21  }
 0x599   : > { %p12828_p4 = scmp.ne.s32.totalorder %s12640_s8, 0  ;;  %s7874_s14 = scalar_lea.sflag [#allocation6], %s7873_s16 }
 0x59b   : > { %p8482_p7 = pnand %p8493_p2, %p12828_p4 }
 0x59d   : > { %p8483_p6 = pneg %p8482_p7 }
 0x59f   : > { %8714 = dma.done.wait (%p8483_p6), %s7874_s14, 128  }
 0x5a0   : > { %8716 = vsyncadd (%p8483_p6), %s7874_s14, 4294967168  ;;  %p19_p9 = scmp.ge.s32.totalorder %s8815_s27, 4   ;;  %s12829_s21 = smov %s8723_s22 }
 0x5a1   : > { %s12830_s22 = smov %s8727_s23  ;;  %s12831_s23 = smov %s8826_s30 }
 0x5a2   : > { %s12832_s24 = smov %s8815_s27  ;;  %21 = sbr.rel (!%p19_p9) target bundleno = 6 (0x6), region = 96 }
 0x5a7   :  { %7879 = vsyncpa [#allocation5], 1 }
 0x5a8   :  { %7881 = vsyncpa [#allocation5 + $0x1], 1 }
 0x5a9   :  { %7882 = vsyncpa [#allocation8], 1 }
 0x5aa   :  { %7883 = vsyncpa [#allocation11], 1 }
 0x5ab   :  { %7884 = vsyncpa [#allocation6], 1 }
 0x5ac   :  { %7886 = vsyncpa [#allocation6 + $0x1], 1 }

</bundles_post_ra>
